<compile_context>
chip_gen: v5e
topology: v5e:2x2
jax: 0.10.0
libtpu: 0.0.40
codegen_flags: <defaults>
</compile_context>

<pallas_src>
import functools

import jax
import jax.numpy as jnp
from jax import lax
from jax.experimental import pallas as pl
from jax.experimental.pallas import tpu as pltpu


# ---------------------------------------------------------------------------
# Fused 3-layer generator kernel (one image per grid step)
# ---------------------------------------------------------------------------
def _fused_cnn3_kernel(x_ref, w1_ref, b1_ref, w2_ref, b2_ref, w3_ref, b3_ref,
                       o_ref, h1_pad, h2_pad, *, H, W):
    """conv3x3+ReLU -> conv3x3+ReLU -> conv3x3, all VMEM-resident.

    x_ref : ((H+2)*W + 2, Cin)  flat input pixels (row-major y,x), zero rows
                                at both ends supply the SAME zero padding.
    wN_ref: (9, CinN, CoutN)    tap-major (dy, dx) conv weights.
    bN_ref: (1, CoutN)
    o_ref : (H*W, Co)
    h1_pad, h2_pad: ((H+2)*W + 2, C{1,2}) f32 VMEM scratch (padded hidden act).
    """
    P = H * W
    PAD = W + 1                       # leading/trailing zero rows in flat pad

    # Column coordinate of each output pixel (computed once, reused by layers).
    pix_x = lax.broadcasted_iota(jnp.int32, (P, 1), 0) % W
    has_left = pix_x > 0              # tap dx == 0 is valid (x-1 exists)
    has_right = pix_x < (W - 1)       # tap dx == 2 is valid (x+1 exists)

    def conv3x3(src_ref, w_ref, b_ref, relu):
        cout = w_ref.shape[-1]
        acc = jnp.zeros((P, cout), dtype=jnp.float32)
        for t in range(9):            # unrolled: 9 small MXU matmuls
            dy, dx = divmod(t, 3)
            tap = src_ref[pl.ds(dy * W + dx, P), :]
            if dx == 0:               # left neighbour: mask x == 0 wraparound
                tap = jnp.where(has_left, tap, 0.0)
            elif dx == 2:             # right neighbour: mask x == W-1 wrap
                tap = jnp.where(has_right, tap, 0.0)
            acc = acc + jnp.dot(tap, w_ref[t],
                                preferred_element_type=jnp.float32)
        acc = acc + b_ref[...]
        return jnp.maximum(acc, 0.0) if relu else acc

    # Zero the padded scratches so the halo rows read as SAME zero padding.
    # (Done every step so the batch grid axis can be megacore-"parallel".)
    h1_pad[...] = jnp.zeros_like(h1_pad)
    h2_pad[...] = jnp.zeros_like(h2_pad)

    h1 = conv3x3(x_ref, w1_ref, b1_ref, relu=True)        # (P, C1) f32
    h1_pad[pl.ds(PAD, P), :] = h1
    h2 = conv3x3(h1_pad, w2_ref, b2_ref, relu=True)       # (P, C2) f32
    h2_pad[pl.ds(PAD, P), :] = h2
    y = conv3x3(h2_pad, w3_ref, b3_ref, relu=False)       # (P, Co) f32
    o_ref[...] = y.astype(o_ref.dtype)


def _fused_generator(x_nhwc, params):
    """net_G on an NHWC input, as one fused pallas_call."""
    B, H, W, Cin = x_nhwc.shape
    C1 = params["w1"].shape[-1]
    C2 = params["w2"].shape[-1]
    Co = params["w3"].shape[-1]
    P = H * W
    PAD = W + 1
    NP = P + 2 * PAD                  # flat padded length

    # Flatten pixels (free) and add the zero halo rows once in XLA (tiny).
    x_flat = jnp.pad(x_nhwc.reshape(B, P, Cin), ((0, 0), (PAD, PAD), (0, 0)))

    w1 = params["w1"].reshape(9, Cin, C1)     # (3,3,Ci,Co) -> tap-major
    w2 = params["w2"].reshape(9, C1, C2)
    w3 = params["w3"].reshape(9, C2, Co)
    b1 = params["b1"].reshape(1, C1)
    b2 = params["b2"].reshape(1, C2)
    b3 = params["b3"].reshape(1, Co)

    kernel = functools.partial(_fused_cnn3_kernel, H=H, W=W)
    out_flat = pl.pallas_call(
        kernel,
        out_shape=jax.ShapeDtypeStruct((B, P, Co), jnp.float32),
        grid_spec=pltpu.PrefetchScalarGridSpec(
            num_scalar_prefetch=0,
            grid=(B,),
            in_specs=[
                pl.BlockSpec((None, NP, Cin), lambda b: (b, 0, 0)),
                pl.BlockSpec((9, Cin, C1), lambda b: (0, 0, 0)),
                pl.BlockSpec((1, C1), lambda b: (0, 0)),
                pl.BlockSpec((9, C1, C2), lambda b: (0, 0, 0)),
                pl.BlockSpec((1, C2), lambda b: (0, 0)),
                pl.BlockSpec((9, C2, Co), lambda b: (0, 0, 0)),
                pl.BlockSpec((1, Co), lambda b: (0, 0)),
            ],
            out_specs=pl.BlockSpec((None, P, Co), lambda b: (b, 0, 0)),
            scratch_shapes=[
                pltpu.VMEM((NP, C1), jnp.float32),
                pltpu.VMEM((NP, C2), jnp.float32),
            ],
        ),
        compiler_params=pltpu.CompilerParams(
            dimension_semantics=("parallel",)),
    )(x_flat, w1, b1, w2, b2, w3, b3)
    return out_flat.reshape(B, H, W, Co)


# ---------------------------------------------------------------------------
# Parameters (gaussian_weights_init ~ N(0, 0.02)) — deterministic
# ---------------------------------------------------------------------------
def init_params(key, c_in, hidden, c_out):
    ks = jax.random.split(key, 6)

    def gw(k, shape):
        return 0.02 * jax.random.normal(k, shape, jnp.float32)

    return {
        "w1": gw(ks[0], (3, 3, c_in, hidden)), "b1": gw(ks[1], (hidden,)),
        "w2": gw(ks[2], (3, 3, hidden, hidden)), "b2": gw(ks[3], (hidden,)),
        "w3": gw(ks[4], (3, 3, hidden, c_out)), "b3": gw(ks[5], (c_out,)),
    }


def _gather_planes(vols, opts):
    planes = [vols["vol_NC"]]
    if opts["use_state"]:
        planes.append(vols["vol_STATE"])
    if opts["use_scatter"]:
        planes.append(vols["vol_SC"])
    if opts["use_scatter2"]:
        planes.append(vols["vol_SC2"])
    if opts["use_scatter3"]:
        planes.append(vols["vol_SC3"])
    if opts["use_bmi"]:
        planes.append(vols["vol_BMI"])
    if opts["use_gender"]:
        planes.append(vols["vol_GD"])
    return planes


# ---------------------------------------------------------------------------
# CNNModel.forward: channel concat (NCHW dim 1) + net_G
# ---------------------------------------------------------------------------
def cnn_model_forward(params, vols, opts):
    # torch.cat(..., dim=1) over (B,Ci,H,W) volumes followed by NCHW->NHWC is
    # equivalent to concatenating the volumes channel-last (one cheap XLA op,
    # no separate full-tensor transpose pass).
    planes = _gather_planes(vols, opts)
    x_nhwc = jnp.concatenate([jnp.moveaxis(p, 1, -1) for p in planes], axis=-1)
    y_nhwc = _fused_generator(x_nhwc, params)
    return jnp.transpose(y_nhwc, (0, 3, 1, 2))            # vol_AC_pred (NCHW)


# ---------------------------------------------------------------------------
# Pure-JAX reference (original concat + transpose formulation)
# ---------------------------------------------------------------------------
def _ref_forward(params, vols, opts):
    planes = _gather_planes(vols, opts)
    x = jnp.transpose(jnp.concatenate(planes, axis=1), (0, 2, 3, 1))

    def conv(x, w, b, relu):
        y = lax.conv_general_dilated(
            x, w, (1, 1), "SAME",
            dimension_numbers=("NHWC", "HWIO", "NHWC")) + b
        return jnp.maximum(y, 0.0) if relu else y

    h = conv(x, params["w1"], params["b1"], True)
    h = conv(h, params["w2"], params["b2"], True)
    y = conv(h, params["w3"], params["b3"], False)
    return jnp.transpose(y, (0, 3, 1, 2))


# ---------------------------------------------------------------------------
if __name__ == "__main__":
    B, H, W = 2, 16, 16
    hidden, c_out = 32, 1

    opts = dict(use_state=False, use_scatter=True, use_scatter2=False,
                use_scatter3=False, use_bmi=True, use_gender=True)
    n_in = 1 + sum(opts[k] for k in
                   ("use_state", "use_scatter", "use_scatter2",
                    "use_scatter3", "use_bmi", "use_gender"))

    key = jax.random.PRNGKey(0)
    kp, kd = jax.random.split(key)
    params = init_params(kp, n_in, hidden, c_out)

    names = ["vol_NC", "vol_STATE", "vol_SC", "vol_SC2",
             "vol_SC3", "vol_BMI", "vol_GD"]
    dkeys = jax.random.split(kd, len(names))
    vols = {n: jax.random.normal(k, (B, 1, H, W), jnp.float32)
            for n, k in zip(names, dkeys)}

    pred = jax.block_until_ready(cnn_model_forward(params, vols, opts))
    ref = jax.block_until_ready(_ref_forward(params, vols, opts))

    assert pred.shape == (B, c_out, H, W), pred.shape
    err = float(jnp.max(jnp.abs(pred - ref)))
    assert err < 1e-4, err

    print("KERNEL_OK")
</pallas_src>

<mosaic_0001>
module attributes {stable_mosaic.version = 11 : i64} {
  func.func @_fused_cnn3_kernel(%arg0: i32, %arg1: memref<1x290x4xf32, #tpu.memory_space<vmem>>, %arg2: memref<9x4x32xf32, #tpu.memory_space<vmem>>, %arg3: memref<1x32xf32, #tpu.memory_space<vmem>>, %arg4: memref<9x32x32xf32, #tpu.memory_space<vmem>>, %arg5: memref<1x32xf32, #tpu.memory_space<vmem>>, %arg6: memref<9x32x1xf32, #tpu.memory_space<vmem>>, %arg7: memref<1x1xf32, #tpu.memory_space<vmem>>, %arg8: memref<1x256x1xf32, #tpu.memory_space<vmem>>, %arg9: memref<290x32xf32, #tpu.memory_space<vmem>>, %arg10: memref<290x32xf32, #tpu.memory_space<vmem>>) attributes {dimension_semantics = [#tpu.dimension_semantics<parallel>], iteration_bounds = array<i64: 2>, scalar_prefetch = 0 : i64, scratch_operands = 2 : i64, tpu.core_type = #tpu.core_type<tc>, window_params = [{transform_indices = @transform_0, window_bounds = array<i64: 1, 290, 4>}, {pipeline_mode = #tpu.pipeline_mode<synchronous>, transform_indices = @transform_1, window_bounds = array<i64: 9, 4, 32>}, {pipeline_mode = #tpu.pipeline_mode<synchronous>, transform_indices = @transform_2, window_bounds = array<i64: 1, 32>}, {pipeline_mode = #tpu.pipeline_mode<synchronous>, transform_indices = @transform_3, window_bounds = array<i64: 9, 32, 32>}, {pipeline_mode = #tpu.pipeline_mode<synchronous>, transform_indices = @transform_4, window_bounds = array<i64: 1, 32>}, {pipeline_mode = #tpu.pipeline_mode<synchronous>, transform_indices = @transform_5, window_bounds = array<i64: 9, 32, 1>}, {pipeline_mode = #tpu.pipeline_mode<synchronous>, transform_indices = @transform_6, window_bounds = array<i64: 1, 1>}, {transform_indices = @transform_7, window_bounds = array<i64: 1, 256, 1>}]} {
    %0 = tpu.iota {dimensions = array<i32: 0>} : vector<256x1xi32>
    %c16_i32 = arith.constant 16 : i32
    %c0_i32 = arith.constant 0 : i32
    %1 = arith.cmpi eq, %c16_i32, %c0_i32 : i32
    %c1_i32 = arith.constant 1 : i32
    %2 = arith.select %1, %c1_i32, %c16_i32 : i32
    %3 = vector.broadcast %2 : i32 to vector<256x1xi32>
    %4 = arith.remsi %0, %3 : vector<256x1xi32>
    %c0_i32_0 = arith.constant 0 : i32
    %5 = vector.broadcast %c0_i32_0 : i32 to vector<256x1xi32>
    %6 = arith.cmpi ne, %4, %5 : vector<256x1xi32>
    %c0_i32_1 = arith.constant 0 : i32
    %7 = vector.broadcast %c0_i32_1 : i32 to vector<256x1xi32>
    %8 = arith.cmpi slt, %4, %7 : vector<256x1xi32>
    %c0_i32_2 = arith.constant 0 : i32
    %9 = arith.cmpi slt, %2, %c0_i32_2 : i32
    %10 = vector.broadcast %9 : i1 to vector<256x1xi1>
    %11 = vector.broadcast %10 : vector<256x1xi1> to vector<256x1xi1>
    %12 = arith.xori %8, %11 : vector<256x1xi1>
    %13 = arith.andi %12, %6 : vector<256x1xi1>
    %14 = vector.broadcast %2 : i32 to vector<256x1xi32>
    %15 = arith.addi %4, %14 : vector<256x1xi32>
    %16 = arith.select %13, %15, %4 : vector<256x1xi1>, vector<256x1xi32>
    %c0_i32_3 = arith.constant 0 : i32
    %17 = vector.broadcast %c0_i32_3 : i32 to vector<256x1xi32>
    %18 = arith.cmpi sgt, %16, %17 : vector<256x1xi32>
    %c15_i32 = arith.constant 15 : i32
    %19 = vector.broadcast %c15_i32 : i32 to vector<256x1xi32>
    %20 = arith.cmpi slt, %16, %19 : vector<256x1xi32>
    %cst = arith.constant 0.000000e+00 : f32
    %21 = vector.broadcast %cst : f32 to vector<290x32xf32>
    %c0 = arith.constant 0 : index
    %c0_4 = arith.constant 0 : index
    %22 = vector.load %arg9[%c0, %c0_4] : memref<290x32xf32, #tpu.memory_space<vmem>>, vector<290x32xf32>
    tpu.vector_store %arg9[%c0, %c0_4], %21 {strides = array<i32>} : memref<290x32xf32, #tpu.memory_space<vmem>>, vector<290x32xf32>,
    %cst_5 = arith.constant 0.000000e+00 : f32
    %23 = vector.broadcast %cst_5 : f32 to vector<290x32xf32>
    %c0_6 = arith.constant 0 : index
    %c0_7 = arith.constant 0 : index
    %24 = vector.load %arg10[%c0_6, %c0_7] : memref<290x32xf32, #tpu.memory_space<vmem>>, vector<290x32xf32>
    tpu.vector_store %arg10[%c0_6, %c0_7], %23 {strides = array<i32>} : memref<290x32xf32, #tpu.memory_space<vmem>>, vector<290x32xf32>,
    %cst_8 = arith.constant 0.000000e+00 : f32
    %25 = vector.broadcast %cst_8 : f32 to vector<256x32xf32>
    %c0_9 = arith.constant 0 : index
    %c0_10 = arith.constant 0 : index
    %c0_11 = arith.constant 0 : index
    %26 = vector.load %arg1[%c0_9, %c0_10, %c0_11] : memref<1x290x4xf32, #tpu.memory_space<vmem>>, vector<1x256x4xf32>
    %27 = vector.shape_cast %26 : vector<1x256x4xf32> to vector<256x4xf32>
    %cst_12 = arith.constant 0.000000e+00 : f32
    %28 = vector.shape_cast %18 : vector<256x1xi1> to vector<256x1xi1>
    %29 = vector.broadcast %28 : vector<256x1xi1> to vector<256x4xi1>
    %30 = vector.broadcast %cst_12 : f32 to vector<256x4xf32>
    %31 = arith.select %29, %27, %30 : vector<256x4xi1>, vector<256x4xf32>
    %c0_13 = arith.constant 0 : index
    %c0_14 = arith.constant 0 : index
    %c0_15 = arith.constant 0 : index
    %32 = vector.load %arg2[%c0_13, %c0_14, %c0_15] : memref<9x4x32xf32, #tpu.memory_space<vmem>>, vector<1x4x32xf32>
    %33 = vector.shape_cast %32 : vector<1x4x32xf32> to vector<4x32xf32>
    %cst_16 = arith.constant dense<0.000000e+00> : vector<256x32xf32>
    %34 = tpu.matmul %31, %33, %cst_16 {dimension_numbers = #tpu.dot_dimension_numbers<[1], [0], [0], [1], [0, 0, 1, 1], [], []>} : vector<256x4xf32>, vector<4x32xf32>, vector<256x32xf32> -> vector<256x32xf32>
    %35 = arith.addf %25, %34 : vector<256x32xf32>
    %c0_17 = arith.constant 0 : index
    %c1 = arith.constant 1 : index
    %c0_18 = arith.constant 0 : index
    %36 = vector.load %arg1[%c0_17, %c1, %c0_18] : memref<1x290x4xf32, #tpu.memory_space<vmem>>, vector<1x256x4xf32>
    %37 = vector.shape_cast %36 : vector<1x256x4xf32> to vector<256x4xf32>
    %c1_19 = arith.constant 1 : index
    %c0_20 = arith.constant 0 : index
    %c0_21 = arith.constant 0 : index
    %38 = vector.load %arg2[%c1_19, %c0_20, %c0_21] : memref<9x4x32xf32, #tpu.memory_space<vmem>>, vector<1x4x32xf32>
    %39 = vector.shape_cast %38 : vector<1x4x32xf32> to vector<4x32xf32>
    %cst_22 = arith.constant dense<0.000000e+00> : vector<256x32xf32>
    %40 = tpu.matmul %37, %39, %cst_22 {dimension_numbers = #tpu.dot_dimension_numbers<[1], [0], [0], [1], [0, 0, 1, 1], [], []>} : vector<256x4xf32>, vector<4x32xf32>, vector<256x32xf32> -> vector<256x32xf32>
    %41 = arith.addf %35, %40 : vector<256x32xf32>
    %c0_23 = arith.constant 0 : index
    %c2 = arith.constant 2 : index
    %c0_24 = arith.constant 0 : index
    %42 = vector.load %arg1[%c0_23, %c2, %c0_24] : memref<1x290x4xf32, #tpu.memory_space<vmem>>, vector<1x256x4xf32>
    %43 = vector.shape_cast %42 : vector<1x256x4xf32> to vector<256x4xf32>
    %cst_25 = arith.constant 0.000000e+00 : f32
    %44 = vector.shape_cast %20 : vector<256x1xi1> to vector<256x1xi1>
    %45 = vector.broadcast %44 : vector<256x1xi1> to vector<256x4xi1>
    %46 = vector.broadcast %cst_25 : f32 to vector<256x4xf32>
    %47 = arith.select %45, %43, %46 : vector<256x4xi1>, vector<256x4xf32>
    %c2_26 = arith.constant 2 : index
    %c0_27 = arith.constant 0 : index
    %c0_28 = arith.constant 0 : index
    %48 = vector.load %arg2[%c2_26, %c0_27, %c0_28] : memref<9x4x32xf32, #tpu.memory_space<vmem>>, vector<1x4x32xf32>
    %49 = vector.shape_cast %48 : vector<1x4x32xf32> to vector<4x32xf32>
    %cst_29 = arith.constant dense<0.000000e+00> : vector<256x32xf32>
    %50 = tpu.matmul %47, %49, %cst_29 {dimension_numbers = #tpu.dot_dimension_numbers<[1], [0], [0], [1], [0, 0, 1, 1], [], []>} : vector<256x4xf32>, vector<4x32xf32>, vector<256x32xf32> -> vector<256x32xf32>
    %51 = arith.addf %41, %50 : vector<256x32xf32>
    %c0_30 = arith.constant 0 : index
    %c16 = arith.constant 16 : index
    %c0_31 = arith.constant 0 : index
    %52 = vector.load %arg1[%c0_30, %c16, %c0_31] : memref<1x290x4xf32, #tpu.memory_space<vmem>>, vector<1x256x4xf32>
    %53 = vector.shape_cast %52 : vector<1x256x4xf32> to vector<256x4xf32>
    %cst_32 = arith.constant 0.000000e+00 : f32
    %54 = vector.shape_cast %18 : vector<256x1xi1> to vector<256x1xi1>
    %55 = vector.broadcast %54 : vector<256x1xi1> to vector<256x4xi1>
    %56 = vector.broadcast %cst_32 : f32 to vector<256x4xf32>
    %57 = arith.select %55, %53, %56 : vector<256x4xi1>, vector<256x4xf32>
    %c3 = arith.constant 3 : index
    %c0_33 = arith.constant 0 : index
    %c0_34 = arith.constant 0 : index
    %58 = vector.load %arg2[%c3, %c0_33, %c0_34] : memref<9x4x32xf32, #tpu.memory_space<vmem>>, vector<1x4x32xf32>
    %59 = vector.shape_cast %58 : vector<1x4x32xf32> to vector<4x32xf32>
    %cst_35 = arith.constant dense<0.000000e+00> : vector<256x32xf32>
    %60 = tpu.matmul %57, %59, %cst_35 {dimension_numbers = #tpu.dot_dimension_numbers<[1], [0], [0], [1], [0, 0, 1, 1], [], []>} : vector<256x4xf32>, vector<4x32xf32>, vector<256x32xf32> -> vector<256x32xf32>
    %61 = arith.addf %51, %60 : vector<256x32xf32>
    %c0_36 = arith.constant 0 : index
    %c17 = arith.constant 17 : index
    %c0_37 = arith.constant 0 : index
    %62 = vector.load %arg1[%c0_36, %c17, %c0_37] : memref<1x290x4xf32, #tpu.memory_space<vmem>>, vector<1x256x4xf32>
    %63 = vector.shape_cast %62 : vector<1x256x4xf32> to vector<256x4xf32>
    %c4 = arith.constant 4 : index
    %c0_38 = arith.constant 0 : index
    %c0_39 = arith.constant 0 : index
    %64 = vector.load %arg2[%c4, %c0_38, %c0_39] : memref<9x4x32xf32, #tpu.memory_space<vmem>>, vector<1x4x32xf32>
    %65 = vector.shape_cast %64 : vector<1x4x32xf32> to vector<4x32xf32>
    %cst_40 = arith.constant dense<0.000000e+00> : vector<256x32xf32>
    %66 = tpu.matmul %63, %65, %cst_40 {dimension_numbers = #tpu.dot_dimension_numbers<[1], [0], [0], [1], [0, 0, 1, 1], [], []>} : vector<256x4xf32>, vector<4x32xf32>, vector<256x32xf32> -> vector<256x32xf32>
    %67 = arith.addf %61, %66 : vector<256x32xf32>
    %c0_41 = arith.constant 0 : index
    %c18 = arith.constant 18 : index
    %c0_42 = arith.constant 0 : index
    %68 = vector.load %arg1[%c0_41, %c18, %c0_42] : memref<1x290x4xf32, #tpu.memory_space<vmem>>, vector<1x256x4xf32>
    %69 = vector.shape_cast %68 : vector<1x256x4xf32> to vector<256x4xf32>
    %cst_43 = arith.constant 0.000000e+00 : f32
    %70 = vector.shape_cast %20 : vector<256x1xi1> to vector<256x1xi1>
    %71 = vector.broadcast %70 : vector<256x1xi1> to vector<256x4xi1>
    %72 = vector.broadcast %cst_43 : f32 to vector<256x4xf32>
    %73 = arith.select %71, %69, %72 : vector<256x4xi1>, vector<256x4xf32>
    %c5 = arith.constant 5 : index
    %c0_44 = arith.constant 0 : index
    %c0_45 = arith.constant 0 : index
    %74 = vector.load %arg2[%c5, %c0_44, %c0_45] : memref<9x4x32xf32, #tpu.memory_space<vmem>>, vector<1x4x32xf32>
    %75 = vector.shape_cast %74 : vector<1x4x32xf32> to vector<4x32xf32>
    %cst_46 = arith.constant dense<0.000000e+00> : vector<256x32xf32>
    %76 = tpu.matmul %73, %75, %cst_46 {dimension_numbers = #tpu.dot_dimension_numbers<[1], [0], [0], [1], [0, 0, 1, 1], [], []>} : vector<256x4xf32>, vector<4x32xf32>, vector<256x32xf32> -> vector<256x32xf32>
    %77 = arith.addf %67, %76 : vector<256x32xf32>
    %c0_47 = arith.constant 0 : index
    %c32 = arith.constant 32 : index
    %c0_48 = arith.constant 0 : index
    %78 = vector.load %arg1[%c0_47, %c32, %c0_48] : memref<1x290x4xf32, #tpu.memory_space<vmem>>, vector<1x256x4xf32>
    %79 = vector.shape_cast %78 : vector<1x256x4xf32> to vector<256x4xf32>
    %cst_49 = arith.constant 0.000000e+00 : f32
    %80 = vector.shape_cast %18 : vector<256x1xi1> to vector<256x1xi1>
    %81 = vector.broadcast %80 : vector<256x1xi1> to vector<256x4xi1>
    %82 = vector.broadcast %cst_49 : f32 to vector<256x4xf32>
    %83 = arith.select %81, %79, %82 : vector<256x4xi1>, vector<256x4xf32>
    %c6 = arith.constant 6 : index
    %c0_50 = arith.constant 0 : index
    %c0_51 = arith.constant 0 : index
    %84 = vector.load %arg2[%c6, %c0_50, %c0_51] : memref<9x4x32xf32, #tpu.memory_space<vmem>>, vector<1x4x32xf32>
    %85 = vector.shape_cast %84 : vector<1x4x32xf32> to vector<4x32xf32>
    %cst_52 = arith.constant dense<0.000000e+00> : vector<256x32xf32>
    %86 = tpu.matmul %83, %85, %cst_52 {dimension_numbers = #tpu.dot_dimension_numbers<[1], [0], [0], [1], [0, 0, 1, 1], [], []>} : vector<256x4xf32>, vector<4x32xf32>, vector<256x32xf32> -> vector<256x32xf32>
    %87 = arith.addf %77, %86 : vector<256x32xf32>
    %c0_53 = arith.constant 0 : index
    %c33 = arith.constant 33 : index
    %c0_54 = arith.constant 0 : index
    %88 = vector.load %arg1[%c0_53, %c33, %c0_54] : memref<1x290x4xf32, #tpu.memory_space<vmem>>, vector<1x256x4xf32>
    %89 = vector.shape_cast %88 : vector<1x256x4xf32> to vector<256x4xf32>
    %c7 = arith.constant 7 : index
    %c0_55 = arith.constant 0 : index
    %c0_56 = arith.constant 0 : index
    %90 = vector.load %arg2[%c7, %c0_55, %c0_56] : memref<9x4x32xf32, #tpu.memory_space<vmem>>, vector<1x4x32xf32>
    %91 = vector.shape_cast %90 : vector<1x4x32xf32> to vector<4x32xf32>
    %cst_57 = arith.constant dense<0.000000e+00> : vector<256x32xf32>
    %92 = tpu.matmul %89, %91, %cst_57 {dimension_numbers = #tpu.dot_dimension_numbers<[1], [0], [0], [1], [0, 0, 1, 1], [], []>} : vector<256x4xf32>, vector<4x32xf32>, vector<256x32xf32> -> vector<256x32xf32>
    %93 = arith.addf %87, %92 : vector<256x32xf32>
    %c0_58 = arith.constant 0 : index
    %c34 = arith.constant 34 : index
    %c0_59 = arith.constant 0 : index
    %94 = vector.load %arg1[%c0_58, %c34, %c0_59] : memref<1x290x4xf32, #tpu.memory_space<vmem>>, vector<1x256x4xf32>
    %95 = vector.shape_cast %94 : vector<1x256x4xf32> to vector<256x4xf32>
    %cst_60 = arith.constant 0.000000e+00 : f32
    %96 = vector.shape_cast %20 : vector<256x1xi1> to vector<256x1xi1>
    %97 = vector.broadcast %96 : vector<256x1xi1> to vector<256x4xi1>
    %98 = vector.broadcast %cst_60 : f32 to vector<256x4xf32>
    %99 = arith.select %97, %95, %98 : vector<256x4xi1>, vector<256x4xf32>
    %c8 = arith.constant 8 : index
    %c0_61 = arith.constant 0 : index
    %c0_62 = arith.constant 0 : index
    %100 = vector.load %arg2[%c8, %c0_61, %c0_62] : memref<9x4x32xf32, #tpu.memory_space<vmem>>, vector<1x4x32xf32>
    %101 = vector.shape_cast %100 : vector<1x4x32xf32> to vector<4x32xf32>
    %cst_63 = arith.constant dense<0.000000e+00> : vector<256x32xf32>
    %102 = tpu.matmul %99, %101, %cst_63 {dimension_numbers = #tpu.dot_dimension_numbers<[1], [0], [0], [1], [0, 0, 1, 1], [], []>} : vector<256x4xf32>, vector<4x32xf32>, vector<256x32xf32> -> vector<256x32xf32>
    %103 = arith.addf %93, %102 : vector<256x32xf32>
    %c0_64 = arith.constant 0 : index
    %c0_65 = arith.constant 0 : index
    %104 = vector.load %arg3[%c0_64, %c0_65] : memref<1x32xf32, #tpu.memory_space<vmem>>, vector<1x32xf32>
    %105 = vector.broadcast %104 : vector<1x32xf32> to vector<256x32xf32>
    %106 = arith.addf %103, %105 : vector<256x32xf32>
    %cst_66 = arith.constant 0.000000e+00 : f32
    %107 = vector.broadcast %cst_66 : f32 to vector<256x32xf32>
    %108 = arith.maximumf %106, %107 : vector<256x32xf32>
    %c17_67 = arith.constant 17 : index
    %c0_68 = arith.constant 0 : index
    %109 = vector.load %arg9[%c17_67, %c0_68] : memref<290x32xf32, #tpu.memory_space<vmem>>, vector<256x32xf32>
    tpu.vector_store %arg9[%c17_67, %c0_68], %108 {strides = array<i32>} : memref<290x32xf32, #tpu.memory_space<vmem>>, vector<256x32xf32>,
    %cst_69 = arith.constant 0.000000e+00 : f32
    %110 = vector.broadcast %cst_69 : f32 to vector<256x32xf32>
    %c0_70 = arith.constant 0 : index
    %c0_71 = arith.constant 0 : index
    %111 = vector.load %arg9[%c0_70, %c0_71] : memref<290x32xf32, #tpu.memory_space<vmem>>, vector<256x32xf32>
    %cst_72 = arith.constant 0.000000e+00 : f32
    %112 = vector.shape_cast %18 : vector<256x1xi1> to vector<256x1xi1>
    %113 = vector.broadcast %112 : vector<256x1xi1> to vector<256x32xi1>
    %114 = vector.broadcast %cst_72 : f32 to vector<256x32xf32>
    %115 = arith.select %113, %111, %114 : vector<256x32xi1>, vector<256x32xf32>
    %c0_73 = arith.constant 0 : index
    %c0_74 = arith.constant 0 : index
    %c0_75 = arith.constant 0 : index
    %116 = vector.load %arg4[%c0_73, %c0_74, %c0_75] : memref<9x32x32xf32, #tpu.memory_space<vmem>>, vector<1x32x32xf32>
    %117 = vector.shape_cast %116 : vector<1x32x32xf32> to vector<32x32xf32>
    %cst_76 = arith.constant dense<0.000000e+00> : vector<256x32xf32>
    %118 = tpu.matmul %115, %117, %cst_76 {dimension_numbers = #tpu.dot_dimension_numbers<[1], [0], [0], [1], [0, 0, 1, 1], [], []>} : vector<256x32xf32>, vector<32x32xf32>, vector<256x32xf32> -> vector<256x32xf32>
    %119 = arith.addf %110, %118 : vector<256x32xf32>
    %c1_77 = arith.constant 1 : index
    %c0_78 = arith.constant 0 : index
    %120 = vector.load %arg9[%c1_77, %c0_78] : memref<290x32xf32, #tpu.memory_space<vmem>>, vector<256x32xf32>
    %c1_79 = arith.constant 1 : index
    %c0_80 = arith.constant 0 : index
    %c0_81 = arith.constant 0 : index
    %121 = vector.load %arg4[%c1_79, %c0_80, %c0_81] : memref<9x32x32xf32, #tpu.memory_space<vmem>>, vector<1x32x32xf32>
    %122 = vector.shape_cast %121 : vector<1x32x32xf32> to vector<32x32xf32>
    %cst_82 = arith.constant dense<0.000000e+00> : vector<256x32xf32>
    %123 = tpu.matmul %120, %122, %cst_82 {dimension_numbers = #tpu.dot_dimension_numbers<[1], [0], [0], [1], [0, 0, 1, 1], [], []>} : vector<256x32xf32>, vector<32x32xf32>, vector<256x32xf32> -> vector<256x32xf32>
    %124 = arith.addf %119, %123 : vector<256x32xf32>
    %c2_83 = arith.constant 2 : index
    %c0_84 = arith.constant 0 : index
    %125 = vector.load %arg9[%c2_83, %c0_84] : memref<290x32xf32, #tpu.memory_space<vmem>>, vector<256x32xf32>
    %cst_85 = arith.constant 0.000000e+00 : f32
    %126 = vector.shape_cast %20 : vector<256x1xi1> to vector<256x1xi1>
    %127 = vector.broadcast %126 : vector<256x1xi1> to vector<256x32xi1>
    %128 = vector.broadcast %cst_85 : f32 to vector<256x32xf32>
    %129 = arith.select %127, %125, %128 : vector<256x32xi1>, vector<256x32xf32>
    %c2_86 = arith.constant 2 : index
    %c0_87 = arith.constant 0 : index
    %c0_88 = arith.constant 0 : index
    %130 = vector.load %arg4[%c2_86, %c0_87, %c0_88] : memref<9x32x32xf32, #tpu.memory_space<vmem>>, vector<1x32x32xf32>
    %131 = vector.shape_cast %130 : vector<1x32x32xf32> to vector<32x32xf32>
    %cst_89 = arith.constant dense<0.000000e+00> : vector<256x32xf32>
    %132 = tpu.matmul %129, %131, %cst_89 {dimension_numbers = #tpu.dot_dimension_numbers<[1], [0], [0], [1], [0, 0, 1, 1], [], []>} : vector<256x32xf32>, vector<32x32xf32>, vector<256x32xf32> -> vector<256x32xf32>
    %133 = arith.addf %124, %132 : vector<256x32xf32>
    %c16_90 = arith.constant 16 : index
    %c0_91 = arith.constant 0 : index
    %134 = vector.load %arg9[%c16_90, %c0_91] : memref<290x32xf32, #tpu.memory_space<vmem>>, vector<256x32xf32>
    %cst_92 = arith.constant 0.000000e+00 : f32
    %135 = vector.shape_cast %18 : vector<256x1xi1> to vector<256x1xi1>
    %136 = vector.broadcast %135 : vector<256x1xi1> to vector<256x32xi1>
    %137 = vector.broadcast %cst_92 : f32 to vector<256x32xf32>
    %138 = arith.select %136, %134, %137 : vector<256x32xi1>, vector<256x32xf32>
    %c3_93 = arith.constant 3 : index
    %c0_94 = arith.constant 0 : index
    %c0_95 = arith.constant 0 : index
    %139 = vector.load %arg4[%c3_93, %c0_94, %c0_95] : memref<9x32x32xf32, #tpu.memory_space<vmem>>, vector<1x32x32xf32>
    %140 = vector.shape_cast %139 : vector<1x32x32xf32> to vector<32x32xf32>
    %cst_96 = arith.constant dense<0.000000e+00> : vector<256x32xf32>
    %141 = tpu.matmul %138, %140, %cst_96 {dimension_numbers = #tpu.dot_dimension_numbers<[1], [0], [0], [1], [0, 0, 1, 1], [], []>} : vector<256x32xf32>, vector<32x32xf32>, vector<256x32xf32> -> vector<256x32xf32>
    %142 = arith.addf %133, %141 : vector<256x32xf32>
    %c17_97 = arith.constant 17 : index
    %c0_98 = arith.constant 0 : index
    %143 = vector.load %arg9[%c17_97, %c0_98] : memref<290x32xf32, #tpu.memory_space<vmem>>, vector<256x32xf32>
    %c4_99 = arith.constant 4 : index
    %c0_100 = arith.constant 0 : index
    %c0_101 = arith.constant 0 : index
    %144 = vector.load %arg4[%c4_99, %c0_100, %c0_101] : memref<9x32x32xf32, #tpu.memory_space<vmem>>, vector<1x32x32xf32>
    %145 = vector.shape_cast %144 : vector<1x32x32xf32> to vector<32x32xf32>
    %cst_102 = arith.constant dense<0.000000e+00> : vector<256x32xf32>
    %146 = tpu.matmul %143, %145, %cst_102 {dimension_numbers = #tpu.dot_dimension_numbers<[1], [0], [0], [1], [0, 0, 1, 1], [], []>} : vector<256x32xf32>, vector<32x32xf32>, vector<256x32xf32> -> vector<256x32xf32>
    %147 = arith.addf %142, %146 : vector<256x32xf32>
    %c18_103 = arith.constant 18 : index
    %c0_104 = arith.constant 0 : index
    %148 = vector.load %arg9[%c18_103, %c0_104] : memref<290x32xf32, #tpu.memory_space<vmem>>, vector<256x32xf32>
    %cst_105 = arith.constant 0.000000e+00 : f32
    %149 = vector.shape_cast %20 : vector<256x1xi1> to vector<256x1xi1>
    %150 = vector.broadcast %149 : vector<256x1xi1> to vector<256x32xi1>
    %151 = vector.broadcast %cst_105 : f32 to vector<256x32xf32>
    %152 = arith.select %150, %148, %151 : vector<256x32xi1>, vector<256x32xf32>
    %c5_106 = arith.constant 5 : index
    %c0_107 = arith.constant 0 : index
    %c0_108 = arith.constant 0 : index
    %153 = vector.load %arg4[%c5_106, %c0_107, %c0_108] : memref<9x32x32xf32, #tpu.memory_space<vmem>>, vector<1x32x32xf32>
    %154 = vector.shape_cast %153 : vector<1x32x32xf32> to vector<32x32xf32>
    %cst_109 = arith.constant dense<0.000000e+00> : vector<256x32xf32>
    %155 = tpu.matmul %152, %154, %cst_109 {dimension_numbers = #tpu.dot_dimension_numbers<[1], [0], [0], [1], [0, 0, 1, 1], [], []>} : vector<256x32xf32>, vector<32x32xf32>, vector<256x32xf32> -> vector<256x32xf32>
    %156 = arith.addf %147, %155 : vector<256x32xf32>
    %c32_110 = arith.constant 32 : index
    %c0_111 = arith.constant 0 : index
    %157 = vector.load %arg9[%c32_110, %c0_111] : memref<290x32xf32, #tpu.memory_space<vmem>>, vector<256x32xf32>
    %cst_112 = arith.constant 0.000000e+00 : f32
    %158 = vector.shape_cast %18 : vector<256x1xi1> to vector<256x1xi1>
    %159 = vector.broadcast %158 : vector<256x1xi1> to vector<256x32xi1>
    %160 = vector.broadcast %cst_112 : f32 to vector<256x32xf32>
    %161 = arith.select %159, %157, %160 : vector<256x32xi1>, vector<256x32xf32>
    %c6_113 = arith.constant 6 : index
    %c0_114 = arith.constant 0 : index
    %c0_115 = arith.constant 0 : index
    %162 = vector.load %arg4[%c6_113, %c0_114, %c0_115] : memref<9x32x32xf32, #tpu.memory_space<vmem>>, vector<1x32x32xf32>
    %163 = vector.shape_cast %162 : vector<1x32x32xf32> to vector<32x32xf32>
    %cst_116 = arith.constant dense<0.000000e+00> : vector<256x32xf32>
    %164 = tpu.matmul %161, %163, %cst_116 {dimension_numbers = #tpu.dot_dimension_numbers<[1], [0], [0], [1], [0, 0, 1, 1], [], []>} : vector<256x32xf32>, vector<32x32xf32>, vector<256x32xf32> -> vector<256x32xf32>
    %165 = arith.addf %156, %164 : vector<256x32xf32>
    %c33_117 = arith.constant 33 : index
    %c0_118 = arith.constant 0 : index
    %166 = vector.load %arg9[%c33_117, %c0_118] : memref<290x32xf32, #tpu.memory_space<vmem>>, vector<256x32xf32>
    %c7_119 = arith.constant 7 : index
    %c0_120 = arith.constant 0 : index
    %c0_121 = arith.constant 0 : index
    %167 = vector.load %arg4[%c7_119, %c0_120, %c0_121] : memref<9x32x32xf32, #tpu.memory_space<vmem>>, vector<1x32x32xf32>
    %168 = vector.shape_cast %167 : vector<1x32x32xf32> to vector<32x32xf32>
    %cst_122 = arith.constant dense<0.000000e+00> : vector<256x32xf32>
    %169 = tpu.matmul %166, %168, %cst_122 {dimension_numbers = #tpu.dot_dimension_numbers<[1], [0], [0], [1], [0, 0, 1, 1], [], []>} : vector<256x32xf32>, vector<32x32xf32>, vector<256x32xf32> -> vector<256x32xf32>
    %170 = arith.addf %165, %169 : vector<256x32xf32>
    %c34_123 = arith.constant 34 : index
    %c0_124 = arith.constant 0 : index
    %171 = vector.load %arg9[%c34_123, %c0_124] : memref<290x32xf32, #tpu.memory_space<vmem>>, vector<256x32xf32>
    %cst_125 = arith.constant 0.000000e+00 : f32
    %172 = vector.shape_cast %20 : vector<256x1xi1> to vector<256x1xi1>
    %173 = vector.broadcast %172 : vector<256x1xi1> to vector<256x32xi1>
    %174 = vector.broadcast %cst_125 : f32 to vector<256x32xf32>
    %175 = arith.select %173, %171, %174 : vector<256x32xi1>, vector<256x32xf32>
    %c8_126 = arith.constant 8 : index
    %c0_127 = arith.constant 0 : index
    %c0_128 = arith.constant 0 : index
    %176 = vector.load %arg4[%c8_126, %c0_127, %c0_128] : memref<9x32x32xf32, #tpu.memory_space<vmem>>, vector<1x32x32xf32>
    %177 = vector.shape_cast %176 : vector<1x32x32xf32> to vector<32x32xf32>
    %cst_129 = arith.constant dense<0.000000e+00> : vector<256x32xf32>
    %178 = tpu.matmul %175, %177, %cst_129 {dimension_numbers = #tpu.dot_dimension_numbers<[1], [0], [0], [1], [0, 0, 1, 1], [], []>} : vector<256x32xf32>, vector<32x32xf32>, vector<256x32xf32> -> vector<256x32xf32>
    %179 = arith.addf %170, %178 : vector<256x32xf32>
    %c0_130 = arith.constant 0 : index
    %c0_131 = arith.constant 0 : index
    %180 = vector.load %arg5[%c0_130, %c0_131] : memref<1x32xf32, #tpu.memory_space<vmem>>, vector<1x32xf32>
    %181 = vector.broadcast %180 : vector<1x32xf32> to vector<256x32xf32>
    %182 = arith.addf %179, %181 : vector<256x32xf32>
    %cst_132 = arith.constant 0.000000e+00 : f32
    %183 = vector.broadcast %cst_132 : f32 to vector<256x32xf32>
    %184 = arith.maximumf %182, %183 : vector<256x32xf32>
    %c17_133 = arith.constant 17 : index
    %c0_134 = arith.constant 0 : index
    %185 = vector.load %arg10[%c17_133, %c0_134] : memref<290x32xf32, #tpu.memory_space<vmem>>, vector<256x32xf32>
    tpu.vector_store %arg10[%c17_133, %c0_134], %184 {strides = array<i32>} : memref<290x32xf32, #tpu.memory_space<vmem>>, vector<256x32xf32>,
    %cst_135 = arith.constant 0.000000e+00 : f32
    %186 = vector.broadcast %cst_135 : f32 to vector<256x1xf32>
    %c0_136 = arith.constant 0 : index
    %c0_137 = arith.constant 0 : index
    %187 = vector.load %arg10[%c0_136, %c0_137] : memref<290x32xf32, #tpu.memory_space<vmem>>, vector<256x32xf32>
    %cst_138 = arith.constant 0.000000e+00 : f32
    %188 = vector.shape_cast %18 : vector<256x1xi1> to vector<256x1xi1>
    %189 = vector.broadcast %188 : vector<256x1xi1> to vector<256x32xi1>
    %190 = vector.broadcast %cst_138 : f32 to vector<256x32xf32>
    %191 = arith.select %189, %187, %190 : vector<256x32xi1>, vector<256x32xf32>
    %c0_139 = arith.constant 0 : index
    %c0_140 = arith.constant 0 : index
    %c0_141 = arith.constant 0 : index
    %192 = vector.load %arg6[%c0_139, %c0_140, %c0_141] : memref<9x32x1xf32, #tpu.memory_space<vmem>>, vector<1x32x1xf32>
    %193 = vector.shape_cast %192 : vector<1x32x1xf32> to vector<32x1xf32>
    %cst_142 = arith.constant dense<0.000000e+00> : vector<256x1xf32>
    %194 = tpu.matmul %191, %193, %cst_142 {dimension_numbers = #tpu.dot_dimension_numbers<[1], [0], [0], [1], [0, 0, 1, 1], [], []>} : vector<256x32xf32>, vector<32x1xf32>, vector<256x1xf32> -> vector<256x1xf32>
    %195 = arith.addf %186, %194 : vector<256x1xf32>
    %c1_143 = arith.constant 1 : index
    %c0_144 = arith.constant 0 : index
    %196 = vector.load %arg10[%c1_143, %c0_144] : memref<290x32xf32, #tpu.memory_space<vmem>>, vector<256x32xf32>
    %c1_145 = arith.constant 1 : index
    %c0_146 = arith.constant 0 : index
    %c0_147 = arith.constant 0 : index
    %197 = vector.load %arg6[%c1_145, %c0_146, %c0_147] : memref<9x32x1xf32, #tpu.memory_space<vmem>>, vector<1x32x1xf32>
    %198 = vector.shape_cast %197 : vector<1x32x1xf32> to vector<32x1xf32>
    %cst_148 = arith.constant dense<0.000000e+00> : vector<256x1xf32>
    %199 = tpu.matmul %196, %198, %cst_148 {dimension_numbers = #tpu.dot_dimension_numbers<[1], [0], [0], [1], [0, 0, 1, 1], [], []>} : vector<256x32xf32>, vector<32x1xf32>, vector<256x1xf32> -> vector<256x1xf32>
    %200 = arith.addf %195, %199 : vector<256x1xf32>
    %c2_149 = arith.constant 2 : index
    %c0_150 = arith.constant 0 : index
    %201 = vector.load %arg10[%c2_149, %c0_150] : memref<290x32xf32, #tpu.memory_space<vmem>>, vector<256x32xf32>
    %cst_151 = arith.constant 0.000000e+00 : f32
    %202 = vector.shape_cast %20 : vector<256x1xi1> to vector<256x1xi1>
    %203 = vector.broadcast %202 : vector<256x1xi1> to vector<256x32xi1>
    %204 = vector.broadcast %cst_151 : f32 to vector<256x32xf32>
    %205 = arith.select %203, %201, %204 : vector<256x32xi1>, vector<256x32xf32>
    %c2_152 = arith.constant 2 : index
    %c0_153 = arith.constant 0 : index
    %c0_154 = arith.constant 0 : index
    %206 = vector.load %arg6[%c2_152, %c0_153, %c0_154] : memref<9x32x1xf32, #tpu.memory_space<vmem>>, vector<1x32x1xf32>
    %207 = vector.shape_cast %206 : vector<1x32x1xf32> to vector<32x1xf32>
    %cst_155 = arith.constant dense<0.000000e+00> : vector<256x1xf32>
    %208 = tpu.matmul %205, %207, %cst_155 {dimension_numbers = #tpu.dot_dimension_numbers<[1], [0], [0], [1], [0, 0, 1, 1], [], []>} : vector<256x32xf32>, vector<32x1xf32>, vector<256x1xf32> -> vector<256x1xf32>
    %209 = arith.addf %200, %208 : vector<256x1xf32>
    %c16_156 = arith.constant 16 : index
    %c0_157 = arith.constant 0 : index
    %210 = vector.load %arg10[%c16_156, %c0_157] : memref<290x32xf32, #tpu.memory_space<vmem>>, vector<256x32xf32>
    %cst_158 = arith.constant 0.000000e+00 : f32
    %211 = vector.shape_cast %18 : vector<256x1xi1> to vector<256x1xi1>
    %212 = vector.broadcast %211 : vector<256x1xi1> to vector<256x32xi1>
    %213 = vector.broadcast %cst_158 : f32 to vector<256x32xf32>
    %214 = arith.select %212, %210, %213 : vector<256x32xi1>, vector<256x32xf32>
    %c3_159 = arith.constant 3 : index
    %c0_160 = arith.constant 0 : index
    %c0_161 = arith.constant 0 : index
    %215 = vector.load %arg6[%c3_159, %c0_160, %c0_161] : memref<9x32x1xf32, #tpu.memory_space<vmem>>, vector<1x32x1xf32>
    %216 = vector.shape_cast %215 : vector<1x32x1xf32> to vector<32x1xf32>
    %cst_162 = arith.constant dense<0.000000e+00> : vector<256x1xf32>
    %217 = tpu.matmul %214, %216, %cst_162 {dimension_numbers = #tpu.dot_dimension_numbers<[1], [0], [0], [1], [0, 0, 1, 1], [], []>} : vector<256x32xf32>, vector<32x1xf32>, vector<256x1xf32> -> vector<256x1xf32>
    %218 = arith.addf %209, %217 : vector<256x1xf32>
    %c17_163 = arith.constant 17 : index
    %c0_164 = arith.constant 0 : index
    %219 = vector.load %arg10[%c17_163, %c0_164] : memref<290x32xf32, #tpu.memory_space<vmem>>, vector<256x32xf32>
    %c4_165 = arith.constant 4 : index
    %c0_166 = arith.constant 0 : index
    %c0_167 = arith.constant 0 : index
    %220 = vector.load %arg6[%c4_165, %c0_166, %c0_167] : memref<9x32x1xf32, #tpu.memory_space<vmem>>, vector<1x32x1xf32>
    %221 = vector.shape_cast %220 : vector<1x32x1xf32> to vector<32x1xf32>
    %cst_168 = arith.constant dense<0.000000e+00> : vector<256x1xf32>
    %222 = tpu.matmul %219, %221, %cst_168 {dimension_numbers = #tpu.dot_dimension_numbers<[1], [0], [0], [1], [0, 0, 1, 1], [], []>} : vector<256x32xf32>, vector<32x1xf32>, vector<256x1xf32> -> vector<256x1xf32>
    %223 = arith.addf %218, %222 : vector<256x1xf32>
    %c18_169 = arith.constant 18 : index
    %c0_170 = arith.constant 0 : index
    %224 = vector.load %arg10[%c18_169, %c0_170] : memref<290x32xf32, #tpu.memory_space<vmem>>, vector<256x32xf32>
    %cst_171 = arith.constant 0.000000e+00 : f32
    %225 = vector.shape_cast %20 : vector<256x1xi1> to vector<256x1xi1>
    %226 = vector.broadcast %225 : vector<256x1xi1> to vector<256x32xi1>
    %227 = vector.broadcast %cst_171 : f32 to vector<256x32xf32>
    %228 = arith.select %226, %224, %227 : vector<256x32xi1>, vector<256x32xf32>
    %c5_172 = arith.constant 5 : index
    %c0_173 = arith.constant 0 : index
    %c0_174 = arith.constant 0 : index
    %229 = vector.load %arg6[%c5_172, %c0_173, %c0_174] : memref<9x32x1xf32, #tpu.memory_space<vmem>>, vector<1x32x1xf32>
    %230 = vector.shape_cast %229 : vector<1x32x1xf32> to vector<32x1xf32>
    %cst_175 = arith.constant dense<0.000000e+00> : vector<256x1xf32>
    %231 = tpu.matmul %228, %230, %cst_175 {dimension_numbers = #tpu.dot_dimension_numbers<[1], [0], [0], [1], [0, 0, 1, 1], [], []>} : vector<256x32xf32>, vector<32x1xf32>, vector<256x1xf32> -> vector<256x1xf32>
    %232 = arith.addf %223, %231 : vector<256x1xf32>
    %c32_176 = arith.constant 32 : index
    %c0_177 = arith.constant 0 : index
    %233 = vector.load %arg10[%c32_176, %c0_177] : memref<290x32xf32, #tpu.memory_space<vmem>>, vector<256x32xf32>
    %cst_178 = arith.constant 0.000000e+00 : f32
    %234 = vector.shape_cast %18 : vector<256x1xi1> to vector<256x1xi1>
    %235 = vector.broadcast %234 : vector<256x1xi1> to vector<256x32xi1>
    %236 = vector.broadcast %cst_178 : f32 to vector<256x32xf32>
    %237 = arith.select %235, %233, %236 : vector<256x32xi1>, vector<256x32xf32>
    %c6_179 = arith.constant 6 : index
    %c0_180 = arith.constant 0 : index
    %c0_181 = arith.constant 0 : index
    %238 = vector.load %arg6[%c6_179, %c0_180, %c0_181] : memref<9x32x1xf32, #tpu.memory_space<vmem>>, vector<1x32x1xf32>
    %239 = vector.shape_cast %238 : vector<1x32x1xf32> to vector<32x1xf32>
    %cst_182 = arith.constant dense<0.000000e+00> : vector<256x1xf32>
    %240 = tpu.matmul %237, %239, %cst_182 {dimension_numbers = #tpu.dot_dimension_numbers<[1], [0], [0], [1], [0, 0, 1, 1], [], []>} : vector<256x32xf32>, vector<32x1xf32>, vector<256x1xf32> -> vector<256x1xf32>
    %241 = arith.addf %232, %240 : vector<256x1xf32>
    %c33_183 = arith.constant 33 : index
    %c0_184 = arith.constant 0 : index
    %242 = vector.load %arg10[%c33_183, %c0_184] : memref<290x32xf32, #tpu.memory_space<vmem>>, vector<256x32xf32>
    %c7_185 = arith.constant 7 : index
    %c0_186 = arith.constant 0 : index
    %c0_187 = arith.constant 0 : index
    %243 = vector.load %arg6[%c7_185, %c0_186, %c0_187] : memref<9x32x1xf32, #tpu.memory_space<vmem>>, vector<1x32x1xf32>
    %244 = vector.shape_cast %243 : vector<1x32x1xf32> to vector<32x1xf32>
    %cst_188 = arith.constant dense<0.000000e+00> : vector<256x1xf32>
    %245 = tpu.matmul %242, %244, %cst_188 {dimension_numbers = #tpu.dot_dimension_numbers<[1], [0], [0], [1], [0, 0, 1, 1], [], []>} : vector<256x32xf32>, vector<32x1xf32>, vector<256x1xf32> -> vector<256x1xf32>
    %246 = arith.addf %241, %245 : vector<256x1xf32>
    %c34_189 = arith.constant 34 : index
    %c0_190 = arith.constant 0 : index
    %247 = vector.load %arg10[%c34_189, %c0_190] : memref<290x32xf32, #tpu.memory_space<vmem>>, vector<256x32xf32>
    %cst_191 = arith.constant 0.000000e+00 : f32
    %248 = vector.shape_cast %20 : vector<256x1xi1> to vector<256x1xi1>
    %249 = vector.broadcast %248 : vector<256x1xi1> to vector<256x32xi1>
    %250 = vector.broadcast %cst_191 : f32 to vector<256x32xf32>
    %251 = arith.select %249, %247, %250 : vector<256x32xi1>, vector<256x32xf32>
    %c8_192 = arith.constant 8 : index
    %c0_193 = arith.constant 0 : index
    %c0_194 = arith.constant 0 : index
    %252 = vector.load %arg6[%c8_192, %c0_193, %c0_194] : memref<9x32x1xf32, #tpu.memory_space<vmem>>, vector<1x32x1xf32>
    %253 = vector.shape_cast %252 : vector<1x32x1xf32> to vector<32x1xf32>
    %cst_195 = arith.constant dense<0.000000e+00> : vector<256x1xf32>
    %254 = tpu.matmul %251, %253, %cst_195 {dimension_numbers = #tpu.dot_dimension_numbers<[1], [0], [0], [1], [0, 0, 1, 1], [], []>} : vector<256x32xf32>, vector<32x1xf32>, vector<256x1xf32> -> vector<256x1xf32>
    %255 = arith.addf %246, %254 : vector<256x1xf32>
    %c0_196 = arith.constant 0 : index
    %c0_197 = arith.constant 0 : index
    %256 = vector.load %arg7[%c0_196, %c0_197] : memref<1x1xf32, #tpu.memory_space<vmem>>, vector<1x1xf32>
    %257 = vector.broadcast %256 : vector<1x1xf32> to vector<256x1xf32>
    %258 = arith.addf %255, %257 : vector<256x1xf32>
    %c0_198 = arith.constant 0 : index
    %c0_199 = arith.constant 0 : index
    %c0_200 = arith.constant 0 : index
    %259 = vector.load %arg8[%c0_198, %c0_199, %c0_200] : memref<1x256x1xf32, #tpu.memory_space<vmem>>, vector<1x256x1xf32>
    %260 = vector.shape_cast %259 : vector<1x256x1xf32> to vector<256x1xf32>
    %261 = vector.shape_cast %258 : vector<256x1xf32> to vector<1x256x1xf32>
    tpu.vector_store %arg8[%c0_198, %c0_199, %c0_200], %261 {strides = array<i32>} : memref<1x256x1xf32, #tpu.memory_space<vmem>>, vector<1x256x1xf32>,
    return
  }
  func.func @transform_0(%arg0: i32) -> (i32, i32, i32) {
    %c0_i32 = arith.constant 0 : i32
    %c0_i32_0 = arith.constant 0 : i32
    %c0_i32_1 = arith.constant 0 : i32
    return %arg0, %c0_i32, %c0_i32_0 : i32, i32, i32
  }
  func.func @transform_1(%arg0: i32) -> (i32, i32, i32) {
    %c0_i32 = arith.constant 0 : i32
    %c0_i32_0 = arith.constant 0 : i32
    %c0_i32_1 = arith.constant 0 : i32
    %c0_i32_2 = arith.constant 0 : i32
    return %c0_i32, %c0_i32_0, %c0_i32_1 : i32, i32, i32
  }
  func.func @transform_2(%arg0: i32) -> (i32, i32) {
    %c0_i32 = arith.constant 0 : i32
    %c0_i32_0 = arith.constant 0 : i32
    %c0_i32_1 = arith.constant 0 : i32
    return %c0_i32, %c0_i32_0 : i32, i32
  }
  func.func @transform_3(%arg0: i32) -> (i32, i32, i32) {
    %c0_i32 = arith.constant 0 : i32
    %c0_i32_0 = arith.constant 0 : i32
    %c0_i32_1 = arith.constant 0 : i32
    %c0_i32_2 = arith.constant 0 : i32
    return %c0_i32, %c0_i32_0, %c0_i32_1 : i32, i32, i32
  }
  func.func @transform_4(%arg0: i32) -> (i32, i32) {
    %c0_i32 = arith.constant 0 : i32
    %c0_i32_0 = arith.constant 0 : i32
    %c0_i32_1 = arith.constant 0 : i32
    return %c0_i32, %c0_i32_0 : i32, i32
  }
  func.func @transform_5(%arg0: i32) -> (i32, i32, i32) {
    %c0_i32 = arith.constant 0 : i32
    %c0_i32_0 = arith.constant 0 : i32
    %c0_i32_1 = arith.constant 0 : i32
    %c0_i32_2 = arith.constant 0 : i32
    return %c0_i32, %c0_i32_0, %c0_i32_1 : i32, i32, i32
  }
  func.func @transform_6(%arg0: i32) -> (i32, i32) {
    %c0_i32 = arith.constant 0 : i32
    %c0_i32_0 = arith.constant 0 : i32
    %c0_i32_1 = arith.constant 0 : i32
    return %c0_i32, %c0_i32_0 : i32, i32
  }
  func.func @transform_7(%arg0: i32) -> (i32, i32, i32) {
    %c0_i32 = arith.constant 0 : i32
    %c0_i32_0 = arith.constant 0 : i32
    %c0_i32_1 = arith.constant 0 : i32
    return %arg0, %c0_i32, %c0_i32_0 : i32, i32, i32
  }
}

</mosaic_0001>

<bundles_post_ra>
// kernel: tpu_custom_call.1
= control target key start
LH: loop header
LB: loop body
LE: loop exit
PB: predicated region body
PF: predicated region fallthrough
CT: control target
= control target key end

     0   :  { %s10205_s26 = smov 0   ;;  %s15059_s0 = inlined_call_operand.vmem [shape: f32[2,290,4], index: 0, kind: input, shape index: {}]   ;;  %s15060_s1 = inlined_call_operand.vmem [shape: f32[9,4,32], index: 1, kind: input, shape index: {}]   ;;  %s15061_s2 = inlined_call_operand.vmem [shape: f32[1,32], index: 2, kind: input, shape index: {}]   ;;  %s15062_s3 = inlined_call_operand.vmem [shape: f32[9,32,32], index: 3, kind: input, shape index: {}]   ;;  %s15063_s4 = inlined_call_operand.vmem [shape: f32[1,32], index: 4, kind: input, shape index: {}]   ;;  %s15064_s5 = inlined_call_operand.vmem [shape: f32[9,32,1], index: 5, kind: input, shape index: {}]   ;;  %s15065_s6 = inlined_call_operand.<no memory space> [shape: f32[1,1], index: 6, kind: input, shape index: {}]   ;;  %s15066_s7 = inlined_call_operand.vmem [shape: f32[2,256,1], index: 7, kind: output, shape index: {}]  }
   0x1   :  { %v12_v0 = vstv %s15065_s6 }
   0x2   :  { %13 = vst [vmem:[#allocation4] sm:$0x1] %v12_v0 }
   0x3 LB: > { %s9179_s27 = sadd.s32 4294967295, %s10159_s26   ;;  %p9183_p0 = scmp.ge.s32.totalorder %s10159_s26, 1  ;;  %s10159_s26 = sphi %s10205_s26, %s19_s26  }
   0x4   : > { %p239_p1 = scmp.lt.s32.totalorder %s10159_s26, 3 }
   0x6   : > { %p240_p2 = pnand %p9183_p0, %p239_p1 }
   0x8   : > { %243 = sbr.rel (%p240_p2) target bundleno = 2157 (0x86d), region = 48 }
   0xd   : > { %v9187_v1 = vld [vmem:[%s15060_s1 + $0x4] sm:$0xf]  ;;  %vm15067_vm0 = vcmask 1043456   ;;  %p271_p3 = scmp.lt.s32.totalorder %s9179_s27, 1  ;;  %v281_v2 = vlaneseq  ;;  %v966_v3 = vld [vmem:[%s15060_s1] sm:$0xf] }
   0xe   : > { %9188 = vmatpush.msk.msra.mxu0 %vm15067_vm0, %v9187_v1  ;;  %10135 = vmatpush.msk.msra.mxu3 %vm15067_vm0, %v9187_v1  ;;  %v9254_v4 = vld [vmem:[%s15060_s1 + $0x8] sm:$0xf]  ;;  %v9322_v5 = vld [vmem:[%s15060_s1 + $0x10] sm:$0xf]  ;;  %vm15218_vm1 = vcmask 31744   ;;  %v15366_v9 = vmov 0 }
   0xf   : > { %s16725_s27 = smov (!%p271_p3, %s9179_s27), 1  ;;  %9255 = vmatpush.msk.msra.mxu2 %vm15067_vm0, %v9254_v4  ;;  %v10231_v6 = vshrl.u32 %v281_v2, 7  ;;  %9221 = vmatpush.msk.msra.mxu1 %vm15067_vm0, %v966_v3  ;;  %v15369_v16 = vmov 0  ;;  %v15372_v25 = vmov 0  ;;  %v15375_v32 = vmov 0 }
  0x10   : > { %10136 = vmatpush.msk.msrb.mxu3 %vm15067_vm0, %v966_v3  ;;  %9323 = vmatpush.msk.msrb.mxu0 %vm15067_vm0, %v9322_v5  ;;  %s10138_s12 = smul.u32 296, %s16725_s27  ;;  %v15378_v41 = vmov 0  ;;  %v15381_v48 = vmov 0  ;;  %v15384_v57 = vmov 0  ;;  %v15387_v1 = vmov 0 }
  0x11   : > { %v318_v7 = vand.u32 15, %v10231_v6  ;;  %v283_v8 = vadd.s32 8, %v10231_v6  ;;  %v284_v18 = vadd.s32 16, %v10231_v6  ;;  %v285_v24 = vadd.s32 24, %v10231_v6 }
  0x12   : > { %s10241_s15 = scalar_lea.vmem %s15059_s0, %s10138_s12  ;;  %v286_v34 = vadd.s32 32, %v10231_v6  ;;  %v287_v40 = vadd.s32 40, %v10231_v6  ;;  %v288_v50 = vadd.s32 48, %v10231_v6  ;;  %v289_v56 = vadd.s32 56, %v10231_v6 }
  0x13   : > { %vm10243_vm2 = vcmp.gt.s32.totalorder %v318_v7, 0  ;;  %v967_v10 = vld [vmem:[%s10241_s15 + $0x1] sm:$0xff]  ;;  %v325_v13 = vand.u32 15, %v283_v8  ;;  %v1428_v17 = vld [vmem:[%s10241_s15 + $0xa] sm:$0xff]  ;;  %v332_v23 = vand.u32 15, %v284_v18  ;;  %v10286_v29 = vld [vmem:[%s10241_s15 + $0x12] sm:$0xff] }
  0x14   : > { %v15367_v9 = vsel %vm10243_vm2, 4294967295, %v15366_v9  ;;  %v991_v11 = vld [vmem:[%s10241_s15 + $0xc1] sm:$0xff]  ;;  %9189 = vmatmul.msk.f32.vlgmr.msra.gmra.mxu0 %vm15218_vm1, %v967_v10  ;;  %v968_v19 = vld [vmem:[%s10241_s15 + $0x9] sm:$0xff]  ;;  %v10282_v27 = vld [vmem:[%s10241_s15 + $0x11] sm:$0xff]  ;;  %v339_v31 = vand.u32 15, %v285_v24  ;;  %v346_v39 = vand.u32 15, %v286_v34 }
  0x15   : > { %15368 = vst [vmem:[#allocation5_spill] sm:$0xff] %v15367_v9  ;;  %v1427_v12 = vld [vmem:[%s10241_s15 + $0x2] sm:$0xff]  ;;  %9213 = vmatmul.msk.f32.vlgmr.msra.gmra.mxu3 %vm15218_vm1, %v991_v11  ;;  %vm10258_vm3 = vcmp.lt.s32.totalorder %v325_v13, 15  ;;  %vm10274_vm4 = vcmp.gt.s32.totalorder %v332_v23, 0  ;;  %v10279_v26 = vld [vmem:[%s10241_s15 + $0x10] sm:$0xff]  ;;  %v10302_v33 = vld [vmem:[%s10241_s15 + $0x1a] sm:$0xff] }
  0x16   : > { %v838_v14 = vld [vmem:[%s10241_s15] sm:$0xff]  ;;  %9256 = vmatmul.msk.f32.vlgmr.msra.gmra.mxu2 %vm15218_vm1, %v1427_v12  ;;  %10137 = vmatpush.msk.msra.mxu3 %vm15067_vm0, %v9254_v4  ;;  %v15370_v16 = vsel %vm10258_vm3, 4294967295, %v15369_v16  ;;  %v992_v20 = vld [vmem:[%s10241_s15 + $0xc9] sm:$0xff]  ;;  %v1524_v21 = vsel %vm10258_vm3, %v1428_v17, 0.0  ;;  %v15373_v25 = vsel %vm10274_vm4, 4294967295, %v15372_v25  ;;  %v993_v28 = vld [vmem:[%s10241_s15 + $0xd1] sm:$0xff] }
  0x17   : > { %v934_v15 = vsel %vm10243_vm2, %v838_v14, 0.0  ;;  %15371 = vst [vmem:[#allocation6_spill] sm:$0xff] %v15370_v16  ;;  %v839_v22 = vld [vmem:[%s10241_s15 + $0x8] sm:$0xff]  ;;  %v936_v30 = vsel %vm10274_vm4, %v10279_v26, 0.0  ;;  %vm10297_vm5 = vcmp.lt.s32.totalorder %v339_v31, 15  ;;  %v10306_v35 = vld [vmem:[%s10241_s15 + $0x19] sm:$0xff] }
  0x18   : > { %9222 = vmatmul.msk.f32.vlgmr.msra.gmra.mxu1 %vm15218_vm1, %v934_v15  ;;  %15374 = vst [vmem:[#allocation7_spill] sm:$0xff] %v15373_v25  ;;  %v15376_v32 = vsel %vm10297_vm5, 4294967295, %v15375_v32  ;;  %v994_v36 = vld [vmem:[%s10241_s15 + $0xd9] sm:$0xff]  ;;  %v1526_v37 = vsel %vm10297_vm5, %v10302_v33, 0.0  ;;  %vm10322_vm6 = vcmp.gt.s32.totalorder %v346_v39, 0  ;;  %v10330_v43 = vld [vmem:[%s10241_s15 + $0x21] sm:$0xff] }
  0x19   : > { %15377 = vst [vmem:[#allocation8_spill] sm:$0xff] %v15376_v32  ;;  %v10313_v38 = vld [vmem:[%s10241_s15 + $0x18] sm:$0xff]  ;;  %v15379_v41 = vsel %vm10322_vm6, 4294967295, %v15378_v41  ;;  %v10327_v42 = vld [vmem:[%s10241_s15 + $0x20] sm:$0xff]  ;;  %v353_v47 = vand.u32 15, %v287_v40  ;;  %v10350_v49 = vld [vmem:[%s10241_s15 + $0x2a] sm:$0xff] }
  0x1a   : > { %15380 = vst [vmem:[#allocation9_spill] sm:$0xff] %v15379_v41  ;;  %v995_v44 = vld [vmem:[%s10241_s15 + $0xe1] sm:$0xff]  ;;  %v938_v46 = vsel %vm10322_vm6, %v10327_v42, 0.0  ;;  %v10354_v51 = vld [vmem:[%s10241_s15 + $0x29] sm:$0xff]  ;;  %v360_v55 = vand.u32 15, %v288_v50  ;;  %v10378_v59 = vld [vmem:[%s10241_s15 + $0x31] sm:$0xff] }
  0x1b   : > { %v10334_v45 = vld [vmem:[%s10241_s15 + $0x22] sm:$0xff]  ;;  %vm10345_vm7 = vcmp.lt.s32.totalorder %v353_v47, 15  ;;  %v10375_v58 = vld [vmem:[%s10241_s15 + $0x30] sm:$0xff]  ;;  %v367_v63 = vand.u32 15, %v289_v56  ;;  %v306_v0 = vadd.s32 192, %v10231_v6  ;;  %v10399_v2 = vld [vmem:[%s10241_s15 + $0x3a] sm:$0xff] }
  0x1c   : > { %9190 = vmatmul.msk.f32.gmra.mxu0 %vm15218_vm1, %v968_v19  ;;  %v15382_v48 = vsel %vm10345_vm7, 4294967295, %v15381_v48  ;;  %v996_v52 = vld [vmem:[%s10241_s15 + $0xe9] sm:$0xff]  ;;  %v1528_v53 = vsel %vm10345_vm7, %v10350_v49, 0.0  ;;  %vm10370_vm8 = vcmp.gt.s32.totalorder %v360_v55, 0  ;;  %v997_v60 = vld [vmem:[%s10241_s15 + $0xf1] sm:$0xff]  ;;  %v290_v3 = vadd.s32 64, %v10231_v6 }
  0x1d   : > { %9214 = vmatmul.msk.f32.gmra.mxu3 %vm15218_vm1, %v992_v20  ;;  %15383 = vst [vmem:[#allocation10_spill] sm:$0xff] %v15382_v48  ;;  %v10361_v54 = vld [vmem:[%s10241_s15 + $0x28] sm:$0xff]  ;;  %v15385_v57 = vsel %vm10370_vm8, 4294967295, %v15384_v57  ;;  %v10382_v61 = vld [vmem:[%s10241_s15 + $0x32] sm:$0xff]  ;;  %v940_v62 = vsel %vm10370_vm8, %v10375_v58, 0.0  ;;  %vm10394_vm9 = vcmp.lt.s32.totalorder %v367_v63, 15 }
  0x1e   : > { %9257 = vmatmul.msk.f32.gmra.mxu2 %vm15218_vm1, %v1524_v21  ;;  %15386 = vst [vmem:[#allocation11_spill] sm:$0xff] %v15385_v57  ;;  %v15388_v1 = vsel %vm10394_vm9, 4294967295, %v15387_v1  ;;  %v10403_v4 = vld [vmem:[%s10241_s15 + $0x39] sm:$0xff]  ;;  %v1530_v7 = vsel %vm10394_vm9, %v10399_v2, 0.0  ;;  %v486_v8 = vand.u32 15, %v306_v0  ;;  %v374_v11 = vand.u32 15, %v290_v3 }
  0x1f   : > { %15389 = vst [vmem:[#allocation12_spill] sm:$0xff] %v15388_v1  ;;  %v998_v5 = vld [vmem:[%s10241_s15 + $0xf9] sm:$0xff]  ;;  %v15390_v12 = vmov 0  ;;  %v291_v14 = vadd.s32 72, %v10231_v6  ;;  %v15393_v15 = vmov 0  ;;  %v10432_v18 = vld [vmem:[%s10241_s15 + $0x41] sm:$0xff] }
  0x20   : > { %9223 = vmatmul.msk.f32.gmra.mxu1 %vm15218_vm1, %v839_v22  ;;  %v10410_v10 = vld [vmem:[%s10241_s15 + $0x38] sm:$0xff]  ;;  %vm10418_vm10 = vcmp.gt.s32.totalorder %v486_v8, 0  ;;  %v862_v13 = vld [vmem:[%s10241_s15 + $0xc0] sm:$0xff]  ;;  %vm10424_vm11 = vcmp.gt.s32.totalorder %v374_v11, 0  ;;  %v308_v23 = vadd.s32 208, %v10231_v6  ;;  %v15396_v24 = vmov 0 }
  0x21   : > { %v15391_v12 = vsel %vm10418_vm10, 4294967295, %v15390_v12  ;;  %v15394_v15 = vsel %vm10424_vm11, 4294967295, %v15393_v15  ;;  %v10429_v17 = vld [vmem:[%s10241_s15 + $0x40] sm:$0xff]  ;;  %v958_v19 = vsel %vm10418_vm10, %v862_v13, 0.0  ;;  %v381_v22 = vand.u32 15, %v291_v14  ;;  %v10458_v31 = vld [vmem:[%s10241_s15 + $0x49] sm:$0xff] }
  0x22   : > { %15392 = vst [vmem:[#allocation13_spill] sm:$0xff] %v15391_v12  ;;  %v10437_v20 = vld [vmem:[%s10241_s15 + $0x42] sm:$0xff]  ;;  %v942_v21 = vsel %vm10424_vm11, %v10429_v17, 0.0  ;;  %v293_v47 = vadd.s32 88, %v10231_v6  ;;  %v15402_v50 = vmov 0  ;;  %v10492_v56 = vld [vmem:[%s10241_s15 + $0x52] sm:$0xff] }
  0x23   : > { %15395 = vst [vmem:[#allocation14_spill] sm:$0xff] %v15394_v15  ;;  %vm10449_vm12 = vcmp.lt.s32.totalorder %v381_v22, 15  ;;  %v863_v34 = vld [vmem:[%s10241_s15 + $0xc8] sm:$0xff]  ;;  %v310_v63 = vadd.s32 224, %v10231_v6  ;;  %v15405_v0 = vmov 0  ;;  %v10509_v3 = vld [vmem:[%s10241_s15 + $0x5a] sm:$0xff] }
  0x24   : > { %9191 = vmatmul.msk.f32.gmra.mxu0 %vm15218_vm1, %v10282_v27  ;;  %v15397_v24 = vsel %vm10449_vm12, 4294967295, %v15396_v24  ;;  %v10465_v39 = vld [vmem:[%s10241_s15 + $0x48] sm:$0xff]  ;;  %v865_v8 = vld [vmem:[%s10241_s15 + $0xd8] sm:$0xff]  ;;  %v866_v22 = vld [vmem:[%s10241_s15 + $0xe0] sm:$0xff]  ;;  %v307_v12 = vadd.s32 200, %v10231_v6 }
  0x25   : > { %9215 = vmatmul.msk.f32.gmra.mxu3 %vm15218_vm1, %v993_v28  ;;  %15398 = vst [vmem:[#allocation15_spill] sm:$0xff] %v15397_v24  ;;  %v10454_v28 = vld [vmem:[%s10241_s15 + $0x4a] sm:$0xff]  ;;  %v514_v13 = vand.u32 15, %v310_v63  ;;  %v10520_v14 = vld [vmem:[%s10241_s15 + $0x58] sm:$0xff] }
  0x26   : > { %9258 = vmatmul.msk.f32.gmra.mxu2 %vm15218_vm1, %v10286_v29  ;;  %v10568_v63 = vld [vmem:[%s10241_s15 + $0x6a] sm:$0xff]  ;;  %v3293_v48 = vld [vmem:[%s10241_s15 + $0x52] sm:$0xff] }
  0x27   : > { %vm10528_vm0 = vcmp.gt.s32.totalorder %v514_v13, 0  ;;  %15420 = vst [vmem:[#allocation24_spill] sm:$0xff] %v10568_v63  ;;  %v867_v13 = vld [vmem:[%s10241_s15 + $0xe8] sm:$0xff]  ;;  %v3015_v32 = vld [vmem:[%s10241_s15 + $0x51] sm:$0xff] }
  0x28   : > { %9224 = vmatmul.msk.f32.gmra.mxu1 %vm15218_vm1, %v936_v30  ;;  %v292_v30 = vadd.s32 80, %v10231_v6  ;;  %v3297_v1 = vld [vmem:[%s10241_s15 + $0x72] sm:$0xff] }
  0x2a   : > { %v388_v40 = vand.u32 15, %v292_v30  ;;  %v15411_v30 = vmov 0 }
  0x2c   : > { %9192 = vmatmul.msk.f32.gmra.mxu0 %vm15218_vm1, %v10306_v35  ;;  %vm10479_vm14 = vcmp.gt.s32.totalorder %v388_v40, 0  ;;  %v10547_v40 = vld [vmem:[%s10241_s15 + $0x62] sm:$0xff] }
  0x2d   : > { %9216 = vmatmul.msk.f32.gmra.mxu3 %vm15218_vm1, %v994_v36  ;;  %v1532_v36 = vsel %vm10449_vm12, %v10454_v28, 0.0  ;;  %v15403_v50 = vsel %vm10479_vm14, 4294967295, %v15402_v50  ;;  %15415 = vst [vmem:[#allocation22_spill] sm:$0xff] %v10547_v40 }
  0x2e   : > { %9259 = vmatmul.msk.f32.gmra.mxu2 %vm15218_vm1, %v1526_v37  ;;  %v500_v37 = vand.u32 15, %v308_v23  ;;  %15404 = vst [vmem:[#allocation17_spill] sm:$0xff] %v15403_v50  ;;  %v295_v23 = vadd.s32 104, %v10231_v6  ;;  %v2134_v50 = vld [vmem:[%s10241_s15 + $0xc9] sm:$0xff] }
  0x30   : > { %9225 = vmatmul.msk.f32.gmra.mxu1 %vm15218_vm1, %v10313_v38  ;;  %vm10473_vm13 = vcmp.gt.s32.totalorder %v500_v37, 0  ;;  %v962_v37 = vsel %vm10528_vm0, %v866_v22, 0.0 }
  0x34   : > { %9193 = vmatmul.msk.f32.gmra.mxu0 %vm15218_vm1, %v10330_v43 }
  0x35   : > { %9217 = vmatmul.msk.f32.gmra.mxu3 %vm15218_vm1, %v995_v44  ;;  %v15399_v44 = vmov 0 }
  0x36   : > { %9260 = vmatmul.msk.f32.gmra.mxu2 %vm15218_vm1, %v10334_v45  ;;  %v15400_v44 = vsel %vm10473_vm13, 4294967295, %v15399_v44 }
  0x37   : > { %15401 = vst [vmem:[#allocation16_spill] sm:$0xff] %v15400_v44 }
  0x38   : > { %9226 = vmatmul.msk.f32.gmra.mxu1 %vm15218_vm1, %v938_v46  ;;  %v864_v46 = vld [vmem:[%s10241_s15 + $0xd0] sm:$0xff] }
  0x39   : > { %v960_v55 = vsel %vm10473_vm13, %v864_v46, 0.0 }
  0x3c   : > { %9194 = vmatmul.msk.f32.gmra.mxu0 %vm15218_vm1, %v10354_v51 }
  0x3d   : > { %9218 = vmatmul.msk.f32.gmra.mxu3 %vm15218_vm1, %v996_v52  ;;  %v10484_v52 = vld [vmem:[%s10241_s15 + $0x50] sm:$0xff] }
  0x3e   : > { %9261 = vmatmul.msk.f32.gmra.mxu2 %vm15218_vm1, %v1528_v53  ;;  %v10487_v53 = vld [vmem:[%s10241_s15 + $0x51] sm:$0xff] }
  0x40   : > { %9227 = vmatmul.msk.f32.gmra.mxu1 %vm15218_vm1, %v10361_v54 }
  0x44   : > { %9195 = vmatmul.msk.f32.gmra.mxu0 %vm15218_vm1, %v10378_v59 }
  0x45   : > { %9219 = vmatmul.msk.f32.gmra.mxu3 %vm15218_vm1, %v997_v60  ;;  %v944_v60 = vsel %vm10479_vm14, %v10484_v52, 0.0 }
  0x46   : > { %9262 = vmatmul.msk.f32.gmra.mxu2 %vm15218_vm1, %v10382_v61 }
  0x48   : > { %9228 = vmatmul.msk.f32.gmra.mxu1 %vm15218_vm1, %v940_v62  ;;  %v395_v62 = vand.u32 15, %v293_v47  ;;  %v409_v47 = vand.u32 15, %v295_v23  ;;  %v10583_v23 = vld [vmem:[%s10241_s15 + $0x68] sm:$0xff] }
  0x4a   : > { %vm10504_vm15 = vcmp.lt.s32.totalorder %v395_v62, 15  ;;  %vm10563_vm10 = vcmp.lt.s32.totalorder %v409_v47, 15  ;;  %v15417_v62 = vmov 0  ;;  %v868_v47 = vld [vmem:[%s10241_s15 + $0xf0] sm:$0xff] }
  0x4b   : > { %v15406_v0 = vsel %vm10504_vm15, 4294967295, %v15405_v0  ;;  %v1534_v11 = vsel %vm10504_vm15, %v10509_v3, 0.0  ;;  %v15418_v62 = vsel %vm10563_vm10, 4294967295, %v15417_v62 }
  0x4c   : > { %9196 = vmatmul.msk.f32.gmra.mxu0 %vm15218_vm1, %v10403_v4  ;;  %15407 = vst [vmem:[#allocation18_spill] sm:$0xff] %v15406_v0 }
  0x4d   : > { %9220 = vmatmul.msk.f32.gmra.mxu3 %vm15218_vm1, %v998_v5  ;;  %v294_v5 = vadd.s32 96, %v10231_v6  ;;  %15419 = vst [vmem:[#allocation23_spill] sm:$0xff] %v15418_v62  ;;  %v10652_v62 = vld [vmem:[%s10241_s15 + $0x80] sm:$0xff] }
  0x4e   : > { %9263 = vmatmul.msk.f32.gmra.mxu2 %vm15218_vm1, %v1530_v7  ;;  %v10513_v7 = vld [vmem:[%s10241_s15 + $0x59] sm:$0xff]  ;;  %15441 = vst [vmem:[#allocation36_spill] sm:$0xff] %v10652_v62 }
  0x50   : > { %9229 = vmatmul.msk.f32.gmra.mxu1 %vm15218_vm1, %v10410_v10 }
  0x54   : > { %9197 = vmatmul.msk.f32.gmra.mxu0 %vm15218_vm1, %v10432_v18 }
  0x55   : > { %9246 = vmatmul.msk.f32.vlgmr.msrb.gmra.mxu3 %vm15218_vm1, %v958_v19  ;;  %v402_v19 = vand.u32 15, %v294_v5  ;;  %v9356_v5 = vld [vmem:[%s15060_s1 + $0x14] sm:$0xf] }
  0x56   : > { %9264 = vmatmul.msk.f32.gmra.mxu2 %vm15218_vm1, %v10437_v20 }
  0x57   : > { %vm10534_vm13 = vcmp.gt.s32.totalorder %v402_v19, 0  ;;  %v1536_v19 = vsel %vm10563_vm10, %v10568_v63, 0.0 }
  0x58   : > { %9230 = vmatmul.msk.f32.gmra.mxu1 %vm15218_vm1, %v942_v21  ;;  %v15408_v21 = vmov 0  ;;  %v15412_v30 = vsel %vm10534_vm13, 4294967295, %v15411_v30 }
  0x59   : > { %v15409_v21 = vsel %vm10528_vm0, 4294967295, %v15408_v21  ;;  %15413 = vst [vmem:[#allocation20_spill] sm:$0xff] %v15412_v30  ;;  %vm15416_vm0 = vcmask 1043456  }
  0x5a   : > { %15410 = vst [vmem:[#allocation19_spill] sm:$0xff] %v15409_v21 }
  0x5c   : > { %9198 = vmatmul.msk.f32.gmra.mxu0 %vm15218_vm1, %v10458_v31 }
  0x5d   : > { %9247 = vmatmul.msk.f32.gmra.mxu3 %vm15218_vm1, %v863_v34  ;;  %v10539_v34 = vld [vmem:[%s10241_s15 + $0x60] sm:$0xff] }
  0x5e   : > { %9265 = vmatmul.msk.f32.gmra.mxu2 %vm15218_vm1, %v1532_v36  ;;  %v10542_v36 = vld [vmem:[%s10241_s15 + $0x61] sm:$0xff]  ;;  %v946_v46 = vsel %vm10534_vm13, %v10539_v34, 0.0  ;;  %vm15421_vm13 = vmmov %vm15416_vm0 }
  0x5f   : > { %15414 = vst [vmem:[#allocation21_spill] sm:$0xff] %v10542_v36  ;;  %9357 = vmatpush.msk.msrb.mxu1 %vm15421_vm13, %v9356_v5  ;;  %v10602_v5 = vld [vmem:[%s10241_s15 + $0x70] sm:$0xff] }
  0x60   : > { %9231 = vmatmul.msk.f32.gmra.mxu1 %vm15218_vm1, %v10465_v39  ;;  %15429 = vst [vmem:[#allocation28_spill] sm:$0xff] %v10602_v5 }
  0x64   : > { %9199 = vmatmul.msk.f32.gmra.mxu0 %vm15218_vm1, %v10487_v53 }
  0x65   : > { %9248 = vmatmul.msk.f32.gmra.mxu3 %vm15218_vm1, %v960_v55  ;;  %v9288_v55 = vld [vmem:[%s15060_s1 + $0xc] sm:$0xf] }
  0x66   : > { %9266 = vmatmul.msk.f32.gmra.mxu2 %vm15218_vm1, %v10492_v56  ;;  %9289 = vmatpush.msk.msrb.mxu3 %vm15416_vm0, %v9288_v55  ;;  %v297_v55 = vadd.s32 120, %v10231_v6 }
  0x68   : > { %9232 = vmatmul.msk.f32.gmra.mxu1 %vm15218_vm1, %v944_v60  ;;  %v312_v60 = vadd.s32 240, %v10231_v6  ;;  %v423_v21 = vand.u32 15, %v297_v55  ;;  %v298_v55 = vadd.s32 128, %v10231_v6 }
  0x6a   : > { %v528_v22 = vand.u32 15, %v312_v60  ;;  %v15426_v60 = vmov 0  ;;  %vm10621_vm10 = vcmp.lt.s32.totalorder %v423_v21, 15  ;;  %v430_v21 = vand.u32 15, %v298_v55  ;;  %v1451_v55 = vld [vmem:[%s10241_s15 + $0xc2] sm:$0xff] }
  0x6c   : > { %9200 = vmatmul.msk.f32.gmra.mxu0 %vm15218_vm1, %v10513_v7  ;;  %vm10591_vm0 = vcmp.gt.s32.totalorder %v528_v22, 0 }
  0x6d   : > { %9249 = vmatmul.msk.f32.gmra.mxu3 %vm15218_vm1, %v865_v8  ;;  %v296_v8 = vadd.s32 112, %v10231_v6 }
  0x6e   : > { %9267 = vmatmul.msk.f32.gmra.mxu2 %vm15218_vm1, %v1534_v11  ;;  %v10576_v11 = vld [vmem:[%s10241_s15 + $0x69] sm:$0xff] }
  0x6f   : > { %15422 = vst [vmem:[#allocation25_spill] sm:$0xff] %v10576_v11 }
  0x70   : > { %9233 = vmatmul.msk.f32.gmra.mxu1 %vm15218_vm1, %v10520_v14 }
  0x74   : > { %9201 = vmatmul.msk.f32.gmra.mxu0 %vm15218_vm1, %v10542_v36 }
  0x75   : > { %9250 = vmatmul.msk.f32.gmra.mxu3 %vm15218_vm1, %v962_v37  ;;  %v416_v37 = vand.u32 15, %v296_v8  ;;  %v10605_v8 = vld [vmem:[%s10241_s15 + $0x71] sm:$0xff] }
  0x76   : > { %9268 = vmatmul.msk.f32.gmra.mxu2 %vm15218_vm1, %v10547_v40  ;;  %15430 = vst [vmem:[#allocation29_spill] sm:$0xff] %v10605_v8 }
  0x77   : > { %vm10597_vm13 = vcmp.gt.s32.totalorder %v416_v37, 0  ;;  %v15432_v37 = vmov 0 }
  0x78   : > { %9234 = vmatmul.msk.f32.gmra.mxu1 %vm15218_vm1, %v946_v46  ;;  %v15423_v46 = vmov 0  ;;  %v15427_v60 = vsel %vm10597_vm13, 4294967295, %v15426_v60  ;;  %v948_v22 = vsel %vm10597_vm13, %v10602_v5, 0.0  ;;  %v15433_v37 = vsel %vm10621_vm10, 4294967295, %v15432_v37  ;;  %v10830_v5 = vld [vmem:[%s10241_s15 + $0xa8] sm:$0xff] }
  0x79   : > { %v15424_v46 = vsel %vm10591_vm0, 4294967295, %v15423_v46  ;;  %15428 = vst [vmem:[#allocation27_spill] sm:$0xff] %v15427_v60  ;;  %v299_v60 = vadd.s32 136, %v10231_v6 }
  0x7a   : > { %15425 = vst [vmem:[#allocation26_spill] sm:$0xff] %v15424_v46  ;;  %v10630_v46 = vld [vmem:[%s10241_s15 + $0x79] sm:$0xff] }
  0x7b   : > { %15434 = vst [vmem:[#allocation31_spill] sm:$0xff] %v15433_v37  ;;  %v15438_v37 = vmov 0 }
  0x7c   : > { %9202 = vmatmul.msk.f32.gmra.mxu0 %vm15218_vm1, %v10576_v11  ;;  %15436 = vst [vmem:[#allocation33_spill] sm:$0xff] %v10630_v46  ;;  %v10696_v11 = vld [vmem:[%s10241_s15 + $0x88] sm:$0xff] }
  0x7d   : > { %9251 = vmatmul.msk.f32.gmra.mxu3 %vm15218_vm1, %v867_v13  ;;  %v964_v13 = vsel %vm10591_vm0, %v868_v47, 0.0  ;;  %v10626_v47 = vld [vmem:[%s10241_s15 + $0x7a] sm:$0xff]  ;;  %vm10647_vm0 = vcmp.gt.s32.totalorder %v430_v21, 0  ;;  %v437_v21 = vand.u32 15, %v299_v60  ;;  %v15447_v60 = vmov 0  ;;  %15453 = vst [vmem:[#allocation44_spill] sm:$0xff] %v10696_v11 }
  0x7e   : > { %9269 = vmatmul.msk.f32.gmra.mxu2 %vm15218_vm1, %v1536_v19  ;;  %v10610_v19 = vld [vmem:[%s10241_s15 + $0x72] sm:$0xff]  ;;  %15435 = vst [vmem:[#allocation32_spill] sm:$0xff] %v10626_v47  ;;  %v1538_v44 = vsel %vm10621_vm10, %v10626_v47, 0.0  ;;  %v15439_v37 = vsel %vm10647_vm0, 4294967295, %v15438_v37  ;;  %v10655_v47 = vld [vmem:[%s10241_s15 + $0x81] sm:$0xff] }
  0x7f   : > { %15431 = vst [vmem:[#allocation30_spill] sm:$0xff] %v10610_v19 }
  0x80   : > { %9235 = vmatmul.msk.f32.gmra.mxu1 %vm15218_vm1, %v10583_v23  ;;  %15440 = vst [vmem:[#allocation35_spill] sm:$0xff] %v15439_v37  ;;  %v1452_v37 = vld [vmem:[%s10241_s15 + $0xca] sm:$0xff] }
  0x81   : > { %15442 = vst [vmem:[#allocation37_spill] sm:$0xff] %v10655_v47 }
  0x82   : > { %15488 = vst [vmem:[#allocation66_spill] sm:$0xff] %v10830_v5 }
  0x84   : > { %9203 = vmatmul.msk.f32.gmra.mxu0 %vm15218_vm1, %v10605_v8  ;;  %v950_v8 = vsel %vm10647_vm0, %v10652_v62, 0.0  ;;  %vm10677_vm0 = vcmp.lt.s32.totalorder %v437_v21, 15 }
  0x85   : > { %9252 = vmatmul.msk.f32.gmra.mxu3 %vm15218_vm1, %v964_v13  ;;  %v869_v13 = vld [vmem:[%s10241_s15 + $0xf8] sm:$0xff]  ;;  %v15448_v60 = vsel %vm10677_vm0, 4294967295, %v15447_v60 }
  0x86   : > { %9270 = vmatmul.msk.f32.gmra.mxu2 %vm15218_vm1, %v10610_v19  ;;  %15449 = vst [vmem:[#allocation40_spill] sm:$0xff] %v15448_v60  ;;  %v301_v60 = vadd.s32 152, %v10231_v6 }
  0x88   : > { %9236 = vmatmul.msk.f32.gmra.mxu1 %vm15218_vm1, %v948_v22  ;;  %v10637_v22 = vld [vmem:[%s10241_s15 + $0x78] sm:$0xff]  ;;  %v451_v63 = vand.u32 15, %v301_v60  ;;  %v15464_v60 = vmov 0 }
  0x89   : > { %15437 = vst [vmem:[#allocation34_spill] sm:$0xff] %v10637_v22 }
  0x8c   : > { %9204 = vmatmul.msk.f32.gmra.mxu0 %vm15218_vm1, %v10630_v46 }
  0x8d   : > { %9253 = vmatmul.msk.f32.gmra.mxu3 %vm15218_vm1, %v869_v13  ;;  %v493_v13 = vand.u32 15, %v307_v12  ;;  %v15444_v12 = vmov 0 }
  0x8e   : > { %9271 = vmatmul.msk.f32.gmra.mxu2 %vm15218_vm1, %v1538_v44  ;;  %v10659_v44 = vld [vmem:[%s10241_s15 + $0x82] sm:$0xff] }
  0x8f   : > { %15443 = vst [vmem:[#allocation38_spill] sm:$0xff] %v10659_v44  ;;  %vm10670_vm10 = vcmp.lt.s32.totalorder %v493_v13, 15 }
  0x90   : > { %9237 = vmatmul.msk.f32.gmra.mxu1 %vm15218_vm1, %v10637_v22  ;;  %v15445_v12 = vsel %vm10670_vm10, 4294967295, %v15444_v12 }
  0x91   : > { %v1119_v46 = vpop.f32.mrf.mxu0  ;;  %15446 = vst [vmem:[#allocation39_spill] sm:$0xff] %v15445_v12 }
  0x94   : > { %9205 = vmatmul.msk.f32.gmra.mxu0 %vm15218_vm1, %v10655_v47  ;;  %v10682_v47 = vld [vmem:[%s10241_s15 + $0x8a] sm:$0xff] }
  0x95   : > { %v1331_v19 = vpop.f32.mrf.mxu1  ;;  %9280 = vmatmul.msk.f32.vlgmr.msra.gmra.mxu3 %vm15218_vm1, %v1451_v55  ;;  %15450 = vst [vmem:[#allocation41_spill] sm:$0xff] %v10682_v47  ;;  %v1540_v13 = vsel %vm10677_vm0, %v10682_v47, 0.0  ;;  %v15454_v47 = vmov 0 }
  0x96   : > { %9272 = vmatmul.msk.f32.gmra.mxu2 %vm15218_vm1, %v10659_v44  ;;  %v1332_v30 = vadd.f32 %v1331_v19, %v1119_v46  ;;  %v300_v44 = vadd.s32 144, %v10231_v6  ;;  %v1548_v19 = vsel %vm10670_vm10, %v1452_v37, 0.0  ;;  %v309_v37 = vadd.s32 216, %v10231_v6 }
  0x98   : > { %9238 = vmatmul.msk.f32.gmra.mxu1 %vm15218_vm1, %v950_v8  ;;  %v10675_v62 = vpop.f32.mrf.mxu3  ;;  %v10688_v8 = vld [vmem:[%s10241_s15 + $0x89] sm:$0xff] }
  0x99   : > { %v1673_v55 = vpop.f32.mrf.mxu2  ;;  %v1122_v22 = vpop.f32.mrf.mxu0  ;;  %15452 = vst [vmem:[#allocation43_spill] sm:$0xff] %v10688_v8 }
  0x9a   : > { %v10685_v46 = vadd.f32 %v1673_v55, %v1332_v30  ;;  %v444_v30 = vand.u32 15, %v300_v44 }
  0x9c   : > { %15451 = vst [vmem:[#allocation42_spill] sm:$0xff] %v10685_v46  ;;  %9206 = vmatmul.msk.f32.gmra.mxu0 %vm15218_vm1, %v10688_v8  ;;  %vm10708_vm10 = vcmp.gt.s32.totalorder %v444_v30, 0  ;;  %v10713_v8 = vld [vmem:[%s10241_s15 + $0x90] sm:$0xff] }
  0x9d   : > { %v1334_v21 = vpop.f32.mrf.mxu1  ;;  %9281 = vmatmul.msk.f32.gmra.mxu3 %vm15218_vm1, %v1548_v19  ;;  %v15455_v47 = vsel %vm10708_vm10, 4294967295, %v15454_v47  ;;  %15457 = vst [vmem:[#allocation46_spill] sm:$0xff] %v10713_v8  ;;  %v952_v30 = vsel %vm10708_vm10, %v10713_v8, 0.0  ;;  %vm10740_vm10 = vcmp.lt.s32.totalorder %v451_v63, 15  ;;  %v10759_v8 = vld [vmem:[%s10241_s15 + $0x98] sm:$0xff] }
  0x9e   : > { %9273 = vmatmul.msk.f32.gmra.mxu2 %vm15218_vm1, %v1540_v13  ;;  %v1335_v55 = vadd.f32 %v1334_v21, %v1122_v22  ;;  %15456 = vst [vmem:[#allocation45_spill] sm:$0xff] %v15455_v47  ;;  %v10718_v22 = vld [vmem:[%s10241_s15 + $0x91] sm:$0xff]  ;;  %v15465_v60 = vsel %vm10740_vm10, 4294967295, %v15464_v60 }
  0x9f   : > { %15459 = vst [vmem:[#allocation48_spill] sm:$0xff] %v10718_v22  ;;  %v1453_v13 = vld [vmem:[%s10241_s15 + $0xd2] sm:$0xff] }
  0xa0   : > { %9239 = vmatmul.msk.f32.gmra.mxu1 %vm15218_vm1, %v10696_v11  ;;  %v10705_v12 = vpop.f32.mrf.mxu3  ;;  %v10722_v21 = vld [vmem:[%s10241_s15 + $0x92] sm:$0xff]  ;;  %v507_v11 = vand.u32 15, %v309_v37  ;;  %v1454_v37 = vld [vmem:[%s10241_s15 + $0xda] sm:$0xff]  ;;  %15466 = vst [vmem:[#allocation51_spill] sm:$0xff] %v15465_v60  ;;  %v303_v60 = vadd.s32 168, %v10231_v6 }
  0xa1   : > { %v1676_v46 = vpop.f32.mrf.mxu2  ;;  %v1125_v44 = vpop.f32.mrf.mxu0  ;;  %15460 = vst [vmem:[#allocation49_spill] sm:$0xff] %v10722_v21 }
  0xa2   : > { %v10715_v19 = vadd.f32 %v1676_v46, %v1335_v55  ;;  %vm10733_vm0 = vcmp.lt.s32.totalorder %v507_v11, 15  ;;  %v15461_v55 = vmov 0  ;;  %15470 = vst [vmem:[#allocation55_spill] sm:$0xff] %v10759_v8  ;;  %v465_v36 = vand.u32 15, %v303_v60 }
  0xa3   : > { %v15462_v55 = vsel %vm10733_vm0, 4294967295, %v15461_v55  ;;  %v1550_v11 = vsel %vm10733_vm0, %v1454_v37, 0.0  ;;  %v311_v37 = vadd.s32 232, %v10231_v6  ;;  %v15479_v60 = vmov 0 }
  0xa4   : > { %15458 = vst [vmem:[#allocation47_spill] sm:$0xff] %v10715_v19  ;;  %9207 = vmatmul.msk.f32.gmra.mxu0 %vm15218_vm1, %v10718_v22  ;;  %v10745_v19 = vld [vmem:[%s10241_s15 + $0x9a] sm:$0xff]  ;;  %vm10807_vm13 = vcmp.lt.s32.totalorder %v465_v36, 15 }
  0xa5   : > { %v1337_v0 = vpop.f32.mrf.mxu1  ;;  %9282 = vmatmul.msk.f32.gmra.mxu3 %vm15218_vm1, %v1453_v13  ;;  %15463 = vst [vmem:[#allocation50_spill] sm:$0xff] %v15462_v55  ;;  %v1542_v63 = vsel %vm10740_vm10, %v10745_v19, 0.0  ;;  %vm15478_vm10 = vcmask 1043456  }
  0xa6   : > { %9274 = vmatmul.msk.f32.gmra.mxu2 %vm15218_vm1, %v10722_v21  ;;  %v1338_v46 = vadd.f32 %v1337_v0, %v1125_v44  ;;  %15467 = vst [vmem:[#allocation52_spill] sm:$0xff] %v10745_v19  ;;  %v302_v21 = vadd.s32 160, %v10231_v6  ;;  %v10751_v44 = vld [vmem:[%s10241_s15 + $0x99] sm:$0xff]  ;;  %v15471_v19 = vmov 0 }
  0xa7   : > { %15469 = vst [vmem:[#allocation54_spill] sm:$0xff] %v10751_v44 }
  0xa8   : > { %9240 = vmatmul.msk.f32.gmra.mxu1 %vm15218_vm1, %v952_v30  ;;  %v10738_v47 = vpop.f32.mrf.mxu3 }
  0xa9   : > { %v1679_v13 = vpop.f32.mrf.mxu2  ;;  %v1128_v22 = vpop.f32.mrf.mxu0 }
  0xaa   : > { %v10748_v0 = vadd.f32 %v1679_v13, %v1338_v46  ;;  %v458_v46 = vand.u32 15, %v302_v21 }
  0xac   : > { %15468 = vst [vmem:[#allocation53_spill] sm:$0xff] %v10748_v0  ;;  %9208 = vmatmul.msk.f32.gmra.mxu0 %vm15218_vm1, %v10751_v44  ;;  %vm10771_vm0 = vcmp.gt.s32.totalorder %v458_v46, 0  ;;  %v10776_v44 = vld [vmem:[%s10241_s15 + $0xa0] sm:$0xff] }
  0xad   : > { %v1340_v30 = vpop.f32.mrf.mxu1  ;;  %9283 = vmatmul.msk.f32.gmra.mxu3 %vm15218_vm1, %v1550_v11  ;;  %v15472_v19 = vsel %vm10771_vm0, 4294967295, %v15471_v19  ;;  %15474 = vst [vmem:[#allocation57_spill] sm:$0xff] %v10776_v44  ;;  %v954_v46 = vsel %vm10771_vm0, %v10776_v44, 0.0 }
  0xae   : > { %9275 = vmatmul.msk.f32.gmra.mxu2 %vm15218_vm1, %v1542_v63  ;;  %v1341_v13 = vadd.f32 %v1340_v30, %v1128_v22  ;;  %15473 = vst [vmem:[#allocation56_spill] sm:$0xff] %v15472_v19  ;;  %v10781_v22 = vld [vmem:[%s10241_s15 + $0xa1] sm:$0xff]  ;;  %v15482_v19 = vmov 0 }
  0xaf   : > { %15476 = vst [vmem:[#allocation59_spill] sm:$0xff] %v10781_v22  ;;  %v1455_v63 = vld [vmem:[%s10241_s15 + $0xe2] sm:$0xff]  ;;  %v15483_v19 = vsel %vm10807_vm13, 4294967295, %v15482_v19 }
  0xb0   : > { %9241 = vmatmul.msk.f32.gmra.mxu1 %vm15218_vm1, %v10759_v8  ;;  %v10768_v55 = vpop.f32.mrf.mxu3  ;;  %v10785_v30 = vld [vmem:[%s10241_s15 + $0xa2] sm:$0xff]  ;;  %v521_v8 = vand.u32 15, %v311_v37  ;;  %v1456_v37 = vld [vmem:[%s10241_s15 + $0xea] sm:$0xff]  ;;  %15484 = vst [vmem:[#allocation62_spill] sm:$0xff] %v15483_v19  ;;  %v15489_v19 = vmov 0 }
  0xb1   : > { %v1682_v0 = vpop.f32.mrf.mxu2  ;;  %v1131_v21 = vpop.f32.mrf.mxu0  ;;  %15477 = vst [vmem:[#allocation60_spill] sm:$0xff] %v10785_v30 }
  0xb2   : > { %v10778_v11 = vadd.f32 %v1682_v0, %v1341_v13  ;;  %v9424_v0 = vld [vmem:[%s15060_s1 + $0x1c] sm:$0xf]  ;;  %vm10800_vm0 = vcmp.lt.s32.totalorder %v521_v8, 15 }
  0xb3   : > { %9425 = vmatpush.msk.msra.mxu3 %vm15478_vm10, %v9424_v0  ;;  %v15480_v60 = vsel %vm10800_vm0, 4294967295, %v15479_v60  ;;  %v10821_v0 = vld [vmem:[%s10241_s15 + $0xa9] sm:$0xff]  ;;  %v1552_v36 = vsel %vm10800_vm0, %v1456_v37, 0.0 }
  0xb4   : > { %15475 = vst [vmem:[#allocation58_spill] sm:$0xff] %v10778_v11  ;;  %9209 = vmatmul.msk.f32.gmra.mxu0 %vm15218_vm1, %v10781_v22  ;;  %v10812_v11 = vld [vmem:[%s10241_s15 + $0xaa] sm:$0xff] }
  0xb5   : > { %v1343_v40 = vpop.f32.mrf.mxu1  ;;  %9284 = vmatmul.msk.f32.gmra.mxu3 %vm15218_vm1, %v1455_v63  ;;  %15481 = vst [vmem:[#allocation61_spill] sm:$0xff] %v15480_v60  ;;  %v1544_v22 = vsel %vm10807_vm13, %v10812_v11, 0.0 }
  0xb6   : > { %9276 = vmatmul.msk.f32.gmra.mxu2 %vm15218_vm1, %v10785_v30  ;;  %v1344_v13 = vadd.f32 %v1343_v40, %v1131_v21  ;;  %15485 = vst [vmem:[#allocation63_spill] sm:$0xff] %v10812_v11  ;;  %v304_v40 = vadd.s32 176, %v10231_v6  ;;  %v9390_v21 = vld [vmem:[%s15060_s1 + $0x18] sm:$0xf] }
  0xb7   : > { %15487 = vst [vmem:[#allocation65_spill] sm:$0xff] %v10821_v0  ;;  %9391 = vmatpush.msk.msrb.mxu2 %vm15478_vm10, %v9390_v21  ;;  %v313_v21 = vadd.s32 248, %v10231_v6 }
  0xb8   : > { %9242 = vmatmul.msk.f32.gmra.mxu1 %vm15218_vm1, %v954_v46  ;;  %v10805_v63 = vpop.f32.mrf.mxu3 }
  0xb9   : > { %v1685_v30 = vpop.f32.mrf.mxu2  ;;  %v1134_v8 = vpop.f32.mrf.mxu0  ;;  %v535_v11 = vand.u32 15, %v313_v21  ;;  %v15495_v21 = vmov 0 }
  0xba   : > { %v10818_v46 = vadd.f32 %v1685_v30, %v1344_v13  ;;  %v472_v30 = vand.u32 15, %v304_v40  ;;  %v9458_v13 = vld [vmem:[%s15060_s1 + $0x20] sm:$0xf] }
  0xbb   : > { %9459 = vmatpush.msk.msra.mxu0 %vm15478_vm10, %v9458_v13  ;;  %v1457_v13 = vld [vmem:[%s10241_s15 + $0xf2] sm:$0xff]  ;;  %vm10871_vm10 = vcmp.lt.s32.totalorder %v535_v11, 15 }
  0xbc   : > { %15486 = vst [vmem:[#allocation64_spill] sm:$0xff] %v10818_v46  ;;  %9210 = vmatmul.msk.f32.gmra.mxu0 %vm15218_vm1, %v10821_v0  ;;  %vm10846_vm0 = vcmp.gt.s32.totalorder %v472_v30, 0  ;;  %v10851_v46 = vld [vmem:[%s10241_s15 + $0xb0] sm:$0xff]  ;;  %v15496_v21 = vsel %vm10871_vm10, 4294967295, %v15495_v21 }
  0xbd   : > { %v1346_v44 = vpop.f32.mrf.mxu1  ;;  %9285 = vmatmul.msk.f32.gmra.mxu3 %vm15218_vm1, %v1552_v36  ;;  %v305_v36 = vadd.s32 184, %v10231_v6  ;;  %v15490_v19 = vsel %vm10846_vm0, 4294967295, %v15489_v19  ;;  %15492 = vst [vmem:[#allocation68_spill] sm:$0xff] %v10851_v46  ;;  %v10860_v0 = vld [vmem:[%s10241_s15 + $0xb2] sm:$0xff]  ;;  %v956_v6 = vsel %vm10846_vm0, %v10851_v46, 0.0 }
  0xbe   : > { %9277 = vmatmul.msk.f32.gmra.mxu2 %vm15218_vm1, %v1544_v22  ;;  %v1347_v37 = vadd.f32 %v1346_v44, %v1134_v8  ;;  %15491 = vst [vmem:[#allocation67_spill] sm:$0xff] %v15490_v19  ;;  %v10856_v8 = vld [vmem:[%s10241_s15 + $0xb1] sm:$0xff] }
  0xbf   : > { %15494 = vst [vmem:[#allocation70_spill] sm:$0xff] %v10856_v8  ;;  %v479_v30 = vand.u32 15, %v305_v36  ;;  %v15498_v36 = vmov 0 }
  0xc0   : > { %9243 = vmatmul.msk.f32.gmra.mxu1 %vm15218_vm1, %v10830_v5  ;;  %v10843_v60 = vpop.f32.mrf.mxu3  ;;  %15497 = vst [vmem:[#allocation71_spill] sm:$0xff] %v15496_v21 }
  0xc1   : > { %v1688_v40 = vpop.f32.mrf.mxu2  ;;  %v1137_v44 = vpop.f32.mrf.mxu0  ;;  %vm10878_vm0 = vcmp.lt.s32.totalorder %v479_v30, 15  ;;  %v10896_v30 = vld [vmem:[%s10241_s15 + $0xb8] sm:$0xff] }
  0xc2   : > { %v10853_v22 = vadd.f32 %v1688_v40, %v1347_v37  ;;  %v1458_v40 = vld [vmem:[%s10241_s15 + $0xfa] sm:$0xff]  ;;  %v15499_v36 = vsel %vm10878_vm0, 4294967295, %v15498_v36 }
  0xc3   : > { %15500 = vst [vmem:[#allocation72_spill] sm:$0xff] %v15499_v36  ;;  %v1554_v11 = vsel %vm10871_vm10, %v1458_v40, 0.0 }
  0xc4   : > { %15493 = vst [vmem:[#allocation69_spill] sm:$0xff] %v10853_v22  ;;  %9211 = vmatmul.msk.f32.gmra.mxu0 %vm15218_vm1, %v10856_v8  ;;  %v10883_v22 = vld [vmem:[%s10241_s15 + $0xba] sm:$0xff] }
  0xc5   : > { %v1349_v5 = vpop.f32.mrf.mxu1  ;;  %9286 = vmatmul.msk.f32.gmra.mxu3 %vm15218_vm1, %v1457_v13 }
  0xc6   : > { %9278 = vmatmul.msk.f32.gmra.mxu2 %vm15218_vm1, %v10860_v0  ;;  %v1350_v37 = vadd.f32 %v1349_v5, %v1137_v44  ;;  %v10888_v5 = vld [vmem:[%s10241_s15 + $0xb9] sm:$0xff]  ;;  %v1546_v44 = vsel %vm10878_vm0, %v10883_v22, 0.0 }
  0xc7   : > { %15502 = vst [vmem:[#allocation74_spill] sm:$0xff] %v10888_v5 }
  0xc8   : > { %9244 = vmatmul.msk.f32.gmra.mxu1 %vm15218_vm1, %v956_v6  ;;  %v10876_v19 = vpop.f32.mrf.mxu3 }
  0xc9   : > { %v1691_v13 = vpop.f32.mrf.mxu2  ;;  %v1140_v8 = vpop.f32.mrf.mxu0 }
  0xca   : > { %v10885_v46 = vadd.f32 %v1691_v13, %v1350_v37 }
  0xcc   : > { %15501 = vst [vmem:[#allocation73_spill] sm:$0xff] %v10885_v46  ;;  %9212 = vmatmul.msk.f32.gmra.mxu0 %vm15218_vm1, %v10888_v5  ;;  %v1833_v46 = vsel %vm10243_vm2, %v10279_v26, 0.0 }
  0xcd   : > { %v1352_v6 = vpop.f32.mrf.mxu1  ;;  %9287 = vmatmul.msk.f32.gmra.mxu3 %vm15218_vm1, %v1554_v11  ;;  %v2731_v11 = vsel %vm10243_vm2, %v10327_v42, 0.0 }
  0xce   : > { %9279 = vmatmul.msk.f32.gmra.mxu2 %vm15218_vm1, %v1546_v44  ;;  %v1353_v37 = vadd.f32 %v1352_v6, %v1140_v8 }
  0xd0   : > { %9245 = vmatmul.msk.f32.gmra.mxu1 %vm15218_vm1, %v10896_v30  ;;  %v10904_v13 = vpop.f32.mrf.mxu3 }
  0xd1   : > { %v1694_v40 = vpop.f32.mrf.mxu2  ;;  %v1143_v21 = vpop.f32.mrf.mxu0 }
  0xd2   : > { %v10906_v36 = vadd.f32 %v1694_v40, %v1353_v37 }
  0xd4   : > { %9324 = vmatmul.msk.f32.vlgmr.msrb.gmra.mxu0 %vm15218_vm1, %v10282_v27 }
  0xd5   : > { %v1355_v5 = vpop.f32.mrf.mxu1  ;;  %9290 = vmatmul.msk.f32.vlgmr.msrb.gmra.mxu3 %vm15218_vm1, %v1833_v46  ;;  %v2422_v46 = vsel %vm10258_vm3, %v10302_v33, 0.0  ;;  %v1835_v33 = vsel %vm10274_vm4, %v10327_v42, 0.0 }
  0xd6   : > { %v1356_v8 = vadd.f32 %v1355_v5, %v1143_v21  ;;  %9392 = vmatmul.msk.f32.vlgmr.msrb.gmra.mxu2 %vm15218_vm1, %v2731_v11 }
  0xd8   : > { %9358 = vmatmul.msk.f32.vlgmr.msrb.gmra.mxu1 %vm15218_vm1, %v10286_v29  ;;  %v1403_v44 = vpop.f32.mrf.mxu3 }
  0xd9   : > { %v10921_v6 = vadd.f32 %v1403_v44, %v10675_v62  ;;  %v1697_v26 = vpop.f32.mrf.mxu2  ;;  %v1146_v37 = vpop.f32.mrf.mxu0 }
  0xda   : > { %v10923_v40 = vadd.f32 %v1697_v26, %v1356_v8 }
  0xdc   : > { %9325 = vmatmul.msk.f32.gmra.mxu0 %vm15218_vm1, %v10306_v35 }
  0xdd   : > { %v1358_v9 = vpop.f32.mrf.mxu1  ;;  %9291 = vmatmul.msk.f32.gmra.mxu3 %vm15218_vm1, %v10313_v38 }
  0xde   : > { %v1359_v27 = vadd.f32 %v1358_v9, %v1146_v37  ;;  %9393 = vmatmul.msk.f32.gmra.mxu2 %vm15218_vm1, %v10361_v54  ;;  %v2733_v9 = vsel %vm10274_vm4, %v10375_v58, 0.0 }
  0xe0   : > { %9359 = vmatmul.msk.f32.gmra.mxu1 %vm15218_vm1, %v2422_v46  ;;  %v1406_v29 = vpop.f32.mrf.mxu3  ;;  %v2424_v46 = vsel %vm10297_vm5, %v10350_v49, 0.0  ;;  %v1837_v49 = vsel %vm10322_vm6, %v10375_v58, 0.0 }
  0xe1   : > { %v10936_v62 = vadd.f32 %v1406_v29, %v10705_v12  ;;  %v1700_v21 = vpop.f32.mrf.mxu2  ;;  %v1149_v5 = vpop.f32.mrf.mxu0 }
  0xe2   : > { %v10938_v11 = vadd.f32 %v1700_v21, %v1359_v27 }
  0xe4   : > { %9326 = vmatmul.msk.f32.gmra.mxu0 %vm15218_vm1, %v10330_v43 }
  0xe5   : > { %v1361_v35 = vpop.f32.mrf.mxu1  ;;  %9292 = vmatmul.msk.f32.gmra.mxu3 %vm15218_vm1, %v1835_v33 }
  0xe6   : > { %v1362_v38 = vadd.f32 %v1361_v35, %v1149_v5  ;;  %9394 = vmatmul.msk.f32.gmra.mxu2 %vm15218_vm1, %v2733_v9 }
  0xe8   : > { %9360 = vmatmul.msk.f32.gmra.mxu1 %vm15218_vm1, %v10334_v45  ;;  %v1409_v12 = vpop.f32.mrf.mxu3 }
  0xe9   : > { %v10953_v8 = vadd.f32 %v1409_v12, %v10738_v47  ;;  %v1703_v42 = vpop.f32.mrf.mxu2  ;;  %v1152_v44 = vpop.f32.mrf.mxu0  ;;  %v2426_v12 = vsel %vm10345_vm7, %v10399_v2, 0.0  ;;  %v1839_v2 = vsel %vm10370_vm8, %v10429_v17, 0.0 }
  0xea   : > { %v10955_v26 = vadd.f32 %v1703_v42, %v1362_v38 }
  0xec   : > { %9327 = vmatmul.msk.f32.gmra.mxu0 %vm15218_vm1, %v10354_v51  ;;  %v2735_v51 = vsel %vm10322_vm6, %v10429_v17, 0.0 }
  0xed   : > { %v1364_v37 = vpop.f32.mrf.mxu1  ;;  %9293 = vmatmul.msk.f32.gmra.mxu3 %vm15218_vm1, %v10361_v54 }
  0xee   : > { %v1365_v43 = vadd.f32 %v1364_v37, %v1152_v44  ;;  %9395 = vmatmul.msk.f32.gmra.mxu2 %vm15218_vm1, %v10410_v10 }
  0xf0   : > { %9361 = vmatmul.msk.f32.gmra.mxu1 %vm15218_vm1, %v2424_v46  ;;  %v1412_v45 = vpop.f32.mrf.mxu3 }
  0xf1   : > { %v10968_v47 = vadd.f32 %v1412_v45, %v10768_v55  ;;  %v1706_v27 = vpop.f32.mrf.mxu2  ;;  %v1155_v29 = vpop.f32.mrf.mxu0 }
  0xf2   : > { %v10970_v21 = vadd.f32 %v1706_v27, %v1365_v43 }
  0xf4   : > { %9328 = vmatmul.msk.f32.gmra.mxu0 %vm15218_vm1, %v10378_v59 }
  0xf5   : > { %v1367_v54 = vpop.f32.mrf.mxu1  ;;  %9294 = vmatmul.msk.f32.gmra.mxu3 %vm15218_vm1, %v1837_v49  ;;  %v2428_v49 = vsel %vm10394_vm9, %v10454_v28, 0.0  ;;  %v1841_v28 = vsel %vm10424_vm11, %v10484_v52, 0.0 }
  0xf6   : > { %v1368_v55 = vadd.f32 %v1367_v54, %v1155_v29  ;;  %9396 = vmatmul.msk.f32.gmra.mxu2 %vm15218_vm1, %v2735_v51 }
  0xf8   : > { %9362 = vmatmul.msk.f32.gmra.mxu1 %vm15218_vm1, %v10382_v61  ;;  %v1415_v5 = vpop.f32.mrf.mxu3 }
  0xf9   : > { %v10985_v33 = vadd.f32 %v1415_v5, %v10805_v63  ;;  %v1709_v58 = vpop.f32.mrf.mxu2  ;;  %v1158_v9 = vpop.f32.mrf.mxu0 }
  0xfa   : > { %v10987_v35 = vadd.f32 %v1709_v58, %v1368_v55 }
  0xfc   : > { %9329 = vmatmul.msk.f32.gmra.mxu0 %vm15218_vm1, %v10403_v4  ;;  %v2737_v4 = vsel %vm10370_vm8, %v10484_v52, 0.0 }
  0xfd   : > { %v1370_v38 = vpop.f32.mrf.mxu1  ;;  %9295 = vmatmul.msk.f32.gmra.mxu3 %vm15218_vm1, %v10410_v10 }
  0xfe   : > { %v1371_v59 = vadd.f32 %v1370_v38, %v1158_v9  ;;  %9397 = vmatmul.msk.f32.gmra.mxu2 %vm15218_vm1, %v10465_v39 }
 0x100   : > { %9363 = vmatmul.msk.f32.gmra.mxu1 %vm15218_vm1, %v2426_v12  ;;  %v1418_v61 = vpop.f32.mrf.mxu3 }
 0x101   : > { %v11000_v63 = vadd.f32 %v1418_v61, %v10843_v60  ;;  %v1712_v42 = vpop.f32.mrf.mxu2  ;;  %v1161_v44 = vpop.f32.mrf.mxu0 }
 0x102   : > { %v11002_v37 = vadd.f32 %v1712_v42, %v1371_v59  ;;  %v2430_v59 = vsel %vm10449_vm12, %v10509_v3, 0.0  ;;  %v1843_v3 = vsel %vm10479_vm14, %v10539_v34, 0.0 }
 0x104   : > { %9330 = vmatmul.msk.f32.gmra.mxu0 %vm15218_vm1, %v10432_v18 }
 0x105   : > { %v1373_v10 = vpop.f32.mrf.mxu1  ;;  %9296 = vmatmul.msk.f32.gmra.mxu3 %vm15218_vm1, %v1839_v2 }
 0x106   : > { %v1374_v60 = vadd.f32 %v1373_v10, %v1161_v44  ;;  %9398 = vmatmul.msk.f32.gmra.mxu2 %vm15218_vm1, %v2737_v4  ;;  %v15504_v4 = vld [vmem:[#allocation21_spill] sm:$0xff]  ;;  %v15505_v10 = vld [vmem:[#allocation22_spill] sm:$0xff] }
 0x108   : > { %9364 = vmatmul.msk.f32.gmra.mxu1 %vm15218_vm1, %v10437_v20  ;;  %v1421_v46 = vpop.f32.mrf.mxu3 }
 0x109   : > { %v11017_v43 = vadd.f32 %v1421_v46, %v10876_v19  ;;  %v1715_v17 = vpop.f32.mrf.mxu2  ;;  %v1164_v45 = vpop.f32.mrf.mxu0 }
 0x10a   : > { %v11019_v27 = vadd.f32 %v1715_v17, %v1374_v60 }
 0x10c   : > { %9331 = vmatmul.msk.f32.gmra.mxu0 %vm15218_vm1, %v10458_v31  ;;  %v2739_v31 = vsel %vm10424_vm11, %v10539_v34, 0.0 }
 0x10d   : > { %v1376_v29 = vpop.f32.mrf.mxu1  ;;  %9297 = vmatmul.msk.f32.gmra.mxu3 %vm15218_vm1, %v10465_v39 }
 0x10e   : > { %v1377_v18 = vadd.f32 %v1376_v29, %v1164_v45  ;;  %9399 = vmatmul.msk.f32.gmra.mxu2 %vm15218_vm1, %v10520_v14 }
 0x110   : > { %9365 = vmatmul.msk.f32.gmra.mxu1 %vm15218_vm1, %v2428_v49  ;;  %v1424_v20 = vpop.f32.mrf.mxu3  ;;  %v15506_v49 = vld [vmem:[#allocation24_spill] sm:$0xff] }
 0x111   : > { %v11032_v19 = vadd.f32 %v1424_v20, %v10904_v13  ;;  %v1718_v51 = vpop.f32.mrf.mxu2  ;;  %v1167_v54 = vpop.f32.mrf.mxu0  ;;  %v2432_v20 = vsel %vm10504_vm15, %v15506_v49, 0.0 }
 0x112   : > { %v11034_v55 = vadd.f32 %v1718_v51, %v1377_v18  ;;  %v15508_v51 = vld [vmem:[#allocation25_spill] sm:$0xff]  ;;  %v3021_v18 = vld [vmem:[%s10241_s15 + $0x81] sm:$0xff] }
 0x114   : > { %9332 = vmatmul.msk.f32.gmra.mxu0 %vm15218_vm1, %v10487_v53 }
 0x115   : > { %v1379_v39 = vpop.f32.mrf.mxu1  ;;  %9298 = vmatmul.msk.f32.gmra.mxu3 %vm15218_vm1, %v1841_v28  ;;  %v15509_v28 = vld [vmem:[#allocation34_spill] sm:$0xff] }
 0x116   : > { %v1380_v13 = vadd.f32 %v1379_v39, %v1167_v54  ;;  %9400 = vmatmul.msk.f32.gmra.mxu2 %vm15218_vm1, %v2739_v31 }
 0x118   : > { %9366 = vmatmul.msk.f32.gmra.mxu1 %vm15218_vm1, %v10492_v56  ;;  %v1745_v5 = vpop.f32.mrf.mxu3 }
 0x119   : > { %v11049_v58 = vadd.f32 %v1745_v5, %v10921_v6  ;;  %v1721_v52 = vpop.f32.mrf.mxu2  ;;  %v1170_v9 = vpop.f32.mrf.mxu0 }
 0x11a   : > { %v11051_v38 = vadd.f32 %v1721_v52, %v1380_v13  ;;  %v15510_v52 = vld [vmem:[#allocation20_spill] sm:$0xff] }
 0x11c   : > { %9333 = vmatmul.msk.f32.gmra.mxu0 %vm15218_vm1, %v10513_v7 }
 0x11d   : > { %v1382_v12 = vpop.f32.mrf.mxu1  ;;  %9299 = vmatmul.msk.f32.gmra.mxu3 %vm15218_vm1, %v10520_v14  ;;  %v15503_v14 = vld [vmem:[#allocation28_spill] sm:$0xff] }
 0x11e   : > { %v1383_v53 = vadd.f32 %v1382_v12, %v1170_v9  ;;  %9401 = vmatmul.msk.f32.gmra.mxu2 %vm15218_vm1, %v10583_v23  ;;  %v2741_v7 = vsel %vm10479_vm14, %v15503_v14, 0.0  ;;  %vm15511_vm14 = vnez %v15510_v52  ;;  %v15512_v9 = vld [vmem:[#allocation36_spill] sm:$0xff] }
 0x11f   : > { %v2743_v12 = vsel %vm15511_vm14, %v15512_v9, 0.0 }
 0x120   : > { %9367 = vmatmul.msk.f32.gmra.mxu1 %vm15218_vm1, %v2430_v59  ;;  %v1748_v56 = vpop.f32.mrf.mxu3 }
 0x121   : > { %v11064_v6 = vadd.f32 %v1748_v56, %v10936_v62  ;;  %v1724_v61 = vpop.f32.mrf.mxu2  ;;  %v1173_v42 = vpop.f32.mrf.mxu0  ;;  %v15514_v56 = vld [vmem:[#allocation30_spill] sm:$0xff] }
 0x122   : > { %v11066_v44 = vadd.f32 %v1724_v61, %v1383_v53  ;;  %v15513_v53 = vld [vmem:[#allocation29_spill] sm:$0xff] }
 0x124   : > { %9334 = vmatmul.msk.f32.gmra.mxu0 %vm15218_vm1, %v15504_v4 }
 0x125   : > { %v1385_v2 = vpop.f32.mrf.mxu1  ;;  %9300 = vmatmul.msk.f32.gmra.mxu3 %vm15218_vm1, %v1843_v3 }
 0x126   : > { %v1386_v62 = vadd.f32 %v1385_v2, %v1173_v42  ;;  %9402 = vmatmul.msk.f32.gmra.mxu2 %vm15218_vm1, %v2741_v7 }
 0x128   : > { %9368 = vmatmul.msk.f32.gmra.mxu1 %vm15218_vm1, %v15505_v10  ;;  %v1751_v60 = vpop.f32.mrf.mxu3  ;;  %v15516_v10 = vld [vmem:[#allocation23_spill] sm:$0xff] }
 0x129   : > { %v11081_v46 = vadd.f32 %v1751_v60, %v10953_v8  ;;  %v1727_v34 = vpop.f32.mrf.mxu2  ;;  %v1176_v17 = vpop.f32.mrf.mxu0 }
 0x12a   : > { %v11083_v45 = vadd.f32 %v1727_v34, %v1386_v62  ;;  %v15515_v62 = vld [vmem:[#allocation32_spill] sm:$0xff]  ;;  %v15518_v34 = vld [vmem:[#allocation33_spill] sm:$0xff] }
 0x12c   : > { %9335 = vmatmul.msk.f32.gmra.mxu0 %vm15218_vm1, %v15508_v51 }
 0x12d   : > { %v1388_v29 = vpop.f32.mrf.mxu1  ;;  %9301 = vmatmul.msk.f32.gmra.mxu3 %vm15218_vm1, %v10583_v23  ;;  %v1845_v23 = vsel %vm15511_vm14, %v15503_v14, 0.0  ;;  %v9495_v14 = vld [vmem:[%s15062_s3 + $0x38] sm:$0xff]  ;;  %vm15517_vm14 = vnez %v15516_v10 }
 0x12e   : > { %v1389_v54 = vadd.f32 %v1388_v29, %v1176_v17  ;;  %9403 = vmatmul.msk.f32.gmra.mxu2 %vm15218_vm1, %v15509_v28  ;;  %3910 = vmatpush.msra.mxu1 %v9495_v14  ;;  %v2434_v60 = vsel %vm15517_vm14, %v15515_v62, 0.0  ;;  %v15519_v17 = vld [vmem:[#allocation44_spill] sm:$0xff]  ;;  %v15525_v14 = vld [vmem:[#allocation41_spill] sm:$0xff]  ;;  %v15528_v62 = vld [vmem:[#allocation43_spill] sm:$0xff] }
 0x12f   : > { %v3024_v10 = vld [vmem:[%s10241_s15 + $0x99] sm:$0xff] }
 0x130   : > { %9369 = vmatmul.msk.f32.gmra.mxu1 %vm15218_vm1, %v2432_v20  ;;  %v1754_v8 = vpop.f32.mrf.mxu3 }
 0x131   : > { %v11096_v31 = vadd.f32 %v1754_v8, %v10968_v47  ;;  %v1730_v39 = vpop.f32.mrf.mxu2  ;;  %v1179_v13 = vpop.f32.mrf.mxu0  ;;  %v15520_v8 = vld [vmem:[#allocation27_spill] sm:$0xff] }
 0x132   : > { %v11098_v5 = vadd.f32 %v1730_v39, %v1389_v54  ;;  %vm15521_vm11 = vnez %v15520_v8  ;;  %v15522_v39 = vld [vmem:[#allocation46_spill] sm:$0xff] }
 0x134   : > { %9336 = vmatmul.msk.f32.gmra.mxu0 %vm15218_vm1, %v15513_v53 }
 0x135   : > { %v1391_v59 = vpop.f32.mrf.mxu1  ;;  %9302 = vmatmul.msk.f32.gmra.mxu3 %vm15218_vm1, %v1845_v23 }
 0x136   : > { %v1392_v47 = vadd.f32 %v1391_v59, %v1179_v13  ;;  %9404 = vmatmul.msk.f32.gmra.mxu2 %vm15218_vm1, %v2743_v12  ;;  %v2745_v13 = vsel %vm15521_vm11, %v15522_v39, 0.0  ;;  %v15523_v12 = vld [vmem:[#allocation37_spill] sm:$0xff]  ;;  %v15524_v59 = vld [vmem:[#allocation38_spill] sm:$0xff] }
 0x138   : > { %9370 = vmatmul.msk.f32.gmra.mxu1 %vm15218_vm1, %v15514_v56  ;;  %v1757_v61 = vpop.f32.mrf.mxu3 }
 0x139   : > { %v11113_v42 = vadd.f32 %v1757_v61, %v10985_v33  ;;  %v1733_v3 = vpop.f32.mrf.mxu2  ;;  %v1182_v7 = vpop.f32.mrf.mxu0 }
 0x13a   : > { %v11118_v2 = vadd.f32 %v1733_v3, %v1392_v47 }
 0x13c   : > { %9337 = vmatmul.msk.f32.gmra.mxu0 %vm15218_vm1, %v15518_v34  ;;  %v15529_v34 = vld [vmem:[#allocation55_spill] sm:$0xff] }
 0x13d   : > { %v1394_v4 = vpop.f32.mrf.mxu1  ;;  %9303 = vmatmul.msk.f32.gmra.mxu3 %vm15218_vm1, %v15509_v28  ;;  %v1847_v28 = vsel %vm15521_vm11, %v15512_v9, 0.0 }
 0x13e   : > { %v1395_v33 = vadd.f32 %v1394_v4, %v1182_v7  ;;  %9405 = vmatmul.msk.f32.gmra.mxu2 %vm15218_vm1, %v15519_v17  ;;  %v15526_v7 = vld [vmem:[#allocation31_spill] sm:$0xff] }
 0x13f   : > { %vm15527_vm11 = vnez %v15526_v7  ;;  %v3303_v7 = vld [vmem:[%s10241_s15 + $0xa2] sm:$0xff] }
 0x140   : > { %9371 = vmatmul.msk.f32.gmra.mxu1 %vm15218_vm1, %v2434_v60  ;;  %v1760_v29 = vpop.f32.mrf.mxu3  ;;  %v2436_v4 = vsel %vm15527_vm11, %v15525_v14, 0.0 }
 0x141   : > { %v11131_v49 = vadd.f32 %v1760_v29, %v11000_v63  ;;  %v1736_v20 = vpop.f32.mrf.mxu2  ;;  %v1185_v51 = vpop.f32.mrf.mxu0 }
 0x142   : > { %v11133_v54 = vadd.f32 %v1736_v20, %v1395_v33 }
 0x144   : > { %9338 = vmatmul.msk.f32.gmra.mxu0 %vm15218_vm1, %v15523_v12 }
 0x145   : > { %v1397_v23 = vpop.f32.mrf.mxu1  ;;  %9304 = vmatmul.msk.f32.gmra.mxu3 %vm15218_vm1, %v1847_v28  ;;  %v15530_v28 = vld [vmem:[#allocation35_spill] sm:$0xff] }
 0x146   : > { %v1398_v63 = vadd.f32 %v1397_v23, %v1185_v51  ;;  %9406 = vmatmul.msk.f32.gmra.mxu2 %vm15218_vm1, %v2745_v13  ;;  %vm15531_vm8 = vnez %v15530_v28  ;;  %v15532_v13 = vld [vmem:[#allocation57_spill] sm:$0xff] }
 0x147   : > { %v2747_v23 = vsel %vm15531_vm8, %v15532_v13, 0.0 }
 0x148   : > { %9372 = vmatmul.msk.f32.gmra.mxu1 %vm15218_vm1, %v15524_v59  ;;  %v1763_v53 = vpop.f32.mrf.mxu3 }
 0x149   : > { %v11148_v47 = vadd.f32 %v1763_v53, %v11017_v43  ;;  %v1739_v9 = vpop.f32.mrf.mxu2  ;;  %v1188_v56 = vpop.f32.mrf.mxu0  ;;  %v15535_v53 = vld [vmem:[#allocation42_spill] sm:$0xff] }
 0x14a   : > { %v11150_v61 = vadd.f32 %v1739_v9, %v1398_v63  ;;  %v15533_v63 = vld [vmem:[#allocation48_spill] sm:$0xff] }
 0x14c   : > { %9339 = vmatmul.msk.f32.gmra.mxu0 %vm15218_vm1, %v15528_v62  ;;  %v15537_v62 = vld [vmem:[#allocation40_spill] sm:$0xff] }
 0x14d   : > { %v1400_v3 = vpop.f32.mrf.mxu1  ;;  %9305 = vmatmul.msk.f32.gmra.mxu3 %vm15218_vm1, %v15519_v17  ;;  %v1849_v17 = vsel %vm15531_vm8, %v15522_v39, 0.0  ;;  %vm15538_vm8 = vnez %v15537_v62 }
 0x14e   : > { %v1401_v60 = vadd.f32 %v1400_v3, %v1188_v56  ;;  %9407 = vmatmul.msk.f32.gmra.mxu2 %vm15218_vm1, %v15529_v34 }
 0x150   : > { %9373 = vmatmul.msk.f32.gmra.mxu1 %vm15218_vm1, %v2436_v4  ;;  %v1766_v43 = vpop.f32.mrf.mxu3  ;;  %v15536_v4 = vld [vmem:[#allocation52_spill] sm:$0xff] }
 0x151   : > { %v11163_v33 = vadd.f32 %v1766_v43, %v11032_v19  ;;  %v1742_v29 = vpop.f32.mrf.mxu2  ;;  %v2261_v20 = vpop.f32.mrf.mxu0  ;;  %v15534_v19 = vld [vmem:[#allocation49_spill] sm:$0xff] }
 0x152   : > { %v11165_v51 = vadd.f32 %v1742_v29, %v1401_v60  ;;  %v2438_v60 = vsel %vm15538_vm8, %v15536_v4, 0.0  ;;  %v15539_v29 = vld [vmem:[#allocation54_spill] sm:$0xff] }
 0x154   : > { %9340 = vmatmul.msk.f32.gmra.mxu0 %vm15218_vm1, %v15533_v63  ;;  %v15541_v63 = vld [vmem:[#allocation47_spill] sm:$0xff] }
 0x155   : > { %v2571_v12 = vpop.f32.mrf.mxu1  ;;  %9306 = vmatmul.msk.f32.gmra.mxu3 %vm15218_vm1, %v1849_v17  ;;  %v15540_v17 = vld [vmem:[#allocation66_spill] sm:$0xff] }
 0x156   : > { %9408 = vmatmul.msk.f32.gmra.mxu2 %vm15218_vm1, %v2747_v23 }
 0x158   : > { %9374 = vmatmul.msk.f32.gmra.mxu1 %vm15218_vm1, %v15534_v19  ;;  %v1983_v59 = vpop.f32.mrf.mxu3 }
 0x159   : > { %v2079_v9 = vadd.f32 %v1983_v59, %v15535_v53  ;;  %v2881_v56 = vpop.f32.mrf.mxu2  ;;  %v2264_v39 = vpop.f32.mrf.mxu0 }
 0x15b   : > { %v2357_v3 = vadd.f32 %v2261_v20, %v2079_v9 }
 0x15c   : > { %9341 = vmatmul.msk.f32.gmra.mxu0 %vm15218_vm1, %v15539_v29 }
 0x15d   : > { %v2574_v14 = vpop.f32.mrf.mxu1  ;;  %v2667_v43 = vadd.f32 %v2571_v12, %v2357_v3  ;;  %9307 = vmatmul.msk.f32.gmra.mxu3 %vm15218_vm1, %v15529_v34  ;;  %v15542_v12 = vld [vmem:[#allocation45_spill] sm:$0xff]  ;;  %v15544_v3 = vld [vmem:[#allocation68_spill] sm:$0xff] }
 0x15e   : > { %9409 = vmatmul.msk.f32.gmra.mxu2 %vm15218_vm1, %v15540_v17  ;;  %vm15543_vm6 = vnez %v15542_v12 }
 0x15f   : > { %v11189_v23 = vadd.f32 %v2881_v56, %v2667_v43  ;;  %v1851_v9 = vsel %vm15543_vm6, %v15532_v13, 0.0  ;;  %v2749_v4 = vsel %vm15543_vm6, %v15544_v3, 0.0  ;;  %v15545_v56 = vld [vmem:[#allocation59_spill] sm:$0xff]  ;;  %v15546_v43 = vld [vmem:[#allocation60_spill] sm:$0xff] }
 0x160   : > { %9375 = vmatmul.msk.f32.gmra.mxu1 %vm15218_vm1, %v2438_v60  ;;  %v1986_v20 = vpop.f32.mrf.mxu3 }
 0x161   : > { %v2080_v19 = vadd.f32 %v1986_v20, %v15541_v63  ;;  %v2884_v59 = vpop.f32.mrf.mxu2  ;;  %v2267_v53 = vpop.f32.mrf.mxu0 }
 0x163   : > { %v2358_v34 = vadd.f32 %v2264_v39, %v2080_v19  ;;  %v15547_v39 = vld [vmem:[#allocation53_spill] sm:$0xff] }
 0x164   : > { %9342 = vmatmul.msk.f32.gmra.mxu0 %vm15218_vm1, %v15545_v56 }
 0x165   : > { %v2577_v29 = vpop.f32.mrf.mxu1  ;;  %v2668_v28 = vadd.f32 %v2574_v14, %v2358_v34  ;;  %9308 = vmatmul.msk.f32.gmra.mxu3 %vm15218_vm1, %v1851_v9  ;;  %v15548_v34 = vld [vmem:[#allocation63_spill] sm:$0xff] }
 0x166   : > { %9410 = vmatmul.msk.f32.gmra.mxu2 %vm15218_vm1, %v2749_v4  ;;  %v15549_v9 = vld [vmem:[#allocation51_spill] sm:$0xff] }
 0x167   : > { %v11203_v60 = vadd.f32 %v2884_v59, %v2668_v28  ;;  %vm15550_vm6 = vnez %v15549_v9  ;;  %v15551_v28 = vld [vmem:[#allocation65_spill] sm:$0xff]  ;;  %v2719_v4 = vld [vmem:[%s10241_s15 + $0xc0] sm:$0xff] }
 0x168   : > { %9376 = vmatmul.msk.f32.gmra.mxu1 %vm15218_vm1, %v15546_v43  ;;  %v1989_v13 = vpop.f32.mrf.mxu3  ;;  %v2440_v8 = vsel %vm15550_vm6, %v15548_v34, 0.0  ;;  %v15552_v43 = vld [vmem:[#allocation58_spill] sm:$0xff] }
 0x169   : > { %v2081_v20 = vadd.f32 %v1989_v13, %v15547_v39  ;;  %v2887_v63 = vpop.f32.mrf.mxu2  ;;  %v2270_v19 = vpop.f32.mrf.mxu0 }
 0x16b   : > { %v2359_v12 = vadd.f32 %v2267_v53, %v2081_v20 }
 0x16c   : > { %9343 = vmatmul.msk.f32.gmra.mxu0 %vm15218_vm1, %v15551_v28 }
 0x16d   : > { %v2580_v14 = vpop.f32.mrf.mxu1  ;;  %v2669_v56 = vadd.f32 %v2577_v29, %v2359_v12  ;;  %9309 = vmatmul.msk.f32.gmra.mxu3 %vm15218_vm1, %v15540_v17  ;;  %v15553_v12 = vld [vmem:[#allocation56_spill] sm:$0xff] }
 0x16e   : > { %9411 = vmatmul.msk.f32.gmra.mxu2 %vm15218_vm1, %v10896_v30  ;;  %vm15554_vm4 = vnez %v15553_v12  ;;  %v2133_v12 = vld [vmem:[%s10241_s15 + $0xc1] sm:$0xff] }
 0x16f   : > { %v11217_v59 = vadd.f32 %v2887_v63, %v2669_v56  ;;  %v1853_v17 = vsel %vm15554_vm4, %v15544_v3, 0.0  ;;  %v2751_v34 = vsel %vm15554_vm4, %v2719_v4, 0.0 }
 0x170   : > { %9377 = vmatmul.msk.f32.gmra.mxu1 %vm15218_vm1, %v2440_v8  ;;  %v1992_v53 = vpop.f32.mrf.mxu3  ;;  %v15555_v8 = vld [vmem:[#allocation70_spill] sm:$0xff] }
 0x171   : > { %v2082_v13 = vadd.f32 %v1992_v53, %v15552_v43  ;;  %v2890_v39 = vpop.f32.mrf.mxu2  ;;  %v2273_v20 = vpop.f32.mrf.mxu0 }
 0x173   : > { %v2360_v29 = vadd.f32 %v2270_v19, %v2082_v13  ;;  %v15556_v19 = vld [vmem:[#allocation64_spill] sm:$0xff] }
 0x174   : > { %9344 = vmatmul.msk.f32.gmra.mxu0 %vm15218_vm1, %v15555_v8 }
 0x175   : > { %v2583_v28 = vpop.f32.mrf.mxu1  ;;  %v2670_v63 = vadd.f32 %v2580_v14, %v2360_v29  ;;  %9310 = vmatmul.msk.f32.gmra.mxu3 %vm15218_vm1, %v1853_v17  ;;  %v9494_v14 = vld [vmem:[%s15062_s3 + $0x30] sm:$0xff]  ;;  %v2720_v29 = vld [vmem:[%s10241_s15 + $0xc8] sm:$0xff] }
 0x176   : > { %9412 = vmatmul.msk.f32.gmra.mxu2 %vm15218_vm1, %v2751_v34  ;;  %3911 = vmatpush.msra.mxu1 %v9494_v14  ;;  %v2442_v34 = vsel %vm10807_vm13, %v10883_v22, 0.0 }
 0x177   : > { %v11231_v56 = vadd.f32 %v2890_v39, %v2670_v63  ;;  %v15557_v39 = vld [vmem:[#allocation62_spill] sm:$0xff] }
 0x178   : > { %9378 = vmatmul.msk.f32.gmra.mxu1 %vm15218_vm1, %v10860_v0  ;;  %v1995_v3 = vpop.f32.mrf.mxu3  ;;  %v15558_v0 = vld [vmem:[#allocation74_spill] sm:$0xff] }
 0x179   : > { %v2083_v53 = vadd.f32 %v1995_v3, %v15556_v19  ;;  %v2893_v43 = vpop.f32.mrf.mxu2  ;;  %v2276_v13 = vpop.f32.mrf.mxu0  ;;  %v2721_v19 = vld [vmem:[%s10241_s15 + $0xd0] sm:$0xff] }
 0x17b   : > { %v2361_v17 = vadd.f32 %v2273_v20, %v2083_v53  ;;  %v15559_v53 = vld [vmem:[#allocation69_spill] sm:$0xff] }
 0x17c   : > { %9345 = vmatmul.msk.f32.gmra.mxu0 %vm15218_vm1, %v15558_v0 }
 0x17d   : > { %v2671_v63 = vadd.f32 %v2583_v28, %v2361_v17  ;;  %9311 = vmatmul.msk.f32.gmra.mxu3 %vm15218_vm1, %v10896_v30  ;;  %v2586_v8 = vpop.f32.mrf.mxu1  ;;  %v15560_v17 = vld [vmem:[#allocation67_spill] sm:$0xff] }
 0x17e   : > { %9413 = vmatmul.msk.f32.gmra.mxu2 %vm15218_vm1, %v2720_v29  ;;  %vm15561_vm4 = vnez %v15560_v17 }
 0x17f   : > { %v11248_v3 = vadd.f32 %v2893_v43, %v2671_v63  ;;  %v1855_v30 = vsel %vm15561_vm4, %v2719_v4, 0.0  ;;  %v2753_v52 = vsel %vm15561_vm4, %v2721_v19, 0.0  ;;  %v2411_v43 = vld [vmem:[%s10241_s15 + $0xc2] sm:$0xff] }
 0x180   : > { %9379 = vmatmul.msk.f32.gmra.mxu1 %vm15218_vm1, %v2442_v34  ;;  %v1998_v20 = vpop.f32.mrf.mxu3 }
 0x181   : > { %v2084_v14 = vadd.f32 %v1998_v20, %v15559_v53  ;;  %v2896_v22 = vpop.f32.mrf.mxu2  ;;  %v2279_v28 = vpop.f32.mrf.mxu0  ;;  %v15562_v53 = vld [vmem:[#allocation73_spill] sm:$0xff] }
 0x183   : > { %v2362_v0 = vadd.f32 %v2276_v13, %v2084_v14  ;;  %v2412_v14 = vld [vmem:[%s10241_s15 + $0xca] sm:$0xff] }
 0x184   : > { %9346 = vmatmul.msk.f32.gmra.mxu0 %vm15218_vm1, %v2133_v12  ;;  %v2444_v12 = vsel %vm10878_vm0, %v2412_v14, 0.0 }
 0x185   : > { %v2672_v63 = vadd.f32 %v2586_v8, %v2362_v0  ;;  %9312 = vmatmul.msk.f32.gmra.mxu3 %vm15218_vm1, %v1855_v30  ;;  %v2589_v20 = vpop.f32.mrf.mxu1  ;;  %v2722_v30 = vld [vmem:[%s10241_s15 + $0xd8] sm:$0xff]  ;;  %v15563_v0 = vld [vmem:[#allocation72_spill] sm:$0xff] }
 0x186   : > { %9414 = vmatmul.msk.f32.gmra.mxu2 %vm15218_vm1, %v2753_v52 }
 0x187   : > { %v11262_v34 = vadd.f32 %v2896_v22, %v2672_v63  ;;  %v2723_v63 = vld [vmem:[%s10241_s15 + $0xe0] sm:$0xff] }
 0x188   : > { %9380 = vmatmul.msk.f32.gmra.mxu1 %vm15218_vm1, %v2411_v43  ;;  %v2001_v4 = vpop.f32.mrf.mxu3 }
 0x189   : > { %v2085_v13 = vadd.f32 %v2001_v4, %v15562_v53  ;;  %v2282_v17 = vpop.f32.mrf.mxu0  ;;  %v2899_v15 = vpop.f32.mrf.mxu2 }
 0x18b   : > { %v2363_v8 = vadd.f32 %v2279_v28, %v2085_v13  ;;  %v15564_v13 = vld [vmem:[#allocation13_spill] sm:$0xff] }
 0x18c   : > { %9347 = vmatmul.msk.f32.gmra.mxu0 %vm15218_vm1, %v2134_v50  ;;  %vm15565_vm4 = vnez %v15564_v13 }
 0x18d   : > { %v2673_v52 = vadd.f32 %v2589_v20, %v2363_v8  ;;  %9313 = vmatmul.msk.f32.gmra.mxu3 %vm15218_vm1, %v2720_v29  ;;  %v2592_v53 = vpop.f32.mrf.mxu1  ;;  %v1857_v20 = vsel %vm15565_vm4, %v2721_v19, 0.0  ;;  %v2135_v29 = vld [vmem:[%s10241_s15 + $0xd1] sm:$0xff] }
 0x18e   : > { %9415 = vmatmul.msk.f32.gmra.mxu2 %vm15218_vm1, %v2722_v30  ;;  %v11285_v8 = vld [vmem:[%s10241_s15 + $0xd2] sm:$0xff] }
 0x18f   : > { %v11274_v22 = vadd.f32 %v2899_v15, %v2673_v52  ;;  %v2755_v15 = vsel %vm15565_vm4, %v2723_v63, 0.0  ;;  %v11296_v52 = vld [vmem:[%s10241_s15 + $0xda] sm:$0xff] }
 0x190   : > { %9381 = vmatmul.msk.f32.gmra.mxu1 %vm15218_vm1, %v2444_v12  ;;  %v2004_v43 = vpop.f32.mrf.mxu3 }
 0x191   : > { %v2086_v28 = vadd.f32 %v2004_v43, %v10906_v36  ;;  %v2285_v4 = vpop.f32.mrf.mxu0  ;;  %v2902_v50 = vpop.f32.mrf.mxu2 }
 0x193   : > { %v2364_v14 = vadd.f32 %v2282_v17, %v2086_v28  ;;  %v2136_v28 = vld [vmem:[%s10241_s15 + $0xd9] sm:$0xff] }
 0x194   : > { %9348 = vmatmul.msk.f32.gmra.mxu0 %vm15218_vm1, %v2135_v29  ;;  %v15566_v29 = vld [vmem:[#allocation39_spill] sm:$0xff] }
 0x195   : > { %v2674_v12 = vadd.f32 %v2592_v53, %v2364_v14  ;;  %9314 = vmatmul.msk.f32.gmra.mxu3 %vm15218_vm1, %v1857_v20  ;;  %v2724_v20 = vld [vmem:[%s10241_s15 + $0xe8] sm:$0xff]  ;;  %vm15567_vm4 = vnez %v15566_v29 }
 0x196   : > { %9416 = vmatmul.msk.f32.gmra.mxu2 %vm15218_vm1, %v2755_v15  ;;  %v2446_v14 = vsel %vm15567_vm4, %v11296_v52, 0.0  ;;  %v2725_v15 = vld [vmem:[%s10241_s15 + $0xf0] sm:$0xff] }
 0x197   : > { %v11290_v36 = vadd.f32 %v2902_v50, %v2674_v12  ;;  %v15568_v12 = vld [vmem:[#allocation16_spill] sm:$0xff] }
 0x198   : > { %9382 = vmatmul.msk.f32.gmra.mxu1 %vm15218_vm1, %v11285_v8  ;;  %v2007_v19 = vpop.f32.mrf.mxu3  ;;  %vm15569_vm0 = vnez %v15568_v12  ;;  %v2726_v12 = vld [vmem:[%s10241_s15 + $0xf8] sm:$0xff] }
 0x199   : > { %v2087_v17 = vadd.f32 %v2007_v19, %v10923_v40  ;;  %v2288_v43 = vpop.f32.mrf.mxu0  ;;  %v1859_v19 = vsel %vm15569_vm0, %v2723_v63, 0.0 }
 0x19b   : > { %v11299_v53 = vadd.f32 %v2285_v4, %v2087_v17  ;;  %v2137_v17 = vld [vmem:[%s10241_s15 + $0xe1] sm:$0xff] }
 0x19c   : > { %9349 = vmatmul.msk.f32.gmra.mxu0 %vm15218_vm1, %v2136_v28  ;;  %v11319_v28 = vld [vmem:[%s10241_s15 + $0xe2] sm:$0xff] }
 0x19d   : > { %9315 = vmatmul.msk.f32.gmra.mxu3 %vm15218_vm1, %v2722_v30  ;;  %v2757_v30 = vsel %vm15569_vm0, %v2725_v15, 0.0 }
 0x19e   : > { %9417 = vmatmul.msk.f32.gmra.mxu2 %vm15218_vm1, %v2724_v20 }
 0x1a0   : > { %9383 = vmatmul.msk.f32.gmra.mxu1 %vm15218_vm1, %v2446_v14  ;;  %v2010_v40 = vpop.f32.mrf.mxu3 }
 0x1a1   : > { %v2088_v4 = vadd.f32 %v2010_v40, %v10938_v11  ;;  %v2291_v50 = vpop.f32.mrf.mxu0  ;;  %v2138_v40 = vld [vmem:[%s10241_s15 + $0xe9] sm:$0xff] }
 0x1a3   : > { %v11314_v13 = vadd.f32 %v2288_v43, %v2088_v4  ;;  %v2416_v43 = vld [vmem:[%s10241_s15 + $0xea] sm:$0xff] }
 0x1a4   : > { %9350 = vmatmul.msk.f32.gmra.mxu0 %vm15218_vm1, %v2137_v17 }
 0x1a5   : > { %15570 = vst [vmem:[#allocation28_spill] sm:$0xff] %v11314_v13  ;;  %9316 = vmatmul.msk.f32.gmra.mxu3 %vm15218_vm1, %v1859_v19  ;;  %v15571_v19 = vld [vmem:[#allocation50_spill] sm:$0xff] }
 0x1a6   : > { %9418 = vmatmul.msk.f32.gmra.mxu2 %vm15218_vm1, %v2757_v30  ;;  %vm15572_vm0 = vnez %v15571_v19  ;;  %v2727_v30 = vld [vmem:[%s10241_s15 + $0x100] sm:$0xff]  ;;  %v2139_v19 = vld [vmem:[%s10241_s15 + $0xf1] sm:$0xff] }
 0x1a7   : > { %v2448_v17 = vsel %vm15572_vm0, %v2416_v43, 0.0 }
 0x1a8   : > { %9384 = vmatmul.msk.f32.gmra.mxu1 %vm15218_vm1, %v11319_v28  ;;  %v2013_v11 = vpop.f32.mrf.mxu3 }
 0x1a9   : > { %v2089_v63 = vadd.f32 %v2013_v11, %v10955_v26  ;;  %v2294_v14 = vpop.f32.mrf.mxu0 }
 0x1ab   : > { %v11329_v4 = vadd.f32 %v2291_v50, %v2089_v63  ;;  %v15573_v50 = vld [vmem:[#allocation19_spill] sm:$0xff] }
 0x1ac   : > { %9351 = vmatmul.msk.f32.gmra.mxu0 %vm15218_vm1, %v2138_v40  ;;  %vm15574_vm4 = vnez %v15573_v50  ;;  %v11348_v40 = vld [vmem:[%s10241_s15 + $0xf2] sm:$0xff] }
 0x1ad   : > { %9317 = vmatmul.msk.f32.gmra.mxu3 %vm15218_vm1, %v2724_v20  ;;  %v1861_v63 = vsel %vm15574_vm4, %v2725_v15, 0.0  ;;  %v2759_v20 = vsel %vm15574_vm4, %v2727_v30, 0.0  ;;  %vm15579_vm4 = vcmask 31744  }
 0x1ae   : > { %9419 = vmatmul.msk.f32.gmra.mxu2 %vm15218_vm1, %v2726_v12  ;;  %vm15580_vm0 = vmmov %vm15579_vm4 }
 0x1af   : > { %vm15581_vm13 = vmmov %vm15580_vm0 }
 0x1b0   : > { %9385 = vmatmul.msk.f32.gmra.mxu1 %vm15218_vm1, %v2448_v17  ;;  %v2016_v26 = vpop.f32.mrf.mxu3  ;;  %v11360_v17 = vld [vmem:[%s10241_s15 + $0xfa] sm:$0xff]  ;;  %vm15582_vm6 = vmmov %vm15580_vm0 }
 0x1b1   : > { %v2090_v11 = vadd.f32 %v2016_v26, %v10970_v21  ;;  %v2297_v13 = vpop.f32.mrf.mxu0  ;;  %v3764_v21 = vld [vmem:[%s15062_s3 + $0x18] sm:$0xff] }
 0x1b2   : > { %4119 = vmatpush.msra.mxu2 %v3764_v21  ;;  %v15577_v21 = vld [vmem:[#allocation61_spill] sm:$0xff] }
 0x1b3   : > { %v11343_v43 = vadd.f32 %v2294_v14, %v2090_v11  ;;  %v2140_v11 = vld [vmem:[%s10241_s15 + $0xf9] sm:$0xff] }
 0x1b4   : > { %9352 = vmatmul.msk.f32.gmra.mxu0 %vm15218_vm1, %v2139_v19  ;;  %v9493_v19 = vld [vmem:[%s15062_s3 + $0x28] sm:$0xff] }
 0x1b5   : > { %15575 = vst [vmem:[#allocation21_spill] sm:$0xff] %v11343_v43  ;;  %9318 = vmatmul.msk.f32.gmra.mxu3 %vm15218_vm1, %v1861_v63  ;;  %3912 = vmatpush.msra.mxu1 %v9493_v19  ;;  %v15583_v19 = vld [vmem:[#allocation26_spill] sm:$0xff] }
 0x1b6   : > { %9420 = vmatmul.msk.f32.gmra.mxu2 %vm15218_vm1, %v2759_v20  ;;  %v2728_v20 = vld [vmem:[%s10241_s15 + $0x108] sm:$0xff]  ;;  %vm15584_vm8 = vnez %v15583_v19 }
 0x1b8   : > { %9386 = vmatmul.msk.f32.gmra.mxu1 %vm15218_vm1, %v11348_v40  ;;  %v2019_v15 = vpop.f32.mrf.mxu3  ;;  %vm15578_vm1 = vnez %v15577_v21  ;;  %v1863_v21 = vsel %vm15584_vm8, %v2727_v30, 0.0 }
 0x1b9   : > { %v2091_v14 = vadd.f32 %v2019_v15, %v10987_v35  ;;  %v2300_v26 = vpop.f32.mrf.mxu0  ;;  %v2450_v50 = vsel %vm15578_vm1, %v11360_v17, 0.0  ;;  %v2729_v15 = vld [vmem:[%s10241_s15 + $0x110] sm:$0xff] }
 0x1bb   : > { %v11366_v63 = vadd.f32 %v2297_v13, %v2091_v14 }
 0x1bc   : > { %9353 = vmatmul.msk.f32.gmra.mxu0 %vm15580_vm0, %v2140_v11  ;;  %v11386_v11 = vld [vmem:[%s10241_s15 + $0x102] sm:$0xff] }
 0x1bd   : > { %15576 = vst [vmem:[#allocation22_spill] sm:$0xff] %v11366_v63  ;;  %9319 = vmatmul.msk.f32.gmra.mxu3 %vm15579_vm4, %v2726_v12  ;;  %v2141_v63 = vld [vmem:[%s10241_s15 + $0x101] sm:$0xff]  ;;  %v2761_v12 = vsel %vm15584_vm8, %v2729_v15, 0.0  ;;  %vm15585_vm4 = vmmov %vm15580_vm0 }
 0x1be   : > { %9421 = vmatmul.msk.f32.gmra.mxu2 %vm15581_vm13, %v2728_v20  ;;  %vm15587_vm13 = vmmov %vm15580_vm0 }
 0x1bf   : > { %vm15593_vm8 = vmmov %vm15580_vm0 }
 0x1c0   : > { %9387 = vmatmul.msk.f32.gmra.mxu1 %vm15582_vm6, %v2450_v50  ;;  %v2022_v35 = vpop.f32.mrf.mxu3  ;;  %vm15586_vm6 = vmmov %vm15580_vm0  ;;  %v11395_v50 = vld [vmem:[%s10241_s15 + $0x10a] sm:$0xff] }
 0x1c1   : > { %v2092_v13 = vadd.f32 %v2022_v35, %v11002_v37  ;;  %v2303_v14 = vpop.f32.mrf.mxu0  ;;  %v2142_v35 = vld [vmem:[%s10241_s15 + $0x109] sm:$0xff] }
 0x1c3   : > { %v11381_v43 = vadd.f32 %v2300_v26, %v2092_v13  ;;  %v2452_v13 = vsel %vm10871_vm10, %v11395_v50, 0.0 }
 0x1c4   : > { %9354 = vmatmul.msk.f32.gmra.mxu0 %vm15586_vm6, %v2141_v63  ;;  %vm15590_vm6 = vmmov %vm15580_vm0  ;;  %v3010_v63 = vld [vmem:[%s10241_s15 + $0x29] sm:$0xff] }
 0x1c5   : > { %9320 = vmatmul.msk.f32.gmra.mxu3 %vm15585_vm4, %v1863_v21  ;;  %v2730_v21 = vld [vmem:[%s10241_s15 + $0x118] sm:$0xff]  ;;  %vm15589_vm4 = vmmov %vm15580_vm0 }
 0x1c6   : > { %9422 = vmatmul.msk.f32.gmra.mxu2 %vm15580_vm0, %v2761_v12 }
 0x1c8   : > { %9388 = vmatmul.msk.f32.gmra.mxu1 %vm15587_vm13, %v11386_v11  ;;  %v2025_v37 = vpop.f32.mrf.mxu3  ;;  %vm15591_vm13 = vmmov %vm15580_vm0 }
 0x1c9   : > { %v2093_v30 = vadd.f32 %v2025_v37, %v11019_v27  ;;  %v2306_v26 = vpop.f32.mrf.mxu0 }
 0x1cb   : > { %v11398_v15 = vadd.f32 %v2303_v14, %v2093_v30  ;;  %v3009_v14 = vld [vmem:[%s10241_s15 + $0x21] sm:$0xff] }
 0x1cc   : > { %9355 = vmatmul.msk.f32.gmra.mxu0 %vm15590_vm6, %v2142_v35  ;;  %v3287_v30 = vld [vmem:[%s10241_s15 + $0x22] sm:$0xff]  ;;  %vm15595_vm6 = vmmov %vm15580_vm0 }
 0x1cd   : > { %9321 = vmatmul.msk.f32.gmra.mxu3 %vm15589_vm4, %v2728_v20  ;;  %vm15594_vm4 = vmmov %vm15580_vm0  ;;  %v3288_v20 = vld [vmem:[%s10241_s15 + $0x2a] sm:$0xff] }
 0x1ce   : > { %9423 = vmatmul.msk.f32.gmra.mxu2 %vm15580_vm0, %v2730_v21 }
 0x1d0   : > { %9389 = vmatmul.msk.f32.gmra.mxu1 %vm15591_vm13, %v2452_v13  ;;  %v2028_v27 = vpop.f32.mrf.mxu3  ;;  %vm15597_vm13 = vmmov %vm15580_vm0 }
 0x1d1   : > { %v2094_v12 = vadd.f32 %v2028_v27, %v11034_v55  ;;  %v2309_v37 = vpop.f32.mrf.mxu0  ;;  %v3320_v55 = vsel %vm10258_vm3, %v3288_v20, 0.0 }
 0x1d3   : > { %v11411_v19 = vadd.f32 %v2306_v26, %v2094_v12 }
 0x1d4   : > { %9460 = vmatmul.msk.f32.vlgmr.msra.gmra.mxu0 %vm15594_vm4, %v3287_v30  ;;  %v3011_v30 = vld [vmem:[%s10241_s15 + $0x31] sm:$0xff]  ;;  %vm15599_vm4 = vmmov %vm15580_vm0 }
 0x1d5   : > { %15592 = vst [vmem:[#allocation24_spill] sm:$0xff] %v11411_v19  ;;  %9426 = vmatmul.msk.f32.vlgmr.msra.gmra.mxu3 %vm15593_vm8, %v3009_v14  ;;  %v3289_v19 = vld [vmem:[%s10241_s15 + $0x32] sm:$0xff]  ;;  %vm15596_vm8 = vmmov %vm15580_vm0 }
 0x1d8   : > { %v2031_v35 = vpop.f32.mrf.mxu3 }
 0x1d9   : > { %v2095_v21 = vadd.f32 %v2031_v35, %v11051_v38  ;;  %v2312_v13 = vpop.f32.mrf.mxu0 }
 0x1db   : > { %v11420_v27 = vadd.f32 %v2309_v37, %v2095_v21  ;;  %v3290_v37 = vld [vmem:[%s10241_s15 + $0x3a] sm:$0xff] }
 0x1dc   : > { %9461 = vmatmul.msk.f32.gmra.mxu0 %vm15580_vm0, %v3320_v55  ;;  %v3012_v21 = vld [vmem:[%s10241_s15 + $0x39] sm:$0xff] }
 0x1dd   : > { %9427 = vmatmul.msk.f32.gmra.mxu3 %vm15595_vm6, %v3010_v63  ;;  %vm15600_vm6 = vmmov %vm15580_vm0 }
 0x1e0   : > { %v2034_v26 = vpop.f32.mrf.mxu3 }
 0x1e1   : > { %v2096_v12 = vadd.f32 %v2034_v26, %v11066_v44  ;;  %v2315_v14 = vpop.f32.mrf.mxu0  ;;  %v3322_v44 = vsel %vm10297_vm5, %v3290_v37, 0.0  ;;  %v3292_v37 = vld [vmem:[%s10241_s15 + $0x4a] sm:$0xff] }
 0x1e3   : > { %v11427_v38 = vadd.f32 %v2312_v13, %v2096_v12  ;;  %v3013_v12 = vld [vmem:[%s10241_s15 + $0x41] sm:$0xff] }
 0x1e4   : > { %9462 = vmatmul.msk.f32.gmra.mxu0 %vm15597_vm13, %v3289_v19  ;;  %vm15604_vm13 = vmmov %vm15580_vm0 }
 0x1e5   : > { %9428 = vmatmul.msk.f32.gmra.mxu3 %vm15596_vm8, %v3011_v30  ;;  %v3291_v30 = vld [vmem:[%s10241_s15 + $0x42] sm:$0xff]  ;;  %vm15602_vm8 = vmmov %vm15580_vm0 }
 0x1e8   : > { %v2037_v20 = vpop.f32.mrf.mxu3 }
 0x1e9   : > { %v2097_v63 = vadd.f32 %v2037_v20, %v11083_v45  ;;  %v2318_v35 = vpop.f32.mrf.mxu0  ;;  %v11445_v20 = vpop.f32.mrf.mxu1 }
 0x1eb   : > { %v11436_v55 = vadd.f32 %v2315_v14, %v2097_v63  ;;  %v3763_v14 = vld [vmem:[%s15062_s3 + $0x10] sm:$0xff] }
 0x1ec   : > { %9463 = vmatmul.msk.f32.gmra.mxu0 %vm15600_vm6, %v3322_v44  ;;  %4120 = vmatpush.msra.mxu2 %v3763_v14  ;;  %v3014_v44 = vld [vmem:[%s10241_s15 + $0x49] sm:$0xff]  ;;  %vm15607_vm6 = vmmov %vm15580_vm0 }
 0x1ed   : > { %15598 = vst [vmem:[#allocation25_spill] sm:$0xff] %v11436_v55  ;;  %9429 = vmatmul.msk.f32.gmra.mxu3 %vm15599_vm4, %v3012_v21  ;;  %vm15605_vm4 = vmmov %vm15580_vm0 }
 0x1f0   : > { %v2040_v13 = vpop.f32.mrf.mxu3 }
 0x1f1   : > { %v2098_v19 = vadd.f32 %v2040_v13, %v11098_v5  ;;  %v2321_v26 = vpop.f32.mrf.mxu0  ;;  %v3324_v13 = vsel %vm10345_vm7, %v3292_v37, 0.0 }
 0x1f3   : > { %v11443_v45 = vadd.f32 %v2318_v35, %v2098_v19  ;;  %v9492_v35 = vld [vmem:[%s15062_s3 + $0x20] sm:$0xff] }
 0x1f4   : > { %9464 = vmatmul.msk.f32.gmra.mxu0 %vm15602_vm8, %v3291_v30  ;;  %3913 = vmatpush.msra.mxu1 %v9492_v35  ;;  %vm15609_vm8 = vmmov %vm15580_vm0 }
 0x1f5   : > { %15601 = vst [vmem:[#allocation34_spill] sm:$0xff] %v11443_v45  ;;  %9430 = vmatmul.msk.f32.gmra.mxu3 %vm15580_vm0, %v3013_v12  ;;  %v11464_v12 = vpop.f32.mrf.mxu2 }
 0x1f8   : > { %v2043_v63 = vpop.f32.mrf.mxu3 }
 0x1f9   : > { %v2099_v5 = vadd.f32 %v2043_v63, %v11118_v2  ;;  %v2324_v21 = vpop.f32.mrf.mxu0  ;;  %v11466_v2 = vpop.f32.mrf.mxu1 }
 0x1fb   : > { %v11460_v19 = vadd.f32 %v2321_v26, %v2099_v5  ;;  %v3294_v26 = vld [vmem:[%s10241_s15 + $0x5a] sm:$0xff] }
 0x1fc   : > { %9465 = vmatmul.msk.f32.gmra.mxu0 %vm15605_vm4, %v3324_v13  ;;  %v3016_v13 = vld [vmem:[%s10241_s15 + $0x59] sm:$0xff]  ;;  %vm15612_vm4 = vmmov %vm15580_vm0 }
 0x1fd   : > { %15603 = vst [vmem:[#allocation36_spill] sm:$0xff] %v11460_v19  ;;  %9431 = vmatmul.msk.f32.gmra.mxu3 %vm15604_vm13, %v3014_v44  ;;  %v11476_v37 = vpop.f32.mrf.mxu2  ;;  %vm15610_vm13 = vmmov %vm15580_vm0 }
 0x200   : > { %v2046_v30 = vpop.f32.mrf.mxu3 }
 0x201   : > { %v2100_v14 = vadd.f32 %v2046_v30, %v11133_v54  ;;  %v2327_v63 = vpop.f32.mrf.mxu0  ;;  %v11478_v35 = vpop.f32.mrf.mxu1 }
 0x203   : > { %v11471_v45 = vadd.f32 %v2324_v21, %v2100_v14  ;;  %v3326_v21 = vsel %vm10394_vm9, %v3294_v26, 0.0 }
 0x204   : > { %9466 = vmatmul.msk.f32.gmra.mxu0 %vm15580_vm0, %v3293_v48 }
 0x205   : > { %15606 = vst [vmem:[#allocation29_spill] sm:$0xff] %v11471_v45  ;;  %9432 = vmatmul.msk.f32.gmra.mxu3 %vm15607_vm6, %v3015_v32  ;;  %v11489_v14 = vpop.f32.mrf.mxu2  ;;  %vm15613_vm6 = vmmov %vm15580_vm0 }
 0x208   : > { %v2049_v5 = vpop.f32.mrf.mxu3 }
 0x209   : > { %v2101_v44 = vadd.f32 %v2049_v5, %v11150_v61  ;;  %v2330_v54 = vpop.f32.mrf.mxu0  ;;  %v3017_v61 = vld [vmem:[%s10241_s15 + $0x61] sm:$0xff]  ;;  %v11493_v19 = vpop.f32.mrf.mxu1 }
 0x20a   : > { %v3295_v5 = vld [vmem:[%s10241_s15 + $0x62] sm:$0xff] }
 0x20b   : > { %v11484_v30 = vadd.f32 %v2327_v63, %v2101_v44  ;;  %v3296_v63 = vld [vmem:[%s10241_s15 + $0x6a] sm:$0xff] }
 0x20c   : > { %9467 = vmatmul.msk.f32.gmra.mxu0 %vm15610_vm13, %v3326_v21  ;;  %v3328_v21 = vsel %vm10449_vm12, %v3296_v63, 0.0  ;;  %vm15617_vm13 = vmmov %vm15580_vm0  ;;  %vm15678_vm12 = vcmask 31744  }
 0x20d   : > { %15608 = vst [vmem:[#allocation30_spill] sm:$0xff] %v11484_v30  ;;  %9433 = vmatmul.msk.f32.gmra.mxu3 %vm15609_vm8, %v3016_v13  ;;  %v3018_v13 = vld [vmem:[%s10241_s15 + $0x69] sm:$0xff]  ;;  %vm15615_vm8 = vmmov %vm15580_vm0  ;;  %v3028_v30 = vld [vmem:[%s10241_s15 + $0xb9] sm:$0xff] }
 0x210   : > { %v2052_v32 = vpop.f32.mrf.mxu3 }
 0x211   : > { %v2102_v48 = vadd.f32 %v2052_v32, %v11165_v51  ;;  %v2333_v45 = vpop.f32.mrf.mxu0 }
 0x213   : > { %v11495_v55 = vadd.f32 %v2330_v54, %v2102_v48  ;;  %v11506_v54 = vpop.f32.mrf.mxu2  ;;  %v11508_v48 = vpop.f32.mrf.mxu1 }
 0x214   : > { %9468 = vmatmul.msk.f32.gmra.mxu0 %vm15613_vm6, %v3295_v5  ;;  %vm15240_vm6 = vcmask 261120  }
 0x215   : > { %15611 = vst [vmem:[#allocation32_spill] sm:$0xff] %v11495_v55  ;;  %9434 = vmatmul.msk.f32.gmra.mxu3 %vm15612_vm4, %v3017_v61  ;;  %vm15618_vm4 = vmmov %vm15580_vm0 }
 0x218   : > { %v2055_v26 = vpop.f32.mrf.mxu3 }
 0x219   : > { %v2103_v44 = vadd.f32 %v2055_v26, %v11049_v58  ;;  %v2336_v51 = vpop.f32.mrf.mxu0  ;;  %v3019_v26 = vld [vmem:[%s10241_s15 + $0x71] sm:$0xff] }
 0x21b   : > { %v11504_v32 = vadd.f32 %v2333_v45, %v2103_v44  ;;  %v11519_v45 = vpop.f32.mrf.mxu2  ;;  %v11521_v63 = vpop.f32.mrf.mxu1  ;;  %v3298_v44 = vld [vmem:[%s10241_s15 + $0x7a] sm:$0xff] }
 0x21c   : > { %9469 = vmatmul.msk.f32.gmra.mxu0 %vm15615_vm8, %v3328_v21  ;;  %vm15620_vm8 = vmmov %vm15580_vm0 }
 0x21d   : > { %15614 = vst [vmem:[#allocation33_spill] sm:$0xff] %v11504_v32  ;;  %9435 = vmatmul.msk.f32.gmra.mxu3 %vm15580_vm0, %v3018_v13 }
 0x220   : > { %v2058_v61 = vpop.f32.mrf.mxu3 }
 0x221   : > { %v2104_v58 = vadd.f32 %v2058_v61, %v11064_v6  ;;  %v2339_v5 = vpop.f32.mrf.mxu0  ;;  %v3020_v6 = vld [vmem:[%s10241_s15 + $0x79] sm:$0xff]  ;;  %v3330_v61 = vsel %vm10504_vm15, %v3298_v44, 0.0  ;;  %vm15666_vm15 = vcmask 31744  }
 0x223   : > { %v11515_v24 = vadd.f32 %v2336_v51, %v2104_v58  ;;  %v15237_v51 = vmov 0.0   ;;  %v11554_v44 = vpop.f32.mrf.mxu1 }
 0x224   : > { %9470 = vmatmul.msk.f32.gmra.mxu0 %vm15618_vm4, %v3297_v1  ;;  %763 = vst.msk [vmem:[#allocation2] sm:$0xff] %vm15240_vm6, %v15237_v51  ;;  %v9563_v1 = vld [vmem:[%s15062_s3 + $0x58] sm:$0xff]  ;;  %vm15624_vm4 = vmmov %vm15580_vm0 }
 0x225   : > { %15616 = vst [vmem:[#allocation44_spill] sm:$0xff] %v11515_v24  ;;  %9436 = vmatmul.msk.f32.gmra.mxu3 %vm15617_vm13, %v3019_v26  ;;  %vm15623_vm13 = vmmov %vm15580_vm0 }
 0x226   : > { %764 = vst.msk [vmem:[#allocation2 + $0x8] sm:$0xff] %vm15240_vm6, %v15237_v51  ;;  %4397 = vmatpush.msrb.mxu3 %v9563_v1  ;;  %v3299_v1 = vld [vmem:[%s10241_s15 + $0x82] sm:$0xff] }
 0x227   : > { %765 = vst.msk [vmem:[#allocation2 + $0x10] sm:$0xff] %vm15240_vm6, %v15237_v51 }
 0x228   : > { %v2061_v13 = vpop.f32.mrf.mxu3  ;;  %766 = vst.msk [vmem:[#allocation2 + $0x18] sm:$0xff] %vm15240_vm6, %v15237_v51 }
 0x229   : > { %v2105_v21 = vadd.f32 %v2061_v13, %v11081_v46  ;;  %v2342_v32 = vpop.f32.mrf.mxu0  ;;  %767 = vst.msk [vmem:[#allocation2 + $0x20] sm:$0xff] %vm15240_vm6, %v15237_v51  ;;  %v3762_v46 = vld [vmem:[%s15062_s3 + $0x8] sm:$0xff] }
 0x22a   : > { %768 = vst.msk [vmem:[#allocation2 + $0x28] sm:$0xff] %vm15240_vm6, %v15237_v51  ;;  %4121 = vmatpush.msra.mxu2 %v3762_v46 }
 0x22b   : > { %v11530_v58 = vadd.f32 %v2339_v5, %v2105_v21  ;;  %v11550_v5 = vpop.f32.mrf.mxu2  ;;  %769 = vst.msk [vmem:[#allocation2 + $0x30] sm:$0xff] %vm15240_vm6, %v15237_v51  ;;  %v3761_v21 = vld [vmem:[%s15062_s3] sm:$0xff] }
 0x22c   : > { %9471 = vmatmul.msk.f32.gmra.mxu0 %vm15620_vm8, %v3330_v61  ;;  %770 = vst.msk [vmem:[#allocation2 + $0x38] sm:$0xff] %vm15240_vm6, %v15237_v51  ;;  %4122 = vmatpush.msra.mxu2 %v3761_v21  ;;  %v3022_v21 = vld [vmem:[%s10241_s15 + $0x89] sm:$0xff]  ;;  %vm15626_vm8 = vmmov %vm15580_vm0 }
 0x22d   : > { %15619 = vst [vmem:[#allocation46_spill] sm:$0xff] %v11530_v58  ;;  %9437 = vmatmul.msk.f32.gmra.mxu3 %vm15580_vm0, %v3020_v6  ;;  %v3697_v6 = vld [vmem:[#allocation2] sm:$0xff] }
 0x22e   : > { %v3729_v58 = vsel %vm10243_vm2, %v3697_v6, 0.0  ;;  %771 = vst.msk [vmem:[#allocation2 + $0x40] sm:$0xff] %vm15240_vm6, %v15237_v51 }
 0x22f   : > { %9528 = vmatmul.msk.f32.vlgmr.msra.gmra.mxu2 %vm15240_vm6, %v3729_v58  ;;  %772 = vst.msk [vmem:[#allocation2 + $0x48] sm:$0xff] %vm15240_vm6, %v15237_v51 }
 0x230   : > { %v2064_v26 = vpop.f32.mrf.mxu3  ;;  %773 = vst.msk [vmem:[#allocation2 + $0x50] sm:$0xff] %vm15240_vm6, %v15237_v51 }
 0x231   : > { %v2106_v13 = vadd.f32 %v2064_v26, %v11096_v31  ;;  %v2345_v61 = vpop.f32.mrf.mxu0  ;;  %774 = vst.msk [vmem:[#allocation2 + $0x58] sm:$0xff] %vm15240_vm6, %v15237_v51 }
 0x232   : > { %775 = vst.msk [vmem:[#allocation2 + $0x60] sm:$0xff] %vm15240_vm6, %v15237_v51 }
 0x233   : > { %v11568_v31 = vadd.f32 %v2342_v32, %v2106_v13  ;;  %v3300_v32 = vld [vmem:[%s10241_s15 + $0x8a] sm:$0xff]  ;;  %776 = vst.msk [vmem:[#allocation2 + $0x68] sm:$0xff] %vm15240_vm6, %v15237_v51 }
 0x234   : > { %9472 = vmatmul.msk.f32.gmra.mxu0 %vm15624_vm4, %v3299_v1  ;;  %777 = vst.msk [vmem:[#allocation2 + $0x70] sm:$0xff] %vm15240_vm6, %v15237_v51  ;;  %v3332_v6 = vsel %vm15517_vm14, %v3300_v32, 0.0  ;;  %v11596_v1 = vpop.f32.mrf.mxu1  ;;  %vm15629_vm4 = vmmov %vm15580_vm0 }
 0x235   : > { %15622 = vst [vmem:[#allocation37_spill] sm:$0xff] %v11568_v31  ;;  %9438 = vmatmul.msk.f32.gmra.mxu3 %vm15623_vm13, %v3021_v18  ;;  %v11589_v18 = vpop.f32.mrf.mxu2  ;;  %vm15628_vm13 = vmmov %vm15580_vm0 }
 0x236   : > { %778 = vst.msk [vmem:[#allocation2 + $0x78] sm:$0xff] %vm15240_vm6, %v15237_v51 }
 0x237   : > { %779 = vst.msk [vmem:[#allocation2 + $0x80] sm:$0xff] %vm15240_vm6, %v15237_v51 }
 0x238   : > { %v2067_v58 = vpop.f32.mrf.mxu3  ;;  %780 = vst.msk [vmem:[#allocation2 + $0x88] sm:$0xff] %vm15240_vm6, %v15237_v51 }
 0x239   : > { %v2107_v26 = vadd.f32 %v2067_v58, %v11113_v42  ;;  %v2348_v13 = vpop.f32.mrf.mxu0  ;;  %781 = vst.msk [vmem:[#allocation2 + $0x90] sm:$0xff] %vm15240_vm6, %v15237_v51  ;;  %v3023_v58 = vld [vmem:[%s10241_s15 + $0x91] sm:$0xff] }
 0x23a   : > { %782 = vst.msk [vmem:[#allocation2 + $0x98] sm:$0xff] %vm15240_vm6, %v15237_v51 }
 0x23b   : > { %v11598_v31 = vadd.f32 %v2345_v61, %v2107_v26  ;;  %783 = vst.msk [vmem:[#allocation2 + $0xa0] sm:$0xff] %vm15240_vm6, %v15237_v51  ;;  %v3301_v26 = vld [vmem:[%s10241_s15 + $0x92] sm:$0xff] }
 0x23c   : > { %9473 = vmatmul.msk.f32.gmra.mxu0 %vm15626_vm8, %v3332_v6  ;;  %784 = vst.msk [vmem:[#allocation2 + $0xa8] sm:$0xff] %vm15240_vm6, %v15237_v51  ;;  %vm15631_vm8 = vmmov %vm15580_vm0 }
 0x23d   : > { %15625 = vst [vmem:[#allocation38_spill] sm:$0xff] %v11598_v31  ;;  %9439 = vmatmul.msk.f32.gmra.mxu3 %vm15580_vm0, %v3022_v21  ;;  %v11625_v6 = vpop.f32.mrf.mxu2 }
 0x23e   : > { %785 = vst.msk [vmem:[#allocation2 + $0xb0] sm:$0xff] %vm15240_vm6, %v15237_v51 }
 0x23f   : > { %786 = vst.msk [vmem:[#allocation2 + $0xb8] sm:$0xff] %vm15240_vm6, %v15237_v51 }
 0x240   : > { %v2070_v42 = vpop.f32.mrf.mxu3  ;;  %787 = vst.msk [vmem:[#allocation2 + $0xc0] sm:$0xff] %vm15240_vm6, %v15237_v51 }
 0x241   : > { %v2108_v61 = vadd.f32 %v2070_v42, %v11131_v49  ;;  %v2351_v32 = vpop.f32.mrf.mxu0  ;;  %788 = vst.msk [vmem:[#allocation2 + $0xc8] sm:$0xff] %vm15240_vm6, %v15237_v51  ;;  %v11629_v49 = vpop.f32.mrf.mxu1 }
 0x242   : > { %789 = vst.msk [vmem:[#allocation2 + $0xd0] sm:$0xff] %vm15240_vm6, %v15237_v51 }
 0x243   : > { %v11621_v21 = vadd.f32 %v2348_v13, %v2108_v61  ;;  %790 = vst.msk [vmem:[#allocation2 + $0xd8] sm:$0xff] %vm15240_vm6, %v15237_v51  ;;  %v3302_v13 = vld [vmem:[%s10241_s15 + $0x9a] sm:$0xff] }
 0x244   : > { %9474 = vmatmul.msk.f32.gmra.mxu0 %vm15629_vm4, %v3301_v26  ;;  %791 = vst.msk [vmem:[#allocation2 + $0xe0] sm:$0xff] %vm15240_vm6, %v15237_v51  ;;  %vm15634_vm4 = vmmov %vm15580_vm0 }
 0x245   : > { %15627 = vst [vmem:[#allocation41_spill] sm:$0xff] %v11621_v21  ;;  %9440 = vmatmul.msk.f32.gmra.mxu3 %vm15628_vm13, %v3023_v58  ;;  %v3765_v58 = vld [vmem:[#allocation2 + $0x1] sm:$0xff]  ;;  %v3334_v21 = vsel %vm15527_vm11, %v3302_v13, 0.0  ;;  %vm15633_vm13 = vmmov %vm15580_vm0 }
 0x246   : > { %792 = vst.msk [vmem:[#allocation2 + $0xe8] sm:$0xff] %vm15240_vm6, %v15237_v51  ;;  %9496 = vmatmul.msk.f32.vlgmr.msra.gmra.mxu1 %vm15240_vm6, %v3765_v58 }
 0x247   : > { %793 = vst.msk [vmem:[#allocation2 + $0xf0] sm:$0xff] %vm15240_vm6, %v15237_v51 }
 0x248   : > { %v2073_v42 = vpop.f32.mrf.mxu3  ;;  %794 = vst.msk [vmem:[#allocation2 + $0xf8] sm:$0xff] %vm15240_vm6, %v15237_v51 }
 0x249   : > { %v2109_v61 = vadd.f32 %v2073_v42, %v11148_v47  ;;  %v2354_v26 = vpop.f32.mrf.mxu0  ;;  %795 = vst.msk [vmem:[#allocation2 + $0x100] sm:$0xff] %vm15240_vm6, %v15237_v51  ;;  %v3698_v47 = vld [vmem:[#allocation2 + $0x8] sm:$0xff]  ;;  %v11666_v13 = vpop.f32.mrf.mxu1 }
 0x24a   : > { %796 = vst.msk [vmem:[#allocation2 + $0x108] sm:$0xff] %vm15240_vm6, %v15237_v51  ;;  %9529 = vmatmul.msk.f32.gmra.mxu2 %vm15240_vm6, %v3698_v47  ;;  %v3025_v47 = vld [vmem:[%s10241_s15 + $0xa1] sm:$0xff] }
 0x24b   : > { %v11651_v31 = vadd.f32 %v2351_v32, %v2109_v61  ;;  %797 = vst.msk [vmem:[#allocation2 + $0x110] sm:$0xff] %vm15240_vm6, %v15237_v51  ;;  %v11662_v32 = vpop.f32.mrf.mxu2  ;;  %v3766_v61 = vld [vmem:[#allocation2 + $0x9] sm:$0xff] }
 0x24c   : > { %9475 = vmatmul.msk.f32.gmra.mxu0 %vm15631_vm8, %v3334_v21  ;;  %798 = vst.msk [vmem:[#allocation2 + $0x118] sm:$0xff] %vm15240_vm6, %v15237_v51  ;;  %v9599_v21 = vld [vmem:[%s15062_s3 + $0x78] sm:$0xff]  ;;  %vm15636_vm8 = vmmov %vm15634_vm4 }
 0x24d   : > { %15630 = vst [vmem:[#allocation43_spill] sm:$0xff] %v11651_v31  ;;  %9441 = vmatmul.msk.f32.gmra.mxu3 %vm15580_vm0, %v3024_v10  ;;  %4707 = vmatpush.msrb.mxu0 %v9599_v21  ;;  %vm15635_vm0 = vnez %v15537_v62  ;;  %v3305_v31 = vld [vmem:[%s10241_s15 + $0xb2] sm:$0xff] }
 0x24e   : > { %801 = vst.msk [vmem:[#allocation3] sm:$0xff] %vm15240_vm6, %v15237_v51  ;;  %9497 = vmatmul.msk.f32.gmra.mxu1 %vm15240_vm6, %v3766_v61 }
 0x24f   : > { %802 = vst.msk [vmem:[#allocation3 + $0x8] sm:$0xff] %vm15240_vm6, %v15237_v51 }
 0x250   : > { %v2076_v42 = vpop.f32.mrf.mxu3  ;;  %803 = vst.msk [vmem:[#allocation3 + $0x10] sm:$0xff] %vm15240_vm6, %v15237_v51 }
 0x251   : > { %v2110_v10 = vadd.f32 %v2076_v42, %v11163_v33  ;;  %804 = vst.msk [vmem:[#allocation3 + $0x18] sm:$0xff] %vm15240_vm6, %v15237_v51  ;;  %v3469_v58 = vpop.f32.mrf.mxu0  ;;  %v9635_v33 = vld [vmem:[%s15062_s3 + $0x98] sm:$0xff]  ;;  %v11705_v61 = vpop.f32.mrf.mxu1 }
 0x252   : > { %805 = vst.msk [vmem:[#allocation3 + $0x20] sm:$0xff] %vm15240_vm6, %v15237_v51  ;;  %4985 = vmatpush.msrb.mxu1 %v9635_v33 }
 0x253   : > { %806 = vst.msk [vmem:[#allocation3 + $0x28] sm:$0xff] %vm15240_vm6, %v15237_v51  ;;  %v11688_v42 = vadd.f32 %v2354_v26, %v2110_v10  ;;  %v3304_v26 = vld [vmem:[%s10241_s15 + $0xaa] sm:$0xff]  ;;  %v11701_v10 = vpop.f32.mrf.mxu2 }
 0x254   : > { %807 = vst.msk [vmem:[#allocation3 + $0x30] sm:$0xff] %vm15240_vm6, %v15237_v51  ;;  %9476 = vmatmul.msk.f32.gmra.mxu0 %vm15634_vm4, %v3303_v7  ;;  %v3336_v33 = vsel %vm15635_vm0, %v3304_v26, 0.0 }
 0x255   : > { %15632 = vst [vmem:[#allocation55_spill] sm:$0xff] %v11688_v42  ;;  %9442 = vmatmul.msk.f32.gmra.mxu3 %vm15633_vm13, %v3025_v47  ;;  %v3026_v47 = vld [vmem:[%s10241_s15 + $0xa9] sm:$0xff]  ;;  %vm15637_vm13 = vmmov %vm15634_vm4  ;;  %v3027_v42 = vld [vmem:[%s10241_s15 + $0xb1] sm:$0xff] }
 0x256   : > { %808 = vst.msk [vmem:[#allocation3 + $0x38] sm:$0xff] %vm15240_vm6, %v15237_v51 }
 0x257   : > { %809 = vst.msk [vmem:[#allocation3 + $0x40] sm:$0xff] %vm15240_vm6, %v15237_v51 }
 0x258   : > { %810 = vst.msk [vmem:[#allocation3 + $0x48] sm:$0xff] %vm15240_vm6, %v15237_v51  ;;  %v3159_v21 = vpop.f32.mrf.mxu3 }
 0x259   : > { %811 = vst.msk [vmem:[#allocation3 + $0x50] sm:$0xff] %vm15240_vm6, %v15237_v51  ;;  %v3472_v7 = vpop.f32.mrf.mxu0  ;;  %v11737_v24 = vpop.f32.mrf.mxu1 }
 0x25a   : > { %812 = vst.msk [vmem:[#allocation3 + $0x58] sm:$0xff] %vm15240_vm6, %v15237_v51 }
 0x25b   : > { %813 = vst.msk [vmem:[#allocation3 + $0x60] sm:$0xff] %vm15240_vm6, %v15237_v51  ;;  %v11730_v62 = vpop.f32.mrf.mxu2 }
 0x25c   : > { %814 = vst.msk [vmem:[#allocation3 + $0x68] sm:$0xff] %vm15240_vm6, %v15237_v51  ;;  %9477 = vmatmul.msk.f32.gmra.mxu0 %vm15637_vm13, %v3336_v33  ;;  %vm15641_vm13 = vnez %v15549_v9 }
 0x25d   : > { %815 = vst.msk [vmem:[#allocation3 + $0x70] sm:$0xff] %vm15240_vm6, %v15237_v51  ;;  %9443 = vmatmul.msk.f32.gmra.mxu3 %vm15636_vm8, %v3026_v47  ;;  %v3255_v47 = vadd.f32 %v3159_v21, %v11189_v23  ;;  %vm15640_vm8 = vmmov %vm15634_vm4  ;;  %v11753_v21 = vld [vmem:[%s15061_s2] ss:$0 sm:$0xff] }
 0x25e   : > { %816 = vst.msk [vmem:[#allocation3 + $0x78] sm:$0xff] %vm15240_vm6, %v15237_v51 }
 0x25f   : > { %817 = vst.msk [vmem:[#allocation3 + $0x80] sm:$0xff] %vm15240_vm6, %v15237_v51  ;;  %v3565_v23 = vadd.f32 %v3469_v58, %v3255_v47 }
 0x260   : > { %818 = vst.msk [vmem:[#allocation3 + $0x88] sm:$0xff] %vm15240_vm6, %v15237_v51  ;;  %v3162_v26 = vpop.f32.mrf.mxu3 }
 0x261   : > { %819 = vst.msk [vmem:[#allocation3 + $0x90] sm:$0xff] %vm15240_vm6, %v15237_v51  ;;  %v3475_v33 = vpop.f32.mrf.mxu0  ;;  %v3256_v55 = vadd.f32 %v3162_v26, %v11203_v60  ;;  %v3306_v26 = vld [vmem:[%s10241_s15 + $0xba] sm:$0xff]  ;;  %v3601_v58 = vadd.f32 %v11753_v21, %v3565_v23 }
 0x262   : > { %820 = vst.msk [vmem:[#allocation3 + $0x98] sm:$0xff] %vm15240_vm6, %v15237_v51 }
 0x263   : > { %15638 = vst [vmem:[#allocation57_spill] sm:$0xff] %v11730_v62  ;;  %v3566_v60 = vadd.f32 %v3472_v7, %v3256_v55  ;;  %v3338_v55 = vsel %vm15641_vm13, %v3306_v26, 0.0  ;;  %v11772_v62 = vpop.f32.mrf.mxu2  ;;  %vm15647_vm13 = vcmask 31744  }
 0x264   : > { %821 = vst.msk [vmem:[#allocation3 + $0xa0] sm:$0xff] %vm15240_vm6, %v15237_v51  ;;  %9478 = vmatmul.msk.f32.gmra.mxu0 %vm15640_vm8, %v3305_v31  ;;  %vm15643_vm8 = vmmov %vm15634_vm4 }
 0x265   : > { %15639 = vst [vmem:[#allocation48_spill] sm:$0xff] %v11737_v24  ;;  %9444 = vmatmul.msk.f32.gmra.mxu3 %vm15634_vm4, %v3027_v42  ;;  %v3602_v7 = vadd.f32 %v11753_v21, %v3566_v60  ;;  %vm15648_vm0 = vmmov %vm15647_vm13 }
 0x266   : > { %822 = vst.msk [vmem:[#allocation3 + $0xa8] sm:$0xff] %vm15240_vm6, %v15237_v51 }
 0x267   : > { %823 = vst.msk [vmem:[#allocation3 + $0xb0] sm:$0xff] %vm15240_vm6, %v15237_v51  ;;  %v3634_v60 = vmax.f32 %v3602_v7, 0.0 }
 0x268   : > { %824 = vst.msk [vmem:[#allocation3 + $0xb8] sm:$0xff] %vm15240_vm6, %v15237_v51  ;;  %v3165_v42 = vpop.f32.mrf.mxu3 }
 0x269   : > { %825 = vst.msk [vmem:[#allocation3 + $0xc0] sm:$0xff] %vm15240_vm6, %v15237_v51  ;;  %v3257_v31 = vadd.f32 %v3165_v42, %v11217_v59  ;;  %v3478_v47 = vpop.f32.mrf.mxu0  ;;  %v11776_v59 = vpop.f32.mrf.mxu1 }
 0x26a   : > { %826 = vst.msk [vmem:[#allocation3 + $0xc8] sm:$0xff] %vm15240_vm6, %v15237_v51 }
 0x26b   : > { %827 = vst.msk [vmem:[#allocation3 + $0xd0] sm:$0xff] %vm15240_vm6, %v15237_v51  ;;  %v3567_v24 = vadd.f32 %v3475_v33, %v3257_v31  ;;  %v3633_v33 = vmax.f32 %v3601_v58, 0.0  ;;  %v3029_v31 = vld [vmem:[%s10241_s15 + $0xc1] sm:$0xff] }
 0x26c   : > { %828 = vst.msk [vmem:[#allocation3 + $0xd8] sm:$0xff] %vm15240_vm6, %v15237_v51  ;;  %9479 = vmatmul.msk.f32.gmra.mxu0 %vm15643_vm8, %v3338_v55  ;;  %v3307_v58 = vld [vmem:[%s10241_s15 + $0xc2] sm:$0xff]  ;;  %vm15644_vm8 = vmmov %vm15634_vm4 }
 0x26d   : > { %829 = vst.msk [vmem:[#allocation3 + $0xe0] sm:$0xff] %vm15240_vm6, %v15237_v51  ;;  %v3603_v23 = vadd.f32 %v11753_v21, %v3567_v24  ;;  %9445 = vmatmul.msk.f32.gmra.mxu3 %vm15634_vm4, %v3028_v30 }
 0x26e   : > { %830 = vst.msk [vmem:[#allocation3 + $0xe8] sm:$0xff] %vm15240_vm6, %v15237_v51 }
 0x26f   : > { %831 = vst.msk [vmem:[#allocation3 + $0xf0] sm:$0xff] %vm15240_vm6, %v15237_v51  ;;  %v3635_v26 = vmax.f32 %v3603_v23, 0.0  ;;  %v11800_v23 = vpop.f32.mrf.mxu2 }
 0x270   : > { %15642 = vst [vmem:[#allocation49_spill] sm:$0xff] %v11776_v59  ;;  %v3168_v42 = vpop.f32.mrf.mxu3 }
 0x271   : > { %832 = vst.msk [vmem:[#allocation3 + $0xf8] sm:$0xff] %vm15240_vm6, %v15237_v51  ;;  %v3258_v24 = vadd.f32 %v3168_v42, %v11231_v56  ;;  %v3481_v30 = vpop.f32.mrf.mxu0  ;;  %v11802_v56 = vpop.f32.mrf.mxu1  ;;  %v3308_v42 = vld [vmem:[%s10241_s15 + $0xca] sm:$0xff] }
 0x272   : > { %833 = vst.msk [vmem:[#allocation3 + $0x100] sm:$0xff] %vm15240_vm6, %v15237_v51 }
 0x273   : > { %834 = vst.msk [vmem:[#allocation3 + $0x108] sm:$0xff] %vm15240_vm6, %v15237_v51  ;;  %v3568_v55 = vadd.f32 %v3478_v47, %v3258_v24  ;;  %v3030_v24 = vld [vmem:[%s10241_s15 + $0xc9] sm:$0xff] }
 0x274   : > { %835 = vst.msk [vmem:[#allocation3 + $0x110] sm:$0xff] %vm15240_vm6, %v15237_v51  ;;  %9480 = vmatmul.msk.f32.gmra.mxu0 %vm15644_vm8, %v3307_v58  ;;  %vm15646_vm8 = vnez %v15557_v39 }
 0x275   : > { %836 = vst.msk [vmem:[#allocation3 + $0x118] sm:$0xff] %vm15240_vm6, %v15237_v51  ;;  %v3604_v7 = vadd.f32 %v11753_v21, %v3568_v55  ;;  %9446 = vmatmul.msk.f32.gmra.mxu3 %vm15634_vm4, %v3029_v31  ;;  %vm15645_vm4 = vnez %v15373_v25  ;;  %v3340_v31 = vsel %vm15646_vm8, %v3308_v42, 0.0  ;;  %v9562_v55 = vld [vmem:[%s15062_s3 + $0x50] sm:$0xff]  ;;  %vm15651_vm8 = vcmask 261120  }
 0x276   : > { %3665 = vst.msk [vmem:[#allocation2 + $0x11] sm:$0xff] %vm15240_vm6, %v3633_v33  ;;  %4398 = vmatpush.msrb.mxu3 %v9562_v55  ;;  %vm15652_vm11 = vmmov %vm15651_vm8 }
 0x277   : > { %3666 = vst.msk [vmem:[#allocation2 + $0x19] sm:$0xff] %vm15240_vm6, %v3634_v60  ;;  %v3636_v33 = vmax.f32 %v3604_v7, 0.0  ;;  %v11823_v7 = vpop.f32.mrf.mxu2 }
 0x278   : > { %3667 = vst.msk [vmem:[#allocation2 + $0x21] sm:$0xff] %vm15240_vm6, %v3635_v26  ;;  %v3171_v51 = vpop.f32.mrf.mxu3 }
 0x279   : > { %3668 = vst.msk [vmem:[#allocation2 + $0x29] sm:$0xff] %vm15240_vm6, %v3636_v33  ;;  %v3259_v47 = vadd.f32 %v3171_v51, %v11248_v3  ;;  %v3484_v26 = vpop.f32.mrf.mxu0 }
 0x27b   : > { %v3569_v58 = vadd.f32 %v3481_v30, %v3259_v47  ;;  %v11827_v30 = vpop.f32.mrf.mxu1 }
 0x27c   : > { %9481 = vmatmul.msk.f32.gmra.mxu0 %vm15648_vm0, %v3340_v31 }
 0x27d   : > { %v3767_v9 = vld [vmem:[#allocation2 + $0x11] sm:$0xff]  ;;  %v3605_v3 = vadd.f32 %v11753_v21, %v3569_v58  ;;  %9447 = vmatmul.msk.f32.gmra.mxu3 %vm15647_vm13, %v3030_v24  ;;  %vm15649_vm13 = vmmov %vm15648_vm0 }
 0x27e   : > { %v11805_v59 = vld [vmem:[#allocation2 + $0x10] sm:$0xff]  ;;  %9498 = vmatmul.msk.f32.gmra.mxu1 %vm15240_vm6, %v3767_v9  ;;  %v3768_v9 = vld [vmem:[#allocation2 + $0x19] sm:$0xff] }
 0x27f   : > { %v3731_v60 = vsel %vm15645_vm4, %v11805_v59, 0.0  ;;  %v3637_v51 = vmax.f32 %v3605_v3, 0.0  ;;  %v11825_v33 = vld [vmem:[#allocation2 + $0x18] sm:$0xff]  ;;  %v9598_v58 = vld [vmem:[%s15062_s3 + $0x70] sm:$0xff]  ;;  %v11838_v55 = vld [vmem:[#allocation2 + $0x20] sm:$0xff] }
 0x280   : > { %9530 = vmatmul.msk.f32.gmra.mxu2 %vm15240_vm6, %v3731_v60  ;;  %v3174_v42 = vpop.f32.mrf.mxu3  ;;  %v3031_v24 = vld [vmem:[%s10241_s15 + $0xd1] sm:$0xff]  ;;  %4708 = vmatpush.msrb.mxu0 %v9598_v58 }
 0x281   : > { %3669 = vst.msk [vmem:[#allocation2 + $0x31] sm:$0xff] %vm15240_vm6, %v3637_v51  ;;  %v3260_v47 = vadd.f32 %v3174_v42, %v11262_v34  ;;  %v3487_v60 = vpop.f32.mrf.mxu0  ;;  %v3769_v34 = vld [vmem:[#allocation2 + $0x21] sm:$0xff]  ;;  %v9634_v58 = vld [vmem:[%s15062_s3 + $0x90] sm:$0xff] }
 0x282   : > { %4986 = vmatpush.msrb.mxu1 %v9634_v58 }
 0x283   : > { %v3570_v31 = vadd.f32 %v3484_v26, %v3260_v47  ;;  %v11849_v47 = vpop.f32.mrf.mxu2 }
 0x284   : > { %9482 = vmatmul.msk.f32.gmra.mxu0 %vm15649_vm13, %v11285_v8 }
 0x285   : > { %v3606_v3 = vadd.f32 %v11753_v21, %v3570_v31  ;;  %9448 = vmatmul.msk.f32.gmra.mxu3 %vm15648_vm0, %v3031_v24  ;;  %v3032_v24 = vld [vmem:[%s10241_s15 + $0xd9] sm:$0xff]  ;;  %vm15653_vm0 = vnez %v15563_v0 }
 0x286   : > { %9499 = vmatmul.msk.f32.gmra.mxu1 %vm15240_vm6, %v3768_v9  ;;  %v3342_v8 = vsel %vm15653_vm0, %v11296_v52, 0.0  ;;  %v11865_v52 = vld [vmem:[#allocation2 + $0x28] sm:$0xff]  ;;  %vm15656_vm0 = vmmov %vm15651_vm8 }
 0x287   : > { %v3638_v9 = vmax.f32 %v3606_v3, 0.0  ;;  %v11859_v3 = vpop.f32.mrf.mxu1  ;;  %vm15657_vm14 = vmmov %vm15656_vm0 }
 0x288   : > { %9531 = vmatmul.msk.f32.gmra.mxu2 %vm15240_vm6, %v11825_v33  ;;  %vm15650_vm6 = vnez %v15379_v41  ;;  %v3177_v51 = vpop.f32.mrf.mxu3  ;;  %v15737_v41 = vld [vmem:[#allocation29_spill] sm:$0xff] }
 0x289   : > { %v3733_v26 = vsel %vm15650_vm6, %v11838_v55, 0.0  ;;  %3670 = vst.msk [vmem:[#allocation2 + $0x39] sm:$0xff] %vm15651_vm8, %v3638_v9  ;;  %v3261_v42 = vadd.f32 %v3177_v51, %v11274_v22  ;;  %v3490_v31 = vpop.f32.mrf.mxu0 }
 0x28b   : > { %v3571_v22 = vadd.f32 %v3487_v60, %v3261_v42  ;;  %v2675_v42 = vadd.f32 %v11445_v20, %v11299_v53  ;;  %v3771_v53 = vld [vmem:[#allocation2 + $0x31] sm:$0xff] }
 0x28d   : > { %v3607_v9 = vadd.f32 %v11753_v21, %v3571_v22  ;;  %v11879_v22 = vld [vmem:[#allocation2 + $0x30] sm:$0xff] }
 0x28e   : > { %9500 = vmatmul.msk.f32.gmra.mxu1 %vm15652_vm11, %v3769_v34  ;;  %vm15654_vm11 = vmmov %vm15649_vm13  ;;  %v3770_v34 = vld [vmem:[#allocation2 + $0x29] sm:$0xff] }
 0x28f   : > { %9449 = vmatmul.msk.f32.gmra.mxu3 %vm15654_vm11, %v3032_v24  ;;  %vm15655_vm13 = vmmov %vm15654_vm11  ;;  %v3639_v51 = vmax.f32 %v3607_v9, 0.0  ;;  %v11877_v58 = vpop.f32.mrf.mxu1  ;;  %v3312_v9 = vld [vmem:[%s10241_s15 + $0xea] sm:$0xff] }
 0x290   : > { %9532 = vmatmul.msk.f32.gmra.mxu2 %vm15651_vm8, %v3733_v26  ;;  %9483 = vmatmul.msk.f32.gmra.mxu0 %vm15655_vm13, %v3342_v8  ;;  %v3180_v0 = vpop.f32.mrf.mxu3  ;;  %v3033_v26 = vld [vmem:[%s10241_s15 + $0xe1] sm:$0xff]  ;;  %vm15658_vm8 = vmmov %vm15656_vm0  ;;  %v11875_v8 = vpop.f32.mrf.mxu2 }
 0x291   : > { %3671 = vst.msk [vmem:[#allocation2 + $0x41] sm:$0xff] %vm15656_vm0, %v3639_v51  ;;  %v3262_v39 = vadd.f32 %v3180_v0, %v11290_v36  ;;  %v3493_v60 = vpop.f32.mrf.mxu0  ;;  %vm15659_vm0 = vmmov %vm15654_vm11  ;;  %v2985_v36 = vadd.f32 %v11464_v12, %v2675_v42  ;;  %vm15661_vm11 = vnez %v15385_v57 }
 0x292   : > { %vm15662_vm13 = vmmov %vm15658_vm8 }
 0x293   : > { %v3572_v24 = vadd.f32 %v3490_v31, %v3262_v39  ;;  %v3735_v39 = vsel %vm15661_vm11, %v11879_v22, 0.0 }
 0x295   : > { %v3608_v0 = vadd.f32 %v11753_v21, %v3572_v24  ;;  %v15664_v24 = vld [vmem:[#allocation28_spill] sm:$0xff] }
 0x296   : > { %9501 = vmatmul.msk.f32.gmra.mxu1 %vm15657_vm14, %v3770_v34  ;;  %vm15660_vm14 = vmmov %vm15659_vm0  ;;  %v2676_v12 = vadd.f32 %v11466_v2, %v15664_v24 }
 0x297   : > { %9450 = vmatmul.msk.f32.gmra.mxu3 %vm15659_vm0, %v3033_v26  ;;  %v3640_v20 = vmax.f32 %v3608_v0, 0.0  ;;  %v3034_v26 = vld [vmem:[%s10241_s15 + $0xe9] sm:$0xff]  ;;  %vm15663_vm0 = vnez %v15566_v29  ;;  %v11906_v29 = vld [vmem:[#allocation2 + $0x38] sm:$0xff] }
 0x298   : > { %9533 = vmatmul.msk.f32.gmra.mxu2 %vm15658_vm8, %v11865_v52  ;;  %9484 = vmatmul.msk.f32.gmra.mxu0 %vm15660_vm14, %v11319_v28  ;;  %v3183_v31 = vpop.f32.mrf.mxu3  ;;  %v3344_v28 = vsel %vm15663_vm0, %v3312_v9, 0.0  ;;  %vm15665_vm14 = vmmov %vm15658_vm8  ;;  %v3772_v9 = vld [vmem:[#allocation2 + $0x39] sm:$0xff] }
 0x299   : > { %3672 = vst.msk [vmem:[#allocation2 + $0x49] sm:$0xff] %vm15662_vm13, %v3640_v20  ;;  %v3263_v34 = vadd.f32 %v3183_v31, %v2985_v36  ;;  %v3496_v51 = vpop.f32.mrf.mxu0  ;;  %vm15667_vm13 = vmmov %vm15666_vm15  ;;  %v11901_v36 = vpop.f32.mrf.mxu2  ;;  %v12193_v57 = vld [vmem:[#allocation2 + $0x3a] sm:$0xff] }
 0x29a   : > { %v11904_v20 = vpop.f32.mrf.mxu1 }
 0x29b   : > { %v3573_v42 = vadd.f32 %v3493_v60, %v3263_v34  ;;  %v3035_v34 = vld [vmem:[%s10241_s15 + $0xf1] sm:$0xff] }
 0x29d   : > { %v3609_v0 = vadd.f32 %v11753_v21, %v3573_v42  ;;  %v3773_v42 = vld [vmem:[#allocation2 + $0x41] sm:$0xff] }
 0x29e   : > { %9502 = vmatmul.msk.f32.gmra.mxu1 %vm15658_vm8, %v3771_v53  ;;  %v2986_v53 = vadd.f32 %v11476_v37, %v2676_v12 }
 0x29f   : > { %9451 = vmatmul.msk.f32.gmra.mxu3 %vm15666_vm15, %v3034_v26  ;;  %v3641_v31 = vmax.f32 %v3609_v0, 0.0  ;;  %v2677_v26 = vadd.f32 %v11478_v35, %v11329_v4  ;;  %vm15669_vm15 = vmmov %vm15658_vm8  ;;  %v15671_v4 = vld [vmem:[#allocation14_spill] sm:$0xff] }
 0x2a0   : > { %9534 = vmatmul.msk.f32.gmra.mxu2 %vm15665_vm14, %v3735_v39  ;;  %9485 = vmatmul.msk.f32.gmra.mxu0 %vm15667_vm13, %v3344_v28  ;;  %v3186_v2 = vpop.f32.mrf.mxu3  ;;  %vm15668_vm14 = vmmov %vm15658_vm8  ;;  %v11915_v28 = vld [vmem:[#allocation2 + $0x40] sm:$0xff] }
 0x2a1   : > { %3673 = vst.msk [vmem:[#allocation2 + $0x51] sm:$0xff] %vm15658_vm8, %v3641_v31  ;;  %v3264_v60 = vadd.f32 %v3186_v2, %v2986_v53  ;;  %v3499_v39 = vpop.f32.mrf.mxu0  ;;  %vm15670_vm8 = vmmov %vm15667_vm13  ;;  %v2987_v12 = vadd.f32 %v11489_v14, %v2677_v26  ;;  %v11922_v53 = vpop.f32.mrf.mxu2  ;;  %v15674_v14 = vld [vmem:[#allocation50_spill] sm:$0xff] }
 0x2a3   : > { %v3574_v37 = vadd.f32 %v3496_v51, %v3264_v60 }
 0x2a5   : > { %v3610_v24 = vadd.f32 %v11753_v21, %v3574_v37 }
 0x2a6   : > { %9503 = vmatmul.msk.f32.gmra.mxu1 %vm15668_vm14, %v3772_v9  ;;  %vm15672_vm14 = vnez %v15671_v4  ;;  %v11927_v9 = vpop.f32.mrf.mxu1 }
 0x2a7   : > { %9452 = vmatmul.msk.f32.gmra.mxu3 %vm15667_vm13, %v3035_v34  ;;  %v3642_v0 = vmax.f32 %v3610_v24, 0.0  ;;  %v3737_v35 = vsel %vm15672_vm14, %v11915_v28, 0.0  ;;  %vm15673_vm13 = vmmov %vm15669_vm15  ;;  %v15676_v34 = vld [vmem:[#allocation21_spill] sm:$0xff] }
 0x2a8   : > { %9535 = vmatmul.msk.f32.gmra.mxu2 %vm15669_vm15, %v11906_v29  ;;  %9486 = vmatmul.msk.f32.gmra.mxu0 %vm15670_vm8, %v11348_v40  ;;  %v3189_v51 = vpop.f32.mrf.mxu3  ;;  %v3036_v40 = vld [vmem:[%s10241_s15 + $0xf9] sm:$0xff]  ;;  %vm15675_vm8 = vnez %v15674_v14  ;;  %v2678_v26 = vadd.f32 %v11493_v19, %v15676_v34  ;;  %vm15677_vm0 = vmmov %vm15673_vm13  ;;  %v12238_v4 = vld [vmem:[#allocation2 + $0x4a] sm:$0xff] }
 0x2a9   : > { %3674 = vst.msk [vmem:[#allocation2 + $0x59] sm:$0xff] %vm15669_vm15, %v3642_v0  ;;  %v3265_v31 = vadd.f32 %v3189_v51, %v2987_v12  ;;  %v3502_v2 = vpop.f32.mrf.mxu0  ;;  %v3346_v60 = vsel %vm15675_vm8, %v11360_v17, 0.0  ;;  %vm15679_vm15 = vmmov %vm15678_vm12  ;;  %v11942_v51 = vld [vmem:[#allocation2 + $0x48] sm:$0xff]  ;;  %v11945_v34 = vpop.f32.mrf.mxu2 }
 0x2aa   : > { %v2988_v12 = vadd.f32 %v11506_v54, %v2678_v26  ;;  %v11955_v26 = vld [vmem:[#allocation2 + $0x50] sm:$0xff] }
 0x2ab   : > { %v3575_v37 = vadd.f32 %v3499_v39, %v3265_v31  ;;  %v15681_v31 = vld [vmem:[#allocation22_spill] sm:$0xff] }
 0x2ad   : > { %v3611_v24 = vadd.f32 %v11753_v21, %v3575_v37 }
 0x2ae   : > { %9504 = vmatmul.msk.f32.gmra.mxu1 %vm15673_vm13, %v3773_v42  ;;  %v3774_v42 = vld [vmem:[#allocation2 + $0x49] sm:$0xff]  ;;  %vm15680_vm13 = vmmov %vm15677_vm0 }
 0x2af   : > { %9453 = vmatmul.msk.f32.gmra.mxu3 %vm15678_vm12, %v3036_v40  ;;  %v3643_v0 = vmax.f32 %v3611_v24, 0.0  ;;  %v2679_v40 = vadd.f32 %v11508_v48, %v15681_v31  ;;  %vm15682_vm12 = vmmov %vm15677_vm0  ;;  %v3038_v31 = vld [vmem:[%s10241_s15 + $0x109] sm:$0xff] }
 0x2b0   : > { %9536 = vmatmul.msk.f32.gmra.mxu2 %vm15677_vm0, %v3737_v35  ;;  %9487 = vmatmul.msk.f32.gmra.mxu0 %vm15679_vm15, %v3346_v60  ;;  %v3192_v17 = vpop.f32.mrf.mxu3  ;;  %v3037_v35 = vld [vmem:[%s10241_s15 + $0x101] sm:$0xff]  ;;  %v11951_v60 = vpop.f32.mrf.mxu1  ;;  %vm15686_vm8 = vmmov %vm15682_vm12 }
 0x2b1   : > { %3675 = vst.msk [vmem:[#allocation2 + $0x61] sm:$0xff] %vm15680_vm13, %v3643_v0  ;;  %v3266_v19 = vadd.f32 %v3192_v17, %v2988_v12  ;;  %v3505_v39 = vpop.f32.mrf.mxu0  ;;  %vm15683_vm13 = vmmov %vm15679_vm15  ;;  %v2989_v24 = vadd.f32 %v11519_v45, %v2679_v40  ;;  %v3775_v12 = vld [vmem:[#allocation2 + $0x51] sm:$0xff]  ;;  %v2680_v45 = vadd.f32 %v11521_v63, %v11381_v43 }
 0x2b3   : > { %v3576_v54 = vadd.f32 %v3502_v2, %v3266_v19  ;;  %v2990_v43 = vadd.f32 %v11550_v5, %v2680_v45  ;;  %v2681_v5 = vadd.f32 %v11554_v44, %v11398_v15  ;;  %v9560_v45 = vld [vmem:[%s15062_s3 + $0x40] sm:$0xff] }
 0x2b5   : > { %v3612_v37 = vadd.f32 %v11753_v21, %v3576_v54  ;;  %v9561_v54 = vld [vmem:[%s15062_s3 + $0x48] sm:$0xff] }
 0x2b6   : > { %9505 = vmatmul.msk.f32.gmra.mxu1 %vm15677_vm0, %v3774_v42  ;;  %v15684_v42 = vld [vmem:[#allocation17_spill] sm:$0xff]  ;;  %4399 = vmatpush.msrb.mxu3 %v9561_v54 }
 0x2b7   : > { %9454 = vmatmul.msk.f32.gmra.mxu3 %vm15679_vm15, %v3037_v35  ;;  %v3644_v48 = vmax.f32 %v3612_v37, 0.0  ;;  %vm15685_vm0 = vnez %v15684_v42  ;;  %vm15688_vm15 = vmmov %vm15686_vm8  ;;  %v11977_v37 = vpop.f32.mrf.mxu2  ;;  %v3317_v54 = vld [vmem:[%s10241_s15 + $0x112] sm:$0xff] }
 0x2b8   : > { %9537 = vmatmul.msk.f32.gmra.mxu2 %vm15682_vm12, %v11942_v51  ;;  %9488 = vmatmul.msk.f32.gmra.mxu0 %vm15683_vm13, %v11386_v11  ;;  %v3739_v0 = vsel %vm15685_vm0, %v11955_v26, 0.0  ;;  %v3195_v17 = vpop.f32.mrf.mxu3  ;;  %v3348_v11 = vsel %vm15578_vm1, %v11395_v50, 0.0  ;;  %v3776_v50 = vld [vmem:[#allocation2 + $0x59] sm:$0xff] }
 0x2b9   : > { %3676 = vst.msk [vmem:[#allocation2 + $0x69] sm:$0xff] %vm15682_vm12, %v3644_v48  ;;  %v3267_v2 = vadd.f32 %v3195_v17, %v2989_v24  ;;  %v3508_v19 = vpop.f32.mrf.mxu0  ;;  %v11979_v24 = vpop.f32.mrf.mxu1  ;;  %4400 = vmatpush.msrb.mxu3 %v9560_v45  ;;  %v12007_v15 = vld [vmem:[#allocation2 + $0x60] sm:$0xff] }
 0x2ba   : > { %v12280_v42 = vld [vmem:[#allocation2 + $0x5a] sm:$0xff] }
 0x2bb   : > { %v3577_v40 = vadd.f32 %v3505_v39, %v3267_v2  ;;  %v11985_v39 = vld [vmem:[#allocation2 + $0x58] sm:$0xff] }
 0x2bc   : > { %v3039_v2 = vld [vmem:[%s10241_s15 + $0x111] sm:$0xff] }
 0x2be   : > { %9506 = vmatmul.msk.f32.gmra.mxu1 %vm15686_vm8, %v3775_v12  ;;  %v3613_v12 = vadd.f32 %v11753_v21, %v3577_v40  ;;  %vm15689_vm8 = vmmov %vm15683_vm13  ;;  %v9596_v40 = vld [vmem:[%s15062_s3 + $0x60] sm:$0xff] }
 0x2bf   : > { %9455 = vmatmul.msk.f32.gmra.mxu3 %vm15689_vm8, %v3038_v31  ;;  %vm15690_vm13 = vmmov %vm15689_vm8  ;;  %v9597_v31 = vld [vmem:[%s15062_s3 + $0x68] sm:$0xff] }
 0x2c0   : > { %9538 = vmatmul.msk.f32.gmra.mxu2 %vm15688_vm15, %v3739_v0  ;;  %9489 = vmatmul.msk.f32.gmra.mxu0 %vm15690_vm13, %v3348_v11  ;;  %v3645_v63 = vmax.f32 %v3613_v12, 0.0  ;;  %v3198_v48 = vpop.f32.mrf.mxu3  ;;  %vm15691_vm15 = vmmov %vm15682_vm12  ;;  %v9671_v12 = vld [vmem:[%s15062_s3 + $0xb8] sm:$0xff] }
 0x2c1   : > { %v3268_v0 = vadd.f32 %v3198_v48, %v2990_v43  ;;  %v3511_v17 = vpop.f32.mrf.mxu0  ;;  %vm15692_vm8 = vmmov %vm15682_vm12  ;;  %4709 = vmatpush.msrb.mxu0 %v9597_v31  ;;  %5295 = vmatpush.msrb.mxu2 %v9671_v12  ;;  %v2991_v43 = vadd.f32 %v11589_v18, %v2681_v5  ;;  %v15695_v31 = vld [vmem:[#allocation20_spill] sm:$0xff] }
 0x2c2   : > { %3677 = vst.msk [vmem:[#allocation2 + $0x71] sm:$0xff] %vm15682_vm12, %v3645_v63  ;;  %vm15693_vm12 = vmmov %vm15690_vm13  ;;  %v3777_v63 = vld [vmem:[#allocation2 + $0x61] sm:$0xff] }
 0x2c3   : > { %v3578_v11 = vadd.f32 %v3508_v19, %v3268_v0  ;;  %v12012_v19 = vpop.f32.mrf.mxu2  ;;  %4710 = vmatpush.msrb.mxu0 %v9596_v40  ;;  %v3318_v0 = vld [vmem:[%s10241_s15 + $0x11a] sm:$0xff]  ;;  %v9633_v5 = vld [vmem:[%s15062_s3 + $0x88] sm:$0xff] }
 0x2c4   : > { %v3040_v40 = vld [vmem:[%s10241_s15 + $0x119] sm:$0xff]  ;;  %v3350_v18 = vsel %vm10871_vm10, %v3318_v0, 0.0  ;;  %4987 = vmatpush.msrb.mxu1 %v9633_v5  ;;  %v12038_v12 = vld [vmem:[#allocation2 + $0x68] sm:$0xff]  ;;  %s10134_s15 = sshll.u32 %s16725_s27, 8 }
 0x2c5   : > { %v3614_v44 = vadd.f32 %v11753_v21, %v3578_v11  ;;  %s14870_s6 = scalar_lea.vmem %s15066_s7, %s10134_s15 }
 0x2c6   : > { %9507 = vmatmul.msk.f32.gmra.mxu1 %vm15691_vm15, %v3776_v50  ;;  %v12015_v50 = vpop.f32.mrf.mxu1  ;;  %vm15696_vm15 = vnez %v15695_v31 }
 0x2c7   : > { %9456 = vmatmul.msk.f32.gmra.mxu3 %vm15690_vm13, %v3039_v2  ;;  %15694 = vst [vmem:[#allocation42_spill] sm:$0xff] %v12015_v50  ;;  %v3646_v48 = vmax.f32 %v3614_v44, 0.0  ;;  %v3741_v11 = vsel %vm15696_vm15, %v12007_v15, 0.0  ;;  %vm15697_vm13 = vmmov %vm15692_vm8  ;;  %v15699_v44 = vld [vmem:[#allocation24_spill] sm:$0xff] }
 0x2c8   : > { %9539 = vmatmul.msk.f32.gmra.mxu2 %vm15692_vm8, %v11985_v39  ;;  %9490 = vmatmul.msk.f32.gmra.mxu0 %vm15693_vm12, %v3317_v54  ;;  %v3201_v45 = vpop.f32.mrf.mxu3  ;;  %v2682_v35 = vadd.f32 %v11596_v1, %v15699_v44  ;;  %vm15700_vm12 = vmmov %vm15692_vm8 }
 0x2c9   : > { %3678 = vst.msk [vmem:[#allocation2 + $0x79] sm:$0xff] %vm15692_vm8, %v3646_v48  ;;  %v3269_v2 = vadd.f32 %v3201_v45, %v2991_v43  ;;  %v3514_v54 = vpop.f32.mrf.mxu0  ;;  %vm15701_vm8 = vcmask 31744   ;;  %v3778_v48 = vld [vmem:[#allocation2 + $0x69] sm:$0xff]  ;;  %vm15703_vm10 = vmmov %vm15700_vm12  ;;  %v3779_v5 = vld [vmem:[#allocation2 + $0x71] sm:$0xff] }
 0x2ca   : > { %v12327_v31 = vld [vmem:[#allocation2 + $0x6a] sm:$0xff] }
 0x2cb   : > { %v3579_v14 = vadd.f32 %v3511_v17, %v3269_v2  ;;  %v12036_v45 = vpop.f32.mrf.mxu2  ;;  %v2683_v2 = vadd.f32 %v11629_v49, %v11420_v27  ;;  %v15707_v49 = vld [vmem:[#allocation27_spill] sm:$0xff] }
 0x2cd   : > { %v3615_v43 = vadd.f32 %v11753_v21, %v3579_v14 }
 0x2ce   : > { %9508 = vmatmul.msk.f32.gmra.mxu1 %vm15697_vm13, %v3777_v63  ;;  %vm15702_vm13 = vmmov %vm15701_vm8  ;;  %v2992_v63 = vadd.f32 %v11625_v6, %v2682_v35  ;;  %v12040_v1 = vpop.f32.mrf.mxu1  ;;  %v4562_v35 = vsel %vm10243_vm2, %v11805_v59, 0.0 }
 0x2cf   : > { %9457 = vmatmul.msk.f32.gmra.mxu3 %vm15701_vm8, %v3040_v40  ;;  %v3647_v0 = vmax.f32 %v3615_v43, 0.0  ;;  %vm15704_vm8 = vmmov %vm15703_vm10  ;;  %v12051_v40 = vld [vmem:[#allocation2 + $0x70] sm:$0xff] }
 0x2d0   : > { %9540 = vmatmul.msk.f32.gmra.mxu2 %vm15700_vm12, %v3741_v11  ;;  %9491 = vmatmul.msk.f32.gmra.mxu0 %vm15702_vm13, %v3350_v18  ;;  %v3204_v50 = vpop.f32.mrf.mxu3  ;;  %v4220_v11 = vld [vmem:[#allocation2 + $0x2] sm:$0xff]  ;;  %vm15705_vm13 = vmmov %vm15704_vm8  ;;  %v4221_v43 = vld [vmem:[#allocation2 + $0xa] sm:$0xff] }
 0x2d1   : > { %3679 = vst.msk [vmem:[#allocation2 + $0x81] sm:$0xff] %vm15700_vm12, %v3647_v0  ;;  %v3270_v17 = vadd.f32 %v3204_v50, %v2992_v63  ;;  %v3517_v14 = vpop.f32.mrf.mxu0  ;;  %v2993_v50 = vadd.f32 %v11662_v32, %v2683_v2  ;;  %vm15708_vm12 = vnez %v15707_v49  ;;  %vm15709_vm2 = vmmov %vm15704_vm8  ;;  %v2684_v0 = vadd.f32 %v11666_v13, %v11427_v38  ;;  %v12076_v38 = vld [vmem:[#allocation2 + $0x78] sm:$0xff]  ;;  %v15804_v49 = vld [vmem:[#allocation55_spill] sm:$0xff] }
 0x2d2   : > { %vm15765_vm1 = vmmov %vm15709_vm2 }
 0x2d3   : > { %v3580_v6 = vadd.f32 %v3514_v54, %v3270_v17  ;;  %v3743_v54 = vsel %vm15708_vm12, %v12051_v40, 0.0  ;;  %v12061_v63 = vpop.f32.mrf.mxu2 }
 0x2d5   : > { %v3616_v18 = vadd.f32 %v11753_v21, %v3580_v6  ;;  %v2994_v6 = vadd.f32 %v11701_v10, %v2684_v0 }
 0x2d6   : > { %9509 = vmatmul.msk.f32.gmra.mxu1 %vm15703_vm10, %v3778_v48  ;;  %vm15706_vm10 = vmmov %vm15704_vm8  ;;  %v12066_v32 = vpop.f32.mrf.mxu1 }
 0x2d7   : > { %9564 = vmatmul.msk.f32.vlgmr.msrb.gmra.mxu3 %vm15705_vm13, %v4220_v11  ;;  %v3648_v27 = vmax.f32 %v3616_v18, 0.0  ;;  %vm15710_vm13 = vmmov %vm15709_vm2  ;;  %v4253_v11 = vsel %vm10258_vm3, %v4221_v43, 0.0 }
 0x2d8   : > { %9541 = vmatmul.msk.f32.gmra.mxu2 %vm15704_vm8, %v12038_v12  ;;  %9600 = vmatmul.msk.f32.vlgmr.msrb.gmra.mxu0 %vm15706_vm10, %v4562_v35  ;;  %v3207_v44 = vpop.f32.mrf.mxu3  ;;  %vm15711_vm10 = vmmov %vm15709_vm2  ;;  %v3780_v35 = vld [vmem:[#allocation2 + $0x79] sm:$0xff] }
 0x2d9   : > { %3680 = vst.msk [vmem:[#allocation2 + $0x89] sm:$0xff] %vm15704_vm8, %v3648_v27  ;;  %v3271_v59 = vadd.f32 %v3207_v44, %v2993_v50  ;;  %v3520_v48 = vpop.f32.mrf.mxu0  ;;  %vm15712_vm8 = vmmov %vm15709_vm2  ;;  %v12088_v44 = vld [vmem:[#allocation2 + $0x12] sm:$0xff]  ;;  %v12093_v43 = vld [vmem:[#allocation2 + $0x80] sm:$0xff] }
 0x2db   : > { %v3581_v17 = vadd.f32 %v3517_v14, %v3271_v59  ;;  %v4564_v59 = vsel %vm15645_vm4, %v11838_v55, 0.0  ;;  %vm15721_vm4 = vmmov %vm15709_vm2 }
 0x2dd   : > { %v3617_v2 = vadd.f32 %v11753_v21, %v3581_v17 }
 0x2de   : > { %9510 = vmatmul.msk.f32.gmra.mxu1 %vm15709_vm2, %v3779_v5  ;;  %v15714_v5 = vld [vmem:[#allocation25_spill] sm:$0xff] }
 0x2df   : > { %9565 = vmatmul.msk.f32.gmra.mxu3 %vm15711_vm10, %v4253_v11  ;;  %v3649_v18 = vmax.f32 %v3617_v2, 0.0  ;;  %v2685_v27 = vadd.f32 %v11705_v61, %v15714_v5  ;;  %vm15715_vm10 = vmmov %vm15709_vm2  ;;  %v15717_v61 = vld [vmem:[#allocation57_spill] sm:$0xff]  ;;  %v15718_v2 = vld [vmem:[#allocation35_spill] sm:$0xff] }
 0x2e0   : > { %9542 = vmatmul.msk.f32.gmra.mxu2 %vm15710_vm13, %v3743_v54  ;;  %9601 = vmatmul.msk.f32.gmra.mxu0 %vm15712_vm8, %v11825_v33  ;;  %v3210_v13 = vpop.f32.mrf.mxu3  ;;  %vm15713_vm13 = vmmov %vm15709_vm2  ;;  %v12084_v33 = vpop.f32.mrf.mxu1  ;;  %v15723_v5 = vld [vmem:[#allocation48_spill] sm:$0xff] }
 0x2e1   : > { %3681 = vst.msk [vmem:[#allocation2 + $0x91] sm:$0xff] %vm15709_vm2, %v3649_v18  ;;  %v3272_v14 = vadd.f32 %v3210_v13, %v2994_v6  ;;  %v3523_v50 = vpop.f32.mrf.mxu0  ;;  %v12086_v54 = vpop.f32.mrf.mxu2  ;;  %vm15716_vm8 = vmmov %vm15709_vm2  ;;  %v2995_v17 = vadd.f32 %v15717_v61, %v2685_v27  ;;  %v12104_v18 = vld [vmem:[#allocation2 + $0x1a] sm:$0xff] }
 0x2e2   : > { %v4255_v61 = vsel %vm10297_vm5, %v12104_v18, 0.0 }
 0x2e3   : > { %v3582_v10 = vadd.f32 %v3520_v48, %v3272_v14  ;;  %v3781_v48 = vld [vmem:[#allocation2 + $0x81] sm:$0xff]  ;;  %v15722_v14 = vld [vmem:[#allocation34_spill] sm:$0xff] }
 0x2e5   : > { %v3618_v0 = vadd.f32 %v11753_v21, %v3582_v10  ;;  %v2686_v10 = vadd.f32 %v15723_v5, %v15722_v14  ;;  %v15729_v5 = vld [vmem:[#allocation36_spill] sm:$0xff] }
 0x2e6   : > { %9511 = vmatmul.msk.f32.gmra.mxu1 %vm15713_vm13, %v3780_v35  ;;  %vm15719_vm13 = vnez %v15718_v2 }
 0x2e7   : > { %9566 = vmatmul.msk.f32.gmra.mxu3 %vm15716_vm8, %v12088_v44  ;;  %v3650_v11 = vmax.f32 %v3618_v0, 0.0  ;;  %v3745_v6 = vsel %vm15719_vm13, %v12093_v43, 0.0  ;;  %vm15724_vm8 = vmmov %vm15709_vm2  ;;  %v2688_v0 = vadd.f32 %v11802_v56, %v15737_v41 }
 0x2e8   : > { %9543 = vmatmul.msk.f32.gmra.mxu2 %vm15715_vm10, %v12076_v38  ;;  %9602 = vmatmul.msk.f32.gmra.mxu0 %vm15709_vm2, %v4564_v59  ;;  %v3213_v35 = vpop.f32.mrf.mxu3  ;;  %vm15720_vm10 = vmmov %vm15709_vm2  ;;  %v12115_v25 = vpop.f32.mrf.mxu1 }
 0x2e9   : > { %3682 = vst.msk [vmem:[#allocation2 + $0x99] sm:$0xff] %vm15720_vm10, %v3650_v11  ;;  %v3273_v55 = vadd.f32 %v3213_v35, %v2995_v17  ;;  %v3526_v13 = vpop.f32.mrf.mxu0  ;;  %v12110_v59 = vpop.f32.mrf.mxu2  ;;  %v3782_v11 = vld [vmem:[#allocation2 + $0x89] sm:$0xff]  ;;  %vm15727_vm10 = vmmov %vm15709_vm2 }
 0x2eb   : > { %v3583_v27 = vadd.f32 %v3523_v50, %v3273_v55  ;;  %v12122_v50 = vld [vmem:[#allocation2 + $0x88] sm:$0xff] }
 0x2ed   : > { %v3619_v17 = vadd.f32 %v11753_v21, %v3583_v27  ;;  %v15730_v27 = vld [vmem:[#allocation49_spill] sm:$0xff] }
 0x2ee   : > { %9512 = vmatmul.msk.f32.gmra.mxu1 %vm15721_vm4, %v3781_v48  ;;  %vm15726_vm4 = vmmov %vm15709_vm2  ;;  %v2996_v48 = vadd.f32 %v11772_v62, %v2686_v10  ;;  %v2687_v46 = vadd.f32 %v15730_v27, %v15729_v5  ;;  %v4566_v62 = vsel %vm15650_vm6, %v11879_v22, 0.0  ;;  %v12135_v10 = vld [vmem:[#allocation2 + $0x90] sm:$0xff] }
 0x2ef   : > { %9567 = vmatmul.msk.f32.gmra.mxu3 %vm15709_vm2, %v4255_v61  ;;  %v12130_v61 = vld [vmem:[#allocation2 + $0x22] sm:$0xff]  ;;  %vm15740_vm6 = vmmov %vm15709_vm2 }
 0x2f0   : > { %9544 = vmatmul.msk.f32.gmra.mxu2 %vm15724_vm8, %v3745_v6  ;;  %9603 = vmatmul.msk.f32.gmra.mxu0 %vm15726_vm4, %v11865_v52  ;;  %v3651_v6 = vmax.f32 %v3619_v17, 0.0  ;;  %v3216_v35 = vpop.f32.mrf.mxu3  ;;  %vm15728_vm8 = vmmov %vm15709_vm2  ;;  %15731 = vst [vmem:[#allocation52_spill] sm:$0xff] %v12130_v61  ;;  %v3784_v56 = vld [vmem:[#allocation2 + $0x99] sm:$0xff] }
 0x2f1   : > { %v3274_v55 = vadd.f32 %v3216_v35, %v2996_v48  ;;  %v3529_v14 = vpop.f32.mrf.mxu0  ;;  %vm15732_vm4 = vmmov %vm15709_vm2  ;;  %v12141_v48 = vpop.f32.mrf.mxu2 }
 0x2f2   : > { %3683 = vst.msk [vmem:[#allocation2 + $0xa1] sm:$0xff] %vm15727_vm10, %v3651_v6  ;;  %vm15733_vm10 = vmmov %vm15709_vm2  ;;  %v3783_v6 = vld [vmem:[#allocation2 + $0x91] sm:$0xff] }
 0x2f3   : > { %v3584_v52 = vadd.f32 %v3526_v13, %v3274_v55  ;;  %v15734_v55 = vld [vmem:[#allocation45_spill] sm:$0xff] }
 0x2f5   : > { %v3620_v17 = vadd.f32 %v11753_v21, %v3584_v52  ;;  %v12148_v52 = vld [vmem:[#allocation2 + $0x2a] sm:$0xff] }
 0x2f6   : > { %9513 = vmatmul.msk.f32.gmra.mxu1 %vm15728_vm8, %v3782_v11  ;;  %v2997_v11 = vadd.f32 %v11800_v23, %v2687_v46  ;;  %vm15735_vm8 = vnez %v15734_v55  ;;  %v4841_v55 = vld [vmem:[#allocation2 + $0x19] sm:$0xff] }
 0x2f7   : > { %9568 = vmatmul.msk.f32.gmra.mxu3 %vm15732_vm4, %v12130_v61  ;;  %v3652_v35 = vmax.f32 %v3620_v17, 0.0  ;;  %v3747_v22 = vsel %vm15735_vm8, %v12135_v10, 0.0  ;;  %vm15736_vm4 = vmmov %vm15709_vm2  ;;  %v4257_v17 = vsel %vm10345_vm7, %v12148_v52, 0.0 }
 0x2f8   : > { %9545 = vmatmul.msk.f32.gmra.mxu2 %vm15709_vm2, %v12122_v50  ;;  %9604 = vmatmul.msk.f32.gmra.mxu0 %vm15733_vm10, %v4566_v62  ;;  %v3219_v5 = vpop.f32.mrf.mxu3  ;;  %vm15738_vm10 = vmmov %vm15709_vm2 }
 0x2f9   : > { %3684 = vst.msk [vmem:[#allocation2 + $0xa9] sm:$0xff] %vm15709_vm2, %v3652_v35  ;;  %v3275_v27 = vadd.f32 %v3219_v5, %v2997_v11  ;;  %v3532_v62 = vpop.f32.mrf.mxu0 }
 0x2fb   : > { %v3921_v13 = vpop.f32.mrf.mxu1  ;;  %v3585_v46 = vadd.f32 %v3529_v14, %v3275_v27  ;;  %v12164_v14 = vld [vmem:[#allocation2 + $0x98] sm:$0xff] }
 0x2fd   : > { %v3621_v61 = vadd.f32 %v11753_v21, %v3585_v46 }
 0x2fe   : > { %9514 = vmatmul.msk.f32.gmra.mxu1 %vm15736_vm4, %v3783_v6  ;;  %v2998_v6 = vadd.f32 %v11823_v7, %v2688_v0  ;;  %vm15741_vm4 = vmmov %vm15709_vm2  ;;  %v12172_v0 = vld [vmem:[#allocation2 + $0x32] sm:$0xff] }
 0x2ff   : > { %9569 = vmatmul.msk.f32.gmra.mxu3 %vm15740_vm6, %v4257_v17  ;;  %v15743_v17 = vld [vmem:[#allocation30_spill] sm:$0xff]  ;;  %vm15744_vm6 = vmmov %vm15709_vm2 }
 0x300   : > { %9546 = vmatmul.msk.f32.gmra.mxu2 %vm15738_vm10, %v3747_v22  ;;  %9605 = vmatmul.msk.f32.gmra.mxu0 %vm15709_vm2, %v11906_v29  ;;  %v3653_v22 = vmax.f32 %v3621_v61, 0.0  ;;  %v3222_v5 = vpop.f32.mrf.mxu3  ;;  %vm15742_vm10 = vmmov %vm15709_vm2  ;;  %v2689_v29 = vadd.f32 %v11827_v30, %v15743_v17  ;;  %v4568_v61 = vsel %vm15661_vm11, %v11915_v28, 0.0  ;;  %v9670_v28 = vld [vmem:[%s15062_s3 + $0xb0] sm:$0xff] }
 0x301   : > { %v3276_v27 = vadd.f32 %v3222_v5, %v2998_v6  ;;  %v3535_v46 = vpop.f32.mrf.mxu0  ;;  %5296 = vmatpush.msrb.mxu2 %v9670_v28  ;;  %vm15754_vm11 = vmmov %vm15709_vm2  ;;  %v15762_v28 = vld [vmem:[#allocation44_spill] sm:$0xff] }
 0x302   : > { %3685 = vst.msk [vmem:[#allocation2 + $0xb1] sm:$0xff] %vm15741_vm4, %v3653_v22  ;;  %vm15745_vm4 = vmmov %vm15709_vm2  ;;  %v2999_v6 = vadd.f32 %v11849_v47, %v2689_v29  ;;  %v3785_v22 = vld [vmem:[#allocation2 + $0xa1] sm:$0xff]  ;;  %v15749_v29 = vld [vmem:[#allocation32_spill] sm:$0xff] }
 0x303   : > { %v4130_v11 = vpop.f32.mrf.mxu2  ;;  %v3924_v41 = vpop.f32.mrf.mxu1  ;;  %v3586_v7 = vadd.f32 %v3532_v62, %v3276_v27  ;;  %v15746_v27 = vld [vmem:[#allocation56_spill] sm:$0xff] }
 0x304   : > { %v12162_v35 = vadd.f32 %v4130_v11, %v3921_v13  ;;  %v12177_v13 = vld [vmem:[#allocation2 + $0xa0] sm:$0xff] }
 0x305   : > { %v3622_v11 = vadd.f32 %v11753_v21, %v3586_v7 }
 0x306   : > { %9515 = vmatmul.msk.f32.gmra.mxu1 %vm15742_vm10, %v3784_v56  ;;  %vm15747_vm10 = vnez %v15746_v27  ;;  %v9706_v27 = vld [vmem:[%s15062_s3 + $0xd0] sm:$0xff] }
 0x307   : > { %9570 = vmatmul.msk.f32.gmra.mxu3 %vm15709_vm2, %v12172_v0  ;;  %v3654_v5 = vmax.f32 %v3622_v11, 0.0  ;;  %v3749_v17 = vsel %vm15747_vm10, %v12177_v13, 0.0  ;;  %v2690_v11 = vadd.f32 %v11859_v3, %v15749_v29 }
 0x308   : > { %9547 = vmatmul.msk.f32.gmra.mxu2 %vm15744_vm6, %v12164_v14  ;;  %9606 = vmatmul.msk.f32.gmra.mxu0 %vm15745_vm4, %v4568_v61  ;;  %v3225_v7 = vpop.f32.mrf.mxu3  ;;  %vm15748_vm6 = vmmov %vm15709_vm2 }
 0x309   : > { %3686 = vst.msk [vmem:[#allocation2 + $0xb9] sm:$0xff] %vm15748_vm6, %v3654_v5  ;;  %v3277_v61 = vadd.f32 %v3225_v7, %v2999_v6  ;;  %vm15750_vm4 = vmmov %vm15709_vm2  ;;  %v4259_v6 = vsel %vm10394_vm9, %v12193_v57, 0.0  ;;  %v3000_v7 = vadd.f32 %v11875_v8, %v2690_v11  ;;  %v4570_v11 = vsel %vm15672_vm14, %v11955_v26, 0.0 }
 0x30a   : > { %vm15752_vm6 = vmmov %vm15709_vm2 }
 0x30b   : > { %v4133_v30 = vpop.f32.mrf.mxu2  ;;  %v3927_v62 = vpop.f32.mrf.mxu1 }
 0x30c   : > { %v12184_v56 = vadd.f32 %v4133_v30, %v3924_v41  ;;  %v9632_v41 = vld [vmem:[%s15062_s3 + $0x80] sm:$0xff]  ;;  %v3587_v30 = vadd.f32 %v3535_v46, %v3277_v61  ;;  %v12212_v61 = vld [vmem:[#allocation2 + $0xa8] sm:$0xff] }
 0x30d   : > { %v3538_v47 = vpop.f32.mrf.mxu0  ;;  %4988 = vmatpush.msrb.mxu1 %v9632_v41 }
 0x30e   : > { %9516 = vmatmul.msk.f32.gmra.mxu1 %vm15709_vm2, %v3785_v22  ;;  %v3623_v5 = vadd.f32 %v11753_v21, %v3587_v30 }
 0x30f   : > { %9571 = vmatmul.msk.f32.gmra.mxu3 %vm15752_vm6, %v4259_v6  ;;  %v15755_v6 = vld [vmem:[#allocation33_spill] sm:$0xff]  ;;  %vm15756_vm6 = vmmov %vm15709_vm2 }
 0x310   : > { %9548 = vmatmul.msk.f32.gmra.mxu2 %vm15750_vm4, %v3749_v17  ;;  %9607 = vmatmul.msk.f32.gmra.mxu0 %vm15709_vm2, %v11942_v51  ;;  %v3786_v17 = vld [vmem:[#allocation2 + $0xa9] sm:$0xff]  ;;  %v3655_v46 = vmax.f32 %v3623_v5, 0.0  ;;  %vm15753_vm4 = vmmov %vm15709_vm2  ;;  %v2691_v51 = vadd.f32 %v11877_v58, %v15755_v6  ;;  %v12525_v16 = vld [vmem:[#allocation2 + $0xb2] sm:$0xff] }
 0x311   : > { %v12225_v5 = vld [vmem:[#allocation2 + $0xb0] sm:$0xff] }
 0x312   : > { %v3228_v41 = vpop.f32.mrf.mxu3  ;;  %3687 = vst.msk [vmem:[#allocation2 + $0xc1] sm:$0xff] %vm15753_vm4, %v3655_v46  ;;  %v3787_v46 = vld [vmem:[#allocation2 + $0xb1] sm:$0xff] }
 0x313   : > { %v4136_v22 = vpop.f32.mrf.mxu2  ;;  %v3930_v3 = vpop.f32.mrf.mxu1  ;;  %v3278_v29 = vadd.f32 %v3228_v41, %v3000_v7  ;;  %v3001_v7 = vadd.f32 %v11901_v36, %v2691_v51  ;;  %v2692_v36 = vadd.f32 %v11904_v20, %v15762_v28  ;;  %v15763_v51 = vld [vmem:[#allocation15_spill] sm:$0xff]  ;;  %v3788_v28 = vld [vmem:[#allocation2 + $0xb9] sm:$0xff] }
 0x314   : > { %v12210_v23 = vadd.f32 %v4136_v22, %v3927_v62  ;;  %v12220_v62 = vld [vmem:[#allocation2 + $0x42] sm:$0xff]  ;;  %vm15764_vm14 = vnez %v15763_v51  ;;  %v15775_v51 = vld [vmem:[#allocation37_spill] sm:$0xff] }
 0x315   : > { %v3541_v30 = vpop.f32.mrf.mxu0  ;;  %v3588_v8 = vadd.f32 %v3538_v47, %v3278_v29  ;;  %v15758_v29 = vld [vmem:[#allocation67_spill] sm:$0xff] }
 0x316   : > { %9517 = vmatmul.msk.f32.gmra.mxu1 %vm15754_vm11, %v3786_v17  ;;  %vm15757_vm11 = vmmov %vm15709_vm2  ;;  %vm15759_vm4 = vnez %v15758_v29 }
 0x317   : > { %v3624_v22 = vadd.f32 %v11753_v21, %v3588_v8  ;;  %9572 = vmatmul.msk.f32.gmra.mxu3 %vm15757_vm11, %v12220_v62  ;;  %v3751_v26 = vsel %vm15759_vm4, %v12225_v5, 0.0  ;;  %vm15761_vm11 = vmmov %vm15709_vm2 }
 0x318   : > { %9549 = vmatmul.msk.f32.gmra.mxu2 %vm15756_vm6, %v12212_v61  ;;  %9608 = vmatmul.msk.f32.gmra.mxu0 %vm15709_vm2, %v4570_v11  ;;  %vm15760_vm6 = vmmov %vm15709_vm2 }
 0x319   : > { %v3656_v41 = vmax.f32 %v3624_v22, 0.0  ;;  %v4261_v22 = vsel %vm15764_vm14, %v12238_v4, 0.0  ;;  %vm15779_vm14 = vmmov %vm15765_vm1 }
 0x31a   : > { %v3231_v6 = vpop.f32.mrf.mxu3 }
 0x31b   : > { %v4139_v58 = vpop.f32.mrf.mxu2  ;;  %v3933_v47 = vpop.f32.mrf.mxu1  ;;  %3688 = vst.msk [vmem:[#allocation2 + $0xc9] sm:$0xff] %vm15760_vm6, %v3656_v41  ;;  %v3279_v8 = vadd.f32 %v3231_v6, %v3001_v7  ;;  %vm15766_vm6 = vmmov %vm15765_vm1 }
 0x31c   : > { %v12232_v17 = vadd.f32 %v4139_v58, %v3930_v3 }
 0x31d   : > { %v3544_v11 = vpop.f32.mrf.mxu0  ;;  %v3589_v3 = vadd.f32 %v3541_v30, %v3279_v8  ;;  %v12254_v30 = vld [vmem:[#allocation2 + $0xb8] sm:$0xff] }
 0x31e   : > { %9518 = vmatmul.msk.f32.gmra.mxu1 %vm15761_vm11, %v3787_v46  ;;  %v3002_v46 = vadd.f32 %v11922_v53, %v2692_v36  ;;  %vm15767_vm11 = vmmov %vm15765_vm1  ;;  %v4572_v36 = vsel %vm15685_vm0, %v12007_v15, 0.0 }
 0x31f   : > { %v3625_v58 = vadd.f32 %v11753_v21, %v3589_v3  ;;  %9573 = vmatmul.msk.f32.gmra.mxu3 %vm15765_vm1, %v4261_v22  ;;  %v15769_v22 = vld [vmem:[#allocation46_spill] sm:$0xff] }
 0x320   : > { %9550 = vmatmul.msk.f32.gmra.mxu2 %vm15709_vm2, %v3751_v26  ;;  %9609 = vmatmul.msk.f32.gmra.mxu0 %vm15766_vm6, %v11985_v39  ;;  %vm15768_vm2 = vmmov %vm15765_vm1  ;;  %v2693_v39 = vadd.f32 %v11927_v9, %v15769_v22 }
 0x321   : > { %v3657_v26 = vmax.f32 %v3625_v58, 0.0  ;;  %v12267_v58 = vld [vmem:[#allocation2 + $0xc0] sm:$0xff]  ;;  %vm15770_vm6 = vmmov %vm15765_vm1 }
 0x322   : > { %v3234_v6 = vpop.f32.mrf.mxu3 }
 0x323   : > { %v4142_v7 = vpop.f32.mrf.mxu2  ;;  %v3936_v20 = vpop.f32.mrf.mxu1  ;;  %3689 = vst.msk [vmem:[#allocation2 + $0xd1] sm:$0xff] %vm15767_vm11, %v3657_v26  ;;  %v3280_v8 = vadd.f32 %v3234_v6, %v3002_v46  ;;  %vm15771_vm11 = vmmov %vm15765_vm1  ;;  %v3003_v46 = vadd.f32 %v11945_v34, %v2693_v39  ;;  %v3789_v26 = vld [vmem:[#allocation2 + $0xc1] sm:$0xff]  ;;  %v2694_v34 = vadd.f32 %v11951_v60, %v15775_v51  ;;  %v15777_v39 = vld [vmem:[#allocation18_spill] sm:$0xff] }
 0x324   : > { %v12252_v41 = vadd.f32 %v4142_v7, %v3933_v47  ;;  %v12262_v47 = vld [vmem:[#allocation2 + $0x52] sm:$0xff]  ;;  %vm15778_vm0 = vnez %v15777_v39  ;;  %v3790_v51 = vld [vmem:[#allocation2 + $0xc9] sm:$0xff] }
 0x325   : > { %v3547_v3 = vpop.f32.mrf.mxu0  ;;  %v3590_v53 = vadd.f32 %v3544_v11, %v3280_v8  ;;  %v15772_v8 = vld [vmem:[#allocation13_spill] sm:$0xff] }
 0x326   : > { %9519 = vmatmul.msk.f32.gmra.mxu1 %vm15768_vm2, %v3788_v28  ;;  %vm15773_vm2 = vnez %v15772_v8  ;;  %v15789_v39 = vld [vmem:[#allocation41_spill] sm:$0xff] }
 0x327   : > { %v3626_v7 = vadd.f32 %v11753_v21, %v3590_v53  ;;  %9574 = vmatmul.msk.f32.gmra.mxu3 %vm15770_vm6, %v12262_v47  ;;  %v3753_v15 = vsel %vm15773_vm2, %v12267_v58, 0.0  ;;  %vm15774_vm6 = vmmov %vm15765_vm1 }
 0x328   : > { %9551 = vmatmul.msk.f32.gmra.mxu2 %vm15765_vm1, %v12254_v30  ;;  %9610 = vmatmul.msk.f32.gmra.mxu0 %vm15771_vm11, %v4572_v36  ;;  %vm15776_vm11 = vmmov %vm15765_vm1 }
 0x329   : > { %v3658_v6 = vmax.f32 %v3626_v7, 0.0  ;;  %v4263_v7 = vsel %vm15778_vm0, %v12280_v42, 0.0  ;;  %vm15794_vm0 = vmmov %vm15765_vm1 }
 0x32a   : > { %v3237_v22 = vpop.f32.mrf.mxu3 }
 0x32b   : > { %v4145_v9 = vpop.f32.mrf.mxu2  ;;  %v3939_v11 = vpop.f32.mrf.mxu1  ;;  %3690 = vst.msk [vmem:[#allocation2 + $0xd9] sm:$0xff] %vm15765_vm1, %v3658_v6  ;;  %v3281_v53 = vadd.f32 %v3237_v22, %v3003_v46 }
 0x32c   : > { %v12274_v28 = vadd.f32 %v4145_v9, %v3936_v20 }
 0x32d   : > { %v3550_v36 = vpop.f32.mrf.mxu0  ;;  %v3591_v20 = vadd.f32 %v3547_v3, %v3281_v53  ;;  %v12296_v3 = vld [vmem:[#allocation2 + $0xc8] sm:$0xff] }
 0x32e   : > { %9520 = vmatmul.msk.f32.gmra.mxu1 %vm15774_vm6, %v3789_v26  ;;  %v3004_v26 = vadd.f32 %v11977_v37, %v2694_v34  ;;  %vm15780_vm6 = vmmov %vm15765_vm1  ;;  %v4574_v34 = vsel %vm15696_vm15, %v12051_v40, 0.0 }
 0x32f   : > { %v3627_v9 = vadd.f32 %v11753_v21, %v3591_v20  ;;  %9575 = vmatmul.msk.f32.gmra.mxu3 %vm15779_vm14, %v4263_v7  ;;  %v15782_v20 = vld [vmem:[#allocation38_spill] sm:$0xff]  ;;  %vm15783_vm14 = vmmov %vm15765_vm1  ;;  %v12309_v7 = vld [vmem:[#allocation2 + $0xd0] sm:$0xff] }
 0x330   : > { %9552 = vmatmul.msk.f32.gmra.mxu2 %vm15776_vm11, %v3753_v15  ;;  %9611 = vmatmul.msk.f32.gmra.mxu0 %vm15765_vm1, %v12038_v12  ;;  %vm15781_vm11 = vmmov %vm15765_vm1  ;;  %v2695_v12 = vadd.f32 %v11979_v24, %v15782_v20 }
 0x331   : > { %v3659_v15 = vmax.f32 %v3627_v9, 0.0  ;;  %v12314_v9 = vld [vmem:[%s15061_s2] ss:$0 sm:$0xff] }
 0x332   : > { %v3240_v22 = vpop.f32.mrf.mxu3 }
 0x333   : > { %v4148_v46 = vpop.f32.mrf.mxu2  ;;  %v3942_v60 = vpop.f32.mrf.mxu1  ;;  %3691 = vst.msk [vmem:[#allocation2 + $0xe1] sm:$0xff] %vm15780_vm6, %v3659_v15  ;;  %v3282_v53 = vadd.f32 %v3240_v22, %v3004_v26  ;;  %vm15785_vm6 = vmmov %vm15765_vm1  ;;  %v15786_v22 = vld [vmem:[#allocation16_spill] sm:$0xff] }
 0x334   : > { %v12294_v6 = vadd.f32 %v4148_v46, %v3939_v11  ;;  %v12304_v11 = vld [vmem:[#allocation2 + $0x62] sm:$0xff] }
 0x335   : > { %v3553_v21 = vpop.f32.mrf.mxu0  ;;  %v3592_v37 = vadd.f32 %v3550_v36, %v3282_v53  ;;  %15784 = vst [vmem:[#allocation54_spill] sm:$0xff] %v12304_v11  ;;  %v3005_v36 = vadd.f32 %v12012_v19, %v2695_v12  ;;  %v15790_v19 = vld [vmem:[#allocation42_spill] sm:$0xff] }
 0x336   : > { %9521 = vmatmul.msk.f32.gmra.mxu1 %vm15781_vm11, %v3790_v51  ;;  %v3791_v51 = vld [vmem:[#allocation2 + $0xd1] sm:$0xff]  ;;  %vm15787_vm11 = vnez %v15786_v22 }
 0x337   : > { %v3628_v46 = vadd.f32 %v12314_v9, %v3592_v37  ;;  %9576 = vmatmul.msk.f32.gmra.mxu3 %vm15765_vm1, %v12304_v11  ;;  %v3755_v53 = vsel %vm15787_vm11, %v12309_v7, 0.0 }
 0x338   : > { %9553 = vmatmul.msk.f32.gmra.mxu2 %vm15783_vm14, %v12296_v3  ;;  %9612 = vmatmul.msk.f32.gmra.mxu0 %vm15785_vm6, %v4574_v34  ;;  %vm15788_vm14 = vmmov %vm15765_vm1 }
 0x339   : > { %v3660_v15 = vmax.f32 %v3628_v46, 0.0  ;;  %vm15791_vm6 = vmmov %vm15765_vm1  ;;  %v15792_v46 = vld [vmem:[#allocation23_spill] sm:$0xff] }
 0x33a   : > { %v3243_v20 = vpop.f32.mrf.mxu3  ;;  %vm15793_vm15 = vnez %v15792_v46 }
 0x33b   : > { %v4151_v24 = vpop.f32.mrf.mxu2  ;;  %v3945_v40 = vpop.f32.mrf.mxu1  ;;  %3692 = vst.msk [vmem:[#allocation2 + $0xe9] sm:$0xff] %vm15788_vm14, %v3660_v15  ;;  %v3283_v37 = vadd.f32 %v3243_v20, %v3005_v36  ;;  %vm15795_vm14 = vmmov %vm15794_vm0  ;;  %v3792_v20 = vld [vmem:[#allocation2 + $0xd9] sm:$0xff] }
 0x33c   : > { %v12321_v26 = vadd.f32 %v4151_v24, %v3942_v60  ;;  %v2696_v60 = vadd.f32 %v15790_v19, %v15789_v39  ;;  %v4265_v24 = vsel %vm15793_vm15, %v12327_v31, 0.0  ;;  %vm15818_vm15 = vmmov %vm15794_vm0 }
 0x33d   : > { %v3556_v34 = vpop.f32.mrf.mxu0  ;;  %v3593_v12 = vadd.f32 %v3553_v21, %v3283_v37  ;;  %v9707_v21 = vld [vmem:[%s15062_s3 + $0xd8] sm:$0xff] }
 0x33e   : > { %9522 = vmatmul.msk.f32.gmra.mxu1 %vm15765_vm1, %v3791_v51  ;;  %v3006_v51 = vadd.f32 %v12036_v45, %v2696_v60  ;;  %v12346_v37 = vld [vmem:[#allocation2 + $0xd8] sm:$0xff]  ;;  %5605 = vmatpush.msra.mxu3 %v9707_v21  ;;  %vm15796_vm1 = vmmov %vm15794_vm0  ;;  %v15797_v45 = vld [vmem:[#allocation43_spill] sm:$0xff] }
 0x33f   : > { %v3629_v11 = vadd.f32 %v12314_v9, %v3593_v12  ;;  %9577 = vmatmul.msk.f32.gmra.mxu3 %vm15794_vm0, %v4265_v24  ;;  %v12354_v60 = vld [vmem:[#allocation2 + $0x72] sm:$0xff]  ;;  %v4576_v24 = vsel %vm15708_vm12, %v12093_v43, 0.0  ;;  %v3793_v21 = vld [vmem:[#allocation2 + $0xe1] sm:$0xff]  ;;  %vm15808_vm12 = vmmov %vm15794_vm0 }
 0x340   : > { %9554 = vmatmul.msk.f32.gmra.mxu2 %vm15791_vm6, %v3755_v53  ;;  %9613 = vmatmul.msk.f32.gmra.mxu0 %vm15795_vm14, %v12076_v38  ;;  %vm15798_vm6 = vmmov %vm15794_vm0  ;;  %v9669_v43 = vld [vmem:[%s15062_s3 + $0xa8] sm:$0xff] }
 0x341   : > { %v3661_v53 = vmax.f32 %v3629_v11, 0.0  ;;  %vm15799_vm14 = vmmov %vm15794_vm0  ;;  %5297 = vmatpush.msrb.mxu2 %v9669_v43  ;;  %v2698_v43 = vadd.f32 %v12066_v32, %v15804_v49  ;;  %5606 = vmatpush.msra.mxu3 %v9706_v27  ;;  %v4584_v27 = vsel %vm15759_vm4, %v12267_v58, 0.0  ;;  %v12541_v58 = vld [vmem:[#allocation2 + $0xba] sm:$0xff] }
 0x342   : > { %v3246_v19 = vpop.f32.mrf.mxu3  ;;  %vm15848_vm4 = vmmov %vm15794_vm0 }
 0x343   : > { %v4154_v36 = vpop.f32.mrf.mxu2  ;;  %v3948_v39 = vpop.f32.mrf.mxu1  ;;  %3693 = vst.msk [vmem:[#allocation2 + $0xf1] sm:$0xff] %vm15794_vm0, %v3661_v53  ;;  %v3284_v12 = vadd.f32 %v3246_v19, %v3006_v51  ;;  %v3008_v46 = vadd.f32 %v12086_v54, %v2698_v43  ;;  %v4578_v54 = vsel %vm15719_vm13, %v12135_v10, 0.0  ;;  %v15812_v10 = vld [vmem:[#allocation26_spill] sm:$0xff] }
 0x344   : > { %v12341_v15 = vadd.f32 %v4154_v36, %v3945_v40  ;;  %v2697_v40 = vadd.f32 %v12040_v1, %v15797_v45  ;;  %v12359_v36 = vld [vmem:[#allocation2 + $0xe0] sm:$0xff] }
 0x345   : > { %v3559_v38 = vpop.f32.mrf.mxu0  ;;  %v3594_v11 = vadd.f32 %v3556_v34, %v3284_v12  ;;  %v9743_v12 = vld [vmem:[%s15062_s3 + $0xf8] sm:$0xff]  ;;  %v15800_v45 = vld [vmem:[#allocation19_spill] sm:$0xff] }
 0x346   : > { %9523 = vmatmul.msk.f32.gmra.mxu1 %vm15796_vm1, %v3792_v20  ;;  %v3007_v20 = vadd.f32 %v12061_v63, %v2697_v40  ;;  %vm15801_vm1 = vnez %v15800_v45  ;;  %5883 = vmatpush.msra.mxu0 %v9743_v12  ;;  %v9705_v45 = vld [vmem:[%s15062_s3 + $0xc8] sm:$0xff] }
 0x347   : > { %v3630_v51 = vadd.f32 %v12314_v9, %v3594_v11  ;;  %9578 = vmatmul.msk.f32.gmra.mxu3 %vm15799_vm14, %v12354_v60  ;;  %v3757_v11 = vsel %vm15801_vm1, %v12359_v36, 0.0  ;;  %vm15803_vm14 = vmmov %vm15794_vm0 }
 0x348   : > { %9555 = vmatmul.msk.f32.gmra.mxu2 %vm15798_vm6, %v12346_v37  ;;  %9614 = vmatmul.msk.f32.gmra.mxu0 %vm15794_vm0, %v4576_v24  ;;  %vm15802_vm6 = vmmov %vm15794_vm0 }
 0x349   : > { %v3662_v19 = vmax.f32 %v3630_v51, 0.0  ;;  %v9668_v51 = vld [vmem:[%s15062_s3 + $0xa0] sm:$0xff]  ;;  %5607 = vmatpush.msra.mxu3 %v9705_v45  ;;  %v9741_v45 = vld [vmem:[%s15062_s3 + $0xe8] sm:$0xff] }
 0x34a   : > { %v3249_v24 = vpop.f32.mrf.mxu3  ;;  %5298 = vmatpush.msrb.mxu2 %v9668_v51 }
 0x34b   : > { %v4157_v1 = vpop.f32.mrf.mxu2  ;;  %v3951_v34 = vpop.f32.mrf.mxu1  ;;  %3694 = vst.msk [vmem:[#allocation2 + $0xf9] sm:$0xff] %vm15802_vm6, %v3662_v19  ;;  %v3285_v63 = vadd.f32 %v3249_v24, %v3007_v20  ;;  %v15805_v20 = vld [vmem:[#allocation31_spill] sm:$0xff] }
 0x34c   : > { %v12366_v53 = vadd.f32 %v4157_v1, %v3948_v39  ;;  %v12378_v39 = vld [vmem:[#allocation2 + $0x7a] sm:$0xff]  ;;  %vm15806_vm6 = vnez %v15805_v20 }
 0x34d   : > { %v3562_v40 = vpop.f32.mrf.mxu0  ;;  %v9779_v1 = vld [vmem:[%s15062_s3 + $0x118] sm:$0xff]  ;;  %v3595_v19 = vadd.f32 %v3559_v38, %v3285_v63  ;;  %v3794_v38 = vld [vmem:[#allocation2 + $0xe9] sm:$0xff] }
 0x34e   : > { %9524 = vmatmul.msk.f32.gmra.mxu1 %vm15803_vm14, %v3793_v21  ;;  %v4267_v21 = vsel %vm15806_vm6, %v12378_v39, 0.0  ;;  %vm15807_vm14 = vmmov %vm15794_vm0  ;;  %v12400_v63 = vld [vmem:[#allocation2 + $0xe8] sm:$0xff] }
 0x34f   : > { %6193 = vmatpush.msra.mxu1 %v9779_v1  ;;  %v3631_v12 = vadd.f32 %v12314_v9, %v3595_v19  ;;  %9579 = vmatmul.msk.f32.gmra.mxu3 %vm15807_vm14, %v4267_v21  ;;  %vm15809_vm6 = vmmov %vm15794_vm0  ;;  %v12406_v21 = vld [vmem:[#allocation2 + $0x82] sm:$0xff] }
 0x350   : > { %9556 = vmatmul.msk.f32.gmra.mxu2 %vm15794_vm0, %v3757_v11  ;;  %9615 = vmatmul.msk.f32.gmra.mxu0 %vm15808_vm12, %v12122_v50  ;;  %vm15810_vm14 = vmmov %vm15794_vm0 }
 0x351   : > { %v3663_v11 = vmax.f32 %v3631_v12, 0.0  ;;  %vm15811_vm12 = vmmov %vm15794_vm0  ;;  %v4125_v12 = vadd.f32 %v12110_v59, %v12084_v33  ;;  %v15816_v59 = vld [vmem:[#allocation40_spill] sm:$0xff] }
 0x352   : > { %v3252_v1 = vpop.f32.mrf.mxu3  ;;  %vm15817_vm13 = vnez %v15816_v59 }
 0x353   : > { %v4160_v24 = vpop.f32.mrf.mxu2  ;;  %v3954_v32 = vpop.f32.mrf.mxu1  ;;  %3695 = vst.msk [vmem:[#allocation2 + $0x101] sm:$0xff] %vm15794_vm0, %v3663_v11  ;;  %v3286_v51 = vadd.f32 %v3252_v1, %v3008_v46 }
 0x354   : > { %v12398_v49 = vadd.f32 %v4160_v24, %v3951_v34  ;;  %v12411_v34 = vld [vmem:[#allocation2 + $0xf0] sm:$0xff] }
 0x355   : > { %v4712_v19 = vpop.f32.mrf.mxu0  ;;  %v3596_v50 = vadd.f32 %v3562_v40, %v3286_v51 }
 0x356   : > { %9525 = vmatmul.msk.f32.gmra.mxu1 %vm15809_vm6, %v3794_v38  ;;  %v3795_v38 = vld [vmem:[#allocation2 + $0xf1] sm:$0xff]  ;;  %vm15813_vm6 = vnez %v15812_v10 }
 0x357   : > { %v3632_v43 = vadd.f32 %v12314_v9, %v3596_v50  ;;  %9580 = vmatmul.msk.f32.gmra.mxu3 %vm15811_vm12, %v12406_v21  ;;  %v3759_v1 = vsel %vm15813_vm6, %v12411_v34, 0.0  ;;  %v12425_v50 = vld [vmem:[#allocation2 + $0x8a] sm:$0xff]  ;;  %vm15815_vm12 = vmmov %vm15794_vm0 }
 0x358   : > { %9557 = vmatmul.msk.f32.gmra.mxu2 %vm15810_vm14, %v12400_v63  ;;  %9616 = vmatmul.msk.f32.gmra.mxu0 %vm15794_vm0, %v4578_v54  ;;  %vm15814_vm14 = vmmov %vm15794_vm0 }
 0x359   : > { %v3664_v11 = vmax.f32 %v3632_v43, 0.0  ;;  %vm15819_vm6 = vmmov %vm15794_vm0 }
 0x35a   : > { %v4402_v51 = vpop.f32.mrf.mxu3 }
 0x35b   : > { %v4163_v46 = vpop.f32.mrf.mxu2  ;;  %v3957_v24 = vpop.f32.mrf.mxu1  ;;  %3696 = vst.msk [vmem:[#allocation2 + $0x109] sm:$0xff] %vm15814_vm14, %v3664_v11  ;;  %v4498_v9 = vadd.f32 %v4402_v51, %v4125_v12  ;;  %v3796_v11 = vld [vmem:[#allocation2 + $0xf9] sm:$0xff]  ;;  %vm15820_vm14 = vmmov %vm15794_vm0 }
 0x35c   : > { %v12419_v40 = vadd.f32 %v4163_v46, %v3954_v32  ;;  %v4269_v32 = vsel %vm15817_vm13, %v12425_v50, 0.0  ;;  %v4128_v46 = vadd.f32 %v12141_v48, %v12115_v25  ;;  %v4580_v25 = vsel %vm15735_vm8, %v12177_v13, 0.0 }
 0x35d   : > { %v4715_v54 = vpop.f32.mrf.mxu0  ;;  %v12429_v33 = vadd.f32 %v4712_v19, %v4498_v9 }
 0x35e   : > { %9526 = vmatmul.msk.f32.gmra.mxu1 %vm15815_vm12, %v3795_v38  ;;  %vm15823_vm12 = vmmov %vm15794_vm0 }
 0x35f   : > { %9581 = vmatmul.msk.f32.gmra.mxu3 %vm15818_vm15, %v4269_v32  ;;  %vm15821_vm15 = vmmov %vm15794_vm0 }
 0x360   : > { %9558 = vmatmul.msk.f32.gmra.mxu2 %vm15794_vm0, %v3759_v1  ;;  %9617 = vmatmul.msk.f32.gmra.mxu0 %vm15819_vm6, %v12164_v14  ;;  %v12441_v1 = vld [vmem:[#allocation2 + $0xf8] sm:$0xff]  ;;  %vm15822_vm6 = vmmov %vm15794_vm0 }
 0x361   : > { %v12448_v14 = vld [vmem:[#allocation2 + $0x92] sm:$0xff] }
 0x362   : > { %v4405_v19 = vpop.f32.mrf.mxu3 }
 0x363   : > { %v4166_v43 = vpop.f32.mrf.mxu2  ;;  %v3960_v38 = vpop.f32.mrf.mxu1  ;;  %v4499_v51 = vadd.f32 %v4405_v19, %v4128_v46  ;;  %v12459_v19 = vld [vmem:[#allocation2 + $0x9a] sm:$0xff] }
 0x364   : > { %v12439_v12 = vadd.f32 %v4166_v43, %v3957_v24 }
 0x365   : > { %v4718_v9 = vpop.f32.mrf.mxu0  ;;  %v12446_v32 = vadd.f32 %v4715_v54, %v4499_v51 }
 0x366   : > { %9527 = vmatmul.msk.f32.gmra.mxu1 %vm15820_vm14, %v3796_v11  ;;  %v4840_v11 = vld [vmem:[#allocation2 + $0x11] sm:$0xff]  ;;  %vm15824_vm14 = vmmov %vm15794_vm0 }
 0x367   : > { %9582 = vmatmul.msk.f32.gmra.mxu3 %vm15822_vm6, %v12448_v14  ;;  %vm15827_vm6 = vmmov %vm15794_vm0 }
 0x368   : > { %9559 = vmatmul.msk.f32.gmra.mxu2 %vm15821_vm15, %v12441_v1  ;;  %9618 = vmatmul.msk.f32.gmra.mxu0 %vm15823_vm12, %v4580_v25  ;;  %v15825_v25 = vld [vmem:[#allocation51_spill] sm:$0xff]  ;;  %vm15828_vm12 = vmmov %vm15794_vm0 }
 0x369   : > { %vm15826_vm15 = vnez %v15825_v25 }
 0x36a   : > { %v4408_v46 = vpop.f32.mrf.mxu3 }
 0x36b   : > { %v4169_v48 = vpop.f32.mrf.mxu2  ;;  %v3963_v43 = vpop.f32.mrf.mxu1  ;;  %v4500_v54 = vadd.f32 %v4408_v46, %v12162_v35 }
 0x36c   : > { %v12456_v24 = vadd.f32 %v4169_v48, %v3960_v38  ;;  %v4271_v38 = vsel %vm15826_vm15, %v12459_v19, 0.0 }
 0x36d   : > { %v4721_v51 = vpop.f32.mrf.mxu0  ;;  %v12464_v13 = vadd.f32 %v4718_v9, %v4500_v54 }
 0x36e   : > { %9636 = vmatmul.msk.f32.vlgmr.msrb.gmra.mxu1 %vm15794_vm0, %v4840_v11 }
 0x36f   : > { %9583 = vmatmul.msk.f32.gmra.mxu3 %vm15827_vm6, %v4271_v38  ;;  %vm15830_vm6 = vmmov %vm15794_vm0 }
 0x370   : > { %9672 = vmatmul.msk.f32.vlgmr.msrb.gmra.mxu2 %vm15824_vm14, %v12088_v44  ;;  %9619 = vmatmul.msk.f32.gmra.mxu0 %vm15828_vm12, %v12212_v61  ;;  %v5151_v44 = vsel %vm10258_vm3, %v12104_v18, 0.0  ;;  %vm15829_vm14 = vmmov %vm15794_vm0  ;;  %v12482_v61 = vld [vmem:[#allocation2 + $0xa2] sm:$0xff] }
 0x371   : > { %vm15831_vm12 = vmmov %vm15794_vm0 }
 0x372   : > { %v4411_v11 = vpop.f32.mrf.mxu3 }
 0x373   : > { %v4172_v35 = vpop.f32.mrf.mxu2  ;;  %v3966_v46 = vpop.f32.mrf.mxu1  ;;  %v4501_v2 = vadd.f32 %v4411_v11, %v12184_v56  ;;  %v15832_v11 = vld [vmem:[#allocation52_spill] sm:$0xff] }
 0x374   : > { %v12472_v48 = vadd.f32 %v4172_v35, %v3963_v43  ;;  %v4582_v43 = vsel %vm15747_vm10, %v12225_v5, 0.0  ;;  %v12492_v35 = vld [vmem:[#allocation2 + $0x21] sm:$0xff]  ;;  %vm15838_vm10 = vmmov %vm15794_vm0 }
 0x375   : > { %v4724_v9 = vpop.f32.mrf.mxu0  ;;  %v12480_v54 = vadd.f32 %v4721_v51, %v4501_v2  ;;  %v12495_v51 = vld [vmem:[#allocation2 + $0xaa] sm:$0xff] }
 0x376   : > { %9637 = vmatmul.msk.f32.gmra.mxu1 %vm15794_vm0, %v4841_v55 }
 0x377   : > { %9584 = vmatmul.msk.f32.gmra.mxu3 %vm15830_vm6, %v12482_v61 }
 0x378   : > { %9673 = vmatmul.msk.f32.gmra.mxu2 %vm15829_vm14, %v5151_v44  ;;  %9620 = vmatmul.msk.f32.gmra.mxu0 %vm15831_vm12, %v4582_v43  ;;  %vm15833_vm14 = vmmov %vm15794_vm0 }
 0x379   : > { %vm15837_vm12 = vmmov %vm15794_vm0 }
 0x37a   : > { %v4414_v38 = vpop.f32.mrf.mxu3 }
 0x37b   : > { %v4175_v55 = vpop.f32.mrf.mxu2  ;;  %v3969_v18 = vpop.f32.mrf.mxu1  ;;  %v4502_v2 = vadd.f32 %v4414_v38, %v12210_v23 }
 0x37c   : > { %v12490_v56 = vadd.f32 %v4175_v55, %v3966_v46  ;;  %v15835_v46 = vld [vmem:[#allocation62_spill] sm:$0xff] }
 0x37d   : > { %v4727_v5 = vpop.f32.mrf.mxu0  ;;  %v12501_v44 = vadd.f32 %v4724_v9, %v4502_v2  ;;  %vm15836_vm6 = vnez %v15835_v46  ;;  %v12514_v9 = vld [vmem:[#allocation2 + $0x29] sm:$0xff] }
 0x37e   : > { %9638 = vmatmul.msk.f32.gmra.mxu1 %vm15794_vm0, %v12492_v35  ;;  %v4273_v43 = vsel %vm15836_vm6, %v12495_v51, 0.0 }
 0x37f   : > { %15834 = vst [vmem:[#allocation66_spill] sm:$0xff] %v12501_v44  ;;  %9585 = vmatmul.msk.f32.gmra.mxu3 %vm15837_vm12, %v4273_v43  ;;  %vm15843_vm12 = vmmov %vm15794_vm0  ;;  %v12560_v44 = vld [vmem:[#allocation2 + $0x39] sm:$0xff] }
 0x380   : > { %9674 = vmatmul.msk.f32.gmra.mxu2 %vm15833_vm14, %v15832_v11  ;;  %9621 = vmatmul.msk.f32.gmra.mxu0 %vm15838_vm10, %v12254_v30  ;;  %v5153_v30 = vsel %vm10297_vm5, %v12148_v52, 0.0  ;;  %vm15840_vm10 = vmmov %vm15794_vm0 }
 0x381   : > { %vm15842_vm14 = vmmov %vm15794_vm0 }
 0x382   : > { %v4417_v11 = vpop.f32.mrf.mxu3 }
 0x383   : > { %v4178_v23 = vpop.f32.mrf.mxu2  ;;  %v3972_v38 = vpop.f32.mrf.mxu1  ;;  %v4503_v2 = vadd.f32 %v4417_v11, %v12232_v17 }
 0x384   : > { %v12509_v55 = vadd.f32 %v4178_v23, %v3969_v18 }
 0x385   : > { %v4730_v18 = vpop.f32.mrf.mxu0  ;;  %v12523_v23 = vadd.f32 %v4727_v5, %v4503_v2  ;;  %v9742_v5 = vld [vmem:[%s15062_s3 + $0xf0] sm:$0xff] }
 0x386   : > { %9639 = vmatmul.msk.f32.gmra.mxu1 %vm15794_vm0, %v12514_v9  ;;  %5884 = vmatpush.msra.mxu0 %v9742_v5  ;;  %v15845_v5 = vld [vmem:[#allocation72_spill] sm:$0xff] }
 0x387   : > { %15841 = vst [vmem:[#allocation47_spill] sm:$0xff] %v12523_v23  ;;  %9586 = vmatmul.msk.f32.gmra.mxu3 %vm15842_vm14, %v12525_v16  ;;  %vm15846_vm14 = vnez %v15845_v5 }
 0x388   : > { %9675 = vmatmul.msk.f32.gmra.mxu2 %vm15840_vm10, %v5153_v30  ;;  %9622 = vmatmul.msk.f32.gmra.mxu0 %vm15843_vm12, %v4584_v27  ;;  %v12538_v30 = vld [vmem:[#allocation2 + $0x31] sm:$0xff]  ;;  %vm15844_vm10 = vmmov %vm15794_vm0 }
 0x389   : > { %vm15847_vm12 = vmmov %vm15794_vm0  ;;  %5885 = vmatpush.msra.mxu0 %v9741_v45 }
 0x38a   : > { %v4420_v2 = vpop.f32.mrf.mxu3 }
 0x38b   : > { %v4181_v17 = vpop.f32.mrf.mxu2  ;;  %v3975_v52 = vpop.f32.mrf.mxu1  ;;  %v4504_v29 = vadd.f32 %v4420_v2, %v12252_v41  ;;  %v4275_v41 = vsel %vm15846_vm14, %v12541_v58, 0.0 }
 0x38c   : > { %v12533_v11 = vadd.f32 %v4181_v17, %v3972_v38  ;;  %v9778_v38 = vld [vmem:[%s15062_s3 + $0x110] sm:$0xff] }
 0x38d   : > { %v4733_v27 = vpop.f32.mrf.mxu0  ;;  %6194 = vmatpush.msra.mxu1 %v9778_v38  ;;  %v12550_v17 = vadd.f32 %v4730_v18, %v4504_v29  ;;  %v5155_v18 = vsel %vm10345_vm7, %v12193_v57, 0.0  ;;  %v12581_v29 = vld [vmem:[#allocation2 + $0x41] sm:$0xff] }
 0x38e   : > { %9640 = vmatmul.msk.f32.gmra.mxu1 %vm15794_vm0, %v12538_v30 }
 0x38f   : > { %9587 = vmatmul.msk.f32.gmra.mxu3 %vm15847_vm12, %v4275_v41  ;;  %v4586_v41 = vsel %vm15773_vm2, %v12309_v7, 0.0  ;;  %vm15853_vm12 = vmmov %vm15794_vm0 }
 0x390   : > { %9676 = vmatmul.msk.f32.gmra.mxu2 %vm15844_vm10, %v12172_v0  ;;  %9623 = vmatmul.msk.f32.gmra.mxu0 %vm15848_vm4, %v12296_v3  ;;  %vm15850_vm10 = vmmov %vm15794_vm0 }
 0x391   : > { %vm15852_vm4 = vmmov %vm15794_vm0 }
 0x392   : > { %v4423_v46 = vpop.f32.mrf.mxu3  ;;  %vm15859_vm2 = vmmov %vm15794_vm0 }
 0x393   : > { %v4184_v2 = vpop.f32.mrf.mxu2  ;;  %v3978_v23 = vpop.f32.mrf.mxu1  ;;  %v4505_v0 = vadd.f32 %v4423_v46, %v12274_v28 }
 0x394   : > { %v12558_v43 = vadd.f32 %v4184_v2, %v3975_v52  ;;  %v12571_v52 = vld [vmem:[#allocation2 + $0xc2] sm:$0xff] }
 0x395   : > { %v4736_v38 = vpop.f32.mrf.mxu0  ;;  %v12569_v3 = vadd.f32 %v4733_v27, %v4505_v0  ;;  %v12584_v0 = vld [vmem:[#allocation2 + $0xca] sm:$0xff] }
 0x396   : > { %9641 = vmatmul.msk.f32.gmra.mxu1 %vm15794_vm0, %v12560_v44 }
 0x397   : > { %15851 = vst [vmem:[#allocation68_spill] sm:$0xff] %v12569_v3  ;;  %9588 = vmatmul.msk.f32.gmra.mxu3 %vm15852_vm4, %v12571_v52  ;;  %v12600_v3 = vld [vmem:[#allocation2 + $0x49] sm:$0xff] }
 0x398   : > { %9677 = vmatmul.msk.f32.gmra.mxu2 %vm15850_vm10, %v5155_v18  ;;  %9624 = vmatmul.msk.f32.gmra.mxu0 %vm15853_vm12, %v4586_v41  ;;  %vm15854_vm10 = vmmov %vm15794_vm0 }
 0x399   : > { %vm15858_vm12 = vmmov %vm15794_vm0 }
 0x39a   : > { %v4426_v2 = vpop.f32.mrf.mxu3 }
 0x39b   : > { %v4187_v28 = vpop.f32.mrf.mxu2  ;;  %v3981_v57 = vpop.f32.mrf.mxu1  ;;  %v4506_v27 = vadd.f32 %v4426_v2, %v12294_v6 }
 0x39c   : > { %v12579_v46 = vadd.f32 %v4187_v28, %v3978_v23  ;;  %v15856_v23 = vld [vmem:[#allocation39_spill] sm:$0xff] }
 0x39d   : > { %v4739_v7 = vpop.f32.mrf.mxu0  ;;  %v12590_v18 = vadd.f32 %v4736_v38, %v4506_v27  ;;  %vm15857_vm4 = vnez %v15856_v23  ;;  %v5157_v27 = vsel %vm10394_vm9, %v12238_v4, 0.0  ;;  %vm15876_vm9 = vmmov %vm15794_vm0 }
 0x39e   : > { %9642 = vmatmul.msk.f32.gmra.mxu1 %vm15794_vm0, %v12581_v29  ;;  %v4277_v41 = vsel %vm15857_vm4, %v12584_v0, 0.0 }
 0x39f   : > { %15855 = vst [vmem:[#allocation59_spill] sm:$0xff] %v12590_v18  ;;  %9589 = vmatmul.msk.f32.gmra.mxu3 %vm15858_vm12, %v4277_v41  ;;  %vm15864_vm12 = vmmov %vm15794_vm0  ;;  %v12621_v18 = vld [vmem:[#allocation2 + $0x51] sm:$0xff] }
 0x3a0   : > { %9678 = vmatmul.msk.f32.gmra.mxu2 %vm15854_vm10, %v12220_v62  ;;  %9625 = vmatmul.msk.f32.gmra.mxu0 %vm15859_vm2, %v12346_v37  ;;  %vm15861_vm10 = vmmov %vm15794_vm0 }
 0x3a1   : > { %vm15863_vm2 = vmmov %vm15794_vm0 }
 0x3a2   : > { %v4429_v8 = vpop.f32.mrf.mxu3 }
 0x3a3   : > { %v4190_v6 = vpop.f32.mrf.mxu2  ;;  %v3984_v2 = vpop.f32.mrf.mxu1  ;;  %v4507_v62 = vadd.f32 %v4429_v8, %v12321_v26 }
 0x3a4   : > { %v12598_v28 = vadd.f32 %v4190_v6, %v3981_v57  ;;  %v12611_v57 = vld [vmem:[#allocation2 + $0xd2] sm:$0xff]  ;;  %v4588_v6 = vsel %vm15787_vm11, %v12359_v36, 0.0  ;;  %vm15870_vm11 = vmmov %vm15794_vm0 }
 0x3a5   : > { %v4742_v41 = vpop.f32.mrf.mxu0  ;;  %v12609_v37 = vadd.f32 %v4739_v7, %v4507_v62  ;;  %v12624_v62 = vld [vmem:[#allocation2 + $0xda] sm:$0xff] }
 0x3a6   : > { %9643 = vmatmul.msk.f32.gmra.mxu1 %vm15794_vm0, %v12600_v3 }
 0x3a7   : > { %15862 = vst [vmem:[#allocation60_spill] sm:$0xff] %v12609_v37  ;;  %9590 = vmatmul.msk.f32.gmra.mxu3 %vm15863_vm2, %v12611_v57  ;;  %v12640_v37 = vld [vmem:[#allocation2 + $0x59] sm:$0xff] }
 0x3a8   : > { %9679 = vmatmul.msk.f32.gmra.mxu2 %vm15861_vm10, %v5157_v27  ;;  %9626 = vmatmul.msk.f32.gmra.mxu0 %vm15864_vm12, %v4588_v6  ;;  %vm15865_vm10 = vmmov %vm15794_vm0 }
 0x3a9   : > { %vm15869_vm12 = vmmov %vm15794_vm0 }
 0x3aa   : > { %v4432_v38 = vpop.f32.mrf.mxu3 }
 0x3ab   : > { %v4193_v8 = vpop.f32.mrf.mxu2  ;;  %v3987_v4 = vpop.f32.mrf.mxu1  ;;  %v4508_v7 = vadd.f32 %v4432_v38, %v12341_v15 }
 0x3ac   : > { %v12619_v26 = vadd.f32 %v4193_v8, %v3984_v2  ;;  %v15867_v2 = vld [vmem:[#allocation50_spill] sm:$0xff] }
 0x3ad   : > { %v4745_v36 = vpop.f32.mrf.mxu0  ;;  %v12630_v27 = vadd.f32 %v4742_v41, %v4508_v7  ;;  %vm15868_vm2 = vnez %v15867_v2  ;;  %v15871_v41 = vld [vmem:[#allocation15_spill] sm:$0xff] }
 0x3ae   : > { %9644 = vmatmul.msk.f32.gmra.mxu1 %vm15794_vm0, %v12621_v18  ;;  %v4279_v6 = vsel %vm15868_vm2, %v12624_v62, 0.0 }
 0x3af   : > { %15866 = vst [vmem:[#allocation53_spill] sm:$0xff] %v12630_v27  ;;  %9591 = vmatmul.msk.f32.gmra.mxu3 %vm15869_vm12, %v4279_v6  ;;  %vm15873_vm12 = vmmov %vm15794_vm0 }
 0x3b0   : > { %9680 = vmatmul.msk.f32.gmra.mxu2 %vm15865_vm10, %v12262_v47  ;;  %9627 = vmatmul.msk.f32.gmra.mxu0 %vm15870_vm11, %v12400_v63  ;;  %vm15872_vm10 = vnez %v15871_v41  ;;  %vm15875_vm11 = vmmov %vm15794_vm0  ;;  %v12661_v41 = vld [vmem:[#allocation2 + $0x61] sm:$0xff] }
 0x3b1   : > { %v5159_v7 = vsel %vm15872_vm10, %v12280_v42, 0.0 }
 0x3b2   : > { %v4435_v22 = vpop.f32.mrf.mxu3 }
 0x3b3   : > { %v4196_v15 = vpop.f32.mrf.mxu2  ;;  %v3990_v8 = vpop.f32.mrf.mxu1  ;;  %v4509_v47 = vadd.f32 %v4435_v22, %v12366_v53 }
 0x3b4   : > { %v12638_v38 = vadd.f32 %v4196_v15, %v3987_v4  ;;  %v12651_v4 = vld [vmem:[#allocation2 + $0xe2] sm:$0xff]  ;;  %v4590_v15 = vsel %vm15801_vm1, %v12411_v34, 0.0  ;;  %vm15883_vm1 = vmmov %vm15794_vm0 }
 0x3b5   : > { %v4748_v6 = vpop.f32.mrf.mxu0  ;;  %v12649_v63 = vadd.f32 %v4745_v36, %v4509_v47  ;;  %v12664_v47 = vld [vmem:[#allocation2 + $0xea] sm:$0xff] }
 0x3b6   : > { %9645 = vmatmul.msk.f32.gmra.mxu1 %vm15794_vm0, %v12640_v37 }
 0x3b7   : > { %15874 = vst [vmem:[#allocation63_spill] sm:$0xff] %v12649_v63  ;;  %9592 = vmatmul.msk.f32.gmra.mxu3 %vm15875_vm11, %v12651_v4  ;;  %vm15882_vm11 = vmmov %vm15794_vm0 }
 0x3b8   : > { %9681 = vmatmul.msk.f32.gmra.mxu2 %vm15873_vm12, %v5159_v7  ;;  %9628 = vmatmul.msk.f32.gmra.mxu0 %vm15876_vm9, %v4590_v15  ;;  %v15877_v7 = vld [vmem:[#allocation54_spill] sm:$0xff]  ;;  %vm15878_vm12 = vmmov %vm15794_vm0 }
 0x3ba   : > { %v4438_v27 = vpop.f32.mrf.mxu3 }
 0x3bb   : > { %v4199_v22 = vpop.f32.mrf.mxu2  ;;  %v3993_v42 = vpop.f32.mrf.mxu1  ;;  %v4510_v36 = vadd.f32 %v4438_v27, %v12398_v49 }
 0x3bc   : > { %v12659_v53 = vadd.f32 %v4199_v22, %v3990_v8  ;;  %v15880_v8 = vld [vmem:[#allocation61_spill] sm:$0xff] }
 0x3bd   : > { %v4751_v34 = vpop.f32.mrf.mxu0  ;;  %v12670_v63 = vadd.f32 %v4748_v6, %v4510_v36  ;;  %vm15881_vm9 = vnez %v15880_v8  ;;  %v12683_v6 = vld [vmem:[#allocation2 + $0x69] sm:$0xff]  ;;  %v12705_v8 = vld [vmem:[#allocation2 + $0xf2] sm:$0xff] }
 0x3be   : > { %9646 = vmatmul.msk.f32.gmra.mxu1 %vm15794_vm0, %v12661_v41  ;;  %v4281_v15 = vsel %vm15881_vm9, %v12664_v47, 0.0  ;;  %15889 = vst [vmem:[#allocation64_spill] sm:$0xff] %v12705_v8 }
 0x3bf   : > { %15879 = vst [vmem:[#allocation65_spill] sm:$0xff] %v12670_v63  ;;  %9593 = vmatmul.msk.f32.gmra.mxu3 %vm15882_vm11, %v4281_v15  ;;  %v12686_v63 = vld [vmem:[#allocation2 + $0x100] sm:$0xff]  ;;  %vm15890_vm11 = vnez %v15812_v10 }
 0x3c0   : > { %9682 = vmatmul.msk.f32.gmra.mxu2 %vm15878_vm12, %v15877_v7  ;;  %9629 = vmatmul.msk.f32.gmra.mxu0 %vm15883_vm1, %v12441_v1  ;;  %15884 = vst [vmem:[#allocation58_spill] sm:$0xff] %v12686_v63  ;;  %v15885_v1 = vld [vmem:[#allocation18_spill] sm:$0xff]  ;;  %vm15887_vm12 = vmmov %vm15794_vm0 }
 0x3c1   : > { %vm15886_vm1 = vnez %v15885_v1 }
 0x3c2   : > { %v4441_v7 = vpop.f32.mrf.mxu3 }
 0x3c3   : > { %v4202_v49 = vpop.f32.mrf.mxu2  ;;  %v3996_v22 = vpop.f32.mrf.mxu1  ;;  %v4511_v36 = vadd.f32 %v4441_v7, %v12419_v40  ;;  %v9704_v40 = vld [vmem:[%s15062_s3 + $0xc0] sm:$0xff] }
 0x3c4   : > { %v12678_v27 = vadd.f32 %v4202_v49, %v3993_v42  ;;  %v5161_v42 = vsel %vm15886_vm1, %v12327_v31, 0.0  ;;  %v9740_v49 = vld [vmem:[%s15062_s3 + $0xe0] sm:$0xff]  ;;  %v4592_v31 = vsel %vm15890_vm11, %v12686_v63, 0.0  ;;  %5608 = vmatpush.msra.mxu3 %v9704_v40  ;;  %vm15898_vm1 = vmmov %vm15794_vm0 }
 0x3c5   : > { %v4754_v15 = vpop.f32.mrf.mxu0  ;;  %v12703_v7 = vadd.f32 %v4751_v34, %v4511_v36  ;;  %5886 = vmatpush.msra.mxu0 %v9740_v49  ;;  %v9815_v34 = vld [vmem:[%s15064_s5 + $0x38] sm:$0xff] }
 0x3c6   : > { %9647 = vmatmul.msk.f32.gmra.mxu1 %vm15794_vm0, %v12683_v6  ;;  %6639 = vmatpush.msra.mxu2 %v9815_v34  ;;  %v12721_v40 = vld [vmem:[#allocation2 + $0xfa] sm:$0xff]  ;;  %v12735_v34 = vld [vmem:[#allocation2 + $0x108] sm:$0xff] }
 0x3c7   : > { %15888 = vst [vmem:[#allocation70_spill] sm:$0xff] %v12703_v7  ;;  %9594 = vmatmul.msk.f32.gmra.mxu3 %vm15794_vm0, %v12705_v8  ;;  %v12718_v7 = vld [vmem:[#allocation2 + $0x71] sm:$0xff] }
 0x3c8   : > { %9683 = vmatmul.msk.f32.gmra.mxu2 %vm15887_vm12, %v5161_v42  ;;  %vm15891_vm12 = vmmov %vm15794_vm0  ;;  %15892 = vst [vmem:[#allocation74_spill] sm:$0xff] %v12721_v40 }
 0x3c9   : > { %9630 = vmatmul.msk.f32.gmra.mxu0 %vm15891_vm12, %v4592_v31  ;;  %vm15893_vm12 = vmmov %vm15794_vm0  ;;  %15897 = vst [vmem:[#allocation73_spill] sm:$0xff] %v12735_v34 }
 0x3ca   : > { %v4444_v36 = vpop.f32.mrf.mxu3 }
 0x3cb   : > { %v4205_v42 = vpop.f32.mrf.mxu2  ;;  %v3999_v2 = vpop.f32.mrf.mxu1  ;;  %v4512_v45 = vadd.f32 %v4444_v36, %v12439_v12 }
 0x3cc   : > { %v12713_v1 = vadd.f32 %v4205_v42, %v3996_v22  ;;  %v9777_v22 = vld [vmem:[%s15062_s3 + $0x108] sm:$0xff] }
 0x3cd   : > { %v4757_v31 = vpop.f32.mrf.mxu0  ;;  %6195 = vmatpush.msra.mxu1 %v9777_v22  ;;  %v12730_v49 = vadd.f32 %v4754_v15, %v4512_v45  ;;  %v15895_v42 = vld [vmem:[#allocation71_spill] sm:$0xff] }
 0x3ce   : > { %9648 = vmatmul.msk.f32.gmra.mxu1 %vm15794_vm0, %v12718_v7  ;;  %vm15896_vm11 = vnez %v15895_v42  ;;  %v5428_v45 = vld [vmem:[#allocation2 + $0x20] sm:$0xff] }
 0x3cf   : > { %15894 = vst [vmem:[#allocation69_spill] sm:$0xff] %v12730_v49  ;;  %v4283_v12 = vsel %vm15896_vm11, %v12721_v40, 0.0  ;;  %v15900_v22 = vld [vmem:[#allocation23_spill] sm:$0xff] }
 0x3d0   : > { %9684 = vmatmul.msk.f32.gmra.mxu2 %vm15893_vm12, %v12354_v60  ;;  %9595 = vmatmul.msk.f32.gmra.mxu3 %vm15898_vm1, %v4283_v12  ;;  %v12742_v60 = vld [vmem:[#allocation2 + $0x79] sm:$0xff]  ;;  %vm15899_vm12 = vmmov %vm15794_vm0  ;;  %vm15901_vm10 = vnez %v15900_v22  ;;  %v12760_v22 = vld [vmem:[#allocation2 + $0x81] sm:$0xff] }
 0x3d1   : > { %9631 = vmatmul.msk.f32.gmra.mxu0 %vm15794_vm0, %v12735_v34  ;;  %v5163_v12 = vsel %vm15901_vm10, %v12378_v39, 0.0  ;;  %vm15902_vm1 = vmmov %vm15794_vm0 }
 0x3d2   : > { %v4447_v8 = vpop.f32.mrf.mxu3  ;;  %vm15905_vm7 = vmmov %vm15902_vm1 }
 0x3d3   : > { %v4208_v36 = vpop.f32.mrf.mxu2  ;;  %v4002_v63 = vpop.f32.mrf.mxu1  ;;  %v4513_v15 = vadd.f32 %v4447_v8, %v12456_v24  ;;  %vm15906_vm5 = vmmov %vm15902_vm1 }
 0x3d4   : > { %v12740_v10 = vadd.f32 %v4208_v36, %v3999_v2  ;;  %v15903_v2 = vld [vmem:[#allocation5_spill] sm:$0xff] }
 0x3d5   : > { %v4760_v49 = vpop.f32.mrf.mxu0  ;;  %v12751_v34 = vadd.f32 %v4757_v31, %v4513_v15  ;;  %vm15904_vm0 = vnez %v15903_v2 }
 0x3d6   : > { %9649 = vmatmul.msk.f32.gmra.mxu1 %vm15899_vm12, %v12742_v60  ;;  %v5460_v36 = vsel %vm15904_vm0, %v5428_v45, 0.0  ;;  %vm15907_vm12 = vmmov %vm15902_vm1  ;;  %v5429_v45 = vld [vmem:[#allocation2 + $0x28] sm:$0xff] }
 0x3d8   : > { %9685 = vmatmul.msk.f32.gmra.mxu2 %vm15902_vm1, %v5163_v12  ;;  %9708 = vmatmul.msk.f32.vlgmr.msra.gmra.mxu3 %vm15905_vm7, %v5460_v36  ;;  %vm15910_vm7 = vmmov %vm15902_vm1 }
 0x3d9   : > { %9744 = vmatmul.msk.f32.vlgmr.msra.gmra.mxu0 %vm15906_vm5, %v12492_v35  ;;  %vm15909_vm5 = vmmov %vm15902_vm1 }
 0x3da   : > { %v4450_v40 = vpop.f32.mrf.mxu3  ;;  %vm15916_vm0 = vmmov %vm15909_vm5 }
 0x3db   : > { %v4211_v24 = vpop.f32.mrf.mxu2  ;;  %v4005_v42 = vpop.f32.mrf.mxu1  ;;  %v4514_v39 = vadd.f32 %v4450_v40, %v12472_v48  ;;  %v12774_v40 = vld [vmem:[#allocation2 + $0x89] sm:$0xff]  ;;  %vm15917_vm10 = vmmov %vm15916_vm0 }
 0x3dc   : > { %v12758_v8 = vadd.f32 %v4211_v24, %v4002_v63  ;;  %v5430_v24 = vld [vmem:[#allocation2 + $0x30] sm:$0xff] }
 0x3dd   : > { %v4763_v31 = vpop.f32.mrf.mxu0  ;;  %v12767_v15 = vadd.f32 %v4760_v49, %v4514_v39 }
 0x3de   : > { %9650 = vmatmul.msk.f32.gmra.mxu1 %vm15907_vm12, %v12760_v22  ;;  %vm15911_vm12 = vmmov %vm15902_vm1 }
 0x3df   : > { %15908 = vst [vmem:[#allocation28_spill] sm:$0xff] %v12767_v15  ;;  %v12792_v15 = vld [vmem:[#allocation2 + $0x91] sm:$0xff] }
 0x3e0   : > { %9686 = vmatmul.msk.f32.gmra.mxu2 %vm15902_vm1, %v12406_v21  ;;  %9709 = vmatmul.msk.f32.gmra.mxu3 %vm15909_vm5, %v5429_v45  ;;  %vm15912_vm1 = vnez %v15805_v20 }
 0x3e1   : > { %9745 = vmatmul.msk.f32.gmra.mxu0 %vm15910_vm7, %v12514_v9  ;;  %v5165_v21 = vsel %vm15912_vm1, %v12425_v50, 0.0 }
 0x3e2   : > { %v4453_v48 = vpop.f32.mrf.mxu3 }
 0x3e3   : > { %v4214_v35 = vpop.f32.mrf.mxu2  ;;  %v4008_v12 = vpop.f32.mrf.mxu1  ;;  %v4515_v36 = vadd.f32 %v4453_v48, %v12490_v56 }
 0x3e4   : > { %v12772_v63 = vadd.f32 %v4214_v35, %v4005_v42  ;;  %v15914_v42 = vld [vmem:[#allocation7_spill] sm:$0xff] }
 0x3e5   : > { %v4766_v49 = vpop.f32.mrf.mxu0  ;;  %v12783_v9 = vadd.f32 %v4763_v31, %v4515_v36  ;;  %vm15915_vm7 = vnez %v15914_v42 }
 0x3e6   : > { %9651 = vmatmul.msk.f32.gmra.mxu1 %vm15911_vm12, %v12774_v40  ;;  %v5462_v39 = vsel %vm15915_vm7, %v5430_v24, 0.0  ;;  %vm15918_vm12 = vmmov %vm15916_vm0  ;;  %v5431_v24 = vld [vmem:[#allocation2 + $0x38] sm:$0xff] }
 0x3e7   : > { %15913 = vst [vmem:[#allocation21_spill] sm:$0xff] %v12783_v9  ;;  %vm15927_vm7 = vmmov %vm15916_vm0  ;;  %v5768_v9 = vld [vmem:[#allocation2 + $0x111] sm:$0xff] }
 0x3e8   : > { %9687 = vmatmul.msk.f32.gmra.mxu2 %vm15909_vm5, %v5165_v21  ;;  %9710 = vmatmul.msk.f32.gmra.mxu3 %vm15916_vm0, %v5462_v39  ;;  %vm15919_vm5 = vmmov %vm15916_vm0 }
 0x3e9   : > { %9746 = vmatmul.msk.f32.gmra.mxu0 %vm15917_vm10, %v12538_v30  ;;  %vm15921_vm10 = vmmov %vm15916_vm0 }
 0x3ea   : > { %v4456_v48 = vpop.f32.mrf.mxu3 }
 0x3eb   : > { %v4217_v56 = vpop.f32.mrf.mxu2  ;;  %v4990_v35 = vpop.f32.mrf.mxu1  ;;  %v4516_v50 = vadd.f32 %v4456_v48, %v12509_v55 }
 0x3ec   : > { %v12790_v45 = vadd.f32 %v4217_v56, %v4008_v12  ;;  %v5086_v30 = vadd.f32 %v4990_v35, %v12429_v33  ;;  %v12807_v56 = vld [vmem:[#allocation2 + $0x99] sm:$0xff]  ;;  %v5167_v33 = vsel %vm15817_vm13, %v12459_v19, 0.0  ;;  %v15925_v35 = vld [vmem:[#allocation9_spill] sm:$0xff] }
 0x3ed   : > { %v4769_v31 = vpop.f32.mrf.mxu0  ;;  %v12799_v36 = vadd.f32 %v4766_v49, %v4516_v50 }
 0x3ee   : > { %9652 = vmatmul.msk.f32.gmra.mxu1 %vm15918_vm12, %v12792_v15  ;;  %vm15922_vm12 = vmmov %vm15916_vm0 }
 0x3ef   : > { %15920 = vst [vmem:[#allocation22_spill] sm:$0xff] %v12799_v36 }
 0x3f0   : > { %9688 = vmatmul.msk.f32.gmra.mxu2 %vm15919_vm5, %v12448_v14  ;;  %9711 = vmatmul.msk.f32.gmra.mxu3 %vm15921_vm10, %v5431_v24  ;;  %v5432_v14 = vld [vmem:[#allocation2 + $0x40] sm:$0xff]  ;;  %vm15923_vm5 = vmmov %vm15916_vm0  ;;  %vm15926_vm10 = vnez %v15925_v35 }
 0x3f1   : > { %9747 = vmatmul.msk.f32.gmra.mxu0 %vm15916_vm0, %v12560_v44  ;;  %v5464_v50 = vsel %vm15926_vm10, %v5432_v14, 0.0  ;;  %vm15937_vm10 = vmmov %vm15916_vm0 }
 0x3f2   : > { %v4459_v39 = vpop.f32.mrf.mxu3 }
 0x3f3   : > { %v5300_v12 = vpop.f32.mrf.mxu2  ;;  %v4993_v55 = vpop.f32.mrf.mxu1  ;;  %v4517_v48 = vadd.f32 %v4459_v39, %v12533_v11  ;;  %v12826_v39 = vld [vmem:[#allocation2 + $0xa1] sm:$0xff] }
 0x3f4   : > { %v12805_v21 = vadd.f32 %v5300_v12, %v5086_v30  ;;  %v5087_v24 = vadd.f32 %v4993_v55, %v12446_v32  ;;  %v5433_v55 = vld [vmem:[#allocation2 + $0x48] sm:$0xff] }
 0x3f5   : > { %v4772_v49 = vpop.f32.mrf.mxu0  ;;  %v12816_v44 = vadd.f32 %v4769_v31, %v4517_v48 }
 0x3f6   : > { %9653 = vmatmul.msk.f32.gmra.mxu1 %vm15922_vm12, %v12807_v56  ;;  %vm15928_vm12 = vmmov %vm15916_vm0 }
 0x3f7   : > { %15924 = vst [vmem:[#allocation24_spill] sm:$0xff] %v12816_v44 }
 0x3f8   : > { %9689 = vmatmul.msk.f32.gmra.mxu2 %vm15923_vm5, %v5167_v33  ;;  %9712 = vmatmul.msk.f32.gmra.mxu3 %vm15916_vm0, %v5464_v50  ;;  %vm15929_vm5 = vmmov %vm15916_vm0 }
 0x3f9   : > { %9748 = vmatmul.msk.f32.gmra.mxu0 %vm15927_vm7, %v12581_v29  ;;  %vm15931_vm7 = vmmov %vm15916_vm0 }
 0x3fa   : > { %v4462_v19 = vpop.f32.mrf.mxu3 }
 0x3fb   : > { %v5303_v11 = vpop.f32.mrf.mxu2  ;;  %v4996_v12 = vpop.f32.mrf.mxu1  ;;  %v4518_v31 = vadd.f32 %v4462_v19, %v12558_v43 }
 0x3fc   : > { %v12824_v30 = vadd.f32 %v5303_v11, %v5087_v24  ;;  %v5088_v29 = vadd.f32 %v4996_v12, %v12464_v13  ;;  %v12841_v24 = vld [vmem:[#allocation2 + $0xa9] sm:$0xff]  ;;  %v5169_v13 = vsel %vm15826_vm15, %v12495_v51, 0.0  ;;  %v15935_v12 = vld [vmem:[#allocation11_spill] sm:$0xff] }
 0x3fd   : > { %v4775_v48 = vpop.f32.mrf.mxu0  ;;  %v12833_v32 = vadd.f32 %v4772_v49, %v4518_v31  ;;  %v9814_v51 = vld [vmem:[%s15064_s5 + $0x30] sm:$0xff] }
 0x3fe   : > { %9654 = vmatmul.msk.f32.gmra.mxu1 %vm15928_vm12, %v12826_v39  ;;  %vm15932_vm12 = vmmov %vm15916_vm0  ;;  %6640 = vmatpush.msra.mxu2 %v9814_v51  ;;  %v12881_v51 = vld [vmem:[#allocation2 + $0xb9] sm:$0xff] }
 0x3ff   : > { %15930 = vst [vmem:[#allocation25_spill] sm:$0xff] %v12833_v32 }
 0x400   : > { %9690 = vmatmul.msk.f32.gmra.mxu2 %vm15929_vm5, %v12482_v61  ;;  %9713 = vmatmul.msk.f32.gmra.mxu3 %vm15931_vm7, %v5433_v55  ;;  %v5434_v61 = vld [vmem:[#allocation2 + $0x50] sm:$0xff]  ;;  %vm15933_vm5 = vmmov %vm15916_vm0  ;;  %vm15936_vm7 = vnez %v15935_v12 }
 0x401   : > { %9749 = vmatmul.msk.f32.gmra.mxu0 %vm15916_vm0, %v12600_v3  ;;  %v5466_v19 = vsel %vm15936_vm7, %v5434_v61, 0.0  ;;  %v15941_v61 = vld [vmem:[#allocation66_spill] sm:$0xff]  ;;  %vm15950_vm7 = vmmov %vm15916_vm0 }
 0x402   : > { %v4465_v50 = vpop.f32.mrf.mxu3 }
 0x403   : > { %v5306_v14 = vpop.f32.mrf.mxu2  ;;  %v4999_v43 = vpop.f32.mrf.mxu1  ;;  %v4519_v11 = vadd.f32 %v4465_v50, %v12579_v46 }
 0x404   : > { %v12839_v33 = vadd.f32 %v5306_v14, %v5088_v29  ;;  %v5089_v31 = vadd.f32 %v4999_v43, %v12480_v54  ;;  %v12863_v14 = vld [vmem:[#allocation2 + $0xb1] sm:$0xff] }
 0x405   : > { %v4778_v49 = vpop.f32.mrf.mxu0  ;;  %v12850_v3 = vadd.f32 %v4775_v48, %v4519_v11  ;;  %v5435_v11 = vld [vmem:[#allocation2 + $0x58] sm:$0xff] }
 0x406   : > { %9655 = vmatmul.msk.f32.gmra.mxu1 %vm15932_vm12, %v12841_v24  ;;  %vm15938_vm12 = vmmov %vm15916_vm0 }
 0x407   : > { %15934 = vst [vmem:[#allocation57_spill] sm:$0xff] %v12850_v3 }
 0x408   : > { %9691 = vmatmul.msk.f32.gmra.mxu2 %vm15933_vm5, %v5169_v13  ;;  %9714 = vmatmul.msk.f32.gmra.mxu3 %vm15916_vm0, %v5466_v19  ;;  %vm15942_vm5 = vmmov %vm15916_vm0 }
 0x409   : > { %9750 = vmatmul.msk.f32.gmra.mxu0 %vm15937_vm10, %v12621_v18  ;;  %v9776_v18 = vld [vmem:[%s15062_s3 + $0x100] sm:$0xff]  ;;  %vm15939_vm10 = vmmov %vm15916_vm0 }
 0x40a   : > { %v4468_v48 = vpop.f32.mrf.mxu3  ;;  %6196 = vmatpush.msra.mxu1 %v9776_v18  ;;  %v15947_v18 = vld [vmem:[#allocation14_spill] sm:$0xff] }
 0x40b   : > { %v5309_v46 = vpop.f32.mrf.mxu2  ;;  %v5002_v29 = vpop.f32.mrf.mxu1  ;;  %v4520_v50 = vadd.f32 %v4468_v48, %v12598_v28  ;;  %v5436_v48 = vld [vmem:[#allocation2 + $0x60] sm:$0xff] }
 0x40c   : > { %v12858_v55 = vadd.f32 %v5309_v46, %v5089_v31  ;;  %v5090_v13 = vadd.f32 %v5002_v29, %v15941_v61  ;;  %v5171_v29 = vsel %vm15836_vm6, %v12541_v58, 0.0  ;;  %v15949_v61 = vld [vmem:[#allocation47_spill] sm:$0xff] }
 0x40d   : > { %v4781_v54 = vpop.f32.mrf.mxu0  ;;  %v12873_v43 = vadd.f32 %v4778_v49, %v4520_v50 }
 0x40e   : > { %9656 = vmatmul.msk.f32.gmra.mxu1 %vm15938_vm12, %v12863_v14  ;;  %vm15943_vm12 = vmmov %vm15916_vm0 }
 0x40f   : > { %15940 = vst [vmem:[#allocation34_spill] sm:$0xff] %v12873_v43  ;;  %v12900_v43 = vld [vmem:[#allocation2 + $0xc1] sm:$0xff] }
 0x410   : > { %9692 = vmatmul.msk.f32.gmra.mxu2 %vm15939_vm10, %v12525_v16  ;;  %9715 = vmatmul.msk.f32.gmra.mxu3 %vm15942_vm5, %v5435_v11  ;;  %vm15945_vm10 = vmmov %vm15916_vm0  ;;  %vm15948_vm5 = vnez %v15947_v18 }
 0x411   : > { %9751 = vmatmul.msk.f32.gmra.mxu0 %vm15916_vm0, %v12640_v37  ;;  %v5468_v11 = vsel %vm15948_vm5, %v5436_v48, 0.0  ;;  %v5437_v48 = vld [vmem:[#allocation2 + $0x68] sm:$0xff]  ;;  %vm15961_vm5 = vmmov %vm15916_vm0 }
 0x412   : > { %v4471_v46 = vpop.f32.mrf.mxu3 }
 0x413   : > { %v5312_v28 = vpop.f32.mrf.mxu2  ;;  %v5005_v31 = vpop.f32.mrf.mxu1  ;;  %v4521_v16 = vadd.f32 %v4471_v46, %v12619_v26 }
 0x414   : > { %v12879_v19 = vadd.f32 %v5312_v28, %v5090_v13  ;;  %v5091_v13 = vadd.f32 %v5005_v31, %v15949_v61 }
 0x415   : > { %v4784_v50 = vpop.f32.mrf.mxu0  ;;  %v12890_v37 = vadd.f32 %v4781_v54, %v4521_v16 }
 0x416   : > { %9657 = vmatmul.msk.f32.gmra.mxu1 %vm15943_vm12, %v12881_v51  ;;  %vm15951_vm12 = vmmov %vm15916_vm0 }
 0x417   : > { %15946 = vst [vmem:[#allocation48_spill] sm:$0xff] %v12890_v37 }
 0x418   : > { %9693 = vmatmul.msk.f32.gmra.mxu2 %vm15945_vm10, %v5171_v29  ;;  %9716 = vmatmul.msk.f32.gmra.mxu3 %vm15916_vm0, %v5468_v11  ;;  %vm15952_vm10 = vmmov %vm15916_vm0 }
 0x419   : > { %9752 = vmatmul.msk.f32.gmra.mxu0 %vm15950_vm7, %v12661_v41  ;;  %vm15954_vm7 = vmmov %vm15916_vm0 }
 0x41a   : > { %v4474_v58 = vpop.f32.mrf.mxu3 }
 0x41b   : > { %v5315_v26 = vpop.f32.mrf.mxu2  ;;  %v5008_v46 = vpop.f32.mrf.mxu1  ;;  %v4522_v54 = vadd.f32 %v4474_v58, %v12638_v38 }
 0x41c   : > { %v12898_v28 = vadd.f32 %v5315_v26, %v5091_v13  ;;  %v5092_v41 = vadd.f32 %v5008_v46, %v12550_v17  ;;  %v12915_v13 = vld [vmem:[#allocation2 + $0xc9] sm:$0xff]  ;;  %v5173_v17 = vsel %vm15846_vm14, %v12584_v0, 0.0  ;;  %v15958_v46 = vld [vmem:[#allocation17_spill] sm:$0xff] }
 0x41d   : > { %v4787_v16 = vpop.f32.mrf.mxu0  ;;  %v12907_v31 = vadd.f32 %v4784_v50, %v4522_v54  ;;  %v15960_v54 = vld [vmem:[#allocation68_spill] sm:$0xff] }
 0x41e   : > { %9658 = vmatmul.msk.f32.gmra.mxu1 %vm15951_vm12, %v12900_v43  ;;  %vm15955_vm12 = vmmov %vm15916_vm0 }
 0x41f   : > { %15953 = vst [vmem:[#allocation36_spill] sm:$0xff] %v12907_v31  ;;  %v6016_v31 = vld [vmem:[#allocation2 + $0x22] sm:$0xff] }
 0x420   : > { %9694 = vmatmul.msk.f32.gmra.mxu2 %vm15952_vm10, %v12571_v52  ;;  %9717 = vmatmul.msk.f32.gmra.mxu3 %vm15954_vm7, %v5437_v48  ;;  %v5438_v52 = vld [vmem:[#allocation2 + $0x70] sm:$0xff]  ;;  %vm15956_vm10 = vmmov %vm15916_vm0  ;;  %vm15959_vm7 = vnez %v15958_v46 }
 0x421   : > { %9753 = vmatmul.msk.f32.gmra.mxu0 %vm15916_vm0, %v12683_v6  ;;  %v5470_v58 = vsel %vm15959_vm7, %v5438_v52, 0.0  ;;  %vm15971_vm7 = vmmov %vm15916_vm0 }
 0x422   : > { %v4477_v61 = vpop.f32.mrf.mxu3 }
 0x423   : > { %v5318_v29 = vpop.f32.mrf.mxu2  ;;  %v5011_v38 = vpop.f32.mrf.mxu1  ;;  %v4523_v26 = vadd.f32 %v4477_v61, %v12659_v53  ;;  %v12936_v61 = vld [vmem:[#allocation2 + $0xd1] sm:$0xff] }
 0x424   : > { %v12913_v11 = vadd.f32 %v5318_v29, %v5092_v41  ;;  %v5093_v48 = vadd.f32 %v5011_v38, %v15960_v54  ;;  %v5440_v54 = vld [vmem:[#allocation2 + $0x80] sm:$0xff] }
 0x425   : > { %v4790_v50 = vpop.f32.mrf.mxu0  ;;  %v12924_v6 = vadd.f32 %v4787_v16, %v4523_v26 }
 0x426   : > { %9659 = vmatmul.msk.f32.gmra.mxu1 %vm15955_vm12, %v12915_v13  ;;  %vm15962_vm12 = vmmov %vm15916_vm0 }
 0x427   : > { %15957 = vst [vmem:[#allocation49_spill] sm:$0xff] %v12924_v6 }
 0x428   : > { %9695 = vmatmul.msk.f32.gmra.mxu2 %vm15956_vm10, %v5173_v17  ;;  %9718 = vmatmul.msk.f32.gmra.mxu3 %vm15916_vm0, %v5470_v58  ;;  %vm15963_vm10 = vmmov %vm15916_vm0  ;;  %v12950_v58 = vld [vmem:[#allocation2 + $0xd9] sm:$0xff] }
 0x429   : > { %9754 = vmatmul.msk.f32.gmra.mxu0 %vm15961_vm5, %v12718_v7  ;;  %v5439_v7 = vld [vmem:[#allocation2 + $0x78] sm:$0xff]  ;;  %vm15965_vm5 = vmmov %vm15916_vm0 }
 0x42a   : > { %v4480_v0 = vpop.f32.mrf.mxu3 }
 0x42b   : > { %v5321_v53 = vpop.f32.mrf.mxu2  ;;  %v12934_v29 = vpop.f32.mrf.mxu1  ;;  %v4524_v16 = vadd.f32 %v4480_v0, %v12678_v27 }
 0x42c   : > { %v12932_v41 = vadd.f32 %v5321_v53, %v5093_v48 }
 0x42d   : > { %v4793_v26 = vpop.f32.mrf.mxu0  ;;  %v12943_v38 = vadd.f32 %v4790_v50, %v4524_v16  ;;  %v12968_v16 = vld [vmem:[#allocation2 + $0xe1] sm:$0xff] }
 0x42e   : > { %9660 = vmatmul.msk.f32.gmra.mxu1 %vm15962_vm12, %v12936_v61  ;;  %vm15966_vm12 = vmmov %vm15916_vm0 }
 0x42f   : > { %15964 = vst [vmem:[#allocation29_spill] sm:$0xff] %v12943_v38  ;;  %v5446_v38 = vld [vmem:[#allocation2 + $0xb0] sm:$0xff] }
 0x430   : > { %9696 = vmatmul.msk.f32.gmra.mxu2 %vm15963_vm10, %v12611_v57  ;;  %9719 = vmatmul.msk.f32.gmra.mxu3 %vm15965_vm5, %v5439_v7  ;;  %v5175_v57 = vsel %vm15857_vm4, %v12624_v62, 0.0  ;;  %vm15967_vm10 = vmmov %vm15916_vm0  ;;  %v5478_v6 = vsel %vm15735_vm8, %v5446_v38, 0.0 }
 0x431   : > { %9755 = vmatmul.msk.f32.gmra.mxu0 %vm15916_vm0, %v12742_v60  ;;  %v15969_v60 = vld [vmem:[#allocation20_spill] sm:$0xff] }
 0x432   : > { %v4483_v17 = vpop.f32.mrf.mxu3  ;;  %vm15970_vm5 = vnez %v15969_v60 }
 0x433   : > { %v12948_v52 = vpop.f32.mrf.mxu1  ;;  %v4525_v27 = vadd.f32 %v4483_v17, %v12713_v1  ;;  %v5472_v53 = vsel %vm15970_vm5, %v5440_v54, 0.0  ;;  %v5441_v17 = vld [vmem:[#allocation2 + $0x88] sm:$0xff] }
 0x434   : > { %v12982_v54 = vld [vmem:[#allocation2 + $0xe9] sm:$0xff] }
 0x435   : > { %v4796_v50 = vpop.f32.mrf.mxu0  ;;  %v12959_v48 = vadd.f32 %v4793_v26, %v4525_v27 }
 0x436   : > { %9661 = vmatmul.msk.f32.gmra.mxu1 %vm15966_vm12, %v12950_v58  ;;  %vm15972_vm12 = vmmov %vm15916_vm0 }
 0x437   : > { %15968 = vst [vmem:[#allocation30_spill] sm:$0xff] %v12959_v48  ;;  %v13035_v48 = vld [vmem:[#allocation2 + $0x101] sm:$0xff] }
 0x438   : > { %9697 = vmatmul.msk.f32.gmra.mxu2 %vm15967_vm10, %v5175_v57  ;;  %9720 = vmatmul.msk.f32.gmra.mxu3 %vm15916_vm0, %v5472_v53  ;;  %vm15973_vm10 = vmmov %vm15916_vm0  ;;  %v5442_v57 = vld [vmem:[#allocation2 + $0x90] sm:$0xff] }
 0x439   : > { %9756 = vmatmul.msk.f32.gmra.mxu0 %vm15971_vm7, %v12760_v22  ;;  %vm15975_vm7 = vmmov %vm15916_vm0 }
 0x43a   : > { %v4486_v0 = vpop.f32.mrf.mxu3  ;;  %vm15982_vm5 = vmmov %vm15975_vm7 }
 0x43b   : > { %v12966_v1 = vpop.f32.mrf.mxu1  ;;  %v4526_v62 = vadd.f32 %v4486_v0, %v12740_v10 }
 0x43d   : > { %v4799_v26 = vpop.f32.mrf.mxu0  ;;  %v12975_v7 = vadd.f32 %v4796_v50, %v4526_v62  ;;  %v5177_v50 = vsel %vm15868_vm2, %v12664_v47, 0.0 }
 0x43e   : > { %9662 = vmatmul.msk.f32.gmra.mxu1 %vm15972_vm12, %v12968_v16  ;;  %vm15976_vm12 = vmmov %vm15916_vm0 }
 0x43f   : > { %15974 = vst [vmem:[#allocation32_spill] sm:$0xff] %v12975_v7 }
 0x440   : > { %9698 = vmatmul.msk.f32.gmra.mxu2 %vm15973_vm10, %v12651_v4  ;;  %9721 = vmatmul.msk.f32.gmra.mxu3 %vm15916_vm0, %v5441_v17  ;;  %v15977_v4 = vld [vmem:[#allocation50_spill] sm:$0xff]  ;;  %vm15978_vm10 = vmmov %vm15916_vm0  ;;  %v9813_v17 = vld [vmem:[%s15064_s5 + $0x28] sm:$0xff] }
 0x441   : > { %9757 = vmatmul.msk.f32.gmra.mxu0 %vm15975_vm7, %v12774_v40  ;;  %v15980_v40 = vld [vmem:[#allocation27_spill] sm:$0xff]  ;;  %6641 = vmatpush.msra.mxu2 %v9813_v17 }
 0x442   : > { %v4489_v27 = vpop.f32.mrf.mxu3  ;;  %vm15981_vm0 = vnez %v15980_v40  ;;  %v16087_v40 = vld [vmem:[#allocation23_spill] sm:$0xff] }
 0x443   : > { %v12980_v22 = vpop.f32.mrf.mxu1  ;;  %v4527_v10 = vadd.f32 %v4489_v27, %v12758_v8  ;;  %v5474_v62 = vsel %vm15981_vm0, %v5442_v57, 0.0  ;;  %v13003_v27 = vld [vmem:[#allocation2 + $0xf1] sm:$0xff]  ;;  %v15984_v57 = vld [vmem:[#allocation64_spill] sm:$0xff] }
 0x445   : > { %v12991_v0 = vadd.f32 %v4799_v26, %v4527_v10 }
 0x446   : > { %9663 = vmatmul.msk.f32.gmra.mxu1 %vm15976_vm12, %v12982_v54  ;;  %v4802_v53 = vpop.f32.mrf.mxu0  ;;  %vm15983_vm12 = vmmov %vm15982_vm5 }
 0x447   : > { %15979 = vst [vmem:[#allocation33_spill] sm:$0xff] %v12991_v0  ;;  %v13017_v0 = vld [vmem:[#allocation2 + $0xf9] sm:$0xff] }
 0x448   : > { %9699 = vmatmul.msk.f32.gmra.mxu2 %vm15978_vm10, %v5177_v50  ;;  %9722 = vmatmul.msk.f32.gmra.mxu3 %vm15975_vm7, %v5474_v62  ;;  %vm15985_vm10 = vmmov %vm15982_vm5  ;;  %v5443_v50 = vld [vmem:[#allocation2 + $0x98] sm:$0xff] }
 0x449   : > { %9758 = vmatmul.msk.f32.gmra.mxu0 %vm15982_vm5, %v12792_v15  ;;  %vm15987_vm7 = vmmov %vm15982_vm5 }
 0x44a   : > { %v4492_v47 = vpop.f32.mrf.mxu3  ;;  %vm15995_vm0 = vmmov %vm15987_vm7 }
 0x44b   : > { %v12998_v8 = vpop.f32.mrf.mxu1  ;;  %v4528_v26 = vadd.f32 %v4492_v47, %v12772_v63  ;;  %v5444_v47 = vld [vmem:[#allocation2 + $0xa0] sm:$0xff]  ;;  %vm16008_vm8 = vmmov %vm15995_vm0 }
 0x44d   : > { %v13010_v15 = vadd.f32 %v4802_v53, %v4528_v26  ;;  %v15990_v53 = vld [vmem:[#allocation61_spill] sm:$0xff] }
 0x44e   : > { %9664 = vmatmul.msk.f32.gmra.mxu1 %vm15983_vm12, %v13003_v27  ;;  %v4805_v10 = vpop.f32.mrf.mxu0  ;;  %vm15988_vm12 = vmmov %vm15982_vm5 }
 0x44f   : > { %15986 = vst [vmem:[#allocation44_spill] sm:$0xff] %v13010_v15 }
 0x450   : > { %9700 = vmatmul.msk.f32.gmra.mxu2 %vm15985_vm10, %v15984_v57  ;;  %9723 = vmatmul.msk.f32.gmra.mxu3 %vm15982_vm5, %v5443_v50  ;;  %v15989_v57 = vld [vmem:[#allocation74_spill] sm:$0xff]  ;;  %vm15991_vm10 = vmmov %vm15982_vm5 }
 0x451   : > { %9759 = vmatmul.msk.f32.gmra.mxu0 %vm15987_vm7, %v12807_v56  ;;  %v5179_v26 = vsel %vm15881_vm9, %v15989_v57, 0.0  ;;  %v15993_v56 = vld [vmem:[#allocation35_spill] sm:$0xff] }
 0x452   : > { %vm15994_vm5 = vnez %v15993_v56  ;;  %v16065_v56 = vld [vmem:[#allocation73_spill] sm:$0xff] }
 0x453   : > { %v13015_v62 = vpop.f32.mrf.mxu1  ;;  %v4495_v17 = vpop.f32.mrf.mxu3  ;;  %v5476_v7 = vsel %vm15994_vm5, %v5444_v47, 0.0 }
 0x454   : > { %v4529_v63 = vadd.f32 %v4495_v17, %v12790_v45 }
 0x456   : > { %9665 = vmatmul.msk.f32.gmra.mxu1 %vm15988_vm12, %v13017_v0  ;;  %v5888_v15 = vpop.f32.mrf.mxu0  ;;  %v13026_v50 = vadd.f32 %v4805_v10, %v4529_v63  ;;  %vm15996_vm12 = vmmov %vm15995_vm0  ;;  %v5148_v10 = vld [vmem:[#allocation2 + $0x102] sm:$0xff] }
 0x458   : > { %9701 = vmatmul.msk.f32.gmra.mxu2 %vm15991_vm10, %v5179_v26  ;;  %15992 = vst [vmem:[#allocation46_spill] sm:$0xff] %v13026_v50  ;;  %9724 = vmatmul.msk.f32.gmra.mxu3 %vm15987_vm7, %v5476_v7  ;;  %vm15997_vm10 = vmmov %vm15995_vm0  ;;  %v5445_v7 = vld [vmem:[#allocation2 + $0xa8] sm:$0xff] }
 0x459   : > { %9760 = vmatmul.msk.f32.gmra.mxu0 %vm15995_vm0, %v12826_v39  ;;  %vm15998_vm7 = vmmov %vm15995_vm0  ;;  %v5149_v26 = vld [vmem:[#allocation2 + $0x10a] sm:$0xff] }
 0x45b   : > { %v13033_v45 = vpop.f32.mrf.mxu1  ;;  %v5610_v17 = vpop.f32.mrf.mxu3 }
 0x45c   : > { %v5706_v57 = vadd.f32 %v5610_v17, %v12805_v21  ;;  %v13048_v21 = vld [vmem:[#allocation2 + $0x109] sm:$0xff] }
 0x45e   : > { %9666 = vmatmul.msk.f32.gmra.mxu1 %vm15996_vm12, %v13035_v48  ;;  %v5891_v63 = vpop.f32.mrf.mxu0  ;;  %v13041_v47 = vadd.f32 %v5888_v15, %v5706_v57  ;;  %vm16000_vm12 = vmmov %vm15995_vm0  ;;  %v5181_v57 = vsel %vm15896_vm11, %v5149_v26, 0.0  ;;  %v6491_v15 = vld [vmem:[%s15064_s5 + $0x8] sm:$0xff] }
 0x460   : > { %9702 = vmatmul.msk.f32.gmra.mxu2 %vm15997_vm10, %v5148_v10  ;;  %9725 = vmatmul.msk.f32.gmra.mxu3 %vm15998_vm7, %v5445_v7  ;;  %vm16002_vm10 = vmmov %vm15995_vm0 }
 0x461   : > { %9761 = vmatmul.msk.f32.gmra.mxu0 %vm15995_vm0, %v12841_v24  ;;  %vm16004_vm7 = vmmov %vm15995_vm0  ;;  %v6018_v24 = vld [vmem:[#allocation2 + $0x32] sm:$0xff] }
 0x463   : > { %v13046_v39 = vpop.f32.mrf.mxu1  ;;  %v5613_v50 = vpop.f32.mrf.mxu3 }
 0x464   : > { %15999 = vst [vmem:[#allocation37_spill] sm:$0xff] %v13046_v39  ;;  %v5707_v17 = vadd.f32 %v5613_v50, %v12824_v30 }
 0x466   : > { %9667 = vmatmul.msk.f32.gmra.mxu1 %vm16000_vm12, %v13048_v21  ;;  %v5894_v10 = vpop.f32.mrf.mxu0  ;;  %v13056_v7 = vadd.f32 %v5891_v63, %v5707_v17  ;;  %vm16006_vm12 = vmmov %vm15995_vm0  ;;  %v5447_v63 = vld [vmem:[#allocation2 + $0xb8] sm:$0xff] }
 0x468   : > { %9703 = vmatmul.msk.f32.gmra.mxu2 %vm16002_vm10, %v5181_v57  ;;  %9726 = vmatmul.msk.f32.gmra.mxu3 %vm16004_vm7, %v5478_v6  ;;  %vm16007_vm10 = vmmov %vm15995_vm0  ;;  %v6017_v6 = vld [vmem:[#allocation2 + $0x2a] sm:$0xff] }
 0x469   : > { %9762 = vmatmul.msk.f32.gmra.mxu0 %vm15995_vm0, %v12863_v14  ;;  %v6049_v3 = vsel %vm10258_vm3, %v6017_v6, 0.0  ;;  %vm16011_vm7 = vmmov %vm15995_vm0 }
 0x46b   : > { %v13063_v30 = vpop.f32.mrf.mxu1  ;;  %v5616_v50 = vpop.f32.mrf.mxu3 }
 0x46c   : > { %16005 = vst [vmem:[#allocation38_spill] sm:$0xff] %v13063_v30  ;;  %v5708_v37 = vadd.f32 %v5616_v50, %v12839_v33  ;;  %v5448_v50 = vld [vmem:[#allocation2 + $0xc0] sm:$0xff] }
 0x46d   : > { %v16074_v30 = vld [vmem:[#allocation26_spill] sm:$0xff] }
 0x46e   : > { %9780 = vmatmul.msk.f32.vlgmr.msra.gmra.mxu1 %vm16006_vm12, %v6016_v31  ;;  %v5897_v26 = vpop.f32.mrf.mxu0  ;;  %v13067_v57 = vadd.f32 %v5894_v10, %v5708_v37  ;;  %v16012_v10 = vld [vmem:[#allocation56_spill] sm:$0xff]  ;;  %vm16014_vm12 = vmmov %vm16011_vm7 }
 0x46f   : > { %vm16013_vm0 = vnez %v16012_v10  ;;  %v16020_v10 = vld [vmem:[#allocation8_spill] sm:$0xff] }
 0x470   : > { %9727 = vmatmul.msk.f32.gmra.mxu3 %vm16007_vm10, %v5447_v63  ;;  %v5480_v63 = vsel %vm16013_vm0, %v5448_v50, 0.0  ;;  %vm16017_vm10 = vmmov %vm16011_vm7 }
 0x471   : > { %9763 = vmatmul.msk.f32.gmra.mxu0 %vm16008_vm8, %v12881_v51  ;;  %vm16015_vm8 = vmmov %vm16011_vm7  ;;  %v5324_v51 = vpop.f32.mrf.mxu2 }
 0x473   : > { %v13072_v38 = vpop.f32.mrf.mxu1  ;;  %v5619_v14 = vpop.f32.mrf.mxu3 }
 0x474   : > { %16009 = vst [vmem:[#allocation41_spill] sm:$0xff] %v13072_v38  ;;  %v5709_v33 = vadd.f32 %v5619_v14, %v12858_v55  ;;  %v5449_v14 = vld [vmem:[#allocation2 + $0xc8] sm:$0xff]  ;;  %v5458_v38 = vld [vmem:[#allocation2 + $0x110] sm:$0xff] }
 0x476   : > { %9781 = vmatmul.msk.f32.gmra.mxu1 %vm16011_vm7, %v6049_v3  ;;  %v5900_v37 = vpop.f32.mrf.mxu0  ;;  %v13078_v31 = vadd.f32 %v5897_v26, %v5709_v33  ;;  %v6019_v33 = vld [vmem:[#allocation2 + $0x3a] sm:$0xff] }
 0x478   : > { %9728 = vmatmul.msk.f32.gmra.mxu3 %vm16014_vm12, %v5480_v63  ;;  %vm16018_vm12 = vmmov %vm16011_vm7 }
 0x479   : > { %9764 = vmatmul.msk.f32.gmra.mxu0 %vm16015_vm8, %v12900_v43  ;;  %v5327_v63 = vpop.f32.mrf.mxu2  ;;  %vm16021_vm8 = vnez %v16020_v10 }
 0x47a   : > { %v6051_v44 = vsel %vm16021_vm8, %v6019_v33, 0.0 }
 0x47b   : > { %v13085_v32 = vpop.f32.mrf.mxu1  ;;  %v5622_v6 = vpop.f32.mrf.mxu3 }
 0x47c   : > { %16016 = vst [vmem:[#allocation42_spill] sm:$0xff] %v13085_v32  ;;  %v5710_v55 = vadd.f32 %v5622_v6, %v12879_v19  ;;  %v16036_v32 = vld [vmem:[#allocation59_spill] sm:$0xff] }
 0x47e   : > { %9782 = vmatmul.msk.f32.gmra.mxu1 %vm16017_vm10, %v6018_v24  ;;  %v5903_v3 = vpop.f32.mrf.mxu0  ;;  %v13089_v26 = vadd.f32 %v5900_v37, %v5710_v55  ;;  %v5450_v24 = vld [vmem:[#allocation2 + $0xd0] sm:$0xff]  ;;  %vm16022_vm10 = vmmov %vm16011_vm7  ;;  %v16023_v55 = vld [vmem:[#allocation67_spill] sm:$0xff] }
 0x47f   : > { %vm16026_vm0 = vmmov %vm16022_vm10 }
 0x480   : > { %9729 = vmatmul.msk.f32.gmra.mxu3 %vm16011_vm7, %v5449_v14  ;;  %vm16024_vm7 = vnez %v16023_v55 }
 0x481   : > { %9765 = vmatmul.msk.f32.gmra.mxu0 %vm16018_vm12, %v12915_v13  ;;  %v5482_v14 = vsel %vm16024_vm7, %v5450_v24, 0.0  ;;  %vm16025_vm12 = vmmov %vm16022_vm10 }
 0x483   : > { %v13094_v43 = vpop.f32.mrf.mxu1  ;;  %v5625_v50 = vpop.f32.mrf.mxu3 }
 0x484   : > { %16019 = vst [vmem:[#allocation43_spill] sm:$0xff] %v13094_v43  ;;  %v5711_v19 = vadd.f32 %v5625_v50, %v12898_v28  ;;  %v9812_v28 = vld [vmem:[%s15064_s5 + $0x20] sm:$0xff]  ;;  %v16034_v43 = vld [vmem:[#allocation13_spill] sm:$0xff] }
 0x485   : > { %6642 = vmatpush.msra.mxu2 %v9812_v28 }
 0x486   : > { %9783 = vmatmul.msk.f32.gmra.mxu1 %vm16022_vm10, %v6051_v44  ;;  %v5906_v37 = vpop.f32.mrf.mxu0  ;;  %v13100_v6 = vadd.f32 %v5903_v3, %v5711_v19  ;;  %v6020_v44 = vld [vmem:[#allocation2 + $0x42] sm:$0xff]  ;;  %vm16028_vm10 = vmmov %vm16026_vm0  ;;  %v13114_v19 = vpop.f32.mrf.mxu2 }
 0x488   : > { %9730 = vmatmul.msk.f32.gmra.mxu3 %vm16025_vm12, %v5482_v14  ;;  %v5451_v14 = vld [vmem:[#allocation2 + $0xd8] sm:$0xff]  ;;  %vm16029_vm12 = vmmov %vm16026_vm0 }
 0x489   : > { %9766 = vmatmul.msk.f32.gmra.mxu0 %vm16026_vm0, %v12936_v61  ;;  %v6021_v61 = vld [vmem:[#allocation2 + $0x4a] sm:$0xff] }
 0x48b   : > { %v13107_v13 = vpop.f32.mrf.mxu1  ;;  %v5628_v33 = vpop.f32.mrf.mxu3 }
 0x48c   : > { %16027 = vst [vmem:[#allocation55_spill] sm:$0xff] %v13107_v13  ;;  %v5712_v3 = vadd.f32 %v5628_v33, %v12913_v11  ;;  %v16031_v13 = vld [vmem:[#allocation10_spill] sm:$0xff] }
 0x48d   : > { %vm16032_vm7 = vnez %v16031_v13 }
 0x48e   : > { %9784 = vmatmul.msk.f32.gmra.mxu1 %vm16028_vm10, %v6020_v44  ;;  %v5909_v50 = vpop.f32.mrf.mxu0  ;;  %v13116_v24 = vadd.f32 %v5906_v37, %v5712_v3  ;;  %v6053_v11 = vsel %vm16032_vm7, %v6021_v61, 0.0  ;;  %v5452_v44 = vld [vmem:[#allocation2 + $0xe0] sm:$0xff]  ;;  %vm16033_vm10 = vmmov %vm16026_vm0  ;;  %v13133_v36 = vpop.f32.mrf.mxu2 }
 0x48f   : > { %vm16038_vm5 = vmmov %vm16033_vm10 }
 0x490   : > { %9731 = vmatmul.msk.f32.gmra.mxu3 %vm16026_vm0, %v5451_v14  ;;  %vm16035_vm0 = vnez %v16034_v43 }
 0x491   : > { %9767 = vmatmul.msk.f32.gmra.mxu0 %vm16029_vm12, %v12950_v58  ;;  %v5484_v14 = vsel %vm16035_vm0, %v5452_v44, 0.0  ;;  %v5094_v58 = vadd.f32 %v12934_v29, %v16036_v32  ;;  %vm16037_vm12 = vmmov %vm16033_vm10  ;;  %v5453_v32 = vld [vmem:[#allocation2 + $0xe8] sm:$0xff] }
 0x492   : > { %v16041_v29 = vld [vmem:[#allocation60_spill] sm:$0xff]  ;;  %vm16046_vm0 = vmmov %vm16038_vm5 }
 0x493   : > { %v13121_v55 = vpop.f32.mrf.mxu1  ;;  %v5631_v28 = vpop.f32.mrf.mxu3  ;;  %v5095_v43 = vadd.f32 %v12948_v52, %v16041_v29  ;;  %vm16050_vm11 = vmmov %vm16046_vm0 }
 0x494   : > { %16030 = vst [vmem:[#allocation52_spill] sm:$0xff] %v13121_v55  ;;  %v5713_v33 = vadd.f32 %v5631_v28, %v12932_v41  ;;  %v5404_v41 = vadd.f32 %v5324_v51, %v5094_v58  ;;  %vm16052_vm9 = vmmov %vm16046_vm0 }
 0x495   : > { %v5405_v51 = vadd.f32 %v5327_v63, %v5095_v43  ;;  %vm16063_vm2 = vmmov %vm16046_vm0 }
 0x496   : > { %9785 = vmatmul.msk.f32.gmra.mxu1 %vm16033_vm10, %v6053_v11  ;;  %v5912_v37 = vpop.f32.mrf.mxu0  ;;  %v13127_v3 = vadd.f32 %v5909_v50, %v5713_v33  ;;  %v6022_v11 = vld [vmem:[#allocation2 + $0x52] sm:$0xff]  ;;  %vm16040_vm10 = vmmov %vm16038_vm5 }
 0x498   : > { %9732 = vmatmul.msk.f32.gmra.mxu3 %vm16037_vm12, %v5484_v14  ;;  %vm16042_vm12 = vmmov %vm16038_vm5  ;;  %v13150_v14 = vpop.f32.mrf.mxu2 }
 0x499   : > { %9768 = vmatmul.msk.f32.gmra.mxu0 %vm16038_vm5, %v12968_v16  ;;  %v6023_v16 = vld [vmem:[#allocation2 + $0x5a] sm:$0xff] }
 0x49b   : > { %v13138_v61 = vpop.f32.mrf.mxu1  ;;  %v5634_v28 = vpop.f32.mrf.mxu3 }
 0x49c   : > { %16039 = vst [vmem:[#allocation39_spill] sm:$0xff] %v13138_v61  ;;  %v5714_v50 = vadd.f32 %v5634_v28, %v5404_v41  ;;  %v16044_v28 = vld [vmem:[#allocation12_spill] sm:$0xff]  ;;  %v16059_v61 = vld [vmem:[#allocation19_spill] sm:$0xff] }
 0x49e   : > { %9786 = vmatmul.msk.f32.gmra.mxu1 %vm16040_vm10, %v6022_v11  ;;  %v13141_v33 = vpop.f32.mrf.mxu0  ;;  %v13143_v44 = vadd.f32 %v5912_v37, %v5714_v50  ;;  %vm16045_vm10 = vnez %v16044_v28  ;;  %v5454_v50 = vld [vmem:[#allocation2 + $0xf0] sm:$0xff] }
 0x49f   : > { %v6055_v37 = vsel %vm16045_vm10, %v6023_v16, 0.0  ;;  %v6024_v16 = vld [vmem:[#allocation2 + $0x62] sm:$0xff] }
 0x4a0   : > { %9733 = vmatmul.msk.f32.gmra.mxu3 %vm16042_vm12, %v5453_v32  ;;  %v16047_v32 = vld [vmem:[#allocation16_spill] sm:$0xff]  ;;  %v13170_v29 = vpop.f32.mrf.mxu2 }
 0x4a1   : > { %9769 = vmatmul.msk.f32.gmra.mxu0 %vm16038_vm5, %v12982_v54  ;;  %vm16048_vm12 = vnez %v16047_v32  ;;  %vm16049_vm5 = vmmov %vm16046_vm0 }
 0x4a2   : > { %v5486_v54 = vsel %vm16048_vm12, %v5454_v50, 0.0  ;;  %vm16053_vm12 = vmmov %vm16046_vm0 }
 0x4a3   : > { %v13152_v58 = vpop.f32.mrf.mxu1  ;;  %v5637_v41 = vpop.f32.mrf.mxu3 }
 0x4a4   : > { %16043 = vst [vmem:[#allocation54_spill] sm:$0xff] %v13152_v58  ;;  %v13156_v11 = vadd.f32 %v5637_v41, %v5405_v51  ;;  %v5455_v41 = vld [vmem:[#allocation2 + $0xf8] sm:$0xff] }
 0x4a5   : > { %v16058_v58 = vld [vmem:[#allocation58_spill] sm:$0xff] }
 0x4a6   : > { %9787 = vmatmul.msk.f32.gmra.mxu1 %vm16046_vm0, %v6055_v37  ;;  %v13159_v52 = vpop.f32.mrf.mxu0  ;;  %v6025_v37 = vld [vmem:[#allocation2 + $0x6a] sm:$0xff] }
 0x4a8   : > { %9734 = vmatmul.msk.f32.gmra.mxu3 %vm16049_vm5, %v5486_v54  ;;  %v16055_v54 = vld [vmem:[#allocation15_spill] sm:$0xff]  ;;  %vm16057_vm5 = vmmov %vm16046_vm0 }
 0x4a9   : > { %9770 = vmatmul.msk.f32.gmra.mxu0 %vm16050_vm11, %v13003_v27  ;;  %vm16056_vm11 = vnez %v16055_v54 }
 0x4aa   : > { %v6057_v32 = vsel %vm16056_vm11, %v6025_v37, 0.0  ;;  %v6026_v37 = vld [vmem:[#allocation2 + $0x72] sm:$0xff] }
 0x4ab   : > { %v13166_v43 = vpop.f32.mrf.mxu1  ;;  %v13168_v63 = vpop.f32.mrf.mxu3 }
 0x4ac   : > { %16051 = vst [vmem:[#allocation7_spill] sm:$0xff] %v13166_v43 }
 0x4ae   : > { %9788 = vmatmul.msk.f32.gmra.mxu1 %vm16052_vm9, %v6024_v16  ;;  %v13173_v51 = vpop.f32.mrf.mxu0  ;;  %v13187_v16 = vpop.f32.mrf.mxu2  ;;  %vm16060_vm9 = vnez %v16059_v61  ;;  %v6493_v61 = vld [vmem:[%s15064_s5 + $0x18] sm:$0xff] }
 0x4af   : > { %6848 = vmatpush.msrb.mxu3 %v6493_v61  ;;  %v6490_v61 = vld [vmem:[%s15064_s5] sm:$0xff] }
 0x4b0   : > { %9735 = vmatmul.msk.f32.gmra.mxu3 %vm16046_vm0, %v5455_v41  ;;  %v5488_v41 = vsel %vm16060_vm9, %v16058_v58, 0.0  ;;  %vm16067_vm9 = vmmov %vm16046_vm0  ;;  %v6027_v58 = vld [vmem:[#allocation2 + $0x7a] sm:$0xff] }
 0x4b1   : > { %9771 = vmatmul.msk.f32.gmra.mxu0 %vm16053_vm12, %v13017_v0  ;;  %vm16061_vm12 = vmmov %vm16046_vm0 }
 0x4b3   : > { %v13178_v50 = vpop.f32.mrf.mxu1  ;;  %v13180_v27 = vpop.f32.mrf.mxu3 }
 0x4b4   : > { %16054 = vst [vmem:[#allocation9_spill] sm:$0xff] %v13178_v50 }
 0x4b6   : > { %9789 = vmatmul.msk.f32.gmra.mxu1 %vm16057_vm5, %v6057_v32  ;;  %v13185_v43 = vpop.f32.mrf.mxu0  ;;  %v13202_v55 = vpop.f32.mrf.mxu2  ;;  %vm16066_vm5 = vmmov %vm16046_vm0 }
 0x4b7   : > { %16064 = vst [vmem:[#allocation66_spill] sm:$0xff] %v13202_v55 }
 0x4b8   : > { %9736 = vmatmul.msk.f32.gmra.mxu3 %vm16046_vm0, %v5488_v41 }
 0x4b9   : > { %9772 = vmatmul.msk.f32.gmra.mxu0 %vm16061_vm12, %v13035_v48  ;;  %vm16075_vm12 = vnez %v16074_v30 }
 0x4ba   : > { %v5490_v55 = vsel %vm16075_vm12, %v5458_v38, 0.0 }
 0x4bb   : > { %v13195_v0 = vpop.f32.mrf.mxu1  ;;  %v13197_v50 = vpop.f32.mrf.mxu3 }
 0x4bc   : > { %16062 = vst [vmem:[#allocation11_spill] sm:$0xff] %v13195_v0  ;;  %v16069_v0 = vld [vmem:[#allocation18_spill] sm:$0xff] }
 0x4bd   : > { %vm16070_vm0 = vnez %v16069_v0 }
 0x4be   : > { %9790 = vmatmul.msk.f32.gmra.mxu1 %vm16063_vm2, %v6026_v37  ;;  %v13200_v32 = vpop.f32.mrf.mxu0  ;;  %v6492_v37 = vld [vmem:[%s15064_s5 + $0x10] sm:$0xff]  ;;  %vm799_vm2 = vcmask 254976  }
 0x4bf   : > { %6849 = vmatpush.msrb.mxu3 %v6492_v37  ;;  %v6494_v37 = vld [vmem:[#allocation3 + $0x1] sm:$0xff] }
 0x4c0   : > { %9737 = vmatmul.msk.f32.gmra.mxu3 %vm16066_vm5, %v16065_v56  ;;  %v6059_v56 = vsel %vm16070_vm0, %v6027_v58, 0.0  ;;  %vm16076_vm0 = vmmov %vm16066_vm5  ;;  %v13235_v58 = vpop.f32.mrf.mxu2 }
 0x4c1   : > { %9773 = vmatmul.msk.f32.gmra.mxu0 %vm16067_vm9, %v13048_v21  ;;  %v16071_v21 = vmov 0.0   ;;  %vm16072_vm9 = vmmov %vm16066_vm5  ;;  %6850 = vmatpush.msrb.mxu3 %v6491_v15  ;;  %16077 = vst [vmem:[#allocation68_spill] sm:$0xff] %v13235_v58  ;;  %v9883_v15 = vld [vmem:[%s15064_s5 + $0x58] sm:$0xff]  ;;  %v9882_v58 = vld [vmem:[%s15064_s5 + $0x50] sm:$0xff] }
 0x4c2   : > { %800 = vst.msk [vmem:[#allocation2 + $0x120] sm:$0x3] %vm799_vm2, %v16071_v21  ;;  %7126 = vmatpush.msrb.mxu0 %v9883_v15  ;;  %v6495_v15 = vld [vmem:[#allocation3 + $0x9] sm:$0xff] }
 0x4c3   : > { %v13208_v41 = vpop.f32.mrf.mxu1  ;;  %v13210_v48 = vpop.f32.mrf.mxu3  ;;  %837 = vst.msk [vmem:[#allocation3 + $0x120] sm:$0x3] %vm799_vm2, %v16071_v21  ;;  %v9955_v21 = vld [vmem:[%s15064_s5 + $0x98] sm:$0xff]  ;;  %6851 = vmatpush.msrb.mxu3 %v6490_v61  ;;  %vm16079_vm2 = vmmov %vm16076_vm0  ;;  %v6029_v61 = vld [vmem:[#allocation2 + $0x8a] sm:$0xff] }
 0x4c4   : > { %16068 = vst [vmem:[#allocation47_spill] sm:$0xff] %v13208_v41  ;;  %9816 = vmatmul.msk.f32.vlgmr.msra.gmra.mxu2 %vm16079_vm2, %v6494_v37  ;;  %7127 = vmatpush.msrb.mxu0 %v9882_v58  ;;  %v9881_v37 = vld [vmem:[%s15064_s5 + $0x48] sm:$0xff]  ;;  %vm16085_vm2 = vmmov %vm16076_vm0 }
 0x4c5   : > { %7714 = vmatpush.msrb.mxu2 %v9955_v21  ;;  %v9919_v21 = vld [vmem:[%s15064_s5 + $0x78] sm:$0xff]  ;;  %vm16092_vm12 = vmmov %vm16085_vm2 }
 0x4c6   : > { %9791 = vmatmul.msk.f32.gmra.mxu1 %vm16072_vm9, %v6059_v56  ;;  %v13222_v41 = vpop.f32.mrf.mxu0  ;;  %vm16081_vm9 = vmmov %vm16076_vm0  ;;  %7128 = vmatpush.msrb.mxu0 %v9881_v37 }
 0x4c7   : > { %16073 = vst [vmem:[#allocation17_spill] sm:$0xff] %v13222_v41  ;;  %7436 = vmatpush.msrb.mxu1 %v9919_v21  ;;  %vm16093_vm11 = vmmov %vm16085_vm2 }
 0x4c8   : > { %9738 = vmatmul.msk.f32.gmra.mxu3 %vm16066_vm5, %v5490_v55  ;;  %v5459_v55 = vld [vmem:[#allocation2 + $0x118] sm:$0xff]  ;;  %vm16082_vm5 = vmmov %vm16076_vm0 }
 0x4c9   : > { %9774 = vmatmul.msk.f32.gmra.mxu0 %vm16076_vm0, %v5768_v9  ;;  %v6028_v9 = vld [vmem:[#allocation2 + $0x82] sm:$0xff] }
 0x4cb   : > { %v13237_v56 = vpop.f32.mrf.mxu1  ;;  %v13242_v30 = vpop.f32.mrf.mxu3 }
 0x4cc   : > { %16078 = vst [vmem:[#allocation20_spill] sm:$0xff] %v13237_v56  ;;  %v5769_v56 = vld [vmem:[#allocation2 + $0x119] sm:$0xff]  ;;  %9817 = vmatmul.msk.f32.gmra.mxu2 %vm16085_vm2, %v6495_v15 }
 0x4cd   : > { %v6030_v15 = vld [vmem:[#allocation2 + $0x92] sm:$0xff] }
 0x4ce   : > { %9792 = vmatmul.msk.f32.gmra.mxu1 %vm16076_vm0, %v6028_v9  ;;  %v13249_v38 = vpop.f32.mrf.mxu0  ;;  %v9880_v9 = vld [vmem:[%s15064_s5 + $0x40] sm:$0xff]  ;;  %vm16088_vm0 = vnez %v16087_v40 }
 0x4cf   : > { %16080 = vst [vmem:[#allocation64_spill] sm:$0xff] %v13249_v38  ;;  %v6426_v38 = vld [vmem:[#allocation3] sm:$0xff]  ;;  %7129 = vmatpush.msrb.mxu0 %v9880_v9  ;;  %v6061_v41 = vsel %vm16088_vm0, %v6029_v61, 0.0 }
 0x4d0   : > { %9739 = vmatmul.msk.f32.gmra.mxu3 %vm16081_vm9, %v5459_v55  ;;  %vm16089_vm9 = vmmov %vm16085_vm2 }
 0x4d1   : > { %9775 = vmatmul.msk.f32.gmra.mxu0 %vm16082_vm5, %v5769_v56  ;;  %v13270_v56 = vpop.f32.mrf.mxu2  ;;  %vm16091_vm5 = vnez %v15903_v2 }
 0x4d2   : > { %16086 = vst [vmem:[#allocation60_spill] sm:$0xff] %v13270_v56  ;;  %v6458_v39 = vsel %vm16091_vm5, %v6426_v38, 0.0  ;;  %v6031_v38 = vld [vmem:[#allocation2 + $0x9a] sm:$0xff] }
 0x4d3   : > { %v13265_v58 = vpop.f32.mrf.mxu1  ;;  %v13267_v55 = vpop.f32.mrf.mxu3 }
 0x4d4   : > { %16083 = vst [vmem:[#allocation74_spill] sm:$0xff] %v13265_v58  ;;  %v6949_v58 = vld [vmem:[#allocation3 + $0x2] sm:$0xff] }
 0x4d5   : > { %16084 = vst [vmem:[#allocation59_spill] sm:$0xff] %v13267_v55 }
 0x4d6   : > { %9793 = vmatmul.msk.f32.gmra.mxu1 %vm16089_vm9, %v6061_v41  ;;  %v13275_v37 = vpop.f32.mrf.mxu0  ;;  %v6427_v41 = vld [vmem:[#allocation3 + $0x8] sm:$0xff]  ;;  %vm16098_vm9 = vmmov %vm16085_vm2 }
 0x4d7   : > { %16090 = vst [vmem:[#allocation58_spill] sm:$0xff] %v13275_v37 }
 0x4d8   : > { %9848 = vmatmul.msk.f32.vlgmr.msrb.gmra.mxu3 %vm16092_vm12, %v6458_v39  ;;  %vm16104_vm12 = vmmov %vm16085_vm2 }
 0x4d9   : > { %9884 = vmatmul.msk.f32.vlgmr.msrb.gmra.mxu0 %vm16093_vm11, %v6949_v58  ;;  %v13288_v56 = vpop.f32.mrf.mxu2  ;;  %v6063_v58 = vsel %vm15912_vm1, %v6031_v38, 0.0  ;;  %vm16101_vm11 = vmmov %vm16085_vm2 }
 0x4da   : > { %16097 = vst [vmem:[#allocation77_spill] sm:$0xff] %v13288_v56  ;;  %v13305_v56 = vld [vmem:[%s15063_s4] ss:$0 sm:$0xff] }
 0x4db   : > { %v13281_v21 = vpop.f32.mrf.mxu1  ;;  %v13283_v9 = vpop.f32.mrf.mxu3 }
 0x4dc   : > { %16094 = vst [vmem:[#allocation73_spill] sm:$0xff] %v13281_v21 }
 0x4dd   : > { %16095 = vst [vmem:[#allocation75_spill] sm:$0xff] %v13283_v9 }
 0x4de   : > { %9794 = vmatmul.msk.f32.gmra.mxu1 %vm16085_vm2, %v6030_v15  ;;  %v13286_v61 = vpop.f32.mrf.mxu0 }
 0x4df   : > { %16096 = vst [vmem:[#allocation76_spill] sm:$0xff] %v13286_v61 }
 0x4e0   : > { %9849 = vmatmul.msk.f32.gmra.mxu3 %vm16098_vm9, %v6427_v41  ;;  %vm16107_vm9 = vmmov %vm16085_vm2 }
 0x4e1   : > { %v13300_v15 = vpop.f32.mrf.mxu2 }
 0x4e2   : > { %16103 = vst [vmem:[#allocation81_spill] sm:$0xff] %v13300_v15  ;;  %v6033_v15 = vld [vmem:[#allocation2 + $0xaa] sm:$0xff] }
 0x4e3   : > { %v13291_v2 = vpop.f32.mrf.mxu1  ;;  %v13293_v39 = vpop.f32.mrf.mxu3 }
 0x4e4   : > { %16099 = vst [vmem:[#allocation78_spill] sm:$0xff] %v13291_v2 }
 0x4e5   : > { %16100 = vst [vmem:[#allocation79_spill] sm:$0xff] %v13293_v39  ;;  %v6032_v39 = vld [vmem:[#allocation2 + $0xa2] sm:$0xff] }
 0x4e6   : > { %9795 = vmatmul.msk.f32.gmra.mxu1 %vm16101_vm11, %v6063_v58  ;;  %v13298_v21 = vpop.f32.mrf.mxu0  ;;  %vm16109_vm11 = vmmov %vm16085_vm2 }
 0x4e7   : > { %16102 = vst [vmem:[#allocation80_spill] sm:$0xff] %v13298_v21 }
 0x4e9   : > { %v13315_v21 = vpop.f32.mrf.mxu2 }
 0x4ea   : > { %16106 = vst [vmem:[#allocation83_spill] sm:$0xff] %v13315_v21 }
 0x4eb   : > { %v6198_v41 = vpop.f32.mrf.mxu1  ;;  %v13308_v2 = vpop.f32.mrf.mxu3 }
 0x4ec   : > { %v6294_v61 = vadd.f32 %v6198_v41, %v13041_v47  ;;  %v6065_v47 = vsel %vm15817_vm13, %v6033_v15, 0.0  ;;  %vm16112_vm13 = vmmov %vm16107_vm9 }
 0x4ee   : > { %v6330_v20 = vadd.f32 %v13305_v56, %v6294_v61  ;;  %9796 = vmatmul.msk.f32.gmra.mxu1 %vm16104_vm12, %v6032_v39  ;;  %v13312_v38 = vpop.f32.mrf.mxu0  ;;  %vm16110_vm12 = vmmov %vm16085_vm2 }
 0x4ef   : > { %16105 = vst [vmem:[#allocation82_spill] sm:$0xff] %v13312_v38 }
 0x4f0   : > { %v6362_v58 = vmax.f32 %v6330_v20, 0.0 }
 0x4f2   : > { %6394 = vst.msk [vmem:[#allocation3 + $0x11] sm:$0xff] %vm16085_vm2, %v6362_v58  ;;  %vm16111_vm2 = vnez %v15914_v42 }
 0x4f3   : > { %v6201_v37 = vpop.f32.mrf.mxu1  ;;  %v13318_v55 = vpop.f32.mrf.mxu3 }
 0x4f4   : > { %v6295_v9 = vadd.f32 %v6201_v37, %v13056_v7 }
 0x4f6   : > { %v6331_v61 = vadd.f32 %v13305_v56, %v6295_v9  ;;  %9797 = vmatmul.msk.f32.gmra.mxu1 %vm16107_vm9, %v6065_v47  ;;  %v13324_v41 = vpop.f32.mrf.mxu0 }
 0x4f7   : > { %16108 = vst [vmem:[#allocation84_spill] sm:$0xff] %v13324_v41 }
 0x4f8   : > { %v6363_v39 = vmax.f32 %v6331_v61, 0.0  ;;  %v13340_v61 = vpop.f32.mrf.mxu2 }
 0x4f9   : > { %v6496_v20 = vld [vmem:[#allocation3 + $0x11] sm:$0xff]  ;;  %16114 = vst [vmem:[#allocation86_spill] sm:$0xff] %v13340_v61 }
 0x4fa   : > { %v13326_v58 = vld [vmem:[#allocation3 + $0x10] sm:$0xff]  ;;  %6395 = vst.msk [vmem:[#allocation3 + $0x19] sm:$0xff] %vm16109_vm11, %v6363_v39  ;;  %9818 = vmatmul.msk.f32.gmra.mxu2 %vm16110_vm12, %v6496_v20  ;;  %vm16115_vm11 = vmmov %vm16107_vm9 }
 0x4fb   : > { %v6950_v38 = vld [vmem:[#allocation3 + $0xa] sm:$0xff]  ;;  %v6460_v7 = vsel %vm16111_vm2, %v13326_v58, 0.0  ;;  %v6204_v9 = vpop.f32.mrf.mxu1  ;;  %v13338_v47 = vpop.f32.mrf.mxu3  ;;  %vm16116_vm12 = vmmov %vm16107_vm9 }
 0x4fc   : > { %v6982_v37 = vsel %vm10258_vm3, %v6950_v38, 0.0  ;;  %9850 = vmatmul.msk.f32.gmra.mxu3 %vm16107_vm9, %v6460_v7  ;;  %v6296_v15 = vadd.f32 %v6204_v9, %v13067_v57  ;;  %16113 = vst [vmem:[#allocation85_spill] sm:$0xff] %v13338_v47  ;;  %v6034_v39 = vld [vmem:[#allocation2 + $0xb2] sm:$0xff]  ;;  %v6035_v7 = vld [vmem:[#allocation2 + $0xba] sm:$0xff]  ;;  %vm16119_vm3 = vmmov %vm16107_vm9 }
 0x4fd   : > { %9885 = vmatmul.msk.f32.gmra.mxu0 %vm16112_vm13, %v6982_v37  ;;  %vm16118_vm13 = vmmov %vm16107_vm9 }
 0x4fe   : > { %v6332_v20 = vadd.f32 %v13305_v56, %v6296_v15  ;;  %9798 = vmatmul.msk.f32.gmra.mxu1 %vm16115_vm11, %v6034_v39  ;;  %v13348_v57 = vpop.f32.mrf.mxu0  ;;  %v6067_v39 = vsel %vm15826_vm15, %v6035_v7, 0.0  ;;  %vm16121_vm11 = vmmov %vm16119_vm3  ;;  %v9954_v7 = vld [vmem:[%s15064_s5 + $0x90] sm:$0xff] }
 0x4ff   : > { %16117 = vst [vmem:[#allocation87_spill] sm:$0xff] %v13348_v57  ;;  %7715 = vmatpush.msrb.mxu2 %v9954_v7 }
 0x500   : > { %v6364_v41 = vmax.f32 %v6332_v20, 0.0 }
 0x501   : > { %v6497_v21 = vld [vmem:[#allocation3 + $0x19] sm:$0xff] }
 0x502   : > { %v13344_v17 = vld [vmem:[#allocation3 + $0x18] sm:$0xff]  ;;  %6396 = vst.msk [vmem:[#allocation3 + $0x21] sm:$0xff] %vm16116_vm12, %v6364_v41  ;;  %9819 = vmatmul.msk.f32.gmra.mxu2 %vm16107_vm9, %v6497_v21  ;;  %v13360_v21 = vpop.f32.mrf.mxu2  ;;  %vm16123_vm12 = vmmov %vm16119_vm3  ;;  %vm16124_vm9 = vnez %v15925_v35 }
 0x503   : > { %v6951_v38 = vld [vmem:[#allocation3 + $0x12] sm:$0xff]  ;;  %v6207_v37 = vpop.f32.mrf.mxu1  ;;  %v13354_v15 = vpop.f32.mrf.mxu3  ;;  %16122 = vst [vmem:[#allocation89_spill] sm:$0xff] %v13360_v21 }
 0x504   : > { %9851 = vmatmul.msk.f32.gmra.mxu3 %vm16118_vm13, %v13344_v17  ;;  %v6297_v9 = vadd.f32 %v6207_v37, %v13078_v31  ;;  %16120 = vst [vmem:[#allocation88_spill] sm:$0xff] %v13354_v15  ;;  %vm16125_vm13 = vmmov %vm16119_vm3 }
 0x505   : > { %9886 = vmatmul.msk.f32.gmra.mxu0 %vm16119_vm3, %v6951_v38 }
 0x506   : > { %v6333_v41 = vadd.f32 %v13305_v56, %v6297_v9  ;;  %9799 = vmatmul.msk.f32.gmra.mxu1 %vm16121_vm11, %v6067_v39  ;;  %vm16126_vm11 = vmmov %vm16119_vm3  ;;  %v13377_v39 = vpop.f32.mrf.mxu0 }
 0x507   : > { %16127 = vst [vmem:[#allocation90_spill] sm:$0xff] %v13377_v39 }
 0x508   : > { %v6365_v20 = vmax.f32 %v6333_v41, 0.0  ;;  %v6036_v41 = vld [vmem:[#allocation2 + $0xc2] sm:$0xff] }
 0x509   : > { %v6498_v57 = vld [vmem:[#allocation3 + $0x21] sm:$0xff] }
 0x50a   : > { %v13362_v61 = vld [vmem:[#allocation3 + $0x20] sm:$0xff]  ;;  %6397 = vst.msk [vmem:[#allocation3 + $0x29] sm:$0xff] %vm16123_vm12, %v6365_v20  ;;  %9820 = vmatmul.msk.f32.gmra.mxu2 %vm16119_vm3, %v6498_v57  ;;  %vm16129_vm12 = vmmov %vm16119_vm3  ;;  %v13383_v10 = vpop.f32.mrf.mxu2 }
 0x50b   : > { %v6952_v47 = vld [vmem:[#allocation3 + $0x1a] sm:$0xff]  ;;  %v6462_v31 = vsel %vm16124_vm9, %v13362_v61, 0.0  ;;  %v6210_v37 = vpop.f32.mrf.mxu1  ;;  %v13379_v57 = vpop.f32.mrf.mxu3  ;;  %16130 = vst [vmem:[#allocation92_spill] sm:$0xff] %v13383_v10 }
 0x50c   : > { %v6984_v38 = vsel %vm16021_vm8, %v6952_v47, 0.0  ;;  %9852 = vmatmul.msk.f32.gmra.mxu3 %vm16125_vm13, %v6462_v31  ;;  %v6298_v9 = vadd.f32 %v6210_v37, %v13089_v26  ;;  %16128 = vst [vmem:[#allocation91_spill] sm:$0xff] %v13379_v57  ;;  %vm16131_vm13 = vmmov %vm16119_vm3  ;;  %v6037_v26 = vld [vmem:[#allocation2 + $0xca] sm:$0xff] }
 0x50d   : > { %9887 = vmatmul.msk.f32.gmra.mxu0 %vm16126_vm11, %v6984_v38  ;;  %v9918_v38 = vld [vmem:[%s15064_s5 + $0x70] sm:$0xff]  ;;  %vm16132_vm11 = vmmov %vm16119_vm3 }
 0x50e   : > { %v6334_v20 = vadd.f32 %v13305_v56, %v6298_v9  ;;  %9800 = vmatmul.msk.f32.gmra.mxu1 %vm16129_vm12, %v6036_v41  ;;  %vm16133_vm12 = vmmov %vm16119_vm3  ;;  %v6069_v41 = vsel %vm15836_vm6, %v6037_v26, 0.0 }
 0x50f   : > { %7437 = vmatpush.msrb.mxu1 %v9918_v38  ;;  %vm16138_vm8 = vmmov %vm16119_vm3 }
 0x510   : > { %v6366_v47 = vmax.f32 %v6334_v20, 0.0  ;;  %v13402_v20 = vpop.f32.mrf.mxu0 }
 0x511   : > { %v6499_v21 = vld [vmem:[#allocation3 + $0x29] sm:$0xff] }
 0x512   : > { %v13385_v15 = vld [vmem:[#allocation3 + $0x28] sm:$0xff]  ;;  %6398 = vst.msk [vmem:[#allocation3 + $0x31] sm:$0xff] %vm16119_vm3, %v6366_v47  ;;  %9821 = vmatmul.msk.f32.gmra.mxu2 %vm16131_vm13, %v6499_v21  ;;  %vm16134_vm13 = vmmov %vm16119_vm3  ;;  %v13413_v26 = vpop.f32.mrf.mxu2 }
 0x513   : > { %v6953_v31 = vld [vmem:[#allocation3 + $0x22] sm:$0xff]  ;;  %v6213_v7 = vpop.f32.mrf.mxu1  ;;  %v13396_v9 = vpop.f32.mrf.mxu3  ;;  %16137 = vst [vmem:[#allocation93_spill] sm:$0xff] %v13413_v26 }
 0x514   : > { %9853 = vmatmul.msk.f32.gmra.mxu3 %vm16132_vm11, %v13385_v15  ;;  %v6299_v37 = vadd.f32 %v6213_v7, %v13100_v6  ;;  %vm16135_vm11 = vmmov %vm16119_vm3 }
 0x515   : > { %9888 = vmatmul.msk.f32.gmra.mxu0 %vm16133_vm12, %v6953_v31  ;;  %vm16136_vm12 = vnez %v15935_v12 }
 0x516   : > { %v6335_v21 = vadd.f32 %v13305_v56, %v6299_v37  ;;  %9801 = vmatmul.msk.f32.gmra.mxu1 %vm16119_vm3, %v6069_v41  ;;  %v6038_v41 = vld [vmem:[#allocation2 + $0xd2] sm:$0xff] }
 0x518   : > { %v6367_v47 = vmax.f32 %v6335_v21, 0.0 }
 0x519   : > { %v6500_v10 = vld [vmem:[#allocation3 + $0x31] sm:$0xff] }
 0x51a   : > { %v13404_v39 = vld [vmem:[#allocation3 + $0x30] sm:$0xff]  ;;  %6399 = vst.msk [vmem:[#allocation3 + $0x39] sm:$0xff] %vm16134_vm13, %v6367_v47  ;;  %9822 = vmatmul.msk.f32.gmra.mxu2 %vm16135_vm11, %v6500_v10  ;;  %vm16140_vm13 = vmmov %vm16119_vm3  ;;  %v13422_v47 = vpop.f32.mrf.mxu0 }
 0x51b   : > { %v6954_v57 = vld [vmem:[#allocation3 + $0x2a] sm:$0xff]  ;;  %v6464_v6 = vsel %vm16136_vm12, %v13404_v39, 0.0  ;;  %v6216_v38 = vpop.f32.mrf.mxu1  ;;  %v13418_v37 = vpop.f32.mrf.mxu3  ;;  %16141 = vst [vmem:[#allocation95_spill] sm:$0xff] %v13422_v47  ;;  %vm16142_vm11 = vmmov %vm16119_vm3 }
 0x51c   : > { %v6986_v31 = vsel %vm16032_vm7, %v6954_v57, 0.0  ;;  %9854 = vmatmul.msk.f32.gmra.mxu3 %vm16119_vm3, %v6464_v6  ;;  %v6300_v7 = vadd.f32 %v6216_v38, %v13116_v24  ;;  %16139 = vst [vmem:[#allocation94_spill] sm:$0xff] %v13418_v37  ;;  %v6039_v6 = vld [vmem:[#allocation2 + $0xda] sm:$0xff]  ;;  %vm16144_vm7 = vmmov %vm16119_vm3 }
 0x51d   : > { %9889 = vmatmul.msk.f32.gmra.mxu0 %vm16138_vm8, %v6986_v31  ;;  %vm16143_vm8 = vmmov %vm16119_vm3 }
 0x51e   : > { %v6336_v10 = vadd.f32 %v13305_v56, %v6300_v7  ;;  %9802 = vmatmul.msk.f32.gmra.mxu1 %vm16140_vm13, %v6038_v41  ;;  %v13434_v7 = vpop.f32.mrf.mxu2  ;;  %v6071_v41 = vsel %vm15846_vm14, %v6039_v6, 0.0  ;;  %vm16146_vm13 = vmmov %vm16119_vm3 }
 0x520   : > { %v6368_v21 = vmax.f32 %v6336_v10, 0.0 }
 0x521   : > { %v6501_v57 = vld [vmem:[#allocation3 + $0x39] sm:$0xff] }
 0x522   : > { %v13424_v13 = vld [vmem:[#allocation3 + $0x38] sm:$0xff]  ;;  %6400 = vst.msk [vmem:[#allocation3 + $0x41] sm:$0xff] %vm16142_vm11, %v6368_v21  ;;  %9823 = vmatmul.msk.f32.gmra.mxu2 %vm16119_vm3, %v6501_v57  ;;  %vm16147_vm11 = vmmov %vm16119_vm3  ;;  %v13449_v6 = vpop.f32.mrf.mxu0 }
 0x523   : > { %v6955_v26 = vld [vmem:[#allocation3 + $0x32] sm:$0xff]  ;;  %v6219_v24 = vpop.f32.mrf.mxu1  ;;  %v13432_v38 = vpop.f32.mrf.mxu3  ;;  %16150 = vst [vmem:[#allocation97_spill] sm:$0xff] %v13449_v6 }
 0x524   : > { %9855 = vmatmul.msk.f32.gmra.mxu3 %vm16143_vm8, %v13424_v13  ;;  %v6301_v31 = vadd.f32 %v6219_v24, %v13127_v3  ;;  %16145 = vst [vmem:[#allocation96_spill] sm:$0xff] %v13432_v38  ;;  %v14082_v42 = vld [vmem:[#allocation3 + $0x32] sm:$0xff] }
 0x525   : > { %9890 = vmatmul.msk.f32.gmra.mxu0 %vm16144_vm7, %v6955_v26  ;;  %vm16148_vm7 = vmmov %vm16119_vm3  ;;  %vm16149_vm3 = vnez %v15947_v18  ;;  %v16155_v18 = vld [vmem:[#allocation53_spill] sm:$0xff] }
 0x526   : > { %v6337_v10 = vadd.f32 %v13305_v56, %v6301_v31  ;;  %9803 = vmatmul.msk.f32.gmra.mxu1 %vm16146_vm13, %v6071_v41  ;;  %vm16151_vm8 = vmmov %vm16148_vm7  ;;  %v6040_v41 = vld [vmem:[#allocation2 + $0xe2] sm:$0xff] }
 0x527   : > { %vm16152_vm13 = vmmov %vm16148_vm7 }
 0x528   : > { %v6369_v21 = vmax.f32 %v6337_v10, 0.0 }
 0x529   : > { %v6502_v57 = vld [vmem:[#allocation3 + $0x41] sm:$0xff] }
 0x52a   : > { %v13440_v47 = vld [vmem:[#allocation3 + $0x40] sm:$0xff]  ;;  %6401 = vst.msk [vmem:[#allocation3 + $0x49] sm:$0xff] %vm16147_vm11, %v6369_v21  ;;  %9824 = vmatmul.msk.f32.gmra.mxu2 %vm16148_vm7, %v6502_v57  ;;  %vm16153_vm11 = vmmov %vm16148_vm7  ;;  %v13458_v57 = vpop.f32.mrf.mxu2 }
 0x52b   : > { %v6956_v37 = vld [vmem:[#allocation3 + $0x3a] sm:$0xff]  ;;  %v6466_v3 = vsel %vm16149_vm3, %v13440_v47, 0.0  ;;  %v6222_v24 = vpop.f32.mrf.mxu1  ;;  %v13456_v21 = vpop.f32.mrf.mxu3 }
 0x52c   : > { %v6988_v26 = vsel %vm16045_vm10, %v6956_v37, 0.0  ;;  %9856 = vmatmul.msk.f32.gmra.mxu3 %vm16151_vm8, %v6466_v3  ;;  %v6302_v31 = vadd.f32 %v6222_v24, %v13143_v44  ;;  %16154 = vst [vmem:[#allocation98_spill] sm:$0xff] %v13456_v21  ;;  %v5096_v3 = vadd.f32 %v12966_v1, %v16155_v18  ;;  %vm16156_vm8 = vmmov %vm16148_vm7  ;;  %v5993_v44 = vadd.f32 %v13141_v33, %v13156_v11 }
 0x52d   : > { %9891 = vmatmul.msk.f32.gmra.mxu0 %vm16152_vm13, %v6988_v26  ;;  %v6041_v26 = vld [vmem:[#allocation2 + $0xea] sm:$0xff]  ;;  %vm16157_vm13 = vmmov %vm16148_vm7 }
 0x52e   : > { %v6338_v10 = vadd.f32 %v13305_v56, %v6302_v31  ;;  %9804 = vmatmul.msk.f32.gmra.mxu1 %vm16153_vm11, %v6040_v41  ;;  %vm16158_vm11 = vmmov %vm16148_vm7  ;;  %v5406_v31 = vadd.f32 %v13114_v19, %v5096_v3  ;;  %v6073_v18 = vsel %vm15857_vm4, %v6041_v26, 0.0  ;;  %v16159_v3 = vld [vmem:[#allocation63_spill] sm:$0xff] }
 0x530   : > { %v6370_v28 = vmax.f32 %v6338_v10, 0.0  ;;  %v13472_v10 = vpop.f32.mrf.mxu0  ;;  %v5716_v1 = vadd.f32 %v13168_v63, %v5406_v31 }
 0x531   : > { %v6503_v37 = vld [vmem:[#allocation3 + $0x49] sm:$0xff] }
 0x532   : > { %v13460_v38 = vld [vmem:[#allocation3 + $0x48] sm:$0xff]  ;;  %6402 = vst.msk [vmem:[#allocation3 + $0x51] sm:$0xff] %vm16148_vm7, %v6370_v28  ;;  %9825 = vmatmul.msk.f32.gmra.mxu2 %vm16156_vm8, %v6503_v37  ;;  %v13481_v37 = vpop.f32.mrf.mxu2  ;;  %vm16160_vm8 = vmmov %vm16148_vm7  ;;  %v5994_v63 = vadd.f32 %v13159_v52, %v5716_v1 }
 0x533   : > { %v6957_v6 = vld [vmem:[#allocation3 + $0x42] sm:$0xff]  ;;  %v6225_v24 = vpop.f32.mrf.mxu1  ;;  %v13479_v11 = vpop.f32.mrf.mxu3  ;;  %vm16164_vm10 = vmmov %vm16160_vm8 }
 0x534   : > { %9857 = vmatmul.msk.f32.gmra.mxu3 %vm16157_vm13, %v13460_v38  ;;  %v6303_v41 = vadd.f32 %v6225_v24, %v5993_v44  ;;  %v5097_v44 = vadd.f32 %v12980_v22, %v16159_v3  ;;  %vm16161_vm13 = vmmov %vm16148_vm7  ;;  %v14128_v35 = vld [vmem:[#allocation3 + $0x42] sm:$0xff] }
 0x535   : > { %9892 = vmatmul.msk.f32.gmra.mxu0 %vm16158_vm11, %v6957_v6  ;;  %vm16162_vm11 = vnez %v15958_v46  ;;  %vm16165_vm4 = vmmov %vm16160_vm8 }
 0x536   : > { %v6339_v28 = vadd.f32 %v13305_v56, %v6303_v41  ;;  %9805 = vmatmul.msk.f32.gmra.mxu1 %vm16148_vm7, %v6073_v18  ;;  %vm16163_vm7 = vnez %v16055_v54  ;;  %v5407_v22 = vadd.f32 %v13133_v36, %v5097_v44  ;;  %v6042_v18 = vld [vmem:[#allocation2 + $0xf2] sm:$0xff]  ;;  %v16198_v54 = vld [vmem:[#allocation28_spill] sm:$0xff] }
 0x538   : > { %v6371_v33 = vmax.f32 %v6339_v28, 0.0  ;;  %v5717_v28 = vadd.f32 %v13180_v27, %v5407_v22  ;;  %v13501_v1 = vpop.f32.mrf.mxu0  ;;  %v6043_v27 = vld [vmem:[#allocation2 + $0xfa] sm:$0xff] }
 0x539   : > { %v6504_v6 = vld [vmem:[#allocation3 + $0x51] sm:$0xff] }
 0x53a   : > { %v13483_v21 = vld [vmem:[#allocation3 + $0x50] sm:$0xff]  ;;  %6403 = vst.msk [vmem:[#allocation3 + $0x59] sm:$0xff] %vm16160_vm8, %v6371_v33  ;;  %9826 = vmatmul.msk.f32.gmra.mxu2 %vm16161_vm13, %v6504_v6  ;;  %vm16166_vm8 = vmmov %vm16165_vm4  ;;  %v5995_v36 = vadd.f32 %v13173_v51, %v5717_v28 }
 0x53b   : > { %v6958_v19 = vld [vmem:[#allocation3 + $0x4a] sm:$0xff]  ;;  %v6468_v26 = vsel %vm16162_vm11, %v13483_v21, 0.0  ;;  %v6228_v31 = vpop.f32.mrf.mxu1  ;;  %v13510_v44 = vpop.f32.mrf.mxu3  ;;  %vm16169_vm13 = vmmov %vm16165_vm4 }
 0x53c   : > { %v6990_v24 = vsel %vm16163_vm7, %v6958_v19, 0.0  ;;  %9858 = vmatmul.msk.f32.gmra.mxu3 %vm16164_vm10, %v6468_v26  ;;  %v6304_v41 = vadd.f32 %v6228_v31, %v5994_v63  ;;  %v16167_v26 = vld [vmem:[#allocation65_spill] sm:$0xff]  ;;  %vm16168_vm10 = vmmov %vm16165_vm4  ;;  %v13512_v63 = vpop.f32.mrf.mxu2  ;;  %vm16175_vm7 = vnez %v15969_v60 }
 0x53d   : > { %9893 = vmatmul.msk.f32.gmra.mxu0 %vm16165_vm4, %v6990_v24  ;;  %v5098_v24 = vadd.f32 %v12998_v8, %v16167_v26 }
 0x53e   : > { %v6340_v52 = vadd.f32 %v13305_v56, %v6304_v41  ;;  %9806 = vmatmul.msk.f32.gmra.mxu1 %vm16166_vm8, %v6042_v18  ;;  %vm16170_vm8 = vmmov %vm16165_vm4 }
 0x53f   : > { %v5408_v22 = vadd.f32 %v13150_v14, %v5098_v24 }
 0x540   : > { %v6372_v33 = vmax.f32 %v6340_v52, 0.0  ;;  %v13523_v52 = vpop.f32.mrf.mxu0 }
 0x541   : > { %v6505_v6 = vld [vmem:[#allocation3 + $0x59] sm:$0xff]  ;;  %v5718_v18 = vadd.f32 %v13197_v50, %v5408_v22 }
 0x542   : > { %v13503_v19 = vld [vmem:[#allocation3 + $0x58] sm:$0xff]  ;;  %6404 = vst.msk [vmem:[#allocation3 + $0x61] sm:$0xff] %vm16165_vm4, %v6372_v33  ;;  %9827 = vmatmul.msk.f32.gmra.mxu2 %vm16168_vm10, %v6505_v6  ;;  %vm16171_vm4 = vnez %v15977_v4  ;;  %vm16172_vm10 = vmmov %vm16170_vm8 }
 0x543   : > { %v6959_v3 = vld [vmem:[#allocation3 + $0x52] sm:$0xff]  ;;  %v6231_v31 = vpop.f32.mrf.mxu1  ;;  %v6075_v41 = vsel %vm16171_vm4, %v6043_v27, 0.0  ;;  %v5996_v50 = vadd.f32 %v13185_v43, %v5718_v18  ;;  %v9953_v27 = vld [vmem:[%s15064_s5 + $0x88] sm:$0xff]  ;;  %vm16177_vm4 = vmmov %vm16170_vm8  ;;  %v13543_v43 = vpop.f32.mrf.mxu3 }
 0x544   : > { %9859 = vmatmul.msk.f32.gmra.mxu3 %vm16169_vm13, %v13503_v19  ;;  %v6305_v8 = vadd.f32 %v6231_v31, %v5995_v36  ;;  %vm16174_vm13 = vmmov %vm16170_vm8  ;;  %7716 = vmatpush.msrb.mxu2 %v9953_v27  ;;  %v9917_v18 = vld [vmem:[%s15064_s5 + $0x68] sm:$0xff]  ;;  %v14166_v12 = vld [vmem:[#allocation3 + $0x52] sm:$0xff] }
 0x545   : > { %9894 = vmatmul.msk.f32.gmra.mxu0 %vm16170_vm8, %v6959_v3  ;;  %v16173_v3 = vld [vmem:[#allocation70_spill] sm:$0xff]  ;;  %vm16178_vm11 = vmmov %vm16177_vm4  ;;  %7438 = vmatpush.msrb.mxu1 %v9917_v18  ;;  %v6045_v27 = vld [vmem:[#allocation2 + $0x10a] sm:$0xff] }
 0x546   : > { %v6341_v51 = vadd.f32 %v13305_v56, %v6305_v8  ;;  %9807 = vmatmul.msk.f32.gmra.mxu1 %vm16172_vm10, %v6075_v41  ;;  %v5099_v14 = vadd.f32 %v13015_v62, %v16173_v3  ;;  %vm16176_vm10 = vnez %v16069_v0  ;;  %v13545_v8 = vpop.f32.mrf.mxu2  ;;  %v6044_v41 = vld [vmem:[#allocation2 + $0x102] sm:$0xff] }
 0x548   : > { %v6373_v28 = vmax.f32 %v6341_v51, 0.0  ;;  %v5409_v62 = vadd.f32 %v13170_v29, %v5099_v14  ;;  %v9916_v29 = vld [vmem:[%s15064_s5 + $0x60] sm:$0xff] }
 0x549   : > { %v6506_v33 = vld [vmem:[#allocation3 + $0x61] sm:$0xff]  ;;  %7439 = vmatpush.msrb.mxu1 %v9916_v29 }
 0x54a   : > { %v13525_v6 = vld [vmem:[#allocation3 + $0x60] sm:$0xff]  ;;  %6405 = vst.msk [vmem:[#allocation3 + $0x69] sm:$0xff] %vm16174_vm13, %v6373_v28  ;;  %9828 = vmatmul.msk.f32.gmra.mxu2 %vm16170_vm8, %v6506_v33  ;;  %v5719_v51 = vadd.f32 %v13210_v48, %v5409_v62  ;;  %v13561_v48 = vpop.f32.mrf.mxu0  ;;  %vm16181_vm13 = vmmov %vm16177_vm4 }
 0x54b   : > { %v6960_v26 = vld [vmem:[#allocation3 + $0x5a] sm:$0xff]  ;;  %v6470_v24 = vsel %vm16175_vm7, %v13525_v6, 0.0  ;;  %v6234_v31 = vpop.f32.mrf.mxu1  ;;  %vm16182_vm8 = vmmov %vm16177_vm4 }
 0x54c   : > { %v6992_v36 = vsel %vm16176_vm10, %v6960_v26, 0.0  ;;  %9860 = vmatmul.msk.f32.gmra.mxu3 %vm16177_vm4, %v6470_v24  ;;  %v6306_v22 = vadd.f32 %v6234_v31, %v5996_v50  ;;  %v16179_v50 = vld [vmem:[#allocation69_spill] sm:$0xff]  ;;  %vm16183_vm10 = vnez %v15990_v53 }
 0x54d   : > { %9895 = vmatmul.msk.f32.gmra.mxu0 %vm16178_vm11, %v6992_v36  ;;  %v5100_v24 = vadd.f32 %v13033_v45, %v16179_v50  ;;  %vm16180_vm11 = vmmov %vm16177_vm4  ;;  %v5997_v36 = vadd.f32 %v13200_v32, %v5719_v51  ;;  %v6077_v45 = vsel %vm16183_vm10, %v6045_v27, 0.0  ;;  %v13574_v32 = vpop.f32.mrf.mxu3 }
 0x54e   : > { %v6342_v28 = vadd.f32 %v13305_v56, %v6306_v22  ;;  %9808 = vmatmul.msk.f32.gmra.mxu1 %vm16177_vm4, %v6044_v41  ;;  %v13576_v51 = vpop.f32.mrf.mxu2 }
 0x54f   : > { %v5410_v62 = vadd.f32 %v13187_v16, %v5100_v24  ;;  %v16185_v16 = vld [vmem:[#allocation37_spill] sm:$0xff]  ;;  %v16189_v24 = vld [vmem:[#allocation27_spill] sm:$0xff] }
 0x550   : > { %v6374_v33 = vmax.f32 %v6342_v28, 0.0 }
 0x551   : > { %v6507_v26 = vld [vmem:[#allocation3 + $0x69] sm:$0xff]  ;;  %v5720_v41 = vadd.f32 %v13242_v30, %v5410_v62 }
 0x552   : > { %v13556_v3 = vld [vmem:[#allocation3 + $0x68] sm:$0xff]  ;;  %6406 = vst.msk [vmem:[#allocation3 + $0x71] sm:$0xff] %vm16180_vm11, %v6374_v33  ;;  %9829 = vmatmul.msk.f32.gmra.mxu2 %vm16181_vm13, %v6507_v26  ;;  %vm16184_vm11 = vmmov %vm16177_vm4 }
 0x553   : > { %v6961_v14 = vld [vmem:[#allocation3 + $0x62] sm:$0xff]  ;;  %v6237_v31 = vpop.f32.mrf.mxu1  ;;  %vm16186_vm13 = vmmov %vm16177_vm4 }
 0x554   : > { %9861 = vmatmul.msk.f32.gmra.mxu3 %vm16182_vm8, %v13556_v3  ;;  %v6307_v22 = vadd.f32 %v6237_v31, %v5997_v36  ;;  %vm16187_vm8 = vmmov %vm16177_vm4  ;;  %v16188_v30 = vld [vmem:[#allocation17_spill] sm:$0xff]  ;;  %v13590_v31 = vpop.f32.mrf.mxu0 }
 0x555   : > { %9896 = vmatmul.msk.f32.gmra.mxu0 %vm16177_vm4, %v6961_v14  ;;  %v5101_v14 = vadd.f32 %v16185_v16, %v12751_v34  ;;  %v5998_v50 = vadd.f32 %v16188_v30, %v5720_v41  ;;  %vm16190_vm4 = vnez %v16189_v24  ;;  %vm16192_vm10 = vmmov %vm16187_vm8  ;;  %v6046_v34 = vld [vmem:[#allocation2 + $0x112] sm:$0xff]  ;;  %v13598_v30 = vpop.f32.mrf.mxu3 }
 0x556   : > { %v6343_v18 = vadd.f32 %v13305_v56, %v6307_v22  ;;  %9809 = vmatmul.msk.f32.gmra.mxu1 %vm16184_vm11, %v6077_v45  ;;  %vm16191_vm11 = vmmov %vm16187_vm8  ;;  %v16193_v22 = vld [vmem:[#allocation66_spill] sm:$0xff]  ;;  %16196 = vst [vmem:[#allocation53_spill] sm:$0xff] %v13598_v30  ;;  %v13600_v40 = vpop.f32.mrf.mxu2 }
 0x557   : > { %v5411_v45 = vadd.f32 %v16193_v22, %v5101_v14  ;;  %16197 = vst [vmem:[#allocation63_spill] sm:$0xff] %v13600_v40  ;;  %v16199_v24 = vld [vmem:[#allocation38_spill] sm:$0xff]  ;;  %v16204_v22 = vld [vmem:[#allocation71_spill] sm:$0xff] }
 0x558   : > { %v6375_v28 = vmax.f32 %v6343_v18, 0.0  ;;  %v5102_v14 = vadd.f32 %v16199_v24, %v16198_v54  ;;  %v16207_v54 = vld [vmem:[#allocation75_spill] sm:$0xff] }
 0x559   : > { %v6508_v29 = vld [vmem:[#allocation3 + $0x71] sm:$0xff] }
 0x55a   : > { %v13578_v33 = vld [vmem:[#allocation3 + $0x70] sm:$0xff]  ;;  %6407 = vst.msk [vmem:[#allocation3 + $0x79] sm:$0xff] %vm16186_vm13, %v6375_v28  ;;  %9830 = vmatmul.msk.f32.gmra.mxu2 %vm16187_vm8, %v6508_v29  ;;  %v16194_v28 = vld [vmem:[#allocation59_spill] sm:$0xff]  ;;  %vm16195_vm13 = vmmov %vm16187_vm8 }
 0x55b   : > { %v6962_v26 = vld [vmem:[#allocation3 + $0x6a] sm:$0xff]  ;;  %v6472_v36 = vsel %vm16190_vm4, %v13578_v33, 0.0  ;;  %v6240_v62 = vpop.f32.mrf.mxu1  ;;  %v5721_v41 = vadd.f32 %v16194_v28, %v5411_v45 }
 0x55c   : > { %v6994_v27 = vsel %vm16088_vm0, %v6962_v26, 0.0  ;;  %9862 = vmatmul.msk.f32.gmra.mxu3 %vm16191_vm11, %v6472_v36  ;;  %v6308_v18 = vadd.f32 %v6240_v62, %v5998_v50  ;;  %v6047_v26 = vld [vmem:[#allocation2 + $0x11a] sm:$0xff]  ;;  %v16201_v50 = vld [vmem:[#allocation64_spill] sm:$0xff]  ;;  %vm16202_vm11 = vmmov %vm16187_vm8  ;;  %vm16205_vm0 = vnez %v16204_v22  ;;  %v13615_v30 = vpop.f32.mrf.mxu0 }
 0x55d   : > { %9897 = vmatmul.msk.f32.gmra.mxu0 %vm16192_vm10, %v6994_v27  ;;  %vm16200_vm10 = vmmov %vm16187_vm8  ;;  %v5999_v62 = vadd.f32 %v16201_v50, %v5721_v41  ;;  %v6079_v45 = vsel %vm16205_vm0, %v6047_v26, 0.0  ;;  %v16210_v22 = vld [vmem:[#allocation21_spill] sm:$0xff] }
 0x55e   : > { %v6344_v29 = vadd.f32 %v13305_v56, %v6308_v18  ;;  %9810 = vmatmul.msk.f32.gmra.mxu1 %vm16195_vm13, %v6046_v34  ;;  %vm16203_vm13 = vmmov %vm16187_vm8  ;;  %v16206_v18 = vld [vmem:[#allocation68_spill] sm:$0xff]  ;;  %v16211_v26 = vld [vmem:[#allocation41_spill] sm:$0xff] }
 0x55f   : > { %v5412_v28 = vadd.f32 %v16206_v18, %v5102_v14  ;;  %v5103_v53 = vadd.f32 %v16211_v26, %v16210_v22  ;;  %v16213_v14 = vld [vmem:[#allocation58_spill] sm:$0xff]  ;;  %vm16219_vm0 = vmmov %vm16187_vm8  ;;  %v16220_v22 = vld [vmem:[#allocation60_spill] sm:$0xff] }
 0x560   : > { %v6376_v16 = vmax.f32 %v6344_v29, 0.0  ;;  %v16222_v26 = vld [vmem:[#allocation79_spill] sm:$0xff] }
 0x561   : > { %v6509_v0 = vld [vmem:[#allocation3 + $0x79] sm:$0xff]  ;;  %v5722_v24 = vadd.f32 %v16207_v54, %v5412_v28 }
 0x562   : > { %v13602_v36 = vld [vmem:[#allocation3 + $0x78] sm:$0xff]  ;;  %6408 = vst.msk [vmem:[#allocation3 + $0x81] sm:$0xff] %vm16200_vm10, %v6376_v16  ;;  %9831 = vmatmul.msk.f32.gmra.mxu2 %vm16187_vm8, %v6509_v0  ;;  %vm16208_vm10 = vmmov %vm16187_vm8 }
 0x563   : > { %v6963_v27 = vld [vmem:[#allocation3 + $0x72] sm:$0xff]  ;;  %v6243_v34 = vpop.f32.mrf.mxu1 }
 0x564   : > { %9863 = vmatmul.msk.f32.gmra.mxu3 %vm16202_vm11, %v13602_v36  ;;  %v6309_v29 = vadd.f32 %v6243_v34, %v5999_v62  ;;  %vm16212_vm11 = vmmov %vm16187_vm8  ;;  %v6000_v62 = vadd.f32 %v16213_v14, %v5722_v24  ;;  %v16214_v34 = vld [vmem:[#allocation35_spill] sm:$0xff]  ;;  %v7291_v24 = vsel %vm16091_vm5, %v13326_v58, 0.0  ;;  %v16228_v58 = vld [vmem:[#allocation76_spill] sm:$0xff] }
 0x565   : > { %9898 = vmatmul.msk.f32.gmra.mxu0 %vm16203_vm13, %v6963_v27  ;;  %v13622_v27 = vpop.f32.mrf.mxu2  ;;  %vm16215_vm13 = vnez %v16214_v34  ;;  %v16225_v34 = vld [vmem:[#allocation22_spill] sm:$0xff] }
 0x566   : > { %v6345_v0 = vadd.f32 %v13305_v56, %v6309_v29  ;;  %9811 = vmatmul.msk.f32.gmra.mxu1 %vm16208_vm10, %v6079_v45  ;;  %16209 = vst [vmem:[#allocation65_spill] sm:$0xff] %v13622_v27  ;;  %v13634_v29 = vpop.f32.mrf.mxu3  ;;  %vm16218_vm10 = vmmov %vm16187_vm8 }
 0x567   : > { %16217 = vst [vmem:[#allocation70_spill] sm:$0xff] %v13634_v29 }
 0x568   : > { %v6377_v41 = vmax.f32 %v6345_v0, 0.0  ;;  %v5413_v0 = vadd.f32 %v16220_v22, %v5103_v53  ;;  %v16226_v53 = vld [vmem:[#allocation42_spill] sm:$0xff] }
 0x569   : > { %v6510_v16 = vld [vmem:[#allocation3 + $0x81] sm:$0xff] }
 0x56a   : > { %v13620_v50 = vld [vmem:[#allocation3 + $0x80] sm:$0xff]  ;;  %6409 = vst.msk [vmem:[#allocation3 + $0x89] sm:$0xff] %vm16187_vm8, %v6377_v41  ;;  %9832 = vmatmul.msk.f32.gmra.mxu2 %vm16212_vm11, %v6510_v16  ;;  %v16221_v16 = vld [vmem:[#allocation5_spill] sm:$0xff]  ;;  %v5723_v14 = vadd.f32 %v16222_v26, %v5413_v0  ;;  %vm16223_vm8 = vmmov %vm16219_vm0 }
 0x56b   : > { %v6964_v40 = vld [vmem:[#allocation3 + $0x7a] sm:$0xff]  ;;  %v6474_v45 = vsel %vm16215_vm13, %v13620_v50, 0.0  ;;  %v6246_v54 = vpop.f32.mrf.mxu1  ;;  %vm16227_vm11 = vmmov %vm16219_vm0  ;;  %v16232_v0 = vld [vmem:[#allocation77_spill] sm:$0xff] }
 0x56c   : > { %v6996_v28 = vsel %vm15912_vm1, %v6964_v40, 0.0  ;;  %9864 = vmatmul.msk.f32.gmra.mxu3 %vm16218_vm10, %v6474_v45  ;;  %v6310_v41 = vadd.f32 %v6246_v54, %v6000_v62  ;;  %v13645_v40 = vpop.f32.mrf.mxu0  ;;  %v5104_v62 = vadd.f32 %v16226_v53, %v16225_v34  ;;  %v6001_v54 = vadd.f32 %v16228_v58, %v5723_v14  ;;  %vm16229_vm10 = vmmov %vm16219_vm0 }
 0x56d   : > { %9899 = vmatmul.msk.f32.gmra.mxu0 %vm16219_vm0, %v6996_v28  ;;  %16224 = vst [vmem:[#allocation69_spill] sm:$0xff] %v13645_v40  ;;  %v16235_v40 = vld [vmem:[#allocation43_spill] sm:$0xff] }
 0x56e   : > { %v6346_v27 = vadd.f32 %v13305_v56, %v6310_v41  ;;  %9920 = vmatmul.msk.f32.vlgmr.msrb.gmra.mxu1 %vm16223_vm8, %v7291_v24  ;;  %vm16230_vm8 = vmmov %vm16219_vm0  ;;  %v5414_v41 = vadd.f32 %v16232_v0, %v5104_v62  ;;  %v13660_v26 = vpop.f32.mrf.mxu3 }
 0x570   : > { %v6378_v29 = vmax.f32 %v6346_v27, 0.0  ;;  %v13657_v27 = vpop.f32.mrf.mxu2  ;;  %v5724_v34 = vadd.f32 %v13308_v2, %v5414_v41  ;;  %v16238_v2 = vld [vmem:[#allocation80_spill] sm:$0xff] }
 0x571   : > { %v6511_v18 = vld [vmem:[#allocation3 + $0x89] sm:$0xff]  ;;  %16231 = vst [vmem:[#allocation37_spill] sm:$0xff] %v13657_v27  ;;  %v16234_v27 = vld [vmem:[#allocation24_spill] sm:$0xff] }
 0x572   : > { %v13647_v45 = vld [vmem:[#allocation3 + $0x88] sm:$0xff]  ;;  %6410 = vst.msk [vmem:[#allocation3 + $0x91] sm:$0xff] %vm16219_vm0, %v6378_v29  ;;  %9833 = vmatmul.msk.f32.gmra.mxu2 %vm16227_vm11, %v6511_v18  ;;  %v5105_v62 = vadd.f32 %v16235_v40, %v16234_v27  ;;  %vm16236_vm11 = vmmov %vm16219_vm0 }
 0x573   : > { %v6965_v28 = vld [vmem:[#allocation3 + $0x82] sm:$0xff]  ;;  %v6249_v22 = vpop.f32.mrf.mxu1 }
 0x574   : > { %9865 = vmatmul.msk.f32.gmra.mxu3 %vm16229_vm10, %v13647_v45  ;;  %v6311_v24 = vadd.f32 %v6249_v22, %v6001_v54  ;;  %vm16237_vm10 = vmmov %vm16219_vm0  ;;  %v6002_v54 = vadd.f32 %v16238_v2, %v5724_v34  ;;  %v16239_v22 = vld [vmem:[#allocation45_spill] sm:$0xff]  ;;  %v7293_v34 = vsel %vm16111_vm2, %v13362_v61, 0.0 }
 0x575   : > { %9900 = vmatmul.msk.f32.gmra.mxu0 %vm16230_vm8, %v6965_v28  ;;  %vm16240_vm8 = vnez %v16239_v22  ;;  %vm16242_vm1 = vmmov %vm16237_vm10 }
 0x576   : > { %v6347_v29 = vadd.f32 %v13305_v56, %v6311_v24  ;;  %9921 = vmatmul.msk.f32.gmra.mxu1 %vm16219_vm0, %v13344_v17  ;;  %vm16241_vm0 = vnez %v15816_v59  ;;  %vm16243_vm5 = vmmov %vm16242_vm1  ;;  %v16244_v24 = vld [vmem:[#allocation81_spill] sm:$0xff] }
 0x577   : > { %v5415_v40 = vadd.f32 %v16244_v24, %v5105_v62  ;;  %v16249_v24 = vld [vmem:[#allocation55_spill] sm:$0xff]  ;;  %16398 = vst [vmem:[#allocation81_spill] sm:$0xff] %v14082_v42 }
 0x578   : > { %v6379_v18 = vmax.f32 %v6347_v29, 0.0 }
 0x579   : > { %v6512_v53 = vld [vmem:[#allocation3 + $0x91] sm:$0xff] }
 0x57a   : > { %v13666_v14 = vpop.f32.mrf.mxu0  ;;  %v13668_v58 = vld [vmem:[#allocation3 + $0x90] sm:$0xff]  ;;  %6411 = vst.msk [vmem:[#allocation3 + $0x99] sm:$0xff] %vm16236_vm11, %v6379_v18  ;;  %9834 = vmatmul.msk.f32.gmra.mxu2 %vm16237_vm10, %v6512_v53  ;;  %v5725_v18 = vadd.f32 %v13318_v55, %v5415_v40  ;;  %vm16245_vm11 = vmmov %vm16242_vm1 }
 0x57b   : > { %16233 = vst [vmem:[#allocation17_spill] sm:$0xff] %v13666_v14  ;;  %v6966_v28 = vld [vmem:[#allocation3 + $0x8a] sm:$0xff]  ;;  %v6476_v17 = vsel %vm16240_vm8, %v13668_v58, 0.0  ;;  %v6252_v41 = vpop.f32.mrf.mxu1  ;;  %vm16252_vm10 = vmmov %vm16242_vm1 }
 0x57c   : > { %v6998_v0 = vsel %vm16241_vm0, %v6966_v28, 0.0  ;;  %9866 = vmatmul.msk.f32.gmra.mxu3 %vm16242_vm1, %v6476_v17  ;;  %v6312_v27 = vadd.f32 %v6252_v41, %v6002_v54  ;;  %v16248_v41 = vld [vmem:[#allocation25_spill] sm:$0xff]  ;;  %v16251_v55 = vld [vmem:[#allocation82_spill] sm:$0xff]  ;;  %vm16265_vm0 = vmmov %vm16242_vm1 }
 0x57d   : > { %9901 = vmatmul.msk.f32.gmra.mxu0 %vm16243_vm5, %v6998_v0  ;;  %v6650_v29 = vpop.f32.mrf.mxu2  ;;  %v5106_v14 = vadd.f32 %v16249_v24, %v16248_v41  ;;  %vm16250_vm5 = vmmov %vm16242_vm1  ;;  %v6003_v61 = vadd.f32 %v16251_v55, %v5725_v18 }
 0x57e   : > { %v6348_v53 = vadd.f32 %v13305_v56, %v6312_v27  ;;  %9922 = vmatmul.msk.f32.gmra.mxu1 %vm16245_vm11, %v7293_v34  ;;  %vm16253_vm11 = vmmov %vm16242_vm1  ;;  %v16254_v27 = vld [vmem:[#allocation83_spill] sm:$0xff] }
 0x57f   : > { %v6859_v2 = vpop.f32.mrf.mxu3 }
 0x580   : > { %v13689_v28 = vadd.f32 %v6859_v2, %v6650_v29  ;;  %v6380_v17 = vmax.f32 %v6348_v53, 0.0  ;;  %v5416_v29 = vadd.f32 %v16254_v27, %v5106_v14  ;;  %v16255_v2 = vld [vmem:[#allocation85_spill] sm:$0xff]  ;;  %v16262_v27 = vld [vmem:[#allocation84_spill] sm:$0xff] }
 0x581   : > { %v6513_v0 = vld [vmem:[#allocation3 + $0x99] sm:$0xff]  ;;  %v16258_v14 = vld [vmem:[#allocation57_spill] sm:$0xff] }
 0x582   : > { %16246 = vst [vmem:[#allocation66_spill] sm:$0xff] %v13689_v28  ;;  %v13691_v59 = vpop.f32.mrf.mxu0  ;;  %v13693_v62 = vld [vmem:[#allocation3 + $0x98] sm:$0xff]  ;;  %9835 = vmatmul.msk.f32.gmra.mxu2 %vm16250_vm5, %v6513_v0  ;;  %vm16260_vm5 = vmmov %vm16242_vm1 }
 0x583   : > { %16247 = vst [vmem:[#allocation59_spill] sm:$0xff] %v13691_v59  ;;  %v6967_v54 = vld [vmem:[#allocation3 + $0x92] sm:$0xff]  ;;  %v6255_v40 = vpop.f32.mrf.mxu1  ;;  %v5726_v59 = vadd.f32 %v16255_v2, %v5416_v29 }
 0x584   : > { %6412 = vst.msk [vmem:[#allocation3 + $0xa1] sm:$0xff] %vm16242_vm1, %v6380_v17  ;;  %9867 = vmatmul.msk.f32.gmra.mxu3 %vm16252_vm10, %v13693_v62  ;;  %v6313_v34 = vadd.f32 %v6255_v40, %v6003_v61  ;;  %v16259_v61 = vld [vmem:[#allocation52_spill] sm:$0xff]  ;;  %vm16261_vm10 = vmmov %vm16242_vm1  ;;  %v9952_v2 = vld [vmem:[%s15064_s5 + $0x80] sm:$0xff] }
 0x585   : > { %9902 = vmatmul.msk.f32.gmra.mxu0 %vm16253_vm11, %v6967_v54  ;;  %v6653_v53 = vpop.f32.mrf.mxu2  ;;  %v5107_v40 = vadd.f32 %v16259_v61, %v16258_v14  ;;  %v6004_v29 = vadd.f32 %v16262_v27, %v5726_v59  ;;  %7717 = vmatpush.msrb.mxu2 %v9952_v2  ;;  %v7295_v14 = vsel %vm16124_vm9, %v13404_v39, 0.0  ;;  %v16267_v61 = vld [vmem:[#allocation88_spill] sm:$0xff]  ;;  %v16274_v39 = vld [vmem:[#allocation87_spill] sm:$0xff]  ;;  %16413 = vst [vmem:[#allocation57_spill] sm:$0xff] %v14128_v35 }
 0x586   : > { %v6349_v41 = vadd.f32 %v13305_v56, %v6313_v34  ;;  %9923 = vmatmul.msk.f32.gmra.mxu1 %vm16242_vm1, %v13385_v15  ;;  %v16263_v15 = vld [vmem:[#allocation56_spill] sm:$0xff]  ;;  %16426 = vst [vmem:[#allocation88_spill] sm:$0xff] %v14166_v12 }
 0x587   : > { %v6862_v24 = vpop.f32.mrf.mxu3  ;;  %vm16264_vm11 = vnez %v16263_v15 }
 0x588   : > { %v13708_v17 = vadd.f32 %v6862_v24, %v6653_v53  ;;  %v6381_v18 = vmax.f32 %v6349_v41, 0.0  ;;  %v16266_v24 = vld [vmem:[#allocation86_spill] sm:$0xff] }
 0x58a   : > { %16256 = vst [vmem:[#allocation28_spill] sm:$0xff] %v13708_v17  ;;  %v13710_v0 = vpop.f32.mrf.mxu0 }
 0x58b   : > { %16257 = vst [vmem:[#allocation38_spill] sm:$0xff] %v13710_v0  ;;  %v6514_v55 = vld [vmem:[#allocation3 + $0xa1] sm:$0xff]  ;;  %v6258_v41 = vpop.f32.mrf.mxu1 }
 0x58c   : > { %v13712_v28 = vld [vmem:[#allocation3 + $0xa0] sm:$0xff]  ;;  %6413 = vst.msk [vmem:[#allocation3 + $0xa9] sm:$0xff] %vm16260_vm5, %v6381_v18  ;;  %9836 = vmatmul.msk.f32.gmra.mxu2 %vm16261_vm10, %v6514_v55  ;;  %v5417_v18 = vadd.f32 %v16266_v24, %v5107_v40  ;;  %v6314_v55 = vadd.f32 %v6258_v41, %v6004_v29  ;;  %vm16268_vm5 = vmmov %vm16265_vm0  ;;  %v16271_v41 = vld [vmem:[#allocation34_spill] sm:$0xff] }
 0x58d   : > { %v6968_v54 = vld [vmem:[#allocation3 + $0x9a] sm:$0xff]  ;;  %v6478_v34 = vsel %vm16264_vm11, %v13712_v28, 0.0  ;;  %v6656_v59 = vpop.f32.mrf.mxu2  ;;  %vm16273_vm10 = vmmov %vm16265_vm0 }
 0x58e   : > { %v7000_v53 = vsel %vm15826_vm15, %v6968_v54, 0.0  ;;  %9868 = vmatmul.msk.f32.gmra.mxu3 %vm16242_vm1, %v6478_v34  ;;  %v5727_v54 = vadd.f32 %v16267_v61, %v5417_v18  ;;  %v6350_v27 = vadd.f32 %v13305_v56, %v6314_v55  ;;  %9924 = vmatmul.msk.f32.gmra.mxu1 %vm16268_vm5, %v7295_v14  ;;  %v16272_v24 = vld [vmem:[#allocation39_spill] sm:$0xff]  ;;  %vm16275_vm1 = vmmov %vm16265_vm0 }
 0x58f   : > { %9903 = vmatmul.msk.f32.gmra.mxu0 %vm16265_vm0, %v7000_v53  ;;  %v6865_v25 = vpop.f32.mrf.mxu3  ;;  %v5108_v17 = vadd.f32 %v16272_v24, %v16271_v41  ;;  %vm16276_vm5 = vmmov %vm16265_vm0 }
 0x590   : > { %v13736_v0 = vadd.f32 %v6865_v25, %v6656_v59  ;;  %v6382_v34 = vmax.f32 %v6350_v27, 0.0  ;;  %v6005_v18 = vadd.f32 %v16274_v39, %v5727_v54  ;;  %v16277_v25 = vld [vmem:[#allocation89_spill] sm:$0xff]  ;;  %v16278_v27 = vld [vmem:[#allocation91_spill] sm:$0xff]  ;;  %vm16287_vm15 = vmmov %vm16265_vm0 }
 0x591   : > { %v5418_v59 = vadd.f32 %v16277_v25, %v5108_v17  ;;  %v16280_v17 = vld [vmem:[#allocation48_spill] sm:$0xff]  ;;  %v16284_v25 = vld [vmem:[#allocation90_spill] sm:$0xff] }
 0x592   : > { %16269 = vst [vmem:[#allocation64_spill] sm:$0xff] %v13736_v0  ;;  %v13738_v53 = vpop.f32.mrf.mxu0 }
 0x593   : > { %16270 = vst [vmem:[#allocation68_spill] sm:$0xff] %v13738_v53  ;;  %v6515_v40 = vld [vmem:[#allocation3 + $0xa9] sm:$0xff]  ;;  %v6261_v55 = vpop.f32.mrf.mxu1  ;;  %v5728_v53 = vadd.f32 %v16278_v27, %v5418_v59 }
 0x594   : > { %v13740_v29 = vld [vmem:[#allocation3 + $0xa8] sm:$0xff]  ;;  %6414 = vst.msk [vmem:[#allocation3 + $0xb1] sm:$0xff] %vm16265_vm0, %v6382_v34  ;;  %9837 = vmatmul.msk.f32.gmra.mxu2 %vm16273_vm10, %v6515_v40  ;;  %v6315_v14 = vadd.f32 %v6261_v55, %v6005_v18  ;;  %v16281_v18 = vld [vmem:[#allocation54_spill] sm:$0xff]  ;;  %vm16282_vm10 = vmmov %vm16265_vm0 }
 0x595   : > { %v6969_v2 = vld [vmem:[#allocation3 + $0xa2] sm:$0xff]  ;;  %v6659_v61 = vpop.f32.mrf.mxu2  ;;  %v5109_v55 = vadd.f32 %v16281_v18, %v16280_v17  ;;  %v6006_v59 = vadd.f32 %v16284_v25, %v5728_v53  ;;  %v7297_v53 = vsel %vm16136_vm12, %v13440_v47, 0.0 }
 0x596   : > { %9869 = vmatmul.msk.f32.gmra.mxu3 %vm16275_vm1, %v13740_v29  ;;  %v6351_v41 = vadd.f32 %v13305_v56, %v6315_v14  ;;  %9925 = vmatmul.msk.f32.gmra.mxu1 %vm16265_vm0, %v13424_v13  ;;  %vm16283_vm1 = vmmov %vm16265_vm0  ;;  %v16285_v13 = vld [vmem:[#allocation67_spill] sm:$0xff] }
 0x597   : > { %9904 = vmatmul.msk.f32.gmra.mxu0 %vm16276_vm5, %v6969_v2  ;;  %v6868_v24 = vpop.f32.mrf.mxu3  ;;  %vm16286_vm5 = vnez %v16285_v13 }
 0x598   : > { %v13755_v34 = vadd.f32 %v6868_v24, %v6659_v61  ;;  %v6383_v54 = vmax.f32 %v6351_v41, 0.0  ;;  %v16288_v41 = vld [vmem:[#allocation92_spill] sm:$0xff] }
 0x599   : > { %v5419_v24 = vadd.f32 %v16288_v41, %v5109_v55  ;;  %v16293_v41 = vld [vmem:[#allocation7_spill] sm:$0xff]  ;;  %v16524_v22 = vld [vmem:[#allocation64_spill] sm:$0xff] }
 0x59a   : > { %v13757_v40 = vpop.f32.mrf.mxu0  ;;  %6415 = vst.msk [vmem:[#allocation3 + $0xb9] sm:$0xff] %vm16282_vm10, %v6383_v54  ;;  %vm16289_vm10 = vmmov %vm16265_vm0 }
 0x59b   : > { %16279 = vst [vmem:[#allocation75_spill] sm:$0xff] %v13757_v40  ;;  %v6516_v39 = vld [vmem:[#allocation3 + $0xb1] sm:$0xff]  ;;  %v6264_v27 = vpop.f32.mrf.mxu1 }
 0x59c   : > { %v13759_v0 = vld [vmem:[#allocation3 + $0xb0] sm:$0xff]  ;;  %9838 = vmatmul.msk.f32.gmra.mxu2 %vm16283_vm1, %v6516_v39  ;;  %v6316_v17 = vadd.f32 %v6264_v27, %v6006_v59  ;;  %v5729_v39 = vadd.f32 %v13396_v9, %v5419_v24  ;;  %v16292_v27 = vld [vmem:[#allocation36_spill] sm:$0xff]  ;;  %vm16295_vm1 = vmmov %vm16265_vm0 }
 0x59d   : > { %v6970_v2 = vld [vmem:[#allocation3 + $0xaa] sm:$0xff]  ;;  %v6480_v14 = vsel %vm16286_vm5, %v13759_v0, 0.0  ;;  %v6662_v54 = vpop.f32.mrf.mxu2  ;;  %v5110_v40 = vadd.f32 %v16293_v41, %v16292_v27 }
 0x59e   : > { %v7002_v61 = vsel %vm15836_vm6, %v6970_v2, 0.0  ;;  %9870 = vmatmul.msk.f32.gmra.mxu3 %vm16265_vm0, %v6480_v14  ;;  %v6352_v18 = vadd.f32 %v13305_v56, %v6316_v17  ;;  %9926 = vmatmul.msk.f32.gmra.mxu1 %vm16289_vm10, %v7297_v53  ;;  %v6007_v9 = vadd.f32 %v13402_v20, %v5729_v39  ;;  %vm16296_vm10 = vmmov %vm16265_vm0  ;;  %v16297_v24 = vld [vmem:[#allocation93_spill] sm:$0xff] }
 0x59f   : > { %9905 = vmatmul.msk.f32.gmra.mxu0 %vm16287_vm15, %v7002_v61  ;;  %v6871_v25 = vpop.f32.mrf.mxu3  ;;  %vm16294_vm15 = vmmov %vm16265_vm0  ;;  %v5420_v17 = vadd.f32 %v16297_v24, %v5110_v40  ;;  %v16304_v24 = vld [vmem:[#allocation13_spill] sm:$0xff] }
 0x5a0   : > { %v13780_v2 = vadd.f32 %v6871_v25, %v6662_v54  ;;  %v6384_v14 = vmax.f32 %v6352_v18, 0.0  ;;  %v16298_v18 = vld [vmem:[#allocation94_spill] sm:$0xff]  ;;  %vm16307_vm6 = vmmov %vm16265_vm0 }
 0x5a1   : > { %v6517_v61 = vld [vmem:[#allocation3 + $0xb9] sm:$0xff]  ;;  %v5730_v25 = vadd.f32 %v16298_v18, %v5420_v17 }
 0x5a2   : > { %16290 = vst [vmem:[#allocation21_spill] sm:$0xff] %v13780_v2  ;;  %v13782_v49 = vpop.f32.mrf.mxu0  ;;  %v13784_v55 = vld [vmem:[#allocation3 + $0xb8] sm:$0xff]  ;;  %v16301_v2 = vld [vmem:[#allocation9_spill] sm:$0xff] }
 0x5a3   : > { %16291 = vst [vmem:[#allocation41_spill] sm:$0xff] %v13782_v49  ;;  %v6971_v59 = vld [vmem:[#allocation3 + $0xb2] sm:$0xff]  ;;  %v6267_v47 = vpop.f32.mrf.mxu1 }
 0x5a4   : > { %6416 = vst.msk [vmem:[#allocation3 + $0xc1] sm:$0xff] %vm16294_vm15, %v6384_v14  ;;  %9839 = vmatmul.msk.f32.gmra.mxu2 %vm16295_vm1, %v6517_v61  ;;  %v6317_v54 = vadd.f32 %v6267_v47, %v6007_v9  ;;  %vm16299_vm15 = vmmov %vm16265_vm0  ;;  %v16303_v9 = vld [vmem:[#allocation95_spill] sm:$0xff] }
 0x5a5   : > { %v6665_v53 = vpop.f32.mrf.mxu2  ;;  %vm16302_vm1 = vmmov %vm16265_vm0  ;;  %v6008_v47 = vadd.f32 %v16303_v9, %v5730_v25  ;;  %v16308_v25 = vld [vmem:[#allocation14_spill] sm:$0xff] }
 0x5a6   : > { %9871 = vmatmul.msk.f32.gmra.mxu3 %vm16265_vm0, %v13784_v55  ;;  %v6353_v27 = vadd.f32 %v13305_v56, %v6317_v54  ;;  %9927 = vmatmul.msk.f32.gmra.mxu1 %vm16299_vm15, %v13460_v38  ;;  %vm16306_vm15 = vmmov %vm16265_vm0 }
 0x5a7   : > { %9906 = vmatmul.msk.f32.gmra.mxu0 %vm16296_vm10, %v6971_v59  ;;  %v6874_v41 = vpop.f32.mrf.mxu3  ;;  %v16300_v59 = vld [vmem:[#allocation49_spill] sm:$0xff]  ;;  %vm16305_vm10 = vnez %v16304_v24 }
 0x5a8   : > { %v13799_v14 = vadd.f32 %v6874_v41, %v6665_v53  ;;  %v6385_v20 = vmax.f32 %v6353_v27, 0.0  ;;  %v5111_v40 = vadd.f32 %v16301_v2, %v16300_v59  ;;  %v7299_v41 = vsel %vm16149_vm3, %v13483_v21, 0.0  ;;  %v16315_v21 = vld [vmem:[#allocation97_spill] sm:$0xff]  ;;  %vm16327_vm3 = vmmov %vm16265_vm0 }
 0x5a9   : > { %v16538_v15 = vld [vmem:[#allocation21_spill] sm:$0xff] }
 0x5aa   : > { %6417 = vst.msk [vmem:[#allocation3 + $0xc9] sm:$0xff] %vm16302_vm1, %v6385_v20  ;;  %v13813_v54 = vpop.f32.mrf.mxu0  ;;  %v5421_v2 = vadd.f32 %v13434_v7, %v5111_v40  ;;  %v16309_v20 = vld [vmem:[#allocation96_spill] sm:$0xff]  ;;  %vm16310_vm1 = vmmov %vm16265_vm0  ;;  %v16312_v40 = vld [vmem:[#allocation29_spill] sm:$0xff] }
 0x5ab   : > { %v6518_v39 = vld [vmem:[#allocation3 + $0xc1] sm:$0xff]  ;;  %v6270_v53 = vpop.f32.mrf.mxu1 }
 0x5ac   : > { %v13801_v61 = vld [vmem:[#allocation3 + $0xc0] sm:$0xff]  ;;  %9840 = vmatmul.msk.f32.gmra.mxu2 %vm16265_vm0, %v6518_v39  ;;  %v6318_v18 = vadd.f32 %v6270_v53, %v6008_v47  ;;  %v5731_v39 = vadd.f32 %v16309_v20, %v5421_v2 }
 0x5ad   : > { %v6972_v49 = vld [vmem:[#allocation3 + $0xba] sm:$0xff]  ;;  %v6482_v38 = vsel %vm16305_vm10, %v13801_v61, 0.0  ;;  %v6668_v27 = vpop.f32.mrf.mxu2 }
 0x5ae   : > { %v7004_v17 = vsel %vm15846_vm14, %v6972_v49, 0.0  ;;  %9872 = vmatmul.msk.f32.gmra.mxu3 %vm16306_vm15, %v6482_v38  ;;  %v6354_v59 = vadd.f32 %v13305_v56, %v6318_v18  ;;  %9928 = vmatmul.msk.f32.gmra.mxu1 %vm16310_vm1, %v7299_v41  ;;  %v16313_v47 = vld [vmem:[#allocation11_spill] sm:$0xff]  ;;  %v6009_v2 = vadd.f32 %v16315_v21, %v5731_v39  ;;  %vm16316_vm15 = vmmov %vm16265_vm0 }
 0x5af   : > { %9907 = vmatmul.msk.f32.gmra.mxu0 %vm16307_vm6, %v7004_v17  ;;  %v6877_v49 = vpop.f32.mrf.mxu3  ;;  %v5112_v53 = vadd.f32 %v16313_v47, %v16312_v40  ;;  %vm16314_vm6 = vmmov %vm16265_vm0 }
 0x5b0   : > { %v13824_v9 = vadd.f32 %v6877_v49, %v6668_v27  ;;  %v6386_v38 = vmax.f32 %v6354_v59, 0.0  ;;  %vm16317_vm1 = vmmov %vm16265_vm0  ;;  %v16318_v49 = vld [vmem:[#allocation98_spill] sm:$0xff] }
 0x5b1   : > { %v6519_v5 = vld [vmem:[#allocation3 + $0xc9] sm:$0xff]  ;;  %v5422_v27 = vadd.f32 %v13458_v57, %v5112_v53  ;;  %v16320_v57 = vld [vmem:[#allocation30_spill] sm:$0xff]  ;;  %v16321_v53 = vld [vmem:[#allocation47_spill] sm:$0xff] }
 0x5b2   : > { %16311 = vst [vmem:[#allocation58_spill] sm:$0xff] %v13824_v9  ;;  %v13826_v17 = vld [vmem:[#allocation3 + $0xc8] sm:$0xff]  ;;  %v13837_v20 = vpop.f32.mrf.mxu0  ;;  %vm16326_vm14 = vmmov %vm16265_vm0 }
 0x5b3   : > { %v6973_v7 = vld [vmem:[#allocation3 + $0xc2] sm:$0xff]  ;;  %6418 = vst.msk [vmem:[#allocation3 + $0xd1] sm:$0xff] %vm16314_vm6, %v6386_v38  ;;  %v6273_v18 = vpop.f32.mrf.mxu1  ;;  %v5732_v40 = vadd.f32 %v16318_v49, %v5422_v27  ;;  %vm16319_vm6 = vmmov %vm16265_vm0 }
 0x5b4   : > { %9841 = vmatmul.msk.f32.gmra.mxu2 %vm16265_vm0, %v6519_v5  ;;  %v6319_v41 = vadd.f32 %v6273_v18, %v6009_v2  ;;  %v5113_v2 = vadd.f32 %v16321_v53, %v16320_v57  ;;  %v16323_v18 = vld [vmem:[#allocation16_spill] sm:$0xff] }
 0x5b5   : > { %v6671_v59 = vpop.f32.mrf.mxu2 }
 0x5b6   : > { %9873 = vmatmul.msk.f32.gmra.mxu3 %vm16316_vm15, %v13826_v17  ;;  %v6355_v38 = vadd.f32 %v13305_v56, %v6319_v41  ;;  %9929 = vmatmul.msk.f32.gmra.mxu1 %vm16319_vm6, %v13503_v19  ;;  %vm16322_vm15 = vmmov %vm16265_vm0  ;;  %v6010_v56 = vadd.f32 %v13472_v10, %v5732_v40  ;;  %vm16325_vm6 = vnez %v15856_v23 }
 0x5b7   : > { %9908 = vmatmul.msk.f32.gmra.mxu0 %vm16317_vm1, %v6973_v7  ;;  %v6880_v47 = vpop.f32.mrf.mxu3  ;;  %vm16324_vm1 = vnez %v16323_v18 }
 0x5b8   : > { %v13843_v5 = vadd.f32 %v6880_v47, %v6671_v59  ;;  %v6387_v39 = vmax.f32 %v6355_v38, 0.0  ;;  %v5423_v59 = vadd.f32 %v13481_v37, %v5113_v2  ;;  %v13867_v47 = vld [vmem:[%s15063_s4] ss:$0 sm:$0xff] }
 0x5ba   : > { %v6520_v21 = vld [vmem:[#allocation3 + $0xd1] sm:$0xff]  ;;  %6419 = vst.msk [vmem:[#allocation3 + $0xd9] sm:$0xff] %vm16265_vm0, %v6387_v39  ;;  %vm16328_vm0 = vnez %v15958_v46  ;;  %v5733_v40 = vadd.f32 %v13479_v11, %v5423_v59  ;;  %v16330_v11 = vld [vmem:[#allocation32_spill] sm:$0xff] }
 0x5bb   : > { %v13845_v9 = vld [vmem:[#allocation3 + $0xd0] sm:$0xff]  ;;  %v6276_v41 = vpop.f32.mrf.mxu1  ;;  %v7301_v10 = vsel %vm16328_vm0, %v13525_v6, 0.0 }
 0x5bc   : > { %v6974_v7 = vld [vmem:[#allocation3 + $0xca] sm:$0xff]  ;;  %9842 = vmatmul.msk.f32.gmra.mxu2 %vm16322_vm15, %v6520_v21  ;;  %v6484_v19 = vsel %vm16324_vm1, %v13845_v9, 0.0  ;;  %v6320_v49 = vadd.f32 %v6276_v41, %v6010_v56  ;;  %v16331_v56 = vld [vmem:[#allocation20_spill] sm:$0xff]  ;;  %vm16332_vm15 = vmmov %vm16327_vm3 }
 0x5bd   : > { %v7006_v27 = vsel %vm16325_vm6, %v6974_v7, 0.0  ;;  %v6674_v38 = vpop.f32.mrf.mxu2  ;;  %v13871_v7 = vpop.f32.mrf.mxu0  ;;  %vm16334_vm6 = vmmov %vm16327_vm3  ;;  %v14504_v13 = vld [vmem:[#allocation3 + $0xd1] sm:$0xff] }
 0x5be   : > { %9874 = vmatmul.msk.f32.gmra.mxu3 %vm16326_vm14, %v6484_v19  ;;  %v6356_v39 = vadd.f32 %v13867_v47, %v6320_v49  ;;  %vm16329_vm14 = vmmov %vm16327_vm3  ;;  %v5114_v19 = vadd.f32 %v16331_v56, %v16330_v11  ;;  %v16336_v56 = vld [vmem:[#allocation74_spill] sm:$0xff] }
 0x5bf   : > { %9909 = vmatmul.msk.f32.gmra.mxu0 %vm16327_vm3, %v7006_v27  ;;  %v6883_v21 = vpop.f32.mrf.mxu3  ;;  %9930 = vmatmul.msk.f32.gmra.mxu1 %vm16329_vm14, %v7301_v10  ;;  %v6011_v27 = vadd.f32 %v13501_v1, %v5733_v40  ;;  %vm16333_vm14 = vmmov %vm16327_vm3  ;;  %v9991_v1 = vld [vmem:[%s15064_s5 + $0xb8] sm:$0xff] }
 0x5c0   : > { %v13873_v37 = vadd.f32 %v6883_v21, %v6674_v38  ;;  %v6388_v57 = vmax.f32 %v6356_v39, 0.0  ;;  %v5424_v59 = vadd.f32 %v13512_v63, %v5114_v19  ;;  %8024 = vmatpush.msra.mxu3 %v9991_v1  ;;  %v9990_v63 = vld [vmem:[%s15064_s5 + $0xb0] sm:$0xff] }
 0x5c1   : > { %v6521_v53 = vld [vmem:[#allocation3 + $0xd9] sm:$0xff] }
 0x5c2   : > { %v13875_v2 = vld [vmem:[#allocation3 + $0xd8] sm:$0xff]  ;;  %6420 = vst.msk [vmem:[#allocation3 + $0xe1] sm:$0xff] %vm16327_vm3, %v6388_v57  ;;  %v5734_v10 = vadd.f32 %v13510_v44, %v5424_v59  ;;  %8025 = vmatpush.msra.mxu3 %v9990_v63 }
 0x5c3   : > { %v6975_v6 = vld [vmem:[#allocation3 + $0xd2] sm:$0xff]  ;;  %v6279_v41 = vpop.f32.mrf.mxu1 }
 0x5c4   : > { %9843 = vmatmul.msk.f32.gmra.mxu2 %vm16332_vm15, %v6521_v53  ;;  %v6321_v49 = vadd.f32 %v6279_v41, %v6011_v27  ;;  %vm16338_vm15 = vmmov %vm16327_vm3  ;;  %v6012_v27 = vadd.f32 %v13523_v52, %v5734_v10  ;;  %v16339_v41 = vld [vmem:[#allocation19_spill] sm:$0xff] }
 0x5c5   : > { %v6677_v38 = vpop.f32.mrf.mxu2  ;;  %v13898_v53 = vpop.f32.mrf.mxu0  ;;  %v9988_v52 = vld [vmem:[%s15064_s5 + $0xa0] sm:$0xff] }
 0x5c6   : > { %9875 = vmatmul.msk.f32.gmra.mxu3 %vm16333_vm14, %v13875_v2  ;;  %v6357_v39 = vadd.f32 %v13867_v47, %v6321_v49  ;;  %vm16340_vm14 = vnez %v16339_v41  ;;  %v7237_v24 = vadd.f32 %v13898_v53, %v13873_v37 }
 0x5c7   : > { %9910 = vmatmul.msk.f32.gmra.mxu0 %vm16334_vm6, %v6975_v6  ;;  %v6886_v21 = vpop.f32.mrf.mxu3  ;;  %9931 = vmatmul.msk.f32.gmra.mxu1 %vm16327_vm3, %v13556_v3  ;;  %v16335_v3 = vld [vmem:[#allocation33_spill] sm:$0xff]  ;;  %vm16337_vm6 = vmmov %vm16327_vm3  ;;  %vm16341_vm3 = vnez %v15977_v4 }
 0x5c8   : > { %v13893_v40 = vadd.f32 %v6886_v21, %v6677_v38  ;;  %v6389_v57 = vmax.f32 %v6357_v39, 0.0  ;;  %v5115_v19 = vadd.f32 %v16336_v56, %v16335_v3  ;;  %v9989_v38 = vld [vmem:[%s15064_s5 + $0xa8] sm:$0xff]  ;;  %v10099_v39 = vld [vmem:[%s15064_s5 + $0x118] sm:$0xff] }
 0x5c9   : > { %v6522_v44 = vld [vmem:[#allocation3 + $0xe1] sm:$0xff]  ;;  %8026 = vmatpush.msra.mxu3 %v9989_v38  ;;  %8922 = vmatpush.msra.mxu2 %v10099_v39  ;;  %v16344_v39 = vld [vmem:[#allocation73_spill] sm:$0xff] }
 0x5ca   : > { %v13900_v6 = vld [vmem:[#allocation3 + $0xe0] sm:$0xff]  ;;  %6421 = vst.msk [vmem:[#allocation3 + $0xe9] sm:$0xff] %vm16337_vm6, %v6389_v57  ;;  %v5425_v10 = vadd.f32 %v13545_v8, %v5115_v19  ;;  %v10027_v57 = vld [vmem:[%s15064_s5 + $0xd8] sm:$0xff]  ;;  %v10026_v19 = vld [vmem:[%s15064_s5 + $0xd0] sm:$0xff] }
 0x5cb   : > { %v6976_v11 = vld [vmem:[#allocation3 + $0xda] sm:$0xff]  ;;  %v6486_v59 = vsel %vm16340_vm14, %v13900_v6, 0.0  ;;  %v6282_v21 = vpop.f32.mrf.mxu1  ;;  %8334 = vmatpush.msra.mxu0 %v10027_v57  ;;  %8027 = vmatpush.msra.mxu3 %v9988_v52 }
 0x5cc   : > { %9844 = vmatmul.msk.f32.gmra.mxu2 %vm16338_vm15, %v6522_v44  ;;  %v7008_v49 = vsel %vm16341_vm3, %v6976_v11, 0.0  ;;  %vm16342_vm15 = vmmov %vm16337_vm6  ;;  %v6322_v1 = vadd.f32 %v6282_v21, %v6012_v27  ;;  %v7303_v44 = vsel %vm16175_vm7, %v13578_v33, 0.0  ;;  %v5735_v11 = vadd.f32 %v13543_v43, %v5425_v10  ;;  %v10063_v27 = vld [vmem:[%s15064_s5 + $0xf8] sm:$0xff]  ;;  %v16343_v38 = vld [vmem:[#allocation44_spill] sm:$0xff] }
 0x5cd   : > { %v6680_v63 = vpop.f32.mrf.mxu2  ;;  %8335 = vmatpush.msra.mxu0 %v10026_v19  ;;  %8612 = vmatpush.msra.mxu1 %v10063_v27  ;;  %v5116_v21 = vadd.f32 %v16344_v39, %v16343_v38  ;;  %v10025_v10 = vld [vmem:[%s15064_s5 + $0xc8] sm:$0xff]  ;;  %vm16346_vm3 = vmmov %vm16337_vm6  ;;  %v16350_v39 = vld [vmem:[#allocation78_spill] sm:$0xff] }
 0x5ce   : > { %9876 = vmatmul.msk.f32.gmra.mxu3 %vm16337_vm6, %v6486_v59  ;;  %v6358_v3 = vadd.f32 %v13867_v47, %v6322_v1  ;;  %v6013_v52 = vadd.f32 %v13561_v48, %v5735_v11  ;;  %v13951_v1 = vpop.f32.mrf.mxu0  ;;  %vm16347_vm7 = vmmov %vm16346_vm3 }
 0x5cf   : > { %9911 = vmatmul.msk.f32.gmra.mxu0 %vm16342_vm15, %v7008_v49  ;;  %v6889_v56 = vpop.f32.mrf.mxu3  ;;  %9932 = vmatmul.msk.f32.gmra.mxu1 %vm16337_vm6, %v7303_v44  ;;  %vm16345_vm15 = vmmov %vm16337_vm6  ;;  %v5426_v44 = vadd.f32 %v13576_v51, %v5116_v21  ;;  %v16349_v51 = vld [vmem:[#allocation46_spill] sm:$0xff] }
 0x5d0   : > { %v13933_v8 = vadd.f32 %v6889_v56, %v6680_v63  ;;  %v6390_v33 = vmax.f32 %v6358_v3, 0.0  ;;  %v10024_v63 = vld [vmem:[%s15064_s5 + $0xc0] sm:$0xff]  ;;  %8336 = vmatpush.msra.mxu0 %v10025_v10  ;;  %v5117_v21 = vadd.f32 %v16350_v39, %v16349_v51  ;;  %v16354_v10 = vld [vmem:[#allocation61_spill] sm:$0xff]  ;;  %vm16356_vm14 = vmmov %vm16346_vm3 }
 0x5d1   : > { %v6523_v43 = vld [vmem:[#allocation3 + $0xe9] sm:$0xff]  ;;  %v5736_v11 = vadd.f32 %v13574_v32, %v5426_v44  ;;  %v16352_v32 = vld [vmem:[#allocation26_spill] sm:$0xff]  ;;  %vm16357_vm0 = vmmov %vm16346_vm3 }
 0x5d2   : > { %v13941_v59 = vld [vmem:[#allocation3 + $0xe8] sm:$0xff]  ;;  %6422 = vst.msk [vmem:[#allocation3 + $0xf1] sm:$0xff] %vm16345_vm15, %v6390_v33  ;;  %vm16348_vm15 = vmmov %vm16346_vm3  ;;  %8337 = vmatpush.msra.mxu0 %v10024_v63  ;;  %v16358_v44 = vld [vmem:[#allocation63_spill] sm:$0xff] }
 0x5d3   : > { %v6977_v49 = vld [vmem:[#allocation3 + $0xe2] sm:$0xff]  ;;  %v6285_v57 = vpop.f32.mrf.mxu1 }
 0x5d4   : > { %9845 = vmatmul.msk.f32.gmra.mxu2 %vm16337_vm6, %v6523_v43  ;;  %v6323_v3 = vadd.f32 %v6285_v57, %v6013_v52  ;;  %v6014_v52 = vadd.f32 %v13590_v31, %v5736_v11  ;;  %vm16353_vm6 = vnez %v16352_v32 }
 0x5d5   : > { %v6683_v48 = vpop.f32.mrf.mxu2 }
 0x5d6   : > { %9877 = vmatmul.msk.f32.gmra.mxu3 %vm16346_vm3, %v13941_v59  ;;  %v6359_v56 = vadd.f32 %v13867_v47, %v6323_v3  ;;  %v5427_v3 = vadd.f32 %v16358_v44, %v5117_v21  ;;  %v13981_v31 = vpop.f32.mrf.mxu0 }
 0x5d7   : > { %9912 = vmatmul.msk.f32.gmra.mxu0 %vm16347_vm7, %v6977_v49  ;;  %v6892_v19 = vpop.f32.mrf.mxu3  ;;  %9933 = vmatmul.msk.f32.gmra.mxu1 %vm16348_vm15, %v13602_v36  ;;  %vm16351_vm7 = vmmov %vm16346_vm3  ;;  %vm16355_vm15 = vnez %v16354_v10  ;;  %v7239_v18 = vadd.f32 %v13981_v31, %v13933_v8 }
 0x5d8   : > { %v13964_v27 = vadd.f32 %v6892_v19, %v6683_v48  ;;  %v6391_v33 = vmax.f32 %v6359_v56, 0.0  ;;  %v7305_v19 = vsel %vm16190_vm4, %v13620_v50, 0.0  ;;  %v14331_v56 = vld [vmem:[#allocation3 + $0x91] sm:$0xff] }
 0x5d9   : > { %v6524_v43 = vld [vmem:[#allocation3 + $0xf1] sm:$0xff]  ;;  %16491 = vst [vmem:[#allocation16_spill] sm:$0xff] %v14331_v56 }
 0x5da   : > { %v13966_v49 = vld [vmem:[#allocation3 + $0xf0] sm:$0xff]  ;;  %6423 = vst.msk [vmem:[#allocation3 + $0xf9] sm:$0xff] %vm16351_vm7, %v6391_v33  ;;  %vm16361_vm7 = vmmov %vm16357_vm0 }
 0x5db   : > { %v6978_v38 = vld [vmem:[#allocation3 + $0xea] sm:$0xff]  ;;  %v6488_v36 = vsel %vm16353_vm6, %v13966_v49, 0.0  ;;  %v6288_v63 = vpop.f32.mrf.mxu1 }
 0x5dc   : > { %9846 = vmatmul.msk.f32.gmra.mxu2 %vm16346_vm3, %v6524_v43  ;;  %v7010_v57 = vsel %vm16355_vm15, %v6978_v38, 0.0  ;;  %v6324_v48 = vadd.f32 %v6288_v63, %v6014_v52  ;;  %v16360_v33 = vld [vmem:[#allocation53_spill] sm:$0xff]  ;;  %vm16364_vm3 = vmmov %vm16357_vm0 }
 0x5dd   : > { %v6686_v11 = vpop.f32.mrf.mxu2  ;;  %v5737_v43 = vadd.f32 %v16360_v33, %v5427_v3  ;;  %vm16365_vm15 = vmmov %vm16357_vm0  ;;  %v14564_v37 = vld [vmem:[#allocation3 + $0xea] sm:$0xff] }
 0x5de   : > { %9878 = vmatmul.msk.f32.gmra.mxu3 %vm16356_vm14, %v6488_v36  ;;  %v6360_v51 = vadd.f32 %v13867_v47, %v6324_v48  ;;  %vm16363_vm14 = vmmov %vm16357_vm0  ;;  %v8183_v53 = vld [vmem:[#allocation3 + $0xf0] sm:$0xff] }
 0x5df   : > { %9913 = vmatmul.msk.f32.gmra.mxu0 %vm16357_vm0, %v7010_v57  ;;  %v6895_v38 = vpop.f32.mrf.mxu3  ;;  %9934 = vmatmul.msk.f32.gmra.mxu1 %vm16361_vm7, %v7305_v19  ;;  %v6015_v63 = vadd.f32 %v13615_v30, %v5737_v43  ;;  %vm16366_vm7 = vmmov %vm16357_vm0  ;;  %v14002_v19 = vpop.f32.mrf.mxu0  ;;  %v7569_v43 = vld [vmem:[#allocation3 + $0x11] sm:$0xff] }
 0x5e0   : > { %v13989_v39 = vadd.f32 %v6895_v38, %v6686_v11  ;;  %v6392_v36 = vmax.f32 %v6360_v51, 0.0  ;;  %v16369_v38 = vld [vmem:[#allocation71_spill] sm:$0xff] }
 0x5e1   : > { %v6525_v57 = vld [vmem:[#allocation3 + $0xf9] sm:$0xff] }
 0x5e2   : > { %16362 = vst [vmem:[#allocation60_spill] sm:$0xff] %v13989_v39  ;;  %v13991_v21 = vld [vmem:[#allocation3 + $0xf8] sm:$0xff] }
 0x5e3   : > { %v6979_v52 = vld [vmem:[#allocation3 + $0xf2] sm:$0xff]  ;;  %6424 = vst.msk [vmem:[#allocation3 + $0x101] sm:$0xff] %vm16357_vm0, %v6392_v36  ;;  %v6291_v50 = vpop.f32.mrf.mxu1 }
 0x5e4   : > { %9847 = vmatmul.msk.f32.gmra.mxu2 %vm16363_vm14, %v6525_v57  ;;  %v6325_v44 = vadd.f32 %v6291_v50, %v6015_v63  ;;  %vm16368_vm14 = vmmov %vm16357_vm0  ;;  %v7847_v36 = vld [vmem:[#allocation3 + $0x12] sm:$0xff]  ;;  %v7307_v63 = vsel %vm16215_vm13, %v13668_v58, 0.0 }
 0x5e5   : > { %v6689_v3 = vpop.f32.mrf.mxu2  ;;  %vm16381_vm13 = vmmov %vm16357_vm0  ;;  %v14608_v31 = vld [vmem:[#allocation3 + $0xf9] sm:$0xff] }
 0x5e6   : > { %9879 = vmatmul.msk.f32.gmra.mxu3 %vm16364_vm3, %v13991_v21  ;;  %v6361_v48 = vadd.f32 %v13867_v47, %v6325_v44  ;;  %vm16371_vm3 = vmmov %vm16357_vm0 }
 0x5e7   : > { %9914 = vmatmul.msk.f32.gmra.mxu0 %vm16365_vm15, %v6979_v52  ;;  %v6898_v11 = vpop.f32.mrf.mxu3  ;;  %9935 = vmatmul.msk.f32.gmra.mxu1 %vm16366_vm7, %v13647_v45  ;;  %vm16370_vm15 = vnez %v16369_v38  ;;  %vm16372_vm7 = vmmov %vm16357_vm0  ;;  %v16373_v52 = vld [vmem:[#allocation35_spill] sm:$0xff] }
 0x5e8   : > { %v14004_v30 = vadd.f32 %v6898_v11, %v6689_v3  ;;  %v6393_v33 = vmax.f32 %v6361_v48, 0.0  ;;  %v7848_v3 = vld [vmem:[#allocation3 + $0x1a] sm:$0xff]  ;;  %v14023_v11 = vpop.f32.mrf.mxu0 }
 0x5e9   : > { %v8157_v48 = vld [vmem:[#allocation3 + $0x20] sm:$0xff]  ;;  %16375 = vst [vmem:[#allocation22_spill] sm:$0xff] %v14023_v11 }
 0x5ea   : > { %16367 = vst [vmem:[#allocation5_spill] sm:$0xff] %v14004_v30  ;;  %v14006_v51 = vld [vmem:[#allocation3 + $0xfa] sm:$0xff] }
 0x5eb   : > { %6425 = vst.msk [vmem:[#allocation3 + $0x109] sm:$0xff] %vm16357_vm0, %v6393_v33  ;;  %v7012_v47 = vsel %vm16370_vm15, %v14006_v51, 0.0  ;;  %v14014_v45 = vpop.f32.mrf.mxu1  ;;  %v7570_v33 = vld [vmem:[#allocation3 + $0x19] sm:$0xff]  ;;  %vm16380_vm15 = vmmov %vm16357_vm0  ;;  %v14200_v11 = vld [vmem:[#allocation3 + $0x61] sm:$0xff] }
 0x5ec   : > { %9956 = vmatmul.msk.f32.vlgmr.msrb.gmra.mxu2 %vm16368_vm14, %v7569_v43  ;;  %vm16376_vm14 = vmmov %vm16357_vm0  ;;  %v16377_v43 = vld [vmem:[#allocation6_spill] sm:$0xff] }
 0x5ed   : > { %v6692_v57 = vpop.f32.mrf.mxu2 }
 0x5ee   : > { %9992 = vmatmul.msk.f32.vlgmr.msra.gmra.mxu3 %vm16372_vm7, %v7847_v36  ;;  %vm16379_vm7 = vnez %v16221_v16  ;;  %v14042_v16 = vld [vmem:[#allocation3 + $0x22] sm:$0xff] }
 0x5ef   : > { %9915 = vmatmul.msk.f32.gmra.mxu0 %vm16371_vm3, %v7012_v47  ;;  %v6901_v50 = vpop.f32.mrf.mxu3  ;;  %9936 = vmatmul.msk.f32.gmra.mxu1 %vm16357_vm0, %v7307_v63  ;;  %vm16378_vm3 = vnez %v16377_v43  ;;  %v8189_v36 = vsel %vm16379_vm7, %v8157_v48, 0.0  ;;  %16384 = vst [vmem:[#allocation76_spill] sm:$0xff] %v14042_v16  ;;  %vm16387_vm7 = vmmov %vm16357_vm0  ;;  %v14059_v43 = vld [vmem:[#allocation3 + $0x29] sm:$0xff] }
 0x5f0   : > { %v14021_v44 = vadd.f32 %v6901_v50, %v6692_v57  ;;  %v7880_v47 = vsel %vm16378_vm3, %v7848_v3, 0.0  ;;  %v14038_v50 = vld [vmem:[#allocation3 + $0x21] sm:$0xff]  ;;  %v14044_v48 = vpop.f32.mrf.mxu0 }
 0x5f1   : > { %v8158_v3 = vld [vmem:[#allocation3 + $0x28] sm:$0xff]  ;;  %16385 = vst [vmem:[#allocation77_spill] sm:$0xff] %v14044_v48  ;;  %v8161_v48 = vld [vmem:[#allocation3 + $0x40] sm:$0xff] }
 0x5f2   : > { %16374 = vst [vmem:[#allocation79_spill] sm:$0xff] %v14021_v44 }
 0x5f3   : > { %v14030_v38 = vpop.f32.mrf.mxu1 }
 0x5f4   : > { %9957 = vmatmul.msk.f32.gmra.mxu2 %vm16376_vm14, %v7570_v33  ;;  %vm16383_vm14 = vmmov %vm16357_vm0 }
 0x5f5   : > { %v6695_v58 = vpop.f32.mrf.mxu2 }
 0x5f6   : > { %9993 = vmatmul.msk.f32.gmra.mxu3 %vm16380_vm15, %v7880_v47  ;;  %vm16386_vm15 = vmmov %vm16357_vm0  ;;  %v7309_v47 = vsel %vm16240_vm8, %v13712_v28, 0.0 }
 0x5f7   : > { %10028 = vmatmul.msk.f32.vlgmr.msra.gmra.mxu0 %vm16357_vm0, %v8189_v36  ;;  %v6904_v57 = vpop.f32.mrf.mxu3  ;;  %9937 = vmatmul.msk.f32.gmra.mxu1 %vm16381_vm13, %v13693_v62  ;;  %vm16388_vm13 = vmmov %vm16357_vm0 }
 0x5f8   : > { %v14036_v63 = vadd.f32 %v6904_v57, %v6695_v58  ;;  %v14057_v57 = vld [vmem:[#allocation3 + $0x2a] sm:$0xff] }
 0x5f9   : > { %16390 = vst [vmem:[#allocation43_spill] sm:$0xff] %v14057_v57 }
 0x5fa   : > { %16382 = vst [vmem:[#allocation42_spill] sm:$0xff] %v14036_v63  ;;  %v8159_v63 = vld [vmem:[#allocation3 + $0x30] sm:$0xff] }
 0x5fb   : > { %v14046_v33 = vpop.f32.mrf.mxu1  ;;  %v8191_v28 = vsel %vm16111_vm2, %v8159_v63, 0.0  ;;  %v8160_v63 = vld [vmem:[#allocation3 + $0x38] sm:$0xff]  ;;  %vm16399_vm2 = vmmov %vm16357_vm0 }
 0x5fc   : > { %9958 = vmatmul.msk.f32.gmra.mxu2 %vm16383_vm14, %v14038_v50 }
 0x5fd   : > { %v6698_v62 = vpop.f32.mrf.mxu2 }
 0x5fe   : > { %9994 = vmatmul.msk.f32.gmra.mxu3 %vm16386_vm15, %v14042_v16  ;;  %vm16393_vm15 = vmmov %vm16357_vm0 }
 0x5ff   : > { %10029 = vmatmul.msk.f32.gmra.mxu0 %vm16387_vm7, %v8158_v3  ;;  %v6907_v36 = vpop.f32.mrf.mxu3  ;;  %9938 = vmatmul.msk.f32.gmra.mxu1 %vm16388_vm13, %v7309_v47  ;;  %v16391_v3 = vld [vmem:[#allocation8_spill] sm:$0xff]  ;;  %vm16394_vm7 = vmmov %vm16357_vm0 }
 0x600   : > { %v14055_v58 = vadd.f32 %v6907_v36, %v6698_v62  ;;  %vm16392_vm14 = vnez %v16391_v3  ;;  %v14072_v62 = vpop.f32.mrf.mxu0  ;;  %vm16396_vm13 = vmmov %vm16357_vm0  ;;  %v14078_v3 = vld [vmem:[#allocation3 + $0x31] sm:$0xff] }
 0x601   : > { %v7882_v16 = vsel %vm16392_vm14, %v14057_v57, 0.0  ;;  %16395 = vst [vmem:[#allocation80_spill] sm:$0xff] %v14072_v62  ;;  %v14100_v62 = vld [vmem:[#allocation3 + $0x3a] sm:$0xff] }
 0x602   : > { %16389 = vst [vmem:[#allocation24_spill] sm:$0xff] %v14055_v58 }
 0x603   : > { %v14068_v44 = vpop.f32.mrf.mxu1  ;;  %16404 = vst [vmem:[#allocation82_spill] sm:$0xff] %v14100_v62 }
 0x604   : > { %9959 = vmatmul.msk.f32.gmra.mxu2 %vm16357_vm0, %v14059_v43 }
 0x605   : > { %v6701_v47 = vpop.f32.mrf.mxu2 }
 0x606   : > { %9995 = vmatmul.msk.f32.gmra.mxu3 %vm16393_vm15, %v7882_v16  ;;  %v10098_v16 = vld [vmem:[%s15064_s5 + $0x110] sm:$0xff]  ;;  %vm16400_vm15 = vmmov %vm16357_vm0 }
 0x607   : > { %10030 = vmatmul.msk.f32.gmra.mxu0 %vm16394_vm7, %v8191_v28  ;;  %v6910_v36 = vpop.f32.mrf.mxu3  ;;  %9939 = vmatmul.msk.f32.gmra.mxu1 %vm16396_vm13, %v13740_v29  ;;  %vm16401_vm7 = vmmov %vm16357_vm0 }
 0x608   : > { %v14076_v58 = vadd.f32 %v6910_v36, %v6701_v47  ;;  %8923 = vmatpush.msra.mxu2 %v10098_v16  ;;  %v7311_v47 = vsel %vm16264_vm11, %v13759_v0, 0.0  ;;  %v14105_v16 = vld [vmem:[#allocation3 + $0x39] sm:$0xff]  ;;  %vm16405_vm13 = vmmov %vm16357_vm0  ;;  %v16406_v0 = vld [vmem:[#allocation10_spill] sm:$0xff] }
 0x60a   : > { %16397 = vst [vmem:[#allocation45_spill] sm:$0xff] %v14076_v58  ;;  %v14096_v58 = vpop.f32.mrf.mxu0 }
 0x60b   : > { %v14087_v28 = vpop.f32.mrf.mxu1  ;;  %16402 = vst [vmem:[#allocation25_spill] sm:$0xff] %v14096_v58 }
 0x60c   : > { %9960 = vmatmul.msk.f32.gmra.mxu2 %vm16357_vm0, %v14078_v3  ;;  %vm16407_vm0 = vnez %v16406_v0  ;;  %v14124_v0 = vld [vmem:[#allocation3 + $0x41] sm:$0xff] }
 0x60e   : > { %9996 = vmatmul.msk.f32.gmra.mxu3 %vm16399_vm2, %v14082_v42 }
 0x60f   : > { %10031 = vmatmul.msk.f32.gmra.mxu0 %vm16400_vm15, %v8160_v63  ;;  %v6704_v29 = vpop.f32.mrf.mxu2  ;;  %9940 = vmatmul.msk.f32.gmra.mxu1 %vm16401_vm7, %v7311_v47  ;;  %v10062_v63 = vld [vmem:[%s15064_s5 + $0xf0] sm:$0xff]  ;;  %v7884_v47 = vsel %vm16407_vm0, %v14100_v62, 0.0  ;;  %vm16408_vm15 = vmmov %vm16399_vm2  ;;  %v8163_v62 = vld [vmem:[#allocation3 + $0x50] sm:$0xff] }
 0x610   : > { %8613 = vmatpush.msra.mxu1 %v10062_v63  ;;  %vm16409_vm7 = vmmov %vm16399_vm2 }
 0x611   : > { %v6913_v36 = vpop.f32.mrf.mxu3  ;;  %vm16469_vm0 = vmmov %vm16399_vm2 }
 0x612   : > { %v14098_v57 = vadd.f32 %v6913_v36, %v6704_v29  ;;  %v8193_v29 = vsel %vm16124_vm9, %v8161_v48, 0.0  ;;  %v14122_v58 = vpop.f32.mrf.mxu0  ;;  %v8162_v48 = vld [vmem:[#allocation3 + $0x48] sm:$0xff]  ;;  %vm16414_vm9 = vmmov %vm16399_vm2 }
 0x613   : > { %v14114_v36 = vpop.f32.mrf.mxu1  ;;  %16411 = vst [vmem:[#allocation85_spill] sm:$0xff] %v14122_v58  ;;  %v14143_v58 = vld [vmem:[#allocation3 + $0x49] sm:$0xff] }
 0x614   : > { %16403 = vst [vmem:[#allocation55_spill] sm:$0xff] %v14098_v57  ;;  %9961 = vmatmul.msk.f32.gmra.mxu2 %vm16405_vm13, %v14105_v16  ;;  %vm16412_vm13 = vmmov %vm16399_vm2 }
 0x616   : > { %9997 = vmatmul.msk.f32.gmra.mxu3 %vm16399_vm2, %v7884_v47 }
 0x617   : > { %10032 = vmatmul.msk.f32.gmra.mxu0 %vm16408_vm15, %v8193_v29  ;;  %v6707_v57 = vpop.f32.mrf.mxu2  ;;  %9941 = vmatmul.msk.f32.gmra.mxu1 %vm16409_vm7, %v13784_v55  ;;  %vm16415_vm15 = vmmov %vm16399_vm2 }
 0x618   : > { %vm16418_vm7 = vmmov %vm16399_vm2 }
 0x619   : > { %v6916_v63 = vpop.f32.mrf.mxu3 }
 0x61a   : > { %v14120_v42 = vadd.f32 %v6916_v63, %v6707_v57  ;;  %v7313_v57 = vsel %vm16286_vm5, %v13801_v61, 0.0  ;;  %v8195_v61 = vsel %vm16136_vm12, %v8163_v62, 0.0  ;;  %v14152_v30 = vpop.f32.mrf.mxu0  ;;  %v8164_v62 = vld [vmem:[#allocation3 + $0x58] sm:$0xff]  ;;  %vm16427_vm12 = vmmov %vm16399_vm2 }
 0x61b   : > { %v14133_v47 = vpop.f32.mrf.mxu1  ;;  %16421 = vst [vmem:[#allocation56_spill] sm:$0xff] %v14152_v30 }
 0x61c   : > { %16410 = vst [vmem:[#allocation83_spill] sm:$0xff] %v14120_v42  ;;  %9962 = vmatmul.msk.f32.gmra.mxu2 %vm16412_vm13, %v14124_v0  ;;  %v14141_v42 = vld [vmem:[#allocation3 + $0x4a] sm:$0xff] }
 0x61d   : > { %16417 = vst [vmem:[#allocation84_spill] sm:$0xff] %v14141_v42 }
 0x61e   : > { %9998 = vmatmul.msk.f32.gmra.mxu3 %vm16414_vm9, %v14128_v35  ;;  %vm16422_vm9 = vmmov %vm16399_vm2 }
 0x61f   : > { %10033 = vmatmul.msk.f32.gmra.mxu0 %vm16399_vm2, %v8162_v48  ;;  %v6710_v55 = vpop.f32.mrf.mxu2  ;;  %9942 = vmatmul.msk.f32.gmra.mxu1 %vm16415_vm15, %v7313_v57  ;;  %v16419_v48 = vld [vmem:[#allocation12_spill] sm:$0xff]  ;;  %vm16423_vm15 = vmmov %vm16399_vm2 }
 0x620   : > { %vm16420_vm13 = vnez %v16419_v48  ;;  %v14162_v48 = vld [vmem:[#allocation3 + $0x51] sm:$0xff] }
 0x621   : > { %v6919_v29 = vpop.f32.mrf.mxu3  ;;  %v7886_v35 = vsel %vm16420_vm13, %v14141_v42, 0.0  ;;  %v8165_v42 = vld [vmem:[#allocation3 + $0x60] sm:$0xff]  ;;  %vm16437_vm13 = vmmov %vm16399_vm2 }
 0x622   : > { %v14139_v63 = vadd.f32 %v6919_v29, %v6710_v55 }
 0x623   : > { %v14156_v57 = vpop.f32.mrf.mxu1 }
 0x624   : > { %16416 = vst [vmem:[#allocation52_spill] sm:$0xff] %v14139_v63  ;;  %9963 = vmatmul.msk.f32.gmra.mxu2 %vm16418_vm7, %v14143_v58  ;;  %vm16425_vm7 = vmmov %vm16399_vm2 }
 0x626   : > { %9999 = vmatmul.msk.f32.gmra.mxu3 %vm16422_vm9, %v7886_v35  ;;  %vm16428_vm9 = vmmov %vm16399_vm2  ;;  %v14171_v35 = vpop.f32.mrf.mxu0 }
 0x627   : > { %10034 = vmatmul.msk.f32.gmra.mxu0 %vm16399_vm2, %v8195_v61  ;;  %v6713_v55 = vpop.f32.mrf.mxu2  ;;  %9943 = vmatmul.msk.f32.gmra.mxu1 %vm16423_vm15, %v13826_v17  ;;  %16429 = vst [vmem:[#allocation34_spill] sm:$0xff] %v14171_v35  ;;  %v7315_v17 = vsel %vm16305_vm10, %v13845_v9, 0.0  ;;  %vm16432_vm15 = vmmov %vm16399_vm2 }
 0x629   : > { %v6922_v29 = vpop.f32.mrf.mxu3 }
 0x62a   : > { %v14160_v63 = vadd.f32 %v6922_v29, %v6713_v55 }
 0x62b   : > { %v14181_v30 = vpop.f32.mrf.mxu1 }
 0x62c   : > { %16424 = vst [vmem:[#allocation86_spill] sm:$0xff] %v14160_v63  ;;  %9964 = vmatmul.msk.f32.gmra.mxu2 %vm16425_vm7, %v14162_v48  ;;  %v14179_v63 = vld [vmem:[#allocation3 + $0x5a] sm:$0xff] }
 0x62d   : > { %16431 = vst [vmem:[#allocation87_spill] sm:$0xff] %v14179_v63 }
 0x62e   : > { %10000 = vmatmul.msk.f32.gmra.mxu3 %vm16427_vm12, %v14166_v12  ;;  %v14183_v12 = vld [vmem:[#allocation3 + $0x59] sm:$0xff]  ;;  %vm16435_vm12 = vnez %v16308_v25  ;;  %v14206_v25 = vld [vmem:[#allocation3 + $0x62] sm:$0xff] }
 0x62f   : > { %10035 = vmatmul.msk.f32.gmra.mxu0 %vm16428_vm9, %v8164_v62  ;;  %v6716_v61 = vpop.f32.mrf.mxu2  ;;  %9944 = vmatmul.msk.f32.gmra.mxu1 %vm16399_vm2, %v7315_v17  ;;  %v16433_v62 = vld [vmem:[#allocation15_spill] sm:$0xff]  ;;  %v8197_v9 = vsel %vm16435_vm12, %v8165_v42, 0.0  ;;  %vm16436_vm9 = vmmov %vm16399_vm2  ;;  %16441 = vst [vmem:[#allocation48_spill] sm:$0xff] %v14206_v25  ;;  %v8166_v42 = vld [vmem:[#allocation3 + $0x68] sm:$0xff] }
 0x630   : > { %vm16434_vm7 = vnez %v16433_v62  ;;  %vm16442_vm12 = vmmov %vm16399_vm2 }
 0x631   : > { %v6925_v55 = vpop.f32.mrf.mxu3  ;;  %v7888_v35 = vsel %vm16434_vm7, %v14179_v63, 0.0  ;;  %vm16453_vm7 = vmmov %vm16399_vm2 }
 0x632   : > { %v14177_v29 = vadd.f32 %v6925_v55, %v6716_v61  ;;  %v14196_v55 = vpop.f32.mrf.mxu0 }
 0x633   : > { %16438 = vst [vmem:[#allocation89_spill] sm:$0xff] %v14196_v55  ;;  %v14202_v62 = vpop.f32.mrf.mxu1  ;;  %v14221_v55 = vld [vmem:[#allocation3 + $0x69] sm:$0xff] }
 0x634   : > { %16430 = vst [vmem:[#allocation39_spill] sm:$0xff] %v14177_v29  ;;  %9965 = vmatmul.msk.f32.gmra.mxu2 %vm16432_vm15, %v14183_v12  ;;  %vm16440_vm15 = vmmov %vm16399_vm2 }
 0x636   : > { %10001 = vmatmul.msk.f32.gmra.mxu3 %vm16436_vm9, %v7888_v35  ;;  %vm16443_vm9 = vmmov %vm16399_vm2  ;;  %v7317_v35 = vsel %vm16324_vm1, %v13900_v6, 0.0 }
 0x637   : > { %10036 = vmatmul.msk.f32.gmra.mxu0 %vm16399_vm2, %v8197_v9  ;;  %v6719_v61 = vpop.f32.mrf.mxu2  ;;  %9945 = vmatmul.msk.f32.gmra.mxu1 %vm16437_vm13, %v13875_v2  ;;  %vm16444_vm13 = vmmov %vm16399_vm2 }
 0x639   : > { %v6928_v17 = vpop.f32.mrf.mxu3 }
 0x63a   : > { %v14198_v29 = vadd.f32 %v6928_v17, %v6719_v61  ;;  %v14217_v17 = vld [vmem:[#allocation3 + $0x6a] sm:$0xff]  ;;  %v14219_v63 = vpop.f32.mrf.mxu0 }
 0x63b   : > { %16446 = vst [vmem:[#allocation90_spill] sm:$0xff] %v14217_v17 }
 0x63c   : > { %16439 = vst [vmem:[#allocation91_spill] sm:$0xff] %v14198_v29  ;;  %9966 = vmatmul.msk.f32.gmra.mxu2 %vm16440_vm15, %v14200_v11  ;;  %v8167_v29 = vld [vmem:[#allocation3 + $0x70] sm:$0xff] }
 0x63d   : > { %16447 = vst [vmem:[#allocation67_spill] sm:$0xff] %v14219_v63  ;;  %v14238_v63 = vld [vmem:[#allocation3 + $0x71] sm:$0xff] }
 0x63e   : > { %10002 = vmatmul.msk.f32.gmra.mxu3 %vm16442_vm12, %v14206_v25  ;;  %vm16450_vm12 = vnez %v15958_v46  ;;  %v14242_v46 = vld [vmem:[#allocation3 + $0x72] sm:$0xff] }
 0x63f   : > { %10037 = vmatmul.msk.f32.gmra.mxu0 %vm16443_vm9, %v8166_v42  ;;  %v6722_v2 = vpop.f32.mrf.mxu2  ;;  %9946 = vmatmul.msk.f32.gmra.mxu1 %vm16444_vm13, %v7317_v35  ;;  %v16448_v42 = vld [vmem:[#allocation18_spill] sm:$0xff]  ;;  %v8199_v6 = vsel %vm16450_vm12, %v8167_v29, 0.0  ;;  %vm16451_vm9 = vmmov %vm16399_vm2  ;;  %16455 = vst [vmem:[#allocation36_spill] sm:$0xff] %v14242_v46 }
 0x640   : > { %vm16449_vm15 = vnez %v16448_v42  ;;  %vm16452_vm13 = vmmov %vm16399_vm2  ;;  %v8168_v29 = vld [vmem:[#allocation3 + $0x78] sm:$0xff] }
 0x641   : > { %v6931_v9 = vpop.f32.mrf.mxu3  ;;  %v7890_v25 = vsel %vm16449_vm15, %v14217_v17, 0.0  ;;  %vm16457_vm12 = vmmov %vm16399_vm2  ;;  %v8169_v17 = vld [vmem:[#allocation3 + $0x80] sm:$0xff] }
 0x642   : > { %v14215_v61 = vadd.f32 %v6931_v9, %v6722_v2  ;;  %v14232_v2 = vpop.f32.mrf.mxu1  ;;  %vm16467_vm15 = vmmov %vm16399_vm2 }
 0x644   : > { %16445 = vst [vmem:[#allocation54_spill] sm:$0xff] %v14215_v61  ;;  %9967 = vmatmul.msk.f32.gmra.mxu2 %vm16399_vm2, %v14221_v55 }
 0x646   : > { %10003 = vmatmul.msk.f32.gmra.mxu3 %vm16451_vm9, %v7890_v25  ;;  %v10097_v25 = vld [vmem:[%s15064_s5 + $0x108] sm:$0xff]  ;;  %vm16459_vm9 = vnez %v16339_v41  ;;  %v14308_v41 = vld [vmem:[#allocation3 + $0x89] sm:$0xff] }
 0x647   : > { %10038 = vmatmul.msk.f32.gmra.mxu0 %vm16452_vm13, %v8199_v6  ;;  %v6725_v35 = vpop.f32.mrf.mxu2  ;;  %9947 = vmatmul.msk.f32.gmra.mxu1 %vm16453_vm7, %v13941_v59  ;;  %v14247_v6 = vpop.f32.mrf.mxu0  ;;  %vm16458_vm7 = vmmov %vm16399_vm2  ;;  %v10061_v59 = vld [vmem:[%s15064_s5 + $0xe8] sm:$0xff]  ;;  %16479 = vst [vmem:[#allocation11_spill] sm:$0xff] %v14308_v41 }
 0x648   : > { %16456 = vst [vmem:[#allocation7_spill] sm:$0xff] %v14247_v6  ;;  %8924 = vmatpush.msra.mxu2 %v10097_v25  ;;  %8614 = vmatpush.msra.mxu1 %v10061_v59  ;;  %vm16460_vm13 = vmmov %vm16399_vm2  ;;  %v14268_v6 = vld [vmem:[#allocation3 + $0x79] sm:$0xff] }
 0x649   : > { %v6934_v9 = vpop.f32.mrf.mxu3 }
 0x64a   : > { %v14236_v61 = vadd.f32 %v6934_v9, %v6725_v35  ;;  %v7319_v9 = vsel %vm16459_vm9, %v13966_v49, 0.0  ;;  %v16463_v49 = vld [vmem:[#allocation23_spill] sm:$0xff] }
 0x64c   : > { %16454 = vst [vmem:[#allocation92_spill] sm:$0xff] %v14236_v61  ;;  %9968 = vmatmul.msk.f32.gmra.mxu2 %vm16399_vm2, %v14238_v63  ;;  %v14258_v61 = vpop.f32.mrf.mxu1 }
 0x64e   : > { %10004 = vmatmul.msk.f32.gmra.mxu3 %vm16457_vm12, %v14242_v46  ;;  %v14266_v46 = vld [vmem:[#allocation3 + $0x7a] sm:$0xff]  ;;  %vm16464_vm12 = vnez %v16463_v49 }
 0x64f   : > { %10039 = vmatmul.msk.f32.gmra.mxu0 %vm16458_vm7, %v8168_v29  ;;  %v6728_v35 = vpop.f32.mrf.mxu2  ;;  %9948 = vmatmul.msk.f32.gmra.mxu1 %vm16460_vm13, %v7319_v9  ;;  %v10060_v29 = vld [vmem:[%s15064_s5 + $0xe0] sm:$0xff]  ;;  %16462 = vst [vmem:[#allocation94_spill] sm:$0xff] %v14266_v46  ;;  %v7892_v59 = vsel %vm16464_vm12, %v14266_v46, 0.0  ;;  %vm16465_vm7 = vnez %v15969_v60  ;;  %vm16466_vm13 = vmmov %vm16399_vm2  ;;  %v14287_v49 = vld [vmem:[#allocation3 + $0x81] sm:$0xff] }
 0x650   : > { %8615 = vmatpush.msra.mxu1 %v10060_v29  ;;  %v8201_v9 = vsel %vm16465_vm7, %v8169_v17, 0.0  ;;  %v14291_v60 = vld [vmem:[#allocation3 + $0x82] sm:$0xff]  ;;  %vm16475_vm7 = vmmov %vm16469_vm0  ;;  %v14306_v46 = vld [vmem:[#allocation3 + $0x8a] sm:$0xff] }
 0x651   : > { %v6937_v42 = vpop.f32.mrf.mxu3  ;;  %16472 = vst [vmem:[#allocation95_spill] sm:$0xff] %v14291_v60  ;;  %v8170_v17 = vld [vmem:[#allocation3 + $0x88] sm:$0xff] }
 0x652   : > { %v14264_v25 = vadd.f32 %v6937_v42, %v6728_v35  ;;  %v14279_v42 = vpop.f32.mrf.mxu0  ;;  %16478 = vst [vmem:[#allocation29_spill] sm:$0xff] %v14306_v46 }
 0x653   : > { %16468 = vst [vmem:[#allocation49_spill] sm:$0xff] %v14279_v42  ;;  %v8171_v42 = vld [vmem:[#allocation3 + $0x90] sm:$0xff] }
 0x654   : > { %16461 = vst [vmem:[#allocation93_spill] sm:$0xff] %v14264_v25  ;;  %9969 = vmatmul.msk.f32.gmra.mxu2 %vm16399_vm2, %v14268_v6  ;;  %v14285_v39 = vpop.f32.mrf.mxu1  ;;  %vm16471_vm2 = vmmov %vm16469_vm0 }
 0x656   : > { %10005 = vmatmul.msk.f32.gmra.mxu3 %vm16466_vm13, %v7892_v59  ;;  %v14293_v59 = vld [vmem:[#allocation3 + $0x100] sm:$0xff]  ;;  %vm16481_vm13 = vmmov %vm16469_vm0 }
 0x657   : > { %10040 = vmatmul.msk.f32.gmra.mxu0 %vm16467_vm15, %v8201_v9  ;;  %v6731_v35 = vpop.f32.mrf.mxu2  ;;  %9949 = vmatmul.msk.f32.gmra.mxu1 %vm16469_vm0, %v13991_v21  ;;  %16473 = vst [vmem:[#allocation13_spill] sm:$0xff] %v14293_v59  ;;  %vm16474_vm15 = vmmov %vm16469_vm0  ;;  %v7321_v9 = vsel %vm16353_vm6, %v14293_v59, 0.0 }
 0x659   : > { %v6940_v29 = vpop.f32.mrf.mxu3 }
 0x65a   : > { %v14283_v25 = vadd.f32 %v6940_v29, %v6731_v35  ;;  %v14302_v29 = vpop.f32.mrf.mxu0 }
 0x65b   : > { %16476 = vst [vmem:[#allocation14_spill] sm:$0xff] %v14302_v29  ;;  %v16488_v29 = vld [vmem:[#allocation70_spill] sm:$0xff] }
 0x65c   : > { %16470 = vst [vmem:[#allocation9_spill] sm:$0xff] %v14283_v25  ;;  %9970 = vmatmul.msk.f32.gmra.mxu2 %vm16471_vm2, %v14287_v49 }
 0x65e   : > { %10006 = vmatmul.msk.f32.gmra.mxu3 %vm16474_vm15, %v14291_v60  ;;  %v14310_v60 = vpop.f32.mrf.mxu1  ;;  %vm16484_vm15 = vmmov %vm16469_vm0 }
 0x65f   : > { %10041 = vmatmul.msk.f32.gmra.mxu0 %vm16475_vm7, %v8170_v17  ;;  %v6734_v21 = vpop.f32.mrf.mxu2  ;;  %9950 = vmatmul.msk.f32.gmra.mxu1 %vm16469_vm0, %v7321_v9  ;;  %16480 = vst [vmem:[#allocation97_spill] sm:$0xff] %v14310_v60  ;;  %v16482_v17 = vld [vmem:[#allocation31_spill] sm:$0xff]  ;;  %v8203_v9 = vsel %vm16190_vm4, %v8171_v42, 0.0  ;;  %vm16485_vm7 = vmmov %vm16469_vm0  ;;  %v16492_v42 = vld [vmem:[#allocation69_spill] sm:$0xff] }
 0x660   : > { %vm16483_vm2 = vnez %v16482_v17  ;;  %vm16493_vm4 = vmmov %vm16469_vm0 }
 0x661   : > { %v6943_v35 = vpop.f32.mrf.mxu3  ;;  %v7894_v32 = vsel %vm16483_vm2, %v14306_v46, 0.0  ;;  %v8172_v46 = vld [vmem:[#allocation3 + $0x98] sm:$0xff] }
 0x662   : > { %v14304_v25 = vadd.f32 %v6943_v35, %v6734_v21  ;;  %v14321_v35 = vld [vmem:[#allocation3 + $0x108] sm:$0xff]  ;;  %v14329_v17 = vpop.f32.mrf.mxu0 }
 0x663   : > { %16486 = vst [vmem:[#allocation98_spill] sm:$0xff] %v14321_v35 }
 0x664   : > { %16477 = vst [vmem:[#allocation96_spill] sm:$0xff] %v14304_v25  ;;  %9971 = vmatmul.msk.f32.gmra.mxu2 %vm16481_vm13, %v14308_v41  ;;  %v16487_v25 = vld [vmem:[#allocation65_spill] sm:$0xff]  ;;  %vm16495_vm13 = vmmov %vm16469_vm0 }
 0x665   : > { %v6854_v60 = vadd.f32 %v16488_v29, %v16487_v25  ;;  %16490 = vst [vmem:[#allocation47_spill] sm:$0xff] %v14329_v17  ;;  %v14348_v17 = vld [vmem:[#allocation3 + $0x9a] sm:$0xff] }
 0x666   : > { %10007 = vmatmul.msk.f32.gmra.mxu3 %vm16484_vm15, %v7894_v32  ;;  %vm16496_vm15 = vmmov %vm16469_vm0  ;;  %16499 = vst [vmem:[#allocation20_spill] sm:$0xff] %v14348_v17 }
 0x667   : > { %10042 = vmatmul.msk.f32.gmra.mxu0 %vm16485_vm7, %v8203_v9  ;;  %v6737_v21 = vpop.f32.mrf.mxu2  ;;  %9951 = vmatmul.msk.f32.gmra.mxu1 %vm16469_vm0, %v14321_v35  ;;  %v7227_v32 = vadd.f32 %v16492_v42, %v6854_v60  ;;  %v14336_v9 = vld [vmem:[#allocation3 + $0x92] sm:$0xff]  ;;  %vm16498_vm7 = vmmov %vm16469_vm0 }
 0x668   : > { %16494 = vst [vmem:[#allocation32_spill] sm:$0xff] %v14336_v9 }
 0x669   : > { %v6946_v59 = vpop.f32.mrf.mxu3  ;;  %v7537_v25 = vadd.f32 %v14014_v45, %v7227_v32  ;;  %v16502_v32 = vld [vmem:[#allocation40_spill] sm:$0xff] }
 0x66a   : > { %v14327_v41 = vadd.f32 %v6946_v59, %v6737_v21  ;;  %v14342_v59 = vpop.f32.mrf.mxu1  ;;  %v16497_v21 = vld [vmem:[#allocation37_spill] sm:$0xff] }
 0x66c   : > { %16489 = vst [vmem:[#allocation30_spill] sm:$0xff] %v14327_v41  ;;  %9972 = vmatmul.msk.f32.gmra.mxu2 %vm16493_vm4, %v14331_v56  ;;  %v6857_v41 = vadd.f32 %v13660_v26, %v16497_v21  ;;  %v8173_v56 = vld [vmem:[#allocation3 + $0xa0] sm:$0xff]  ;;  %vm16503_vm4 = vnez %v16502_v32 }
 0x66d   : > { %v7896_v26 = vsel %vm16503_vm4, %v14348_v17, 0.0  ;;  %v16509_v32 = vld [vmem:[#allocation59_spill] sm:$0xff]  ;;  %vm16522_vm4 = vmmov %vm16469_vm0 }
 0x66e   : > { %10008 = vmatmul.msk.f32.gmra.mxu3 %vm16495_vm13, %v14336_v9  ;;  %v14352_v9 = vld [vmem:[#allocation3 + $0x99] sm:$0xff]  ;;  %vm16504_vm13 = vnez %v16373_v52  ;;  %v14373_v52 = vld [vmem:[#allocation3 + $0xa1] sm:$0xff] }
 0x66f   : > { %10043 = vmatmul.msk.f32.gmra.mxu0 %vm16496_vm15, %v8172_v46  ;;  %v7719_v29 = vpop.f32.mrf.mxu2  ;;  %10064 = vmatmul.msk.f32.vlgmr.msra.gmra.mxu1 %vm16498_vm7, %v14038_v50  ;;  %v16501_v46 = vld [vmem:[#allocation17_spill] sm:$0xff]  ;;  %v14362_v50 = vpop.f32.mrf.mxu0  ;;  %vm16505_vm15 = vmmov %vm16469_vm0  ;;  %v14440_v17 = vld [vmem:[#allocation3 + $0xb9] sm:$0xff] }
 0x670   : > { %v7815_v60 = vadd.f32 %v7719_v29, %v7537_v25  ;;  %v7228_v45 = vadd.f32 %v16501_v46, %v6857_v41  ;;  %v8205_v25 = vsel %vm16504_vm13, %v8173_v56, 0.0  ;;  %vm16506_vm7 = vmmov %vm16469_vm0  ;;  %v16508_v56 = vld [vmem:[#allocation66_spill] sm:$0xff] }
 0x671   : > { %v8029_v42 = vpop.f32.mrf.mxu3  ;;  %vm16510_vm13 = vmmov %vm16469_vm0 }
 0x672   : > { %v14350_v35 = vadd.f32 %v8029_v42, %v7815_v60  ;;  %v7538_v29 = vadd.f32 %v14030_v38, %v7228_v45  ;;  %v14367_v41 = vpop.f32.mrf.mxu1  ;;  %v8174_v38 = vld [vmem:[#allocation3 + $0xa8] sm:$0xff] }
 0x674   : > { %16500 = vst [vmem:[#allocation33_spill] sm:$0xff] %v14350_v35  ;;  %9973 = vmatmul.msk.f32.gmra.mxu2 %vm16469_vm0, %v14352_v9  ;;  %v7229_v35 = vadd.f32 %v16509_v32, %v16508_v56  ;;  %v14389_v32 = vld [vmem:[#allocation3 + $0xaa] sm:$0xff] }
 0x675   : > { %16514 = vst [vmem:[#allocation73_spill] sm:$0xff] %v14389_v32 }
 0x676   : > { %10009 = vmatmul.msk.f32.gmra.mxu3 %vm16505_vm15, %v7896_v26  ;;  %v14379_v26 = vld [vmem:[#allocation3 + $0xa2] sm:$0xff]  ;;  %vm16512_vm15 = vmmov %vm16469_vm0 }
 0x677   : > { %10044 = vmatmul.msk.f32.gmra.mxu0 %vm16506_vm7, %v8205_v25  ;;  %v7722_v21 = vpop.f32.mrf.mxu2  ;;  %10065 = vmatmul.msk.f32.gmra.mxu1 %vm16469_vm0, %v14059_v43  ;;  %16511 = vst [vmem:[#allocation44_spill] sm:$0xff] %v14379_v26  ;;  %vm16513_vm7 = vmmov %vm16469_vm0  ;;  %v7539_v43 = vadd.f32 %v14046_v33, %v7229_v35  ;;  %v14385_v45 = vpop.f32.mrf.mxu0  ;;  %v16519_v35 = vld [vmem:[#allocation51_spill] sm:$0xff] }
 0x678   : > { %v7816_v60 = vadd.f32 %v7722_v21, %v7538_v29 }
 0x679   : > { %v8032_v42 = vpop.f32.mrf.mxu3 }
 0x67a   : > { %v14371_v46 = vadd.f32 %v8032_v42, %v7816_v60  ;;  %v8175_v60 = vld [vmem:[#allocation3 + $0xb0] sm:$0xff]  ;;  %v14391_v42 = vpop.f32.mrf.mxu1 }
 0x67c   : > { %16507 = vst [vmem:[#allocation74_spill] sm:$0xff] %v14371_v46  ;;  %9974 = vmatmul.msk.f32.gmra.mxu2 %vm16510_vm13, %v14373_v52  ;;  %v14395_v46 = vld [vmem:[#allocation3 + $0xa9] sm:$0xff]  ;;  %vm16518_vm13 = vmmov %vm16469_vm0 }
 0x67e   : > { %10010 = vmatmul.msk.f32.gmra.mxu3 %vm16512_vm15, %v14379_v26  ;;  %v16517_v26 = vld [vmem:[#allocation38_spill] sm:$0xff]  ;;  %vm16520_vm15 = vnez %v16519_v35 }
 0x67f   : > { %10045 = vmatmul.msk.f32.gmra.mxu0 %vm16513_vm7, %v8174_v38  ;;  %v7725_v25 = vpop.f32.mrf.mxu2  ;;  %10066 = vmatmul.msk.f32.gmra.mxu1 %vm16469_vm0, %v14078_v3  ;;  %v16516_v38 = vld [vmem:[#allocation28_spill] sm:$0xff]  ;;  %v8207_v3 = vsel %vm16240_vm8, %v8175_v60, 0.0  ;;  %vm16521_vm7 = vmmov %vm16469_vm0  ;;  %v14415_v35 = vld [vmem:[#allocation3 + $0xb1] sm:$0xff] }
 0x680   : > { %v7817_v29 = vadd.f32 %v7725_v25, %v7539_v43  ;;  %v7230_v33 = vadd.f32 %v16517_v26, %v16516_v38  ;;  %v7898_v43 = vsel %vm16520_vm15, %v14389_v32, 0.0  ;;  %v14411_v26 = vpop.f32.mrf.mxu0  ;;  %v16525_v60 = vld [vmem:[#allocation68_spill] sm:$0xff]  ;;  %vm16526_vm8 = vmmov %vm16469_vm0 }
 0x681   : > { %v8035_v21 = vpop.f32.mrf.mxu3  ;;  %v7231_v32 = vadd.f32 %v16525_v60, %v16524_v22  ;;  %v8177_v22 = vld [vmem:[#allocation3 + $0xc0] sm:$0xff] }
 0x682   : > { %v14393_v56 = vadd.f32 %v8035_v21, %v7817_v29  ;;  %v7540_v25 = vadd.f32 %v14068_v44, %v7230_v33  ;;  %v14423_v44 = vld [vmem:[#allocation3 + $0xb2] sm:$0xff] }
 0x683   : > { %16527 = vst [vmem:[#allocation63_spill] sm:$0xff] %v14423_v44  ;;  %v8176_v33 = vld [vmem:[#allocation3 + $0xb8] sm:$0xff] }
 0x684   : > { %16515 = vst [vmem:[#allocation46_spill] sm:$0xff] %v14393_v56  ;;  %9975 = vmatmul.msk.f32.gmra.mxu2 %vm16518_vm13, %v14395_v46  ;;  %vm16529_vm13 = vmmov %vm16469_vm0 }
 0x686   : > { %10011 = vmatmul.msk.f32.gmra.mxu3 %vm16521_vm7, %v7898_v43  ;;  %v14419_v43 = vpop.f32.mrf.mxu1  ;;  %vm16530_vm7 = vmmov %vm16469_vm0 }
 0x687   : > { %10046 = vmatmul.msk.f32.gmra.mxu0 %vm16469_vm0, %v8207_v3  ;;  %v7728_v29 = vpop.f32.mrf.mxu2  ;;  %10067 = vmatmul.msk.f32.gmra.mxu1 %vm16522_vm4, %v14105_v16  ;;  %v10096_v16 = vld [vmem:[%s15064_s5 + $0x100] sm:$0xff]  ;;  %vm16528_vm4 = vmmov %vm16469_vm0 }
 0x688   : > { %v7818_v21 = vadd.f32 %v7728_v29, %v7540_v25  ;;  %8925 = vmatpush.msra.mxu2 %v10096_v16 }
 0x689   : > { %v8038_v56 = vpop.f32.mrf.mxu3 }
 0x68a   : > { %v14413_v38 = vadd.f32 %v8038_v56, %v7818_v21  ;;  %v7541_v56 = vadd.f32 %v14087_v28, %v7231_v32  ;;  %v14434_v21 = vld [vmem:[#allocation3 + $0xba] sm:$0xff]  ;;  %v16532_v28 = vld [vmem:[#allocation62_spill] sm:$0xff] }
 0x68c   : > { %16523 = vst [vmem:[#allocation78_spill] sm:$0xff] %v14413_v38  ;;  %9976 = vmatmul.msk.f32.gmra.mxu2 %vm16526_vm8, %v14415_v35  ;;  %v14438_v38 = vpop.f32.mrf.mxu0  ;;  %vm16533_vm8 = vnez %v16532_v28 }
 0x68d   : > { %v7900_v32 = vsel %vm16533_vm8, %v14434_v21, 0.0 }
 0x68e   : > { %10012 = vmatmul.msk.f32.gmra.mxu3 %vm16528_vm4, %v14423_v44  ;;  %vm16534_vm4 = vmmov %vm16469_vm0 }
 0x68f   : > { %10047 = vmatmul.msk.f32.gmra.mxu0 %vm16529_vm13, %v8176_v33  ;;  %v7731_v3 = vpop.f32.mrf.mxu2  ;;  %10068 = vmatmul.msk.f32.gmra.mxu1 %vm16530_vm7, %v14124_v0  ;;  %v16531_v33 = vld [vmem:[#allocation75_spill] sm:$0xff]  ;;  %v8209_v0 = vsel %vm16264_vm11, %v8177_v22, 0.0  ;;  %vm16535_vm13 = vmmov %vm16469_vm0  ;;  %v16539_v22 = vld [vmem:[#allocation41_spill] sm:$0xff] }
 0x690   : > { %v7819_v25 = vadd.f32 %v7731_v3, %v7541_v56  ;;  %v7232_v44 = vadd.f32 %v16531_v33, %v13755_v34  ;;  %v14454_v56 = vpop.f32.mrf.mxu1  ;;  %vm16536_vm7 = vmmov %vm16469_vm0  ;;  %v14460_v33 = vld [vmem:[#allocation3 + $0xc1] sm:$0xff]  ;;  %v7233_v28 = vadd.f32 %v16539_v22, %v16538_v15  ;;  %v8179_v15 = vld [vmem:[#allocation3 + $0xd0] sm:$0xff] }
 0x691   : > { %v8041_v29 = vpop.f32.mrf.mxu3  ;;  %vm16540_vm11 = vmmov %vm16469_vm0 }
 0x692   : > { %v14436_v60 = vadd.f32 %v8041_v29, %v7819_v25  ;;  %v7542_v16 = vadd.f32 %v14114_v36, %v7232_v44  ;;  %v8178_v36 = vld [vmem:[#allocation3 + $0xc8] sm:$0xff] }
 0x694   : > { %9977 = vmatmul.msk.f32.gmra.mxu2 %vm16469_vm0, %v14440_v17  ;;  %v14468_v44 = vpop.f32.mrf.mxu0 }
 0x696   : > { %10013 = vmatmul.msk.f32.gmra.mxu3 %vm16534_vm4, %v7900_v32  ;;  %v14466_v32 = vld [vmem:[#allocation3 + $0xc2] sm:$0xff]  ;;  %vm16541_vm4 = vmmov %vm16469_vm0 }
 0x697   : > { %10048 = vmatmul.msk.f32.gmra.mxu0 %vm16535_vm13, %v8209_v0  ;;  %v7734_v3 = vpop.f32.mrf.mxu2  ;;  %10069 = vmatmul.msk.f32.gmra.mxu1 %vm16536_vm7, %v14143_v58  ;;  %v7543_v58 = vadd.f32 %v14133_v47, %v7233_v28  ;;  %vm16542_vm13 = vmmov %vm16469_vm0  ;;  %v16544_v47 = vld [vmem:[#allocation72_spill] sm:$0xff] }
 0x698   : > { %v7820_v34 = vadd.f32 %v7734_v3, %v7542_v16  ;;  %v14474_v16 = vpop.f32.mrf.mxu1  ;;  %vm16543_vm7 = vmmov %vm16469_vm0 }
 0x699   : > { %v8044_v25 = vpop.f32.mrf.mxu3 }
 0x69a   : > { %v14458_v29 = vadd.f32 %v8044_v25, %v7820_v34  ;;  %v14478_v25 = vld [vmem:[#allocation3 + $0xca] sm:$0xff] }
 0x69c   : > { %16537 = vst [vmem:[#allocation27_spill] sm:$0xff] %v14458_v29  ;;  %9978 = vmatmul.msk.f32.gmra.mxu2 %vm16540_vm11, %v14460_v33  ;;  %v14482_v29 = vld [vmem:[#allocation3 + $0xc9] sm:$0xff]  ;;  %vm16545_vm11 = vnez %v16544_v47 }
 0x69d   : > { %v7902_v28 = vsel %vm16545_vm11, %v14478_v25, 0.0 }
 0x69e   : > { %10014 = vmatmul.msk.f32.gmra.mxu3 %vm16469_vm0, %v14466_v32 }
 0x69f   : > { %10049 = vmatmul.msk.f32.gmra.mxu0 %vm16541_vm4, %v8178_v36  ;;  %v7737_v0 = vpop.f32.mrf.mxu2  ;;  %10070 = vmatmul.msk.f32.gmra.mxu1 %vm16542_vm13, %v14162_v48  ;;  %v7234_v36 = vadd.f32 %v13813_v54, %v13799_v14  ;;  %v8211_v48 = vsel %vm16286_vm5, %v8179_v15, 0.0  ;;  %vm16546_vm4 = vmmov %vm16469_vm0  ;;  %v16549_v15 = vld [vmem:[#allocation58_spill] sm:$0xff] }
 0x6a0   : > { %v7821_v3 = vadd.f32 %v7737_v0, %v7543_v58  ;;  %v14496_v0 = vpop.f32.mrf.mxu0  ;;  %vm16547_vm13 = vmmov %vm16469_vm0 }
 0x6a1   : > { %v8047_v34 = vpop.f32.mrf.mxu3  ;;  %v7544_v58 = vadd.f32 %v14156_v57, %v7234_v36  ;;  %vm16550_vm5 = vmmov %vm16469_vm0  ;;  %v14510_v57 = vld [vmem:[#allocation3 + $0xd2] sm:$0xff] }
 0x6a2   : > { %v14480_v22 = vadd.f32 %v8047_v34, %v7821_v3  ;;  %v14500_v34 = vpop.f32.mrf.mxu1  ;;  %v8180_v36 = vld [vmem:[#allocation3 + $0xd8] sm:$0xff] }
 0x6a4   : > { %9979 = vmatmul.msk.f32.gmra.mxu2 %vm16543_vm7, %v14482_v29  ;;  %vm16551_vm7 = vmmov %vm16469_vm0 }
 0x6a6   : > { %10015 = vmatmul.msk.f32.gmra.mxu3 %vm16469_vm0, %v7902_v28  ;;  %v7235_v28 = vadd.f32 %v13837_v20, %v16549_v15  ;;  %v7236_v15 = vadd.f32 %v13871_v7, %v13843_v5 }
 0x6a7   : > { %10050 = vmatmul.msk.f32.gmra.mxu0 %vm16546_vm4, %v8211_v48  ;;  %v7740_v3 = vpop.f32.mrf.mxu2  ;;  %10071 = vmatmul.msk.f32.gmra.mxu1 %vm16547_vm13, %v14183_v12  ;;  %vm16552_vm4 = vmmov %vm16469_vm0 }
 0x6a8   : > { %v7822_v14 = vadd.f32 %v7740_v3, %v7544_v58  ;;  %v7545_v12 = vadd.f32 %v14181_v30, %v7235_v28  ;;  %v14520_v20 = vpop.f32.mrf.mxu0  ;;  %v14522_v3 = vld [vmem:[#allocation3 + $0xda] sm:$0xff]  ;;  %vm16553_vm13 = vmmov %vm16469_vm0  ;;  %v7546_v28 = vadd.f32 %v14202_v62, %v7236_v15  ;;  %v7547_v62 = vadd.f32 %v14232_v2, %v7237_v24 }
 0x6a9   : > { %v8050_v54 = vpop.f32.mrf.mxu3 }
 0x6aa   : > { %v14502_v47 = vadd.f32 %v8050_v54, %v7822_v14  ;;  %v8181_v14 = vld [vmem:[#allocation3 + $0xe0] sm:$0xff] }
 0x6ab   : > { %v14524_v54 = vld [vmem:[#allocation3 + $0xd9] sm:$0xff] }
 0x6ac   : > { %16548 = vst [vmem:[#allocation53_spill] sm:$0xff] %v14502_v47  ;;  %9980 = vmatmul.msk.f32.gmra.mxu2 %vm16550_vm5, %v14504_v13  ;;  %v14528_v47 = vpop.f32.mrf.mxu1  ;;  %vm16554_vm5 = vnez %v15856_v23 }
 0x6ad   : > { %v7904_v30 = vsel %vm16554_vm5, %v14522_v3, 0.0 }
 0x6ae   : > { %10016 = vmatmul.msk.f32.gmra.mxu3 %vm16551_vm7, %v14510_v57  ;;  %vm16555_vm7 = vmmov %vm16469_vm0 }
 0x6af   : > { %10051 = vmatmul.msk.f32.gmra.mxu0 %vm16469_vm0, %v8180_v36  ;;  %v7743_v48 = vpop.f32.mrf.mxu2  ;;  %10072 = vmatmul.msk.f32.gmra.mxu1 %vm16552_vm4, %v14200_v11  ;;  %v8213_v11 = vsel %vm16305_vm10, %v8181_v14, 0.0  ;;  %vm16556_vm4 = vmmov %vm16469_vm0  ;;  %v8182_v14 = vld [vmem:[#allocation3 + $0xe8] sm:$0xff] }
 0x6b0   : > { %v14516_v58 = vadd.f32 %v7743_v48, %v7545_v12  ;;  %v14544_v7 = vpop.f32.mrf.mxu0  ;;  %v14546_v12 = vld [vmem:[#allocation3 + $0xe1] sm:$0xff]  ;;  %vm16557_vm10 = vmmov %vm16469_vm0 }
 0x6b1   : > { %v14552_v48 = vld [vmem:[#allocation3 + $0xe2] sm:$0xff] }
 0x6b4   : > { %9981 = vmatmul.msk.f32.gmra.mxu2 %vm16553_vm13, %v14524_v54  ;;  %vm16558_vm13 = vmmov %vm16469_vm0 }
 0x6b6   : > { %10017 = vmatmul.msk.f32.gmra.mxu3 %vm16555_vm7, %v7904_v30  ;;  %vm16559_vm7 = vmmov %vm16469_vm0 }
 0x6b7   : > { %10052 = vmatmul.msk.f32.gmra.mxu0 %vm16469_vm0, %v8213_v11  ;;  %v7746_v36 = vpop.f32.mrf.mxu2  ;;  %10073 = vmatmul.msk.f32.gmra.mxu1 %vm16556_vm4, %v14221_v55  ;;  %v14558_v55 = vpop.f32.mrf.mxu1  ;;  %v14566_v11 = vld [vmem:[#allocation3 + $0xe9] sm:$0xff]  ;;  %vm16560_vm4 = vmmov %vm16469_vm0 }
 0x6b8   : > { %v14540_v5 = vadd.f32 %v7746_v36, %v7546_v28  ;;  %v7238_v28 = vadd.f32 %v13951_v1, %v13893_v40  ;;  %v8215_v36 = vsel %vm16324_vm1, %v8183_v53, 0.0  ;;  %v14577_v24 = vpop.f32.mrf.mxu0  ;;  %vm16565_vm1 = vmmov %vm16469_vm0  ;;  %v8184_v53 = vld [vmem:[#allocation3 + $0xf8] sm:$0xff] }
 0x6bc   : > { %9982 = vmatmul.msk.f32.gmra.mxu2 %vm16557_vm10, %v14546_v12  ;;  %vm16561_vm10 = vnez %v15977_v4  ;;  %v16590_v4 = vld [vmem:[#allocation5_spill] sm:$0xff] }
 0x6bd   : > { %v7906_v2 = vsel %vm16561_vm10, %v14564_v37, 0.0 }
 0x6be   : > { %10018 = vmatmul.msk.f32.gmra.mxu3 %vm16558_vm13, %v14552_v48  ;;  %vm16562_vm13 = vmmov %vm16469_vm0 }
 0x6bf   : > { %10053 = vmatmul.msk.f32.gmra.mxu0 %vm16559_vm7, %v8182_v14  ;;  %v7749_v15 = vpop.f32.mrf.mxu2  ;;  %10074 = vmatmul.msk.f32.gmra.mxu1 %vm16469_vm0, %v14238_v63  ;;  %vm16563_vm7 = vmmov %vm16469_vm0  ;;  %v7548_v63 = vadd.f32 %v14258_v61, %v7238_v28  ;;  %v14582_v40 = vpop.f32.mrf.mxu1  ;;  %v7549_v61 = vadd.f32 %v14285_v39, %v7239_v18 }
 0x6c0   : > { %v14560_v30 = vadd.f32 %v7749_v15, %v7547_v62  ;;  %v14588_v62 = vld [vmem:[#allocation3 + $0xf1] sm:$0xff]  ;;  %v14600_v28 = vpop.f32.mrf.mxu0 }
 0x6c1   : > { %v14594_v15 = vld [vmem:[#allocation3 + $0xf2] sm:$0xff] }
 0x6c2   : > { %16566 = vst [vmem:[#allocation65_spill] sm:$0xff] %v14594_v15 }
 0x6c4   : > { %9983 = vmatmul.msk.f32.gmra.mxu2 %vm16560_vm4, %v14566_v11  ;;  %vm16567_vm4 = vmmov %vm16469_vm0 }
 0x6c6   : > { %10019 = vmatmul.msk.f32.gmra.mxu3 %vm16562_vm13, %v7906_v2  ;;  %vm16568_vm13 = vmmov %vm16469_vm0 }
 0x6c7   : > { %10054 = vmatmul.msk.f32.gmra.mxu0 %vm16563_vm7, %v8215_v36  ;;  %v7752_v14 = vpop.f32.mrf.mxu2  ;;  %10075 = vmatmul.msk.f32.gmra.mxu1 %vm16469_vm0, %v14268_v6  ;;  %vm16570_vm7 = vmmov %vm16469_vm0  ;;  %v14606_v8 = vpop.f32.mrf.mxu1  ;;  %v7240_v36 = vadd.f32 %v14002_v19, %v13964_v27  ;;  %v16578_v27 = vld [vmem:[#allocation11_spill] sm:$0xff] }
 0x6c8   : > { %v14584_v1 = vadd.f32 %v7752_v14, %v7548_v63  ;;  %v16572_v63 = vld [vmem:[#allocation13_spill] sm:$0xff]  ;;  %v14627_v19 = vpop.f32.mrf.mxu0 }
 0x6c9   : > { %v8217_v18 = vsel %vm16459_vm9, %v16572_v63, 0.0  ;;  %vm16582_vm9 = vmmov %vm16469_vm0  ;;  %v16707_v23 = vld [vmem:[#allocation65_spill] sm:$0xff] }
 0x6ca   : > { %16564 = vst [vmem:[#allocation35_spill] sm:$0xff] %v14584_v1 }
 0x6cc   : > { %9984 = vmatmul.msk.f32.gmra.mxu2 %vm16565_vm1, %v14588_v62  ;;  %vm16571_vm1 = vnez %v16354_v10  ;;  %v14629_v10 = vld [vmem:[#allocation3 + $0x101] sm:$0xff] }
 0x6cd   : > { %v7908_v39 = vsel %vm16571_vm1, %v14006_v51, 0.0  ;;  %v16580_v51 = vld [vmem:[#allocation60_spill] sm:$0xff] }
 0x6ce   : > { %10020 = vmatmul.msk.f32.gmra.mxu3 %vm16567_vm4, %v14594_v15  ;;  %vm16574_vm4 = vmmov %vm16469_vm0 }
 0x6cf   : > { %10055 = vmatmul.msk.f32.gmra.mxu0 %vm16568_vm13, %v8184_v53  ;;  %v7755_v6 = vpop.f32.mrf.mxu2  ;;  %10076 = vmatmul.msk.f32.gmra.mxu1 %vm16570_vm7, %v14287_v49  ;;  %vm16575_vm13 = vmmov %vm16469_vm0  ;;  %v16576_v49 = vld [vmem:[#allocation97_spill] sm:$0xff]  ;;  %v14633_v63 = vpop.f32.mrf.mxu1 }
 0x6d0   : > { %v14602_v2 = vadd.f32 %v7755_v6, %v7549_v61  ;;  %v7550_v53 = vadd.f32 %v16576_v49, %v7240_v36  ;;  %vm16579_vm7 = vmmov %vm16469_vm0  ;;  %v16584_v36 = vld [vmem:[#allocation98_spill] sm:$0xff] }
 0x6d2   : > { %16569 = vst [vmem:[#allocation70_spill] sm:$0xff] %v14602_v2  ;;  %v16581_v2 = vld [vmem:[#allocation22_spill] sm:$0xff] }
 0x6d3   : > { %v7241_v14 = vadd.f32 %v16581_v2, %v16580_v51  ;;  %v14648_v2 = vld [vmem:[#allocation3 + $0x10a] sm:$0xff]  ;;  %v14650_v51 = vpop.f32.mrf.mxu0 }
 0x6d4   : > { %9985 = vmatmul.msk.f32.gmra.mxu2 %vm16469_vm0, %v14608_v31  ;;  %16589 = vst [vmem:[#allocation66_spill] sm:$0xff] %v14648_v2 }
 0x6d6   : > { %10021 = vmatmul.msk.f32.gmra.mxu3 %vm16574_vm4, %v7908_v39  ;;  %v14637_v39 = vld [vmem:[#allocation3 + $0x102] sm:$0xff]  ;;  %vm16585_vm4 = vmmov %vm16469_vm0 }
 0x6d7   : > { %10056 = vmatmul.msk.f32.gmra.mxu0 %vm16575_vm13, %v8217_v18  ;;  %v7758_v61 = vpop.f32.mrf.mxu2  ;;  %10077 = vmatmul.msk.f32.gmra.mxu1 %vm16579_vm7, %v16578_v27  ;;  %16583 = vst [vmem:[#allocation37_spill] sm:$0xff] %v14637_v39  ;;  %v7551_v18 = vadd.f32 %v14342_v59, %v7241_v14  ;;  %vm16588_vm13 = vmmov %vm16469_vm0  ;;  %v8187_v27 = vld [vmem:[#allocation3 + $0x110] sm:$0xff]  ;;  %v16593_v59 = vld [vmem:[#allocation71_spill] sm:$0xff] }
 0x6d8   : > { %v14623_v6 = vadd.f32 %v7758_v61, %v7550_v53  ;;  %v16587_v61 = vld [vmem:[#allocation16_spill] sm:$0xff]  ;;  %vm16592_vm7 = vmmov %vm16469_vm0 }
 0x6da   : > { %16577 = vst [vmem:[#allocation69_spill] sm:$0xff] %v14623_v6  ;;  %v14652_v6 = vld [vmem:[#allocation3 + $0x109] sm:$0xff] }
 0x6dc   : > { %9986 = vmatmul.msk.f32.gmra.mxu2 %vm16582_vm9, %v14629_v10  ;;  %vm16594_vm9 = vnez %v16593_v59  ;;  %v16598_v59 = vld [vmem:[#allocation79_spill] sm:$0xff] }
 0x6dd   : > { %v7910_v14 = vsel %vm16594_vm9, %v14648_v2, 0.0  ;;  %v16599_v2 = vld [vmem:[#allocation80_spill] sm:$0xff] }
 0x6de   : > { %10022 = vmatmul.msk.f32.gmra.mxu3 %vm16469_vm0, %v14637_v39  ;;  %v16591_v39 = vld [vmem:[#allocation77_spill] sm:$0xff]  ;;  %v7243_v15 = vadd.f32 %v16599_v2, %v16598_v59  ;;  %v16606_v59 = vld [vmem:[#allocation42_spill] sm:$0xff] }
 0x6df   : > { %10057 = vmatmul.msk.f32.gmra.mxu0 %vm16585_vm4, %v16584_v36  ;;  %v7761_v49 = vpop.f32.mrf.mxu2  ;;  %10078 = vmatmul.msk.f32.gmra.mxu1 %vm16588_vm13, %v16587_v61  ;;  %v7242_v1 = vadd.f32 %v16591_v39, %v16590_v4  ;;  %vm16596_vm4 = vmmov %vm16469_vm0  ;;  %v14666_v61 = vpop.f32.mrf.mxu1  ;;  %v8188_v39 = vld [vmem:[#allocation3 + $0x118] sm:$0xff]  ;;  %v16600_v36 = vld [vmem:[#allocation76_spill] sm:$0xff] }
 0x6e0   : > { %v14644_v53 = vadd.f32 %v7761_v49, %v7551_v18  ;;  %v8219_v18 = vsel %vm16353_vm6, %v8187_v27, 0.0  ;;  %vm16597_vm13 = vmmov %vm16469_vm0  ;;  %v14676_v27 = vpop.f32.mrf.mxu0 }
 0x6e1   : > { %v7552_v49 = vadd.f32 %v14367_v41, %v7242_v1  ;;  %vm16601_vm6 = vmmov %vm16469_vm0  ;;  %v7553_v41 = vadd.f32 %v14391_v42, %v7243_v15 }
 0x6e2   : > { %16586 = vst [vmem:[#allocation17_spill] sm:$0xff] %v14644_v53 }
 0x6e4   : > { %9987 = vmatmul.msk.f32.gmra.mxu2 %vm16592_vm7, %v14652_v6  ;;  %vm16602_vm7 = vmmov %vm16469_vm0 }
 0x6e6   : > { %10023 = vmatmul.msk.f32.gmra.mxu3 %vm16469_vm0, %v7910_v14 }
 0x6e7   : > { %10058 = vmatmul.msk.f32.gmra.mxu0 %vm16596_vm4, %v8219_v18  ;;  %v7764_v53 = vpop.f32.mrf.mxu2  ;;  %10079 = vmatmul.msk.f32.gmra.mxu1 %vm16597_vm13, %v14352_v9  ;;  %v14680_v14 = vpop.f32.mrf.mxu1  ;;  %v16604_v9 = vld [vmem:[#allocation43_spill] sm:$0xff]  ;;  %vm16608_vm4 = vmmov %vm16469_vm0  ;;  %v16613_v18 = vld [vmem:[#allocation81_spill] sm:$0xff] }
 0x6e8   : > { %v14668_v4 = vadd.f32 %v7764_v53, %v7552_v49  ;;  %v8778_v2 = vsel %vm16378_vm3, %v16604_v9, 0.0  ;;  %v16607_v49 = vld [vmem:[#allocation25_spill] sm:$0xff]  ;;  %vm16610_vm13 = vmmov %vm16469_vm0 }
 0x6e9   : > { %vm16614_vm3 = vmmov %vm16469_vm0 }
 0x6ec   : > { %10100 = vmatmul.msk.f32.vlgmr.msra.gmra.mxu2 %vm16601_vm6, %v16600_v36  ;;  %v7244_v36 = vadd.f32 %v16607_v49, %v16606_v59  ;;  %vm16615_vm6 = vmmov %vm16469_vm0 }
 0x6ef   : > { %10059 = vmatmul.msk.f32.gmra.mxu0 %vm16602_vm7, %v8188_v39  ;;  %v7767_v1 = vpop.f32.mrf.mxu2  ;;  %10080 = vmatmul.msk.f32.gmra.mxu1 %vm16469_vm0, %v14373_v52  ;;  %v7554_v39 = vadd.f32 %v14419_v43, %v7244_v36  ;;  %v16611_v52 = vld [vmem:[#allocation24_spill] sm:$0xff]  ;;  %v16616_v43 = vld [vmem:[#allocation82_spill] sm:$0xff]  ;;  %v16618_v36 = vld [vmem:[#allocation45_spill] sm:$0xff] }
 0x6f0   : > { %v14682_v53 = vadd.f32 %v7767_v1, %v7553_v41  ;;  %v14697_v41 = vpop.f32.mrf.mxu1  ;;  %v16612_v1 = vld [vmem:[#allocation85_spill] sm:$0xff]  ;;  %vm16620_vm7 = vmmov %vm16469_vm0 }
 0x6f2   : > { %16603 = vst [vmem:[#allocation59_spill] sm:$0xff] %v14682_v53  ;;  %v7245_v53 = vadd.f32 %v16612_v1, %v16611_v52  ;;  %v16622_v1 = vld [vmem:[#allocation34_spill] sm:$0xff] }
 0x6f4   : > { %10101 = vmatmul.msk.f32.gmra.mxu2 %vm16608_vm4, %v8778_v2  ;;  %v7555_v9 = vadd.f32 %v14454_v56, %v7245_v53  ;;  %vm16625_vm4 = vmmov %vm16469_vm0 }
 0x6f7   : > { %v7770_v42 = vpop.f32.mrf.mxu2  ;;  %10081 = vmatmul.msk.f32.gmra.mxu1 %vm16610_vm13, %v14395_v46  ;;  %v8780_v46 = vsel %vm16392_vm14, %v16616_v43, 0.0  ;;  %vm16624_vm14 = vmmov %vm16469_vm0 }
 0x6f8   : > { %v14693_v15 = vadd.f32 %v7770_v42, %v7554_v39  ;;  %v16619_v39 = vld [vmem:[#allocation56_spill] sm:$0xff] }
 0x6f9   : > { %v7246_v42 = vadd.f32 %v16619_v39, %v16618_v36  ;;  %v16627_v36 = vld [vmem:[#allocation10_spill] sm:$0xff]  ;;  %v16629_v39 = vld [vmem:[#allocation83_spill] sm:$0xff] }
 0x6fa   : > { %16609 = vst [vmem:[#allocation28_spill] sm:$0xff] %v14693_v15  ;;  %v14713_v15 = vpop.f32.mrf.mxu1  ;;  %vm16628_vm13 = vnez %v16627_v36 }
 0x6fb   : > { %v7556_v52 = vadd.f32 %v14474_v16, %v7246_v42  ;;  %v16626_v16 = vld [vmem:[#allocation84_spill] sm:$0xff]  ;;  %v16630_v42 = vld [vmem:[#allocation89_spill] sm:$0xff] }
 0x6fc   : > { %10102 = vmatmul.msk.f32.gmra.mxu2 %vm16614_vm3, %v16613_v18  ;;  %vm16631_vm3 = vmmov %vm16469_vm0 }
 0x6ff   : > { %v7773_v59 = vpop.f32.mrf.mxu2  ;;  %10082 = vmatmul.msk.f32.gmra.mxu1 %vm16615_vm6, %v14415_v35  ;;  %v16621_v35 = vld [vmem:[#allocation55_spill] sm:$0xff]  ;;  %vm16632_vm6 = vmmov %vm16469_vm0 }
 0x700   : > { %v14704_v2 = vadd.f32 %v7773_v59, %v7555_v9  ;;  %v7247_v18 = vadd.f32 %v16622_v1, %v16621_v35  ;;  %v16623_v9 = vld [vmem:[#allocation57_spill] sm:$0xff] }
 0x702   : > { %v7557_v59 = vadd.f32 %v14500_v34, %v7247_v18  ;;  %v14726_v43 = vpop.f32.mrf.mxu1  ;;  %v16634_v18 = vld [vmem:[#allocation67_spill] sm:$0xff] }
 0x704   : > { %10103 = vmatmul.msk.f32.gmra.mxu2 %vm16620_vm7, %v8780_v46  ;;  %vm16636_vm7 = vmmov %vm16469_vm0 }
 0x707   : > { %v7776_v56 = vpop.f32.mrf.mxu2  ;;  %10083 = vmatmul.msk.f32.gmra.mxu1 %vm16469_vm0, %v14440_v17  ;;  %v8782_v17 = vsel %vm16628_vm13, %v16626_v16, 0.0  ;;  %vm16643_vm13 = vmmov %vm16469_vm0 }
 0x708   : > { %v14717_v53 = vadd.f32 %v7776_v56, %v7556_v52  ;;  %v7248_v52 = vadd.f32 %v16630_v42, %v16629_v39  ;;  %v16638_v39 = vld [vmem:[#allocation12_spill] sm:$0xff]  ;;  %v16640_v42 = vld [vmem:[#allocation86_spill] sm:$0xff] }
 0x70a   : > { %v7558_v56 = vadd.f32 %v14528_v47, %v7248_v52  ;;  %v14739_v35 = vpop.f32.mrf.mxu1  ;;  %v16641_v52 = vld [vmem:[#allocation7_spill] sm:$0xff] }
 0x70c   : > { %10104 = vmatmul.msk.f32.gmra.mxu2 %vm16624_vm14, %v16623_v9  ;;  %vm16639_vm14 = vnez %v16638_v39 }
 0x70f   : > { %v7779_v49 = vpop.f32.mrf.mxu2  ;;  %10084 = vmatmul.msk.f32.gmra.mxu1 %vm16625_vm4, %v14460_v33  ;;  %v16633_v33 = vld [vmem:[#allocation52_spill] sm:$0xff]  ;;  %vm16642_vm4 = vmmov %vm16469_vm0 }
 0x710   : > { %v14728_v46 = vadd.f32 %v7779_v49, %v7557_v59  ;;  %v7249_v9 = vadd.f32 %v16634_v18, %v16633_v33  ;;  %v16635_v59 = vld [vmem:[#allocation88_spill] sm:$0xff]  ;;  %v16645_v18 = vld [vmem:[#allocation49_spill] sm:$0xff] }
 0x712   : > { %v7559_v49 = vadd.f32 %v14558_v55, %v7249_v9  ;;  %v14754_v47 = vpop.f32.mrf.mxu1 }
 0x714   : > { %10105 = vmatmul.msk.f32.gmra.mxu2 %vm16631_vm3, %v8782_v17  ;;  %v16637_v17 = vld [vmem:[#allocation87_spill] sm:$0xff]  ;;  %vm16647_vm3 = vmmov %vm16469_vm0 }
 0x717   : > { %v7782_v34 = vpop.f32.mrf.mxu2  ;;  %10085 = vmatmul.msk.f32.gmra.mxu1 %vm16632_vm6, %v14482_v29  ;;  %v8784_v29 = vsel %vm16639_vm14, %v16637_v17, 0.0  ;;  %vm16648_vm6 = vmmov %vm16469_vm0 }
 0x718   : > { %v14741_v1 = vadd.f32 %v7782_v34, %v7558_v56  ;;  %v7250_v56 = vadd.f32 %v16641_v52, %v16640_v42  ;;  %v16652_v42 = vld [vmem:[#allocation91_spill] sm:$0xff]  ;;  %v16653_v52 = vld [vmem:[#allocation14_spill] sm:$0xff]  ;;  %vm16654_vm14 = vmmov %vm16469_vm0 }
 0x71a   : > { %v7560_v34 = vadd.f32 %v14582_v40, %v7250_v56  ;;  %v16649_v40 = vld [vmem:[#allocation90_spill] sm:$0xff]  ;;  %v7252_v56 = vadd.f32 %v16653_v52, %v16652_v42  ;;  %v16663_v42 = vld [vmem:[#allocation92_spill] sm:$0xff] }
 0x71b   : > { %v7254_v52 = vadd.f32 %v14362_v50, %v16663_v42 }
 0x71c   : > { %10106 = vmatmul.msk.f32.gmra.mxu2 %vm16636_vm7, %v16635_v59  ;;  %v14769_v59 = vpop.f32.mrf.mxu1 }
 0x71f   : > { %v7785_v16 = vpop.f32.mrf.mxu2  ;;  %10086 = vmatmul.msk.f32.gmra.mxu1 %vm16469_vm0, %v14504_v13  ;;  %v16644_v13 = vld [vmem:[#allocation39_spill] sm:$0xff] }
 0x720   : > { %v14750_v36 = vadd.f32 %v7785_v16, %v7559_v49  ;;  %v7251_v9 = vadd.f32 %v16645_v18, %v16644_v13  ;;  %v16646_v49 = vld [vmem:[#allocation48_spill] sm:$0xff]  ;;  %v16656_v18 = vld [vmem:[#allocation47_spill] sm:$0xff] }
 0x722   : > { %v7561_v16 = vadd.f32 %v14606_v8, %v7251_v9 }
 0x724   : > { %10107 = vmatmul.msk.f32.gmra.mxu2 %vm16642_vm4, %v8784_v29  ;;  %v16650_v29 = vld [vmem:[#allocation15_spill] sm:$0xff]  ;;  %vm16658_vm4 = vmmov %vm16469_vm0 }
 0x725   : > { %vm16651_vm7 = vnez %v16650_v29  ;;  %v16660_v29 = vld [vmem:[#allocation94_spill] sm:$0xff] }
 0x727   : > { %v7788_v55 = vpop.f32.mrf.mxu2  ;;  %10087 = vmatmul.msk.f32.gmra.mxu1 %vm16643_vm13, %v14524_v54  ;;  %v8786_v54 = vsel %vm16651_vm7, %v16649_v40, 0.0  ;;  %vm16659_vm13 = vmmov %vm16469_vm0 }
 0x728   : > { %v14763_v33 = vadd.f32 %v7788_v55, %v7560_v34  ;;  %v7562_v34 = vadd.f32 %v14633_v63, %v7252_v56  ;;  %v14785_v55 = vpop.f32.mrf.mxu1  ;;  %v7564_v56 = vadd.f32 %v14680_v14, %v7254_v52  ;;  %vm16665_vm7 = vmmov %vm16469_vm0  ;;  %v16669_v14 = vld [vmem:[#allocation29_spill] sm:$0xff]  ;;  %v16675_v52 = vld [vmem:[#allocation32_spill] sm:$0xff] }
 0x72c   : > { %10108 = vmatmul.msk.f32.gmra.mxu2 %vm16647_vm3, %v16646_v49  ;;  %v16657_v49 = vld [vmem:[#allocation36_spill] sm:$0xff] }
 0x72f   : > { %v7791_v17 = vpop.f32.mrf.mxu2  ;;  %10088 = vmatmul.msk.f32.gmra.mxu1 %vm16648_vm6, %v14546_v12  ;;  %v16655_v12 = vld [vmem:[#allocation54_spill] sm:$0xff]  ;;  %vm16664_vm6 = vmmov %vm16469_vm0 }
 0x730   : > { %v14774_v39 = vadd.f32 %v7791_v17, %v7561_v16  ;;  %v7253_v9 = vadd.f32 %v16656_v18, %v16655_v12  ;;  %v14796_v40 = vpop.f32.mrf.mxu1  ;;  %v16667_v18 = vld [vmem:[#allocation95_spill] sm:$0xff] }
 0x732   : > { %v7563_v16 = vadd.f32 %v14666_v61, %v7253_v9 }
 0x734   : > { %10109 = vmatmul.msk.f32.gmra.mxu2 %vm16469_vm0, %v8786_v54  ;;  %v16661_v54 = vld [vmem:[#allocation18_spill] sm:$0xff] }
 0x735   : > { %vm16662_vm3 = vnez %v16661_v54 }
 0x737   : > { %v7794_v8 = vpop.f32.mrf.mxu2  ;;  %10089 = vmatmul.msk.f32.gmra.mxu1 %vm16654_vm14, %v14566_v11  ;;  %v8788_v11 = vsel %vm16662_vm3, %v16660_v29, 0.0  ;;  %vm16668_vm14 = vmmov %vm16469_vm0 }
 0x738   : > { %v14787_v13 = vadd.f32 %v7794_v8, %v7562_v34  ;;  %v14813_v8 = vpop.f32.mrf.mxu1  ;;  %vm16677_vm3 = vmmov %vm16469_vm0 }
 0x73c   : > { %10110 = vmatmul.msk.f32.gmra.mxu2 %vm16658_vm4, %v16657_v49  ;;  %vm16672_vm4 = vmmov %vm16469_vm0 }
 0x73f   : > { %v7797_v17 = vpop.f32.mrf.mxu2  ;;  %10090 = vmatmul.msk.f32.gmra.mxu1 %vm16659_vm13, %v14588_v62  ;;  %v16666_v62 = vld [vmem:[#allocation93_spill] sm:$0xff]  ;;  %vm16673_vm13 = vmmov %vm16469_vm0 }
 0x740   : > { %v14798_v63 = vadd.f32 %v7797_v17, %v7563_v16  ;;  %v7255_v12 = vadd.f32 %v14385_v45, %v16666_v62  ;;  %v16671_v17 = vld [vmem:[#allocation9_spill] sm:$0xff]  ;;  %v14829_v54 = vpop.f32.mrf.mxu1 }
 0x741   : > { %v7256_v29 = vadd.f32 %v14411_v26, %v16671_v17  ;;  %v16683_v17 = vld [vmem:[#allocation33_spill] sm:$0xff] }
 0x742   : > { %v7565_v50 = vadd.f32 %v14697_v41, %v7255_v12  ;;  %v16678_v12 = vld [vmem:[#allocation20_spill] sm:$0xff] }
 0x743   : > { %v7566_v45 = vadd.f32 %v14713_v15, %v7256_v29  ;;  %v8435_v29 = vadd.f32 %v14496_v0, %v16683_v17 }
 0x744   : > { %10111 = vmatmul.msk.f32.gmra.mxu2 %vm16664_vm6, %v8788_v11  ;;  %vm16681_vm6 = vmmov %vm16469_vm0 }
 0x747   : > { %v7800_v61 = vpop.f32.mrf.mxu2  ;;  %10091 = vmatmul.msk.f32.gmra.mxu1 %vm16665_vm7, %v14608_v31  ;;  %v8790_v31 = vsel %vm16464_vm12, %v16669_v14, 0.0  ;;  %vm16676_vm12 = vmmov %vm16469_vm0 }
 0x748   : > { %v14809_v34 = vadd.f32 %v7800_v61, %v7564_v56  ;;  %v8497_v56 = vld [vmem:[#allocation3 + $0x111] sm:$0xff]  ;;  %v14842_v61 = vpop.f32.mrf.mxu1  ;;  %vm16682_vm7 = vmmov %vm16469_vm0 }
 0x74c   : > { %10112 = vmatmul.msk.f32.gmra.mxu2 %vm16469_vm0, %v16667_v18 }
 0x74f   : > { %v7803_v9 = vpop.f32.mrf.mxu2  ;;  %10092 = vmatmul.msk.f32.gmra.mxu1 %vm16668_vm14, %v14629_v10  ;;  %v16674_v10 = vld [vmem:[#allocation96_spill] sm:$0xff] }
 0x750   : > { %v14820_v49 = vadd.f32 %v7803_v9, %v7565_v50  ;;  %v7257_v42 = vadd.f32 %v14438_v38, %v16674_v10  ;;  %v16680_v50 = vld [vmem:[#allocation30_spill] sm:$0xff]  ;;  %v8498_v9 = vld [vmem:[#allocation3 + $0x119] sm:$0xff]  ;;  %v14854_v16 = vpop.f32.mrf.mxu1 }
 0x751   : > { %v7258_v38 = vadd.f32 %v14468_v44, %v16680_v50  ;;  %v8713_v44 = vadd.f32 %v14754_v47, %v8435_v29  ;;  %v16689_v47 = vld [vmem:[#allocation74_spill] sm:$0xff] }
 0x752   : > { %v7567_v26 = vadd.f32 %v14726_v43, %v7257_v42  ;;  %v16686_v42 = vld [vmem:[#allocation73_spill] sm:$0xff] }
 0x753   : > { %v7568_v43 = vadd.f32 %v14739_v35, %v7258_v38  ;;  %v8363_v38 = vpop.f32.mrf.mxu0 }
 0x754   : > { %10113 = vmatmul.msk.f32.gmra.mxu2 %vm16672_vm4, %v8790_v31 }
 0x757   : > { %v7806_v41 = vpop.f32.mrf.mxu2  ;;  %10093 = vmatmul.msk.f32.gmra.mxu1 %vm16673_vm13, %v14652_v6  ;;  %v8792_v6 = vsel %vm16483_vm2, %v16678_v12, 0.0  ;;  %vm16685_vm2 = vmmov %vm16469_vm0  ;;  %vm9091_vm0 = vcmask 7168   ;;  %v8053_v12 = vpop.f32.mrf.mxu3 }
 0x758   : > { %v14833_v11 = vadd.f32 %v7806_v41, %v7566_v45  ;;  %v16684_v45 = vld [vmem:[#allocation44_spill] sm:$0xff]  ;;  %vm16690_vm4 = vmmov %vm16685_vm2 }
 0x759   : > { %v14865_v41 = vld [vmem:[#allocation4] ss:$0 sm:$0xff]  ;;  %vm16693_vm13 = vmmov %vm16685_vm2 }
 0x75c   : > { %10114 = vmatmul.msk.f32.gmra.mxu2 %vm16676_vm12, %v16675_v52  ;;  %v16687_v52 = vld [vmem:[#allocation40_spill] sm:$0xff]  ;;  %vm16696_vm12 = vmmov %vm16685_vm2 }
 0x75d   : > { %vm16688_vm14 = vnez %v16687_v52 }
 0x75f   : > { %v7809_v62 = vpop.f32.mrf.mxu2  ;;  %10094 = vmatmul.msk.f32.gmra.mxu1 %vm16677_vm3, %v8497_v56  ;;  %v8794_v56 = vsel %vm16688_vm14, %v16686_v42, 0.0  ;;  %v8366_v42 = vpop.f32.mrf.mxu0  ;;  %vm16700_vm3 = vmmov %vm16685_vm2 }
 0x760   : > { %v14844_v15 = vadd.f32 %v7809_v62, %v7567_v26  ;;  %v8436_v26 = vadd.f32 %v14520_v20, %v16689_v47  ;;  %v8641_v20 = vpop.f32.mrf.mxu1  ;;  %vm16717_vm14 = vmmov %vm16685_vm2 }
 0x762   : > { %v8714_v62 = vadd.f32 %v14769_v59, %v8436_v26 }
 0x764   : > { %10115 = vmatmul.msk.f32.gmra.mxu2 %vm16681_vm6, %v8792_v6  ;;  %vm16704_vm6 = vmmov %vm16685_vm2 }
 0x767   : > { %v7812_v14 = vpop.f32.mrf.mxu2  ;;  %10095 = vmatmul.msk.f32.gmra.mxu1 %vm16682_vm7, %v8498_v9  ;;  %v16691_v9 = vld [vmem:[#allocation46_spill] sm:$0xff]  ;;  %vm16706_vm7 = vmmov %vm16685_vm2 }
 0x768   : > { %v14856_v31 = vadd.f32 %v7812_v14, %v7568_v43  ;;  %v8437_v43 = vadd.f32 %v14544_v7, %v16691_v9  ;;  %v16692_v14 = vld [vmem:[#allocation63_spill] sm:$0xff]  ;;  %v8644_v52 = vpop.f32.mrf.mxu1 }
 0x76a   : > { %v8715_v17 = vadd.f32 %v14785_v55, %v8437_v43 }
 0x76c   : > { %10116 = vmatmul.msk.f32.gmra.mxu2 %vm16685_vm2, %v16684_v45  ;;  %v8056_v45 = vpop.f32.mrf.mxu3 }
 0x76f   : > { %v8927_v10 = vpop.f32.mrf.mxu2 }
 0x770   : > { %v9023_v35 = vadd.f32 %v8927_v10, %v8713_v44 }
 0x772   : > { %v9059_v0 = vadd.f32 %v14865_v41, %v9023_v35  ;;  %v8796_v35 = vsel %vm16520_vm15, %v14434_v21, 0.0  ;;  %v8439_v21 = vadd.f32 %v14600_v28, %v14436_v60  ;;  %vm16697_vm15 = vmmov %vm16685_vm2 }
 0x774   : > { %9092 = vst.msk [vmem:[%s14870_s6] sm:$0xff] %vm9091_vm0, %v9059_v0  ;;  %10117 = vmatmul.msk.f32.gmra.mxu2 %vm16690_vm4, %v8794_v56  ;;  %v16695_v0 = vld [vmem:[#allocation78_spill] sm:$0xff] }
 0x775   : > { %v8438_v7 = vadd.f32 %v14577_v24, %v16695_v0  ;;  %v8717_v24 = vadd.f32 %v14813_v8, %v8439_v21  ;;  %v8133_v21 = vadd.f32 %v8053_v12, %v14516_v58 }
 0x777   : > { %v8930_v18 = vpop.f32.mrf.mxu2  ;;  %v8716_v55 = vadd.f32 %v14796_v40, %v8438_v7 }
 0x778   : > { %v9024_v6 = vadd.f32 %v8930_v18, %v8714_v62  ;;  %v8059_v62 = vpop.f32.mrf.mxu3  ;;  %v8369_v18 = vpop.f32.mrf.mxu0 }
 0x77a   : > { %v9060_v50 = vadd.f32 %v14865_v41, %v9024_v6 }
 0x77c   : > { %9093 = vst.msk [vmem:[%s14870_s6 + $0x8] sm:$0xff] %vm9091_vm0, %v9060_v50  ;;  %10118 = vmatmul.msk.f32.gmra.mxu2 %vm16693_vm13, %v16692_v14  ;;  %v8647_v50 = vpop.f32.mrf.mxu1  ;;  %v8798_v14 = vsel %vm16533_vm8, %v14478_v25, 0.0  ;;  %v8441_v25 = vadd.f32 %v14650_v51, %v14480_v22  ;;  %vm16701_vm8 = vmmov %vm16685_vm2 }
 0x77f   : > { %v8933_v29 = vpop.f32.mrf.mxu2 }
 0x780   : > { %v9025_v59 = vadd.f32 %v8933_v29, %v8715_v17  ;;  %v16699_v17 = vld [vmem:[#allocation27_spill] sm:$0xff] }
 0x781   : > { %v8440_v60 = vadd.f32 %v14627_v19, %v16699_v17  ;;  %v8719_v19 = vadd.f32 %v14842_v61, %v8441_v25 }
 0x782   : > { %v9061_v44 = vadd.f32 %v14865_v41, %v9025_v59  ;;  %v8372_v59 = vpop.f32.mrf.mxu0 }
 0x783   : > { %v8718_v28 = vadd.f32 %v14829_v54, %v8440_v60 }
 0x784   : > { %9094 = vst.msk [vmem:[%s14870_s6 + $0x10] sm:$0xff] %vm9091_vm0, %v9061_v44  ;;  %10119 = vmatmul.msk.f32.gmra.mxu2 %vm16696_vm12, %v8796_v35  ;;  %v8650_v10 = vpop.f32.mrf.mxu1 }
 0x787   : > { %v8936_v56 = vpop.f32.mrf.mxu2 }
 0x788   : > { %v9026_v47 = vadd.f32 %v8936_v56, %v8716_v55 }
 0x78a   : > { %v9062_v26 = vadd.f32 %v14865_v41, %v9026_v47  ;;  %v8375_v55 = vpop.f32.mrf.mxu0  ;;  %v8800_v47 = vsel %vm16545_vm11, %v14522_v3, 0.0  ;;  %vm16705_vm11 = vmmov %vm16685_vm2 }
 0x78c   : > { %9095 = vst.msk [vmem:[%s14870_s6 + $0x18] sm:$0xff] %vm9091_vm0, %v9062_v26  ;;  %10120 = vmatmul.msk.f32.gmra.mxu2 %vm16697_vm15, %v14466_v32  ;;  %v8062_v32 = vpop.f32.mrf.mxu3  ;;  %v16703_v26 = vld [vmem:[#allocation53_spill] sm:$0xff] }
 0x78d   : > { %v8442_v22 = vadd.f32 %v14676_v27, %v16703_v26 }
 0x78f   : > { %v8939_v6 = vpop.f32.mrf.mxu2  ;;  %v8720_v51 = vadd.f32 %v14854_v16, %v8442_v22  ;;  %v8134_v16 = vadd.f32 %v8056_v45, %v14540_v5 }
 0x790   : > { %v9027_v40 = vadd.f32 %v8939_v6, %v8717_v24 }
 0x791   : > { %v8444_v60 = vadd.f32 %v8366_v42, %v8134_v16  ;;  %v16714_v16 = vld [vmem:[#allocation69_spill] sm:$0xff] }
 0x792   : > { %v9063_v9 = vadd.f32 %v14865_v41, %v9027_v40  ;;  %v8378_v3 = vpop.f32.mrf.mxu0 }
 0x794   : > { %9096 = vst.msk [vmem:[%s14870_s6 + $0x20] sm:$0xff] %vm9091_vm0, %v9063_v9  ;;  %10121 = vmatmul.msk.f32.gmra.mxu2 %vm16700_vm3, %v8798_v14  ;;  %v8065_v35 = vpop.f32.mrf.mxu3  ;;  %v8443_v9 = vadd.f32 %v8363_v38, %v8133_v21  ;;  %v8802_v38 = vsel %vm16554_vm5, %v14564_v37, 0.0  ;;  %vm16708_vm5 = vmmov %vm16685_vm2 }
 0x796   : > { %v8721_v27 = vadd.f32 %v8641_v20, %v8443_v9  ;;  %v16712_v9 = vld [vmem:[#allocation37_spill] sm:$0xff] }
 0x797   : > { %v8942_v8 = vpop.f32.mrf.mxu2 }
 0x798   : > { %v9028_v29 = vadd.f32 %v8942_v8, %v8718_v28  ;;  %v8135_v8 = vadd.f32 %v8059_v62, %v14560_v30 }
 0x79a   : > { %v9064_v44 = vadd.f32 %v14865_v41, %v9028_v29  ;;  %v8381_v20 = vpop.f32.mrf.mxu0 }
 0x79c   : > { %9097 = vst.msk [vmem:[%s14870_s6 + $0x28] sm:$0xff] %vm9091_vm0, %v9064_v44  ;;  %10122 = vmatmul.msk.f32.gmra.mxu2 %vm16701_vm8, %v14510_v57  ;;  %v8653_v57 = vpop.f32.mrf.mxu1  ;;  %v8068_v6 = vpop.f32.mrf.mxu3  ;;  %v8445_v44 = vadd.f32 %v8369_v18, %v8135_v8 }
 0x79e   : > { %v8723_v42 = vadd.f32 %v8647_v50, %v8445_v44 }
 0x79f   : > { %v8945_v0 = vpop.f32.mrf.mxu2 }
 0x7a0   : > { %v9029_v54 = vadd.f32 %v8945_v0, %v8719_v19  ;;  %v16709_v19 = vld [vmem:[#allocation35_spill] sm:$0xff] }
 0x7a2   : > { %v9065_v7 = vadd.f32 %v14865_v41, %v9029_v54  ;;  %v8772_v54 = vld [vmem:[#allocation3 + $0xfa] sm:$0xff]  ;;  %v8384_v30 = vpop.f32.mrf.mxu0 }
 0x7a3   : > { %v8804_v18 = vsel %vm16561_vm10, %v8772_v54, 0.0  ;;  %vm16713_vm10 = vmmov %vm16685_vm2 }
 0x7a4   : > { %9098 = vst.msk [vmem:[%s14870_s6 + $0x30] sm:$0xff] %vm9091_vm0, %v9065_v7  ;;  %10123 = vmatmul.msk.f32.gmra.mxu2 %vm16704_vm6, %v8800_v47  ;;  %v8656_v43 = vpop.f32.mrf.mxu1  ;;  %v8071_v12 = vpop.f32.mrf.mxu3 }
 0x7a7   : > { %v8948_v61 = vpop.f32.mrf.mxu2 }
 0x7a8   : > { %v9030_v24 = vadd.f32 %v8948_v61, %v8720_v51  ;;  %v16711_v51 = vld [vmem:[#allocation70_spill] sm:$0xff] }
 0x7aa   : > { %v9066_v40 = vadd.f32 %v14865_v41, %v9030_v24  ;;  %v8387_v24 = vpop.f32.mrf.mxu0 }
 0x7ac   : > { %9099 = vst.msk [vmem:[%s14870_s6 + $0x38] sm:$0xff] %vm9091_vm0, %v9066_v40  ;;  %10124 = vmatmul.msk.f32.gmra.mxu2 %vm16705_vm11, %v14552_v48  ;;  %v8722_v48 = vadd.f32 %v8644_v52, %v8444_v60  ;;  %v8659_v45 = vpop.f32.mrf.mxu1  ;;  %v8074_v37 = vpop.f32.mrf.mxu3  ;;  %v8136_v52 = vadd.f32 %v8062_v32, %v16709_v19  ;;  %v8137_v32 = vadd.f32 %v8065_v35, %v16711_v51  ;;  %v16722_v51 = vld [vmem:[#allocation59_spill] sm:$0xff] }
 0x7ae   : > { %v8446_v47 = vadd.f32 %v8372_v59, %v8136_v52  ;;  %v8447_v40 = vadd.f32 %v8375_v55, %v8137_v32  ;;  %v8776_v52 = vld [vmem:[#allocation3 + $0x11a] sm:$0xff] }
 0x7af   : > { %v8951_v14 = vpop.f32.mrf.mxu2 }
 0x7b0   : > { %v9031_v17 = vadd.f32 %v8951_v14, %v8721_v27  ;;  %v8724_v26 = vadd.f32 %v8650_v10, %v8446_v47  ;;  %v8725_v27 = vadd.f32 %v8653_v57, %v8447_v40  ;;  %v8138_v10 = vadd.f32 %v8068_v6, %v16714_v16 }
 0x7b2   : > { %v9067_v58 = vadd.f32 %v14865_v41, %v9031_v17  ;;  %v8448_v55 = vadd.f32 %v8378_v3, %v8138_v10 }
 0x7b4   : > { %9100 = vst.msk [vmem:[%s14870_s6 + $0x40] sm:$0xff] %vm9091_vm0, %v9067_v58  ;;  %10125 = vmatmul.msk.f32.gmra.mxu2 %vm16706_vm7, %v8802_v38  ;;  %v8662_v7 = vpop.f32.mrf.mxu1  ;;  %v8077_v50 = vpop.f32.mrf.mxu3  ;;  %v16715_v38 = vld [vmem:[#allocation66_spill] sm:$0xff]  ;;  %v8726_v8 = vadd.f32 %v8656_v43, %v8448_v55  ;;  %v8140_v43 = vadd.f32 %v8074_v37, %v14668_v4 }
 0x7b5   : > { %v8141_v32 = vadd.f32 %v8077_v50, %v16722_v51 }
 0x7b7   : > { %v8954_v28 = vpop.f32.mrf.mxu2  ;;  %v8451_v40 = vadd.f32 %v8387_v24, %v8141_v32 }
 0x7b8   : > { %v9032_v5 = vadd.f32 %v8954_v28, %v8722_v48  ;;  %v8806_v48 = vsel %vm16571_vm1, %v16715_v38, 0.0  ;;  %v8390_v28 = vpop.f32.mrf.mxu0  ;;  %vm16719_vm1 = vmmov %vm16685_vm2 }
 0x7b9   : > { %vm16721_vm4 = vmmov %vm16719_vm1 }
 0x7ba   : > { %v9068_v29 = vadd.f32 %v14865_v41, %v9032_v5 }
 0x7bc   : > { %9101 = vst.msk [vmem:[%s14870_s6 + $0x48] sm:$0xff] %vm9091_vm0, %v9068_v29  ;;  %10126 = vmatmul.msk.f32.gmra.mxu2 %vm16708_vm5, %v16707_v23  ;;  %v8665_v59 = vpop.f32.mrf.mxu1  ;;  %v8080_v58 = vpop.f32.mrf.mxu3  ;;  %v16718_v29 = vld [vmem:[#allocation17_spill] sm:$0xff]  ;;  %v8775_v23 = vld [vmem:[#allocation3 + $0x112] sm:$0xff] }
 0x7bd   : > { %v8139_v6 = vadd.f32 %v8071_v12, %v16718_v29 }
 0x7bf   : > { %v8957_v25 = vpop.f32.mrf.mxu2  ;;  %v8449_v19 = vadd.f32 %v8381_v20, %v8139_v6 }
 0x7c0   : > { %v9033_v0 = vadd.f32 %v8957_v25, %v8723_v42 }
 0x7c1   : > { %v8727_v3 = vadd.f32 %v8659_v45, %v8449_v19 }
 0x7c2   : > { %v9069_v62 = vadd.f32 %v14865_v41, %v9033_v0  ;;  %v8393_v0 = vpop.f32.mrf.mxu0 }
 0x7c4   : > { %9102 = vst.msk [vmem:[%s14870_s6 + $0x50] sm:$0xff] %vm9091_vm0, %v9069_v62  ;;  %10127 = vmatmul.msk.f32.gmra.mxu2 %vm16685_vm2, %v8804_v18  ;;  %v8668_v57 = vpop.f32.mrf.mxu1  ;;  %v8083_v25 = vpop.f32.mrf.mxu3  ;;  %v8808_v18 = vsel %vm16594_vm9, %v8776_v52, 0.0 }
 0x7c5   : > { %v8143_v24 = vadd.f32 %v8083_v25, %v14704_v2 }
 0x7c7   : > { %v8960_v22 = vpop.f32.mrf.mxu2 }
 0x7c8   : > { %v9034_v61 = vadd.f32 %v8960_v22, %v8724_v26  ;;  %v8450_v26 = vadd.f32 %v8384_v30, %v8140_v43 }
 0x7ca   : > { %v9070_v21 = vadd.f32 %v14865_v41, %v9034_v61  ;;  %v8728_v45 = vadd.f32 %v8662_v7, %v8450_v26  ;;  %v8396_v37 = vpop.f32.mrf.mxu0 }
 0x7cc   : > { %9103 = vst.msk [vmem:[%s14870_s6 + $0x58] sm:$0xff] %vm9091_vm0, %v9070_v21  ;;  %10128 = vmatmul.msk.f32.gmra.mxu2 %vm16713_vm10, %v16712_v9  ;;  %v8671_v12 = vpop.f32.mrf.mxu1  ;;  %v8086_v20 = vpop.f32.mrf.mxu3  ;;  %v8729_v9 = vadd.f32 %v8665_v59, %v8451_v40 }
 0x7cd   : > { %v8144_v6 = vadd.f32 %v8086_v20, %v14717_v53 }
 0x7cf   : > { %v8963_v14 = vpop.f32.mrf.mxu2 }
 0x7d0   : > { %v9035_v17 = vadd.f32 %v8963_v14, %v8725_v27  ;;  %v16723_v14 = vld [vmem:[#allocation28_spill] sm:$0xff] }
 0x7d1   : > { %v8142_v16 = vadd.f32 %v8080_v58, %v16723_v14 }
 0x7d2   : > { %v9071_v35 = vadd.f32 %v14865_v41, %v9035_v17  ;;  %v8399_v17 = vpop.f32.mrf.mxu0 }
 0x7d4   : > { %9104 = vst.msk [vmem:[%s14870_s6 + $0x60] sm:$0xff] %vm9091_vm0, %v9071_v35  ;;  %10129 = vmatmul.msk.f32.gmra.mxu2 %vm16717_vm14, %v8806_v48  ;;  %v8674_v21 = vpop.f32.mrf.mxu1  ;;  %v8089_v30 = vpop.f32.mrf.mxu3  ;;  %v8452_v35 = vadd.f32 %v8390_v28, %v8142_v16 }
 0x7d6   : > { %v8730_v38 = vadd.f32 %v8668_v57, %v8452_v35 }
 0x7d7   : > { %v8966_v5 = vpop.f32.mrf.mxu2 }
 0x7d8   : > { %v9036_v44 = vadd.f32 %v8966_v5, %v8726_v8  ;;  %v8453_v8 = vadd.f32 %v8393_v0, %v8143_v24 }
 0x7da   : > { %v9072_v42 = vadd.f32 %v14865_v41, %v9036_v44  ;;  %v8402_v58 = vpop.f32.mrf.mxu0  ;;  %v8731_v5 = vadd.f32 %v8671_v12, %v8453_v8 }
 0x7dc   : > { %9105 = vst.msk [vmem:[%s14870_s6 + $0x68] sm:$0xff] %vm9091_vm0, %v9072_v42  ;;  %10130 = vmatmul.msk.f32.gmra.mxu2 %vm16719_vm1, %v8775_v23  ;;  %v8677_v50 = vpop.f32.mrf.mxu1  ;;  %v8092_v59 = vpop.f32.mrf.mxu3  ;;  %v8454_v42 = vadd.f32 %v8396_v37, %v8144_v6 }
 0x7dd   : > { %v8146_v56 = vadd.f32 %v8092_v59, %v14741_v1 }
 0x7de   : > { %v8732_v2 = vadd.f32 %v8674_v21, %v8454_v42 }
 0x7df   : > { %v8969_v54 = vpop.f32.mrf.mxu2 }
 0x7e0   : > { %v9037_v62 = vadd.f32 %v8969_v54, %v8727_v3  ;;  %v8145_v3 = vadd.f32 %v8089_v30, %v14728_v46 }
 0x7e2   : > { %v9073_v47 = vadd.f32 %v14865_v41, %v9037_v62  ;;  %v8405_v25 = vpop.f32.mrf.mxu0  ;;  %v8455_v43 = vadd.f32 %v8399_v17, %v8145_v3 }
 0x7e4   : > { %9106 = vst.msk [vmem:[%s14870_s6 + $0x70] sm:$0xff] %vm9091_vm0, %v9073_v47  ;;  %10131 = vmatmul.msk.f32.gmra.mxu2 %vm16721_vm4, %v8808_v18  ;;  %v8680_v29 = vpop.f32.mrf.mxu1  ;;  %v8095_v23 = vpop.f32.mrf.mxu3  ;;  %v8733_v62 = vadd.f32 %v8677_v50, %v8455_v43 }
 0x7e5   : > { %v8147_v32 = vadd.f32 %v8095_v23, %v14750_v36 }
 0x7e7   : > { %v8972_v22 = vpop.f32.mrf.mxu2  ;;  %v8457_v21 = vadd.f32 %v8405_v25, %v8147_v32 }
 0x7e8   : > { %v9038_v4 = vadd.f32 %v8972_v22, %v8728_v45  ;;  %v8456_v45 = vadd.f32 %v8402_v58, %v8146_v56 }
 0x7ea   : > { %v9074_v61 = vadd.f32 %v14865_v41, %v9038_v4  ;;  %v8408_v47 = vpop.f32.mrf.mxu0  ;;  %v8734_v46 = vadd.f32 %v8680_v29, %v8456_v45 }
 0x7ec   : > { %9107 = vst.msk [vmem:[%s14870_s6 + $0x78] sm:$0xff] %vm9091_vm0, %v9074_v61  ;;  %v8683_v0 = vpop.f32.mrf.mxu1  ;;  %v8098_v53 = vpop.f32.mrf.mxu3 }
 0x7ed   : > { %v8735_v40 = vadd.f32 %v8683_v0, %v8457_v21  ;;  %v8148_v30 = vadd.f32 %v8098_v53, %v14763_v33 }
 0x7ef   : > { %v8975_v27 = vpop.f32.mrf.mxu2 }
 0x7f0   : > { %v9039_v10 = vadd.f32 %v8975_v27, %v8729_v9 }
 0x7f2   : > { %v9075_v7 = vadd.f32 %v14865_v41, %v9039_v10  ;;  %v8411_v61 = vpop.f32.mrf.mxu0  ;;  %v8458_v10 = vadd.f32 %v8408_v47, %v8148_v30 }
 0x7f4   : > { %9108 = vst.msk [vmem:[%s14870_s6 + $0x80] sm:$0xff] %vm9091_vm0, %v9075_v7  ;;  %v8686_v20 = vpop.f32.mrf.mxu1  ;;  %v8101_v22 = vpop.f32.mrf.mxu3 }
 0x7f5   : > { %v8736_v7 = vadd.f32 %v8686_v20, %v8458_v10  ;;  %v8149_v50 = vadd.f32 %v8101_v22, %v14774_v39 }
 0x7f7   : > { %v8978_v60 = vpop.f32.mrf.mxu2 }
 0x7f8   : > { %v9040_v48 = vadd.f32 %v8978_v60, %v8730_v38 }
 0x7fa   : > { %v9076_v55 = vadd.f32 %v14865_v41, %v9040_v48  ;;  %v8414_v36 = vpop.f32.mrf.mxu0  ;;  %v8459_v48 = vadd.f32 %v8411_v61, %v8149_v50 }
 0x7fc   : > { %9109 = vst.msk [vmem:[%s14870_s6 + $0x88] sm:$0xff] %vm9091_vm0, %v9076_v55  ;;  %v8689_v1 = vpop.f32.mrf.mxu1  ;;  %v8104_v14 = vpop.f32.mrf.mxu3 }
 0x7fd   : > { %v8737_v33 = vadd.f32 %v8689_v1, %v8459_v48  ;;  %v8150_v8 = vadd.f32 %v8104_v14, %v14787_v13 }
 0x7ff   : > { %v8981_v28 = vpop.f32.mrf.mxu2 }
 0x800   : > { %v9041_v44 = vadd.f32 %v8981_v28, %v8731_v5  ;;  %v8460_v28 = vadd.f32 %v8414_v36, %v8150_v8 }
 0x802   : > { %v9077_v57 = vadd.f32 %v14865_v41, %v9041_v44  ;;  %v8417_v59 = vpop.f32.mrf.mxu0 }
 0x804   : > { %9110 = vst.msk [vmem:[%s14870_s6 + $0x90] sm:$0xff] %vm9091_vm0, %v9077_v57  ;;  %v8692_v17 = vpop.f32.mrf.mxu1  ;;  %v8107_v24 = vpop.f32.mrf.mxu3 }
 0x805   : > { %v8738_v6 = vadd.f32 %v8692_v17, %v8460_v28  ;;  %v8151_v57 = vadd.f32 %v8107_v24, %v14798_v63 }
 0x807   : > { %v8984_v19 = vpop.f32.mrf.mxu2 }
 0x808   : > { %v9042_v52 = vadd.f32 %v8984_v19, %v8732_v2  ;;  %v8461_v19 = vadd.f32 %v8417_v59, %v8151_v57 }
 0x80a   : > { %v9078_v54 = vadd.f32 %v14865_v41, %v9042_v52  ;;  %v8420_v42 = vpop.f32.mrf.mxu0 }
 0x80c   : > { %9111 = vst.msk [vmem:[%s14870_s6 + $0x98] sm:$0xff] %vm9091_vm0, %v9078_v54  ;;  %v8695_v5 = vpop.f32.mrf.mxu1  ;;  %v8110_v39 = vpop.f32.mrf.mxu3 }
 0x80d   : > { %v8739_v13 = vadd.f32 %v8695_v5, %v8461_v19  ;;  %v8152_v0 = vadd.f32 %v8110_v39, %v14809_v34 }
 0x80f   : > { %v8987_v12 = vpop.f32.mrf.mxu2 }
 0x810   : > { %v9043_v18 = vadd.f32 %v8987_v12, %v8733_v62  ;;  %v8462_v62 = vadd.f32 %v8420_v42, %v8152_v0 }
 0x812   : > { %v9079_v26 = vadd.f32 %v14865_v41, %v9043_v18  ;;  %v8423_v53 = vpop.f32.mrf.mxu0 }
 0x814   : > { %9112 = vst.msk [vmem:[%s14870_s6 + $0xa0] sm:$0xff] %vm9091_vm0, %v9079_v26  ;;  %v8698_v25 = vpop.f32.mrf.mxu1  ;;  %v8113_v3 = vpop.f32.mrf.mxu3 }
 0x815   : > { %v8740_v12 = vadd.f32 %v8698_v25, %v8462_v62  ;;  %v8153_v18 = vadd.f32 %v8113_v3, %v14820_v49 }
 0x817   : > { %v8990_v51 = vpop.f32.mrf.mxu2  ;;  %v8463_v45 = vadd.f32 %v8423_v53, %v8153_v18 }
 0x818   : > { %v9044_v4 = vadd.f32 %v8990_v51, %v8734_v46 }
 0x81a   : > { %v9080_v37 = vadd.f32 %v14865_v41, %v9044_v4  ;;  %v8426_v34 = vpop.f32.mrf.mxu0 }
 0x81c   : > { %9113 = vst.msk [vmem:[%s14870_s6 + $0xa8] sm:$0xff] %vm9091_vm0, %v9080_v37  ;;  %v8701_v63 = vpop.f32.mrf.mxu1  ;;  %v8116_v26 = vpop.f32.mrf.mxu3 }
 0x81d   : > { %v8741_v46 = vadd.f32 %v8701_v63, %v8463_v45  ;;  %v8154_v32 = vadd.f32 %v8116_v26, %v14833_v11 }
 0x81f   : > { %v8993_v9 = vpop.f32.mrf.mxu2  ;;  %v8464_v21 = vadd.f32 %v8426_v34, %v8154_v32 }
 0x820   : > { %v9045_v27 = vadd.f32 %v8993_v9, %v8735_v40 }
 0x822   : > { %v9081_v16 = vadd.f32 %v14865_v41, %v9045_v27  ;;  %v8429_v1 = vpop.f32.mrf.mxu0 }
 0x824   : > { %9114 = vst.msk [vmem:[%s14870_s6 + $0xb0] sm:$0xff] %vm9091_vm0, %v9081_v16  ;;  %v8704_v22 = vpop.f32.mrf.mxu1  ;;  %v8119_v61 = vpop.f32.mrf.mxu3 }
 0x825   : > { %v8742_v49 = vadd.f32 %v8704_v22, %v8464_v21  ;;  %v8155_v9 = vadd.f32 %v8119_v61, %v14844_v15 }
 0x827   : > { %v8996_v35 = vpop.f32.mrf.mxu2  ;;  %v8465_v16 = vadd.f32 %v8429_v1, %v8155_v9 }
 0x828   : > { %v9046_v38 = vadd.f32 %v8996_v35, %v8736_v7 }
 0x82a   : > { %v9082_v60 = vadd.f32 %v14865_v41, %v9046_v38  ;;  %v8432_v35 = vpop.f32.mrf.mxu0 }
 0x82c   : > { %9115 = vst.msk [vmem:[%s14870_s6 + $0xb8] sm:$0xff] %vm9091_vm0, %v9082_v60  ;;  %v8707_v27 = vpop.f32.mrf.mxu1  ;;  %v8122_v11 = vpop.f32.mrf.mxu3 }
 0x82d   : > { %v8743_v10 = vadd.f32 %v8707_v27, %v8465_v16  ;;  %v8156_v7 = vadd.f32 %v8122_v11, %v14856_v31 }
 0x82f   : > { %v8999_v55 = vpop.f32.mrf.mxu2  ;;  %v8466_v60 = vadd.f32 %v8432_v35, %v8156_v7 }
 0x830   : > { %v9047_v58 = vadd.f32 %v8999_v55, %v8737_v33 }
 0x832   : > { %v9083_v29 = vadd.f32 %v14865_v41, %v9047_v58 }
 0x834   : > { %9116 = vst.msk [vmem:[%s14870_s6 + $0xc0] sm:$0xff] %vm9091_vm0, %v9083_v29  ;;  %v8710_v38 = vpop.f32.mrf.mxu1 }
 0x835   : > { %v8744_v15 = vadd.f32 %v8710_v38, %v8466_v60 }
 0x837   : > { %v9002_v44 = vpop.f32.mrf.mxu2 }
 0x838   : > { %v9048_v23 = vadd.f32 %v9002_v44, %v8738_v6 }
 0x83a   : > { %v9084_v2 = vadd.f32 %v14865_v41, %v9048_v23 }
 0x83c   : > { %9117 = vst.msk [vmem:[%s14870_s6 + $0xc8] sm:$0xff] %vm9091_vm0, %v9084_v2 }
 0x83f   : > { %v9005_v52 = vpop.f32.mrf.mxu2 }
 0x840   : > { %v9049_v54 = vadd.f32 %v9005_v52, %v8739_v13 }
 0x842   : > { %v9085_v43 = vadd.f32 %v14865_v41, %v9049_v54 }
 0x844   : > { %9118 = vst.msk [vmem:[%s14870_s6 + $0xd0] sm:$0xff] %vm9091_vm0, %v9085_v43 }
 0x847   : > { %v9008_v56 = vpop.f32.mrf.mxu2 }
 0x848   : > { %v9050_v47 = vadd.f32 %v9008_v56, %v8740_v12 }
 0x84a   : > { %v9086_v20 = vadd.f32 %v14865_v41, %v9050_v47 }
 0x84c   : > { %9119 = vst.msk [vmem:[%s14870_s6 + $0xd8] sm:$0xff] %vm9091_vm0, %v9086_v20 }
 0x84f   : > { %v9011_v51 = vpop.f32.mrf.mxu2 }
 0x850   : > { %v9051_v4 = vadd.f32 %v9011_v51, %v8741_v46 }
 0x852   : > { %v9087_v37 = vadd.f32 %v14865_v41, %v9051_v4 }
 0x854   : > { %9120 = vst.msk [vmem:[%s14870_s6 + $0xe0] sm:$0xff] %vm9091_vm0, %v9087_v37 }
 0x857   : > { %v9014_v40 = vpop.f32.mrf.mxu2 }
 0x858   : > { %v9052_v30 = vadd.f32 %v9014_v40, %v8742_v49 }
 0x85a   : > { %v9088_v14 = vadd.f32 %v14865_v41, %v9052_v30 }
 0x85c   : > { %9121 = vst.msk [vmem:[%s14870_s6 + $0xe8] sm:$0xff] %vm9091_vm0, %v9088_v14 }
 0x85f   : > { %v9017_v36 = vpop.f32.mrf.mxu2 }
 0x860   : > { %v9053_v17 = vadd.f32 %v9017_v36, %v8743_v10 }
 0x862   : > { %v9089_v50 = vadd.f32 %v14865_v41, %v9053_v17 }
 0x864   : > { %9122 = vst.msk [vmem:[%s14870_s6 + $0xf0] sm:$0xff] %vm9091_vm0, %v9089_v50 }
 0x867   : > { %v9020_v24 = vpop.f32.mrf.mxu2 }
 0x868   : > { %v9054_v48 = vadd.f32 %v9020_v24, %v8744_v15 }
 0x86a   : > { %v9090_v33 = vadd.f32 %v14865_v41, %v9054_v48 }
 0x86c   : > { %9123 = vst.msk [vmem:[%s14870_s6 + $0xf8] sm:$0xff] %vm9091_vm0, %v9090_v33 }
 0x86d PF: > { %s19_s26 = sadd.s32 1, %s10159_s26  }
 0x86e   : > { %p16_p4 = scmp.ge.s32.totalorder %s19_s26, 4  }
 0x870   :  { %18 = sbr.rel (!%p16_p4) target bundleno = 3 (0x3), region = 102 }

</bundles_post_ra>
